<compile_context>
chip_gen: v7x
topology: tpu7x:2x2x1
jax: 0.10.0
libtpu: 0.0.40
codegen_flags: <defaults>
</compile_context>

<pallas_src>
import functools
import math

import jax
import jax.numpy as jnp
from jax.experimental import pallas as pl
from jax.experimental.pallas import tpu as pltpu

_NEG_LARGE = float(jnp.finfo(jnp.bfloat16).min)  # finite maxpool pad (post-ReLU data)
_VMEM_LIMIT = 32 * 1024 * 1024                   # v7x-safe; plenty for these tiles


def _round_up(x, m):
    return (x + m - 1) // m * m


# ----------------------------------------------------------------------------
# Pallas kernels
# ----------------------------------------------------------------------------
# --- im2col / plain matmul path: out = relu?(p @ w [+ pd @ wd | + res] + bias)
def _matmul_bias_kernel(p_ref, w_ref, b_ref, o_ref, *, relu):
    acc = jnp.dot(p_ref[...], w_ref[...], preferred_element_type=jnp.float32)
    out = acc + b_ref[...]
    if relu:
        out = jnp.maximum(out, 0.0)
    o_ref[...] = out.astype(o_ref.dtype)


def _matmul_bias_res_kernel(p_ref, w_ref, b_ref, r_ref, o_ref, *, relu):
    acc = jnp.dot(p_ref[...], w_ref[...], preferred_element_type=jnp.float32)
    out = acc + b_ref[...] + r_ref[...].astype(jnp.float32)
    if relu:
        out = jnp.maximum(out, 0.0)
    o_ref[...] = out.astype(o_ref.dtype)


def _matmul_bias_dual_kernel(p_ref, w_ref, b_ref, pd_ref, wd_ref, o_ref, *, relu):
    acc = jnp.dot(p_ref[...], w_ref[...], preferred_element_type=jnp.float32)
    acc = acc + jnp.dot(pd_ref[...], wd_ref[...], preferred_element_type=jnp.float32)
    out = acc + b_ref[...]
    if relu:
        out = jnp.maximum(out, 0.0)
    o_ref[...] = out.astype(o_ref.dtype)


# --- no-im2col 3x3 stride-1 conv (tap accumulation over a resident image block).
#     x_ref: (1, L, C) flat-padded WPAD image; w_ref: (9, C, Cout); b_ref: (1, Cout)
#     m_ref: (M, 1) mask zeroing the 2 pad columns; o_ref: (1, M, Cout).
#     taps = 9 static row offsets into the flat-padded image.
def _conv_tap_kernel(x_ref, w_ref, b_ref, m_ref, o_ref, *, taps, relu):
    mm, cout = o_ref.shape[1], o_ref.shape[2]
    acc = jnp.zeros((mm, cout), jnp.float32)
    for t, off in enumerate(taps):
        acc = acc + jnp.dot(x_ref[0, off:off + mm, :], w_ref[t, :, :],
                            preferred_element_type=jnp.float32)
    out = acc + b_ref[...]
    if relu:
        out = jnp.maximum(out, 0.0)
    out = out * m_ref[...]
    o_ref[0, :, :] = out.astype(o_ref.dtype)


def _conv_tap_res_kernel(x_ref, w_ref, b_ref, m_ref, r_ref, o_ref, *, taps, relu):
    mm, cout = o_ref.shape[1], o_ref.shape[2]
    acc = jnp.zeros((mm, cout), jnp.float32)
    for t, off in enumerate(taps):
        acc = acc + jnp.dot(x_ref[0, off:off + mm, :], w_ref[t, :, :],
                            preferred_element_type=jnp.float32)
    out = acc + b_ref[...] + r_ref[0, :, :].astype(jnp.float32)
    if relu:
        out = jnp.maximum(out, 0.0)
    out = out * m_ref[...]
    o_ref[0, :, :] = out.astype(o_ref.dtype)


def _conv_tap_dual_kernel(x_ref, w_ref, b_ref, m_ref, xd_ref, wd_ref, o_ref,
                          *, taps, relu):
    mm, cout = o_ref.shape[1], o_ref.shape[2]
    acc = jnp.zeros((mm, cout), jnp.float32)
    for t, off in enumerate(taps):
        acc = acc + jnp.dot(x_ref[0, off:off + mm, :], w_ref[t, :, :],
                            preferred_element_type=jnp.float32)
    acc = acc + jnp.dot(xd_ref[0, :, :], wd_ref[...],
                        preferred_element_type=jnp.float32)
    out = acc + b_ref[...]                      # bias = b2 + bd, pre-combined
    if relu:
        out = jnp.maximum(out, 0.0)
    out = out * m_ref[...]
    o_ref[0, :, :] = out.astype(o_ref.dtype)


# ----------------------------------------------------------------------------
# Wrapper: tap-accumulation 3x3/s1 conv on WPAD activations
# ----------------------------------------------------------------------------
def conv3x3_s1_wpad(x_wpad, w_taps, bias, *, relu=True, residual=None,
                    xd=None, wd=None):
    """x_wpad: (N, H, Wp, C) with Wp = W+2 and two trailing zero columns.
    Returns (N, H, Wp, Cout) in the same WPAD layout (pad columns zeroed)."""
    n, h, wp, c = x_wpad.shape
    m = h * wp
    t, cw, cout = w_taps.shape
    assert t == 9 and cw == c
    front = wp + 8                       # >= wp+1 rows of zeros before the image
    back = wp + 8                        # >= wp+1 rows after
    length = m + front + back
    # flat-pad the image with zero rows (top/bottom conv padding); ~1.1x copy max.
    xflat = jnp.pad(x_wpad.reshape(n, m, c).astype(jnp.bfloat16),
                    ((0, 0), (front, back), (0, 0)))
    # tap (di, dj) reads flat index q + di*wp + dj  (q = output flat index)
    taps = tuple(front + di * wp + dj for di in (-1, 0, 1) for dj in (-1, 0, 1))
    # zero out the two pad columns of every output row (keeps the WPAD invariant)
    mask = (jnp.arange(m) % wp < wp - 2).astype(jnp.float32).reshape(m, 1)
    w_taps = w_taps.astype(jnp.bfloat16)
    bias = bias.astype(jnp.float32)

    cparams = pltpu.CompilerParams(dimension_semantics=("parallel",),
                                   vmem_limit_bytes=_VMEM_LIMIT)
    out_shape = jax.ShapeDtypeStruct((n, m, cout), jnp.bfloat16)
    x_spec = pl.BlockSpec((1, length, c), lambda i: (i, 0, 0))
    w_spec = pl.BlockSpec((t, cw, cout), lambda i: (0, 0, 0))
    b_spec = pl.BlockSpec((1, cout), lambda i: (0, 0))
    m_spec = pl.BlockSpec((m, 1), lambda i: (0, 0))
    o_spec = pl.BlockSpec((1, m, cout), lambda i: (i, 0, 0))

    flops = 2 * n * m * cw * cout * t
    byts = xflat.size * 2 + w_taps.size * 2 + bias.size * 4 + mask.size * 4 \
        + n * m * cout * 2

    if xd is not None:
        xd_flat = xd.reshape(n, m, xd.shape[-1]).astype(jnp.bfloat16)
        wd2 = wd.astype(jnp.bfloat16)
        flops += 2 * n * m * wd2.shape[0] * cout
        byts += xd_flat.size * 2 + wd2.size * 2
        out = pl.pallas_call(
            functools.partial(_conv_tap_dual_kernel, taps=taps, relu=relu),
            out_shape=out_shape, grid=(n,),
            in_specs=[x_spec, w_spec, b_spec, m_spec,
                      pl.BlockSpec((1, m, xd_flat.shape[-1]), lambda i: (i, 0, 0)),
                      pl.BlockSpec(wd2.shape, lambda i: (0, 0))],
            out_specs=o_spec, compiler_params=cparams,
            cost_estimate=pl.CostEstimate(flops=flops, transcendentals=0,
                                          bytes_accessed=byts),
        )(xflat, w_taps, bias, mask, xd_flat, wd2)
    elif residual is not None:
        r_flat = residual.reshape(n, m, residual.shape[-1]).astype(jnp.bfloat16)
        byts += r_flat.size * 2
        out = pl.pallas_call(
            functools.partial(_conv_tap_res_kernel, taps=taps, relu=relu),
            out_shape=out_shape, grid=(n,),
            in_specs=[x_spec, w_spec, b_spec, m_spec,
                      pl.BlockSpec((1, m, r_flat.shape[-1]), lambda i: (i, 0, 0))],
            out_specs=o_spec, compiler_params=cparams,
            cost_estimate=pl.CostEstimate(flops=flops, transcendentals=0,
                                          bytes_accessed=byts),
        )(xflat, w_taps, bias, mask, r_flat)
    else:
        out = pl.pallas_call(
            functools.partial(_conv_tap_kernel, taps=taps, relu=relu),
            out_shape=out_shape, grid=(n,),
            in_specs=[x_spec, w_spec, b_spec, m_spec],
            out_specs=o_spec, compiler_params=cparams,
            cost_estimate=pl.CostEstimate(flops=flops, transcendentals=0,
                                          bytes_accessed=byts),
        )(xflat, w_taps, bias, mask)
    return out.reshape(n, h, wp, cout)


# ----------------------------------------------------------------------------
# Wrapper: tiled matmul (+bias/residual/dual) for im2col / 1x1 conv paths
# ----------------------------------------------------------------------------
def fused_matmul(p, w, bias, *, relu, residual=None, p_down=None, w_down=None):
    """out[m, npad] = relu?(p @ w [+ p_down @ w_down | + residual] + bias).
    No row padding / output slicing: exact out_shape, Pallas masks the partial
    last row block (safe with a bias/residual/ReLU-only epilogue)."""
    m, k = p.shape
    k_w, npad = w.shape
    assert k == k_w
    tile_m = 512 if m >= 1024 else (256 if m >= 256 else m)
    grid = (pl.cdiv(m, tile_m),)

    p = p.astype(jnp.bfloat16)
    w = w.astype(jnp.bfloat16)
    bias = bias.astype(jnp.float32)

    cparams = pltpu.CompilerParams(dimension_semantics=("parallel",),
                                   vmem_limit_bytes=_VMEM_LIMIT)
    out_shape = jax.ShapeDtypeStruct((m, npad), jnp.bfloat16)

    def row_spec(shape):
        return pl.BlockSpec(shape, lambda i: (i, 0))

    def const_spec(shape):
        return pl.BlockSpec(shape, lambda i: (0, 0))

    flops = 2 * m * k * npad
    byts = p.size * 2 + w.size * 2 + bias.size * 4 + m * npad * 2

    if p_down is not None:
        kd = p_down.shape[1]
        pd = p_down.astype(jnp.bfloat16)
        wd = w_down.astype(jnp.bfloat16)
        flops += 2 * m * kd * npad
        byts += pd.size * 2 + wd.size * 2
        return pl.pallas_call(
            functools.partial(_matmul_bias_dual_kernel, relu=relu),
            out_shape=out_shape, grid=grid,
            in_specs=[row_spec((tile_m, k)), const_spec((k, npad)),
                      const_spec((1, npad)),
                      row_spec((tile_m, kd)), const_spec((kd, npad))],
            out_specs=row_spec((tile_m, npad)),
            compiler_params=cparams,
            cost_estimate=pl.CostEstimate(flops=flops, transcendentals=0,
                                          bytes_accessed=byts),
        )(p, w, bias, pd, wd)
    if residual is not None:
        r = residual.astype(jnp.bfloat16)
        byts += r.size * 2
        return pl.pallas_call(
            functools.partial(_matmul_bias_res_kernel, relu=relu),
            out_shape=out_shape, grid=grid,
            in_specs=[row_spec((tile_m, k)), const_spec((k, npad)),
                      const_spec((1, npad)), row_spec((tile_m, npad))],
            out_specs=row_spec((tile_m, npad)),
            compiler_params=cparams,
            cost_estimate=pl.CostEstimate(flops=flops, transcendentals=0,
                                          bytes_accessed=byts),
        )(p, w, bias, r)
    return pl.pallas_call(
        functools.partial(_matmul_bias_kernel, relu=relu),
        out_shape=out_shape, grid=grid,
        in_specs=[row_spec((tile_m, k)), const_spec((k, npad)),
                  const_spec((1, npad))],
        out_specs=row_spec((tile_m, npad)),
        compiler_params=cparams,
        cost_estimate=pl.CostEstimate(flops=flops, transcendentals=0,
                                      bytes_accessed=byts),
    )(p, w, bias)


# ----------------------------------------------------------------------------
# Plain-JAX glue (fused by XLA under jit)
# ----------------------------------------------------------------------------
def _im2col(x, kh, kw, stride, pad):
    """x: (N,H,W,C) -> patches (N*Ho*Wo, kh*kw*C), Ho, Wo. (Only for the stem
    7x7 and the few stride-2 3x3 convs; stride-1 convs use the tap kernel.)"""
    n, h, w, c = x.shape
    ho = (h + 2 * pad - kh) // stride + 1
    wo = (w + 2 * pad - kw) // stride + 1
    xp = jnp.pad(x, ((0, 0), (pad, pad), (pad, pad), (0, 0)))
    cols = []
    for i in range(kh):
        for j in range(kw):
            cols.append(jax.lax.slice(
                xp, (0, i, j, 0),
                (n, i + (ho - 1) * stride + 1, j + (wo - 1) * stride + 1, c),
                (1, stride, stride, 1)))
    patches = jnp.concatenate(cols, axis=-1).reshape(n * ho * wo, kh * kw * c)
    return patches, ho, wo


def _maxpool_3x3_s2_p1(x):
    """Running maximum over the 9 shifted strided slices (no 9x stack)."""
    n, h, w, c = x.shape
    stride, pad, kh, kw = 2, 1, 3, 3
    ho = (h + 2 * pad - kh) // stride + 1
    wo = (w + 2 * pad - kw) // stride + 1
    xp = jnp.pad(x, ((0, 0), (pad, pad), (pad, pad), (0, 0)),
                 constant_values=_NEG_LARGE)
    out = None
    for i in range(kh):
        for j in range(kw):
            sl = jax.lax.slice(
                xp, (0, i, j, 0),
                (n, i + (ho - 1) * stride + 1, j + (wo - 1) * stride + 1, c),
                (1, stride, stride, 1))
            out = sl if out is None else jnp.maximum(out, sl)
    return out


def _to_wpad(x_nhwc):
    """(N,H,W,C) -> (N,H,W+2,C) with two trailing zero columns."""
    return jnp.pad(x_nhwc, ((0, 0), (0, 0), (0, 2), (0, 0)))


def _from_wpad(x_wpad):
    return x_wpad[:, :, :-2, :]


# ----------------------------------------------------------------------------
# Parameter construction (conv + folded eval-mode BatchNorm)
# ----------------------------------------------------------------------------
def make_conv_bn(key, cout, cin, kh, kw, cin_pad, cout_pad, eps=1e-5):
    """Returns (W, bias): W (kh*kw, cin_pad, cout_pad) bf16 with the BN scale
    folded into the output columns; bias (1, cout_pad) f32."""
    kw_, k1, k2, k3, k4 = jax.random.split(key, 5)
    fan_in = cin * kh * kw
    w = jax.random.normal(kw_, (cout, cin, kh, kw), jnp.float32) / math.sqrt(fan_in)
    gamma = 1.0 + 0.1 * jax.random.normal(k1, (cout,), jnp.float32)
    beta = 0.1 * jax.random.normal(k2, (cout,), jnp.float32)
    mean = 0.1 * jax.random.normal(k3, (cout,), jnp.float32)
    var = 1.0 + 0.1 * jnp.abs(jax.random.normal(k4, (cout,), jnp.float32))
    scale = gamma / jnp.sqrt(var + eps)
    bias = beta - mean * scale
    w_hw = jnp.transpose(w, (2, 3, 1, 0)) * scale[None, None, None, :]
    w_full = jnp.zeros((kh * kw, cin_pad, cout_pad), jnp.float32)
    w_full = w_full.at[:, :cin, :cout].set(w_hw.reshape(kh * kw, cin, cout))
    bias_full = jnp.zeros((1, cout_pad), jnp.float32).at[0, :cout].set(bias)
    return w_full.astype(jnp.bfloat16), bias_full


def get_blocks_layer_params(layers):
    if layers == 18:
        return ("basic", [2, 2, 2, 2])
    if layers == 34:
        return ("basic", [3, 4, 6, 3])
    if layers == 50:
        return ("bottleneck", [3, 4, 6, 3])
    if layers == 101:
        return ("bottleneck", [3, 4, 23, 3])
    if layers == 152:
        return ("bottleneck", [3, 8, 36, 3])
    raise ValueError(layers)


# ----------------------------------------------------------------------------
# Blocks
# ----------------------------------------------------------------------------
def make_basic_block(key, cin, mid, stride, cin_pad):
    mid_pad = _round_up(mid, 8)
    ks = jax.random.split(key, 3)
    p = {"stride": stride}
    p["w1"], p["b1"] = make_conv_bn(ks[0], mid, cin, 3, 3, cin_pad, mid_pad)
    p["w2"], p["b2"] = make_conv_bn(ks[1], mid, mid, 3, 3, mid_pad, mid_pad)
    if stride != 1 or cin != mid:  # expansion = 1
        p["wd"], p["bd"] = make_conv_bn(ks[2], mid, cin, 1, 1, cin_pad, mid_pad)
        p["b2d"] = p["b2"] + p["bd"]            # review: pre-combine biases
    return p, mid_pad


def basic_block_forward(x_wpad, p):
    """x_wpad: (N, H, Wp, Cpad) WPAD layout; returns WPAD output."""
    n, h, wp, c = x_wpad.shape
    stride = p["stride"]
    cout = p["w1"].shape[-1]
    if stride == 1:
        out1 = conv3x3_s1_wpad(x_wpad, p["w1"], p["b1"], relu=True)
    else:
        # stride-2 3x3 conv1: im2col path (TODO(synk): phase-decomposed tap kernel)
        x_nhwc = _from_wpad(x_wpad)
        patches, ho, wo = _im2col(x_nhwc, 3, 3, stride, 1)
        out1 = fused_matmul(patches, p["w1"].reshape(-1, cout), p["b1"], relu=True)
        out1 = _to_wpad(out1.reshape(n, ho, wo, cout))
    # conv2 (3x3, s1) + bn2 + (fused downsample conv | identity residual) + relu
    if "wd" in p:
        xd = x_wpad[:, ::stride, ::stride, :]        # 1x1 stride-s: no im2col
        wp_o = out1.shape[2]
        if xd.shape[2] != wp_o:
            xd = jnp.pad(xd, ((0, 0), (0, 0), (0, wp_o - xd.shape[2]), (0, 0)))
        out = conv3x3_s1_wpad(out1, p["w2"], p["b2d"], relu=True,
                              xd=xd, wd=p["wd"][0])
    else:
        out = conv3x3_s1_wpad(out1, p["w2"], p["b2"], relu=True, residual=x_wpad)
    return out


def make_bottleneck(key, cin, mid, stride, cin_pad):
    mid_pad = _round_up(mid, 8)
    out_pad = _round_up(mid * 4, 8)
    ks = jax.random.split(key, 4)
    p = {"stride": stride}
    p["w1"], p["b1"] = make_conv_bn(ks[0], mid, cin, 1, 1, cin_pad, mid_pad)
    p["w2"], p["b2"] = make_conv_bn(ks[1], mid, mid, 3, 3, mid_pad, mid_pad)
    p["w3"], p["b3"] = make_conv_bn(ks[2], mid * 4, mid, 1, 1, mid_pad, out_pad)
    if stride != 1 or cin != mid * 4:  # expansion = 4
        p["wd"], p["bd"] = make_conv_bn(ks[3], mid * 4, cin, 1, 1, cin_pad, out_pad)
        p["b3d"] = p["b3"] + p["bd"]
    return p, out_pad


def bottleneck_forward(x, p):
    """NHWC path. NOTE: the PyTorch Bottleneck.forward references an undefined
    self.relu; standard ResNet ReLU placement is applied.
    TODO(synk): move to the tap-accumulation / WPAD path like BasicBlock."""
    n, h, w, cpad = x.shape
    stride = p["stride"]
    mid_pad = p["w1"].shape[-1]
    out_pad = p["w3"].shape[-1]
    out = fused_matmul(x.reshape(n * h * w, cpad), p["w1"][0], p["b1"], relu=True)
    out4 = out.reshape(n, h, w, mid_pad)
    pt2, ho, wo = _im2col(out4, 3, 3, stride, 1)
    out = fused_matmul(pt2, p["w2"].reshape(-1, mid_pad), p["b2"], relu=True)
    if "wd" in p:
        xd = x[:, ::stride, ::stride, :].reshape(n * ho * wo, cpad)
        out = fused_matmul(out, p["w3"][0], p["b3d"], relu=True,
                           p_down=xd, w_down=p["wd"][0])
    else:
        res = x.reshape(n * ho * wo, cpad)
        out = fused_matmul(out, p["w3"][0], p["b3"], relu=True, residual=res)
    return out.reshape(n, ho, wo, out_pad)


# ----------------------------------------------------------------------------
# ResNet backbone
# ----------------------------------------------------------------------------
class ResNetPallas:
    def __init__(self, key, config="resnet#18", in_channels=3,
                 base_channels=8, remove_output=True):
        layers = int(config.split("#")[1])
        kind, block_nums = get_blocks_layer_params(layers)
        expansion = 1 if kind == "basic" else 4
        make_block = make_basic_block if kind == "basic" else make_bottleneck
        self._block_fwd = basic_block_forward if kind == "basic" else bottleneck_forward
        self._uses_wpad = (kind == "basic")
        self.remove_output = remove_output
        self.in_channels = in_channels

        keys = iter(jax.random.split(key, 1 + sum(block_nums)))
        # stem: conv 7x7 / s2 / p3 -> bn -> relu -> maxpool 3x3 / s2 / p1
        self.cin_pad = _round_up(in_channels, 8)
        self.stem_cout_pad = _round_up(base_channels, 8)
        self.stem_w, self.stem_b = make_conv_bn(
            next(keys), base_channels, in_channels, 7, 7,
            self.cin_pad, self.stem_cout_pad)

        self.stages = []
        c, c_pad = base_channels, self.stem_cout_pad
        mids = [base_channels, base_channels * 2, base_channels * 4, base_channels * 8]
        strides = [1, 2, 2, 2]
        for mid, s, nblk in zip(mids, strides, block_nums):
            blocks = []
            blk, out_pad = make_block(next(keys), c, mid, s, c_pad)
            blocks.append(blk)
            c, c_pad = mid * expansion, out_pad
            for _ in range(1, nblk):
                blk, out_pad = make_block(next(keys), c, mid, 1, c_pad)
                blocks.append(blk)
            self.stages.append(blocks)
        self.out_channels = c
        self.out_channels_pad = c_pad

    def forward(self, x_nchw):
        x = jnp.transpose(x_nchw.astype(jnp.float32), (0, 2, 3, 1))  # NCHW -> NHWC
        n, h, w, cin = x.shape
        if cin < self.cin_pad:
            x = jnp.pad(x, ((0, 0), (0, 0), (0, 0), (0, self.cin_pad - cin)))
        x = x.astype(jnp.bfloat16)
        # stem conv + bn + relu (single fused Pallas matmul)
        # TODO(synk): replace the 7x7 im2col with a tap-accumulation kernel too.
        patches, ho, wo = _im2col(x, 7, 7, 2, 3)
        out = fused_matmul(patches, self.stem_w.reshape(-1, self.stem_cout_pad),
                           self.stem_b, relu=True)
        out = out.reshape(n, ho, wo, self.stem_cout_pad)
        out = _maxpool_3x3_s2_p1(out)
        if self._uses_wpad:
            out = _to_wpad(out)
        for stage in self.stages:
            for blk in stage:
                out = self._block_fwd(out, blk)
        if self._uses_wpad:
            out = _from_wpad(out)
        out = out[..., :self.out_channels].astype(jnp.float32)
        return jnp.transpose(out, (0, 3, 1, 2))  # NHWC -> NCHW


if __name__ == "__main__":
    key = jax.random.PRNGKey(0)
    kparam, kx = jax.random.split(key)
    model = ResNetPallas(kparam, config="resnet#18", in_channels=3,
                         base_channels=8, remove_output=True)
    x = jax.random.normal(kx, (2, 3, 32, 32), jnp.float32)  # NCHW, PyTorch-style
    fwd = jax.jit(model.forward)  # fuses the plain-JAX glue between Pallas calls
    y = fwd(x)
    jax.block_until_ready(y)
    assert y.shape == (2, model.out_channels, 1, 1), y.shape
    assert bool(jnp.all(jnp.isfinite(y)))
    print("KERNEL_OK")
</pallas_src>

<mosaic_0001>
module attributes {stable_mosaic.version = 11 : i64} {
  func.func @_matmul_bias_kernel(%arg0: i32, %arg1: memref<256x392xbf16, #tpu.memory_space<vmem>>, %arg2: memref<392x8xbf16, #tpu.memory_space<vmem>>, %arg3: memref<1x8xf32, #tpu.memory_space<vmem>>, %arg4: memref<256x8xbf16, #tpu.memory_space<vmem>>) attributes {dimension_semantics = [#tpu.dimension_semantics<parallel>], iteration_bounds = array<i64: 2>, scalar_prefetch = 0 : i64, scratch_operands = 0 : i64, tpu.core_type = #tpu.core_type<tc>, window_params = [{transform_indices = @transform_0, window_bounds = array<i64: 256, 392>}, {pipeline_mode = #tpu.pipeline_mode<synchronous>, transform_indices = @transform_1, window_bounds = array<i64: 392, 8>}, {pipeline_mode = #tpu.pipeline_mode<synchronous>, transform_indices = @transform_2, window_bounds = array<i64: 1, 8>}, {transform_indices = @transform_3, window_bounds = array<i64: 256, 8>}]} {
    %c0 = arith.constant 0 : index
    %c0_0 = arith.constant 0 : index
    %0 = vector.load %arg1[%c0, %c0_0] : memref<256x392xbf16, #tpu.memory_space<vmem>>, vector<256x392xbf16>
    %c0_1 = arith.constant 0 : index
    %c0_2 = arith.constant 0 : index
    %1 = vector.load %arg2[%c0_1, %c0_2] : memref<392x8xbf16, #tpu.memory_space<vmem>>, vector<392x8xbf16>
    %cst = arith.constant dense<0.000000e+00> : vector<256x8xf32>
    %2 = tpu.matmul %0, %1, %cst {dimension_numbers = #tpu.dot_dimension_numbers<[1], [0], [0], [1], [0, 0, 1, 1], [], []>} : vector<256x392xbf16>, vector<392x8xbf16>, vector<256x8xf32> -> vector<256x8xf32>
    %c0_3 = arith.constant 0 : index
    %c0_4 = arith.constant 0 : index
    %3 = vector.load %arg3[%c0_3, %c0_4] : memref<1x8xf32, #tpu.memory_space<vmem>>, vector<1x8xf32>
    %4 = vector.broadcast %3 : vector<1x8xf32> to vector<256x8xf32>
    %5 = arith.addf %2, %4 : vector<256x8xf32>
    %cst_5 = arith.constant 0.000000e+00 : f32
    %6 = vector.broadcast %cst_5 : f32 to vector<256x8xf32>
    %7 = arith.maximumf %5, %6 : vector<256x8xf32>
    %8 = arith.truncf %7 : vector<256x8xf32> to vector<256x8xbf16>
    %c0_6 = arith.constant 0 : index
    %c0_7 = arith.constant 0 : index
    %9 = vector.load %arg4[%c0_6, %c0_7] : memref<256x8xbf16, #tpu.memory_space<vmem>>, vector<256x8xbf16>
    tpu.vector_store %arg4[%c0_6, %c0_7], %8 {strides = array<i32>} : memref<256x8xbf16, #tpu.memory_space<vmem>>, vector<256x8xbf16>,
    return
  }
  func.func @transform_0(%arg0: i32) -> (i32, i32) {
    %c0_i32 = arith.constant 0 : i32
    %c0_i32_0 = arith.constant 0 : i32
    return %arg0, %c0_i32 : i32, i32
  }
  func.func @transform_1(%arg0: i32) -> (i32, i32) {
    %c0_i32 = arith.constant 0 : i32
    %c0_i32_0 = arith.constant 0 : i32
    %c0_i32_1 = arith.constant 0 : i32
    return %c0_i32, %c0_i32_0 : i32, i32
  }
  func.func @transform_2(%arg0: i32) -> (i32, i32) {
    %c0_i32 = arith.constant 0 : i32
    %c0_i32_0 = arith.constant 0 : i32
    %c0_i32_1 = arith.constant 0 : i32
    return %c0_i32, %c0_i32_0 : i32, i32
  }
  func.func @transform_3(%arg0: i32) -> (i32, i32) {
    %c0_i32 = arith.constant 0 : i32
    %c0_i32_0 = arith.constant 0 : i32
    return %arg0, %c0_i32 : i32, i32
  }
}

module attributes {stable_mosaic.version = 11 : i64} {
  func.func @_conv_tap_kernel(%arg0: i32, %arg1: memref<1x116x8xbf16, #tpu.memory_space<vmem>>, %arg2: memref<9x8x8xbf16, #tpu.memory_space<vmem>>, %arg3: memref<1x8xf32, #tpu.memory_space<vmem>>, %arg4: memref<80x1xf32, #tpu.memory_space<vmem>>, %arg5: memref<1x80x8xbf16, #tpu.memory_space<vmem>>) attributes {dimension_semantics = [#tpu.dimension_semantics<parallel>], iteration_bounds = array<i64: 2>, scalar_prefetch = 0 : i64, scratch_operands = 0 : i64, tpu.core_type = #tpu.core_type<tc>, window_params = [{transform_indices = @transform_0, window_bounds = array<i64: 1, 116, 8>}, {pipeline_mode = #tpu.pipeline_mode<synchronous>, transform_indices = @transform_1, window_bounds = array<i64: 9, 8, 8>}, {pipeline_mode = #tpu.pipeline_mode<synchronous>, transform_indices = @transform_2, window_bounds = array<i64: 1, 8>}, {pipeline_mode = #tpu.pipeline_mode<synchronous>, transform_indices = @transform_3, window_bounds = array<i64: 80, 1>}, {transform_indices = @transform_4, window_bounds = array<i64: 1, 80, 8>}]} {
    %cst = arith.constant 0.000000e+00 : f32
    %0 = vector.broadcast %cst : f32 to vector<80x8xf32>
    %c0 = arith.constant 0 : index
    %c7 = arith.constant 7 : index
    %c0_0 = arith.constant 0 : index
    %1 = vector.load %arg1[%c0, %c7, %c0_0] : memref<1x116x8xbf16, #tpu.memory_space<vmem>>, vector<1x80x8xbf16>
    %2 = vector.shape_cast %1 : vector<1x80x8xbf16> to vector<80x8xbf16>
    %c0_1 = arith.constant 0 : index
    %c0_2 = arith.constant 0 : index
    %c0_3 = arith.constant 0 : index
    %3 = vector.load %arg2[%c0_1, %c0_2, %c0_3] : memref<9x8x8xbf16, #tpu.memory_space<vmem>>, vector<1x8x8xbf16>
    %4 = vector.shape_cast %3 : vector<1x8x8xbf16> to vector<8x8xbf16>
    %cst_4 = arith.constant dense<0.000000e+00> : vector<80x8xf32>
    %5 = tpu.matmul %2, %4, %cst_4 {dimension_numbers = #tpu.dot_dimension_numbers<[1], [0], [0], [1], [0, 0, 1, 1], [], []>} : vector<80x8xbf16>, vector<8x8xbf16>, vector<80x8xf32> -> vector<80x8xf32>
    %6 = arith.addf %0, %5 : vector<80x8xf32>
    %c0_5 = arith.constant 0 : index
    %c8 = arith.constant 8 : index
    %c0_6 = arith.constant 0 : index
    %7 = vector.load %arg1[%c0_5, %c8, %c0_6] : memref<1x116x8xbf16, #tpu.memory_space<vmem>>, vector<1x80x8xbf16>
    %8 = vector.shape_cast %7 : vector<1x80x8xbf16> to vector<80x8xbf16>
    %c1 = arith.constant 1 : index
    %c0_7 = arith.constant 0 : index
    %c0_8 = arith.constant 0 : index
    %9 = vector.load %arg2[%c1, %c0_7, %c0_8] : memref<9x8x8xbf16, #tpu.memory_space<vmem>>, vector<1x8x8xbf16>
    %10 = vector.shape_cast %9 : vector<1x8x8xbf16> to vector<8x8xbf16>
    %cst_9 = arith.constant dense<0.000000e+00> : vector<80x8xf32>
    %11 = tpu.matmul %8, %10, %cst_9 {dimension_numbers = #tpu.dot_dimension_numbers<[1], [0], [0], [1], [0, 0, 1, 1], [], []>} : vector<80x8xbf16>, vector<8x8xbf16>, vector<80x8xf32> -> vector<80x8xf32>
    %12 = arith.addf %6, %11 : vector<80x8xf32>
    %c0_10 = arith.constant 0 : index
    %c9 = arith.constant 9 : index
    %c0_11 = arith.constant 0 : index
    %13 = vector.load %arg1[%c0_10, %c9, %c0_11] : memref<1x116x8xbf16, #tpu.memory_space<vmem>>, vector<1x80x8xbf16>
    %14 = vector.shape_cast %13 : vector<1x80x8xbf16> to vector<80x8xbf16>
    %c2 = arith.constant 2 : index
    %c0_12 = arith.constant 0 : index
    %c0_13 = arith.constant 0 : index
    %15 = vector.load %arg2[%c2, %c0_12, %c0_13] : memref<9x8x8xbf16, #tpu.memory_space<vmem>>, vector<1x8x8xbf16>
    %16 = vector.shape_cast %15 : vector<1x8x8xbf16> to vector<8x8xbf16>
    %cst_14 = arith.constant dense<0.000000e+00> : vector<80x8xf32>
    %17 = tpu.matmul %14, %16, %cst_14 {dimension_numbers = #tpu.dot_dimension_numbers<[1], [0], [0], [1], [0, 0, 1, 1], [], []>} : vector<80x8xbf16>, vector<8x8xbf16>, vector<80x8xf32> -> vector<80x8xf32>
    %18 = arith.addf %12, %17 : vector<80x8xf32>
    %c0_15 = arith.constant 0 : index
    %c17 = arith.constant 17 : index
    %c0_16 = arith.constant 0 : index
    %19 = vector.load %arg1[%c0_15, %c17, %c0_16] : memref<1x116x8xbf16, #tpu.memory_space<vmem>>, vector<1x80x8xbf16>
    %20 = vector.shape_cast %19 : vector<1x80x8xbf16> to vector<80x8xbf16>
    %c3 = arith.constant 3 : index
    %c0_17 = arith.constant 0 : index
    %c0_18 = arith.constant 0 : index
    %21 = vector.load %arg2[%c3, %c0_17, %c0_18] : memref<9x8x8xbf16, #tpu.memory_space<vmem>>, vector<1x8x8xbf16>
    %22 = vector.shape_cast %21 : vector<1x8x8xbf16> to vector<8x8xbf16>
    %cst_19 = arith.constant dense<0.000000e+00> : vector<80x8xf32>
    %23 = tpu.matmul %20, %22, %cst_19 {dimension_numbers = #tpu.dot_dimension_numbers<[1], [0], [0], [1], [0, 0, 1, 1], [], []>} : vector<80x8xbf16>, vector<8x8xbf16>, vector<80x8xf32> -> vector<80x8xf32>
    %24 = arith.addf %18, %23 : vector<80x8xf32>
    %c0_20 = arith.constant 0 : index
    %c18 = arith.constant 18 : index
    %c0_21 = arith.constant 0 : index
    %25 = vector.load %arg1[%c0_20, %c18, %c0_21] : memref<1x116x8xbf16, #tpu.memory_space<vmem>>, vector<1x80x8xbf16>
    %26 = vector.shape_cast %25 : vector<1x80x8xbf16> to vector<80x8xbf16>
    %c4 = arith.constant 4 : index
    %c0_22 = arith.constant 0 : index
    %c0_23 = arith.constant 0 : index
    %27 = vector.load %arg2[%c4, %c0_22, %c0_23] : memref<9x8x8xbf16, #tpu.memory_space<vmem>>, vector<1x8x8xbf16>
    %28 = vector.shape_cast %27 : vector<1x8x8xbf16> to vector<8x8xbf16>
    %cst_24 = arith.constant dense<0.000000e+00> : vector<80x8xf32>
    %29 = tpu.matmul %26, %28, %cst_24 {dimension_numbers = #tpu.dot_dimension_numbers<[1], [0], [0], [1], [0, 0, 1, 1], [], []>} : vector<80x8xbf16>, vector<8x8xbf16>, vector<80x8xf32> -> vector<80x8xf32>
    %30 = arith.addf %24, %29 : vector<80x8xf32>
    %c0_25 = arith.constant 0 : index
    %c19 = arith.constant 19 : index
    %c0_26 = arith.constant 0 : index
    %31 = vector.load %arg1[%c0_25, %c19, %c0_26] : memref<1x116x8xbf16, #tpu.memory_space<vmem>>, vector<1x80x8xbf16>
    %32 = vector.shape_cast %31 : vector<1x80x8xbf16> to vector<80x8xbf16>
    %c5 = arith.constant 5 : index
    %c0_27 = arith.constant 0 : index
    %c0_28 = arith.constant 0 : index
    %33 = vector.load %arg2[%c5, %c0_27, %c0_28] : memref<9x8x8xbf16, #tpu.memory_space<vmem>>, vector<1x8x8xbf16>
    %34 = vector.shape_cast %33 : vector<1x8x8xbf16> to vector<8x8xbf16>
    %cst_29 = arith.constant dense<0.000000e+00> : vector<80x8xf32>
    %35 = tpu.matmul %32, %34, %cst_29 {dimension_numbers = #tpu.dot_dimension_numbers<[1], [0], [0], [1], [0, 0, 1, 1], [], []>} : vector<80x8xbf16>, vector<8x8xbf16>, vector<80x8xf32> -> vector<80x8xf32>
    %36 = arith.addf %30, %35 : vector<80x8xf32>
    %c0_30 = arith.constant 0 : index
    %c27 = arith.constant 27 : index
    %c0_31 = arith.constant 0 : index
    %37 = vector.load %arg1[%c0_30, %c27, %c0_31] : memref<1x116x8xbf16, #tpu.memory_space<vmem>>, vector<1x80x8xbf16>
    %38 = vector.shape_cast %37 : vector<1x80x8xbf16> to vector<80x8xbf16>
    %c6 = arith.constant 6 : index
    %c0_32 = arith.constant 0 : index
    %c0_33 = arith.constant 0 : index
    %39 = vector.load %arg2[%c6, %c0_32, %c0_33] : memref<9x8x8xbf16, #tpu.memory_space<vmem>>, vector<1x8x8xbf16>
    %40 = vector.shape_cast %39 : vector<1x8x8xbf16> to vector<8x8xbf16>
    %cst_34 = arith.constant dense<0.000000e+00> : vector<80x8xf32>
    %41 = tpu.matmul %38, %40, %cst_34 {dimension_numbers = #tpu.dot_dimension_numbers<[1], [0], [0], [1], [0, 0, 1, 1], [], []>} : vector<80x8xbf16>, vector<8x8xbf16>, vector<80x8xf32> -> vector<80x8xf32>
    %42 = arith.addf %36, %41 : vector<80x8xf32>
    %c0_35 = arith.constant 0 : index
    %c28 = arith.constant 28 : index
    %c0_36 = arith.constant 0 : index
    %43 = vector.load %arg1[%c0_35, %c28, %c0_36] : memref<1x116x8xbf16, #tpu.memory_space<vmem>>, vector<1x80x8xbf16>
    %44 = vector.shape_cast %43 : vector<1x80x8xbf16> to vector<80x8xbf16>
    %c7_37 = arith.constant 7 : index
    %c0_38 = arith.constant 0 : index
    %c0_39 = arith.constant 0 : index
    %45 = vector.load %arg2[%c7_37, %c0_38, %c0_39] : memref<9x8x8xbf16, #tpu.memory_space<vmem>>, vector<1x8x8xbf16>
    %46 = vector.shape_cast %45 : vector<1x8x8xbf16> to vector<8x8xbf16>
    %cst_40 = arith.constant dense<0.000000e+00> : vector<80x8xf32>
    %47 = tpu.matmul %44, %46, %cst_40 {dimension_numbers = #tpu.dot_dimension_numbers<[1], [0], [0], [1], [0, 0, 1, 1], [], []>} : vector<80x8xbf16>, vector<8x8xbf16>, vector<80x8xf32> -> vector<80x8xf32>
    %48 = arith.addf %42, %47 : vector<80x8xf32>
    %c0_41 = arith.constant 0 : index
    %c29 = arith.constant 29 : index
    %c0_42 = arith.constant 0 : index
    %49 = vector.load %arg1[%c0_41, %c29, %c0_42] : memref<1x116x8xbf16, #tpu.memory_space<vmem>>, vector<1x80x8xbf16>
    %50 = vector.shape_cast %49 : vector<1x80x8xbf16> to vector<80x8xbf16>
    %c8_43 = arith.constant 8 : index
    %c0_44 = arith.constant 0 : index
    %c0_45 = arith.constant 0 : index
    %51 = vector.load %arg2[%c8_43, %c0_44, %c0_45] : memref<9x8x8xbf16, #tpu.memory_space<vmem>>, vector<1x8x8xbf16>
    %52 = vector.shape_cast %51 : vector<1x8x8xbf16> to vector<8x8xbf16>
    %cst_46 = arith.constant dense<0.000000e+00> : vector<80x8xf32>
    %53 = tpu.matmul %50, %52, %cst_46 {dimension_numbers = #tpu.dot_dimension_numbers<[1], [0], [0], [1], [0, 0, 1, 1], [], []>} : vector<80x8xbf16>, vector<8x8xbf16>, vector<80x8xf32> -> vector<80x8xf32>
    %54 = arith.addf %48, %53 : vector<80x8xf32>
    %c0_47 = arith.constant 0 : index
    %c0_48 = arith.constant 0 : index
    %55 = vector.load %arg3[%c0_47, %c0_48] : memref<1x8xf32, #tpu.memory_space<vmem>>, vector<1x8xf32>
    %56 = vector.broadcast %55 : vector<1x8xf32> to vector<80x8xf32>
    %57 = arith.addf %54, %56 : vector<80x8xf32>
    %cst_49 = arith.constant 0.000000e+00 : f32
    %58 = vector.broadcast %cst_49 : f32 to vector<80x8xf32>
    %59 = arith.maximumf %57, %58 : vector<80x8xf32>
    %c0_50 = arith.constant 0 : index
    %c0_51 = arith.constant 0 : index
    %60 = vector.load %arg4[%c0_50, %c0_51] : memref<80x1xf32, #tpu.memory_space<vmem>>, vector<80x1xf32>
    %61 = vector.broadcast %60 : vector<80x1xf32> to vector<80x8xf32>
    %62 = arith.mulf %59, %61 : vector<80x8xf32>
    %63 = arith.truncf %62 : vector<80x8xf32> to vector<80x8xbf16>
    %c0_52 = arith.constant 0 : index
    %c0_53 = arith.constant 0 : index
    %c0_54 = arith.constant 0 : index
    %64 = vector.load %arg5[%c0_52, %c0_53, %c0_54] : memref<1x80x8xbf16, #tpu.memory_space<vmem>>, vector<1x80x8xbf16>
    %65 = vector.shape_cast %64 : vector<1x80x8xbf16> to vector<80x8xbf16>
    %66 = vector.shape_cast %63 : vector<80x8xbf16> to vector<1x80x8xbf16>
    tpu.vector_store %arg5[%c0_52, %c0_53, %c0_54], %66 {strides = array<i32>} : memref<1x80x8xbf16, #tpu.memory_space<vmem>>, vector<1x80x8xbf16>,
    return
  }
  func.func @transform_0(%arg0: i32) -> (i32, i32, i32) {
    %c0_i32 = arith.constant 0 : i32
    %c0_i32_0 = arith.constant 0 : i32
    %c0_i32_1 = arith.constant 0 : i32
    return %arg0, %c0_i32, %c0_i32_0 : i32, i32, i32
  }
  func.func @transform_1(%arg0: i32) -> (i32, i32, i32) {
    %c0_i32 = arith.constant 0 : i32
    %c0_i32_0 = arith.constant 0 : i32
    %c0_i32_1 = arith.constant 0 : i32
    %c0_i32_2 = arith.constant 0 : i32
    return %c0_i32, %c0_i32_0, %c0_i32_1 : i32, i32, i32
  }
  func.func @transform_2(%arg0: i32) -> (i32, i32) {
    %c0_i32 = arith.constant 0 : i32
    %c0_i32_0 = arith.constant 0 : i32
    %c0_i32_1 = arith.constant 0 : i32
    return %c0_i32, %c0_i32_0 : i32, i32
  }
  func.func @transform_3(%arg0: i32) -> (i32, i32) {
    %c0_i32 = arith.constant 0 : i32
    %c0_i32_0 = arith.constant 0 : i32
    %c0_i32_1 = arith.constant 0 : i32
    return %c0_i32, %c0_i32_0 : i32, i32
  }
  func.func @transform_4(%arg0: i32) -> (i32, i32, i32) {
    %c0_i32 = arith.constant 0 : i32
    %c0_i32_0 = arith.constant 0 : i32
    %c0_i32_1 = arith.constant 0 : i32
    return %arg0, %c0_i32, %c0_i32_0 : i32, i32, i32
  }
}

module attributes {stable_mosaic.version = 11 : i64} {
  func.func @_conv_tap_res_kernel(%arg0: i32, %arg1: memref<1x116x8xbf16, #tpu.memory_space<vmem>>, %arg2: memref<9x8x8xbf16, #tpu.memory_space<vmem>>, %arg3: memref<1x8xf32, #tpu.memory_space<vmem>>, %arg4: memref<80x1xf32, #tpu.memory_space<vmem>>, %arg5: memref<1x80x8xbf16, #tpu.memory_space<vmem>>, %arg6: memref<1x80x8xbf16, #tpu.memory_space<vmem>>) attributes {dimension_semantics = [#tpu.dimension_semantics<parallel>], iteration_bounds = array<i64: 2>, scalar_prefetch = 0 : i64, scratch_operands = 0 : i64, tpu.core_type = #tpu.core_type<tc>, window_params = [{transform_indices = @transform_0, window_bounds = array<i64: 1, 116, 8>}, {pipeline_mode = #tpu.pipeline_mode<synchronous>, transform_indices = @transform_1, window_bounds = array<i64: 9, 8, 8>}, {pipeline_mode = #tpu.pipeline_mode<synchronous>, transform_indices = @transform_2, window_bounds = array<i64: 1, 8>}, {pipeline_mode = #tpu.pipeline_mode<synchronous>, transform_indices = @transform_3, window_bounds = array<i64: 80, 1>}, {transform_indices = @transform_4, window_bounds = array<i64: 1, 80, 8>}, {transform_indices = @transform_5, window_bounds = array<i64: 1, 80, 8>}]} {
    %cst = arith.constant 0.000000e+00 : f32
    %0 = vector.broadcast %cst : f32 to vector<80x8xf32>
    %c0 = arith.constant 0 : index
    %c7 = arith.constant 7 : index
    %c0_0 = arith.constant 0 : index
    %1 = vector.load %arg1[%c0, %c7, %c0_0] : memref<1x116x8xbf16, #tpu.memory_space<vmem>>, vector<1x80x8xbf16>
    %2 = vector.shape_cast %1 : vector<1x80x8xbf16> to vector<80x8xbf16>
    %c0_1 = arith.constant 0 : index
    %c0_2 = arith.constant 0 : index
    %c0_3 = arith.constant 0 : index
    %3 = vector.load %arg2[%c0_1, %c0_2, %c0_3] : memref<9x8x8xbf16, #tpu.memory_space<vmem>>, vector<1x8x8xbf16>
    %4 = vector.shape_cast %3 : vector<1x8x8xbf16> to vector<8x8xbf16>
    %cst_4 = arith.constant dense<0.000000e+00> : vector<80x8xf32>
    %5 = tpu.matmul %2, %4, %cst_4 {dimension_numbers = #tpu.dot_dimension_numbers<[1], [0], [0], [1], [0, 0, 1, 1], [], []>} : vector<80x8xbf16>, vector<8x8xbf16>, vector<80x8xf32> -> vector<80x8xf32>
    %6 = arith.addf %0, %5 : vector<80x8xf32>
    %c0_5 = arith.constant 0 : index
    %c8 = arith.constant 8 : index
    %c0_6 = arith.constant 0 : index
    %7 = vector.load %arg1[%c0_5, %c8, %c0_6] : memref<1x116x8xbf16, #tpu.memory_space<vmem>>, vector<1x80x8xbf16>
    %8 = vector.shape_cast %7 : vector<1x80x8xbf16> to vector<80x8xbf16>
    %c1 = arith.constant 1 : index
    %c0_7 = arith.constant 0 : index
    %c0_8 = arith.constant 0 : index
    %9 = vector.load %arg2[%c1, %c0_7, %c0_8] : memref<9x8x8xbf16, #tpu.memory_space<vmem>>, vector<1x8x8xbf16>
    %10 = vector.shape_cast %9 : vector<1x8x8xbf16> to vector<8x8xbf16>
    %cst_9 = arith.constant dense<0.000000e+00> : vector<80x8xf32>
    %11 = tpu.matmul %8, %10, %cst_9 {dimension_numbers = #tpu.dot_dimension_numbers<[1], [0], [0], [1], [0, 0, 1, 1], [], []>} : vector<80x8xbf16>, vector<8x8xbf16>, vector<80x8xf32> -> vector<80x8xf32>
    %12 = arith.addf %6, %11 : vector<80x8xf32>
    %c0_10 = arith.constant 0 : index
    %c9 = arith.constant 9 : index
    %c0_11 = arith.constant 0 : index
    %13 = vector.load %arg1[%c0_10, %c9, %c0_11] : memref<1x116x8xbf16, #tpu.memory_space<vmem>>, vector<1x80x8xbf16>
    %14 = vector.shape_cast %13 : vector<1x80x8xbf16> to vector<80x8xbf16>
    %c2 = arith.constant 2 : index
    %c0_12 = arith.constant 0 : index
    %c0_13 = arith.constant 0 : index
    %15 = vector.load %arg2[%c2, %c0_12, %c0_13] : memref<9x8x8xbf16, #tpu.memory_space<vmem>>, vector<1x8x8xbf16>
    %16 = vector.shape_cast %15 : vector<1x8x8xbf16> to vector<8x8xbf16>
    %cst_14 = arith.constant dense<0.000000e+00> : vector<80x8xf32>
    %17 = tpu.matmul %14, %16, %cst_14 {dimension_numbers = #tpu.dot_dimension_numbers<[1], [0], [0], [1], [0, 0, 1, 1], [], []>} : vector<80x8xbf16>, vector<8x8xbf16>, vector<80x8xf32> -> vector<80x8xf32>
    %18 = arith.addf %12, %17 : vector<80x8xf32>
    %c0_15 = arith.constant 0 : index
    %c17 = arith.constant 17 : index
    %c0_16 = arith.constant 0 : index
    %19 = vector.load %arg1[%c0_15, %c17, %c0_16] : memref<1x116x8xbf16, #tpu.memory_space<vmem>>, vector<1x80x8xbf16>
    %20 = vector.shape_cast %19 : vector<1x80x8xbf16> to vector<80x8xbf16>
    %c3 = arith.constant 3 : index
    %c0_17 = arith.constant 0 : index
    %c0_18 = arith.constant 0 : index
    %21 = vector.load %arg2[%c3, %c0_17, %c0_18] : memref<9x8x8xbf16, #tpu.memory_space<vmem>>, vector<1x8x8xbf16>
    %22 = vector.shape_cast %21 : vector<1x8x8xbf16> to vector<8x8xbf16>
    %cst_19 = arith.constant dense<0.000000e+00> : vector<80x8xf32>
    %23 = tpu.matmul %20, %22, %cst_19 {dimension_numbers = #tpu.dot_dimension_numbers<[1], [0], [0], [1], [0, 0, 1, 1], [], []>} : vector<80x8xbf16>, vector<8x8xbf16>, vector<80x8xf32> -> vector<80x8xf32>
    %24 = arith.addf %18, %23 : vector<80x8xf32>
    %c0_20 = arith.constant 0 : index
    %c18 = arith.constant 18 : index
    %c0_21 = arith.constant 0 : index
    %25 = vector.load %arg1[%c0_20, %c18, %c0_21] : memref<1x116x8xbf16, #tpu.memory_space<vmem>>, vector<1x80x8xbf16>
    %26 = vector.shape_cast %25 : vector<1x80x8xbf16> to vector<80x8xbf16>
    %c4 = arith.constant 4 : index
    %c0_22 = arith.constant 0 : index
    %c0_23 = arith.constant 0 : index
    %27 = vector.load %arg2[%c4, %c0_22, %c0_23] : memref<9x8x8xbf16, #tpu.memory_space<vmem>>, vector<1x8x8xbf16>
    %28 = vector.shape_cast %27 : vector<1x8x8xbf16> to vector<8x8xbf16>
    %cst_24 = arith.constant dense<0.000000e+00> : vector<80x8xf32>
    %29 = tpu.matmul %26, %28, %cst_24 {dimension_numbers = #tpu.dot_dimension_numbers<[1], [0], [0], [1], [0, 0, 1, 1], [], []>} : vector<80x8xbf16>, vector<8x8xbf16>, vector<80x8xf32> -> vector<80x8xf32>
    %30 = arith.addf %24, %29 : vector<80x8xf32>
    %c0_25 = arith.constant 0 : index
    %c19 = arith.constant 19 : index
    %c0_26 = arith.constant 0 : index
    %31 = vector.load %arg1[%c0_25, %c19, %c0_26] : memref<1x116x8xbf16, #tpu.memory_space<vmem>>, vector<1x80x8xbf16>
    %32 = vector.shape_cast %31 : vector<1x80x8xbf16> to vector<80x8xbf16>
    %c5 = arith.constant 5 : index
    %c0_27 = arith.constant 0 : index
    %c0_28 = arith.constant 0 : index
    %33 = vector.load %arg2[%c5, %c0_27, %c0_28] : memref<9x8x8xbf16, #tpu.memory_space<vmem>>, vector<1x8x8xbf16>
    %34 = vector.shape_cast %33 : vector<1x8x8xbf16> to vector<8x8xbf16>
    %cst_29 = arith.constant dense<0.000000e+00> : vector<80x8xf32>
    %35 = tpu.matmul %32, %34, %cst_29 {dimension_numbers = #tpu.dot_dimension_numbers<[1], [0], [0], [1], [0, 0, 1, 1], [], []>} : vector<80x8xbf16>, vector<8x8xbf16>, vector<80x8xf32> -> vector<80x8xf32>
    %36 = arith.addf %30, %35 : vector<80x8xf32>
    %c0_30 = arith.constant 0 : index
    %c27 = arith.constant 27 : index
    %c0_31 = arith.constant 0 : index
    %37 = vector.load %arg1[%c0_30, %c27, %c0_31] : memref<1x116x8xbf16, #tpu.memory_space<vmem>>, vector<1x80x8xbf16>
    %38 = vector.shape_cast %37 : vector<1x80x8xbf16> to vector<80x8xbf16>
    %c6 = arith.constant 6 : index
    %c0_32 = arith.constant 0 : index
    %c0_33 = arith.constant 0 : index
    %39 = vector.load %arg2[%c6, %c0_32, %c0_33] : memref<9x8x8xbf16, #tpu.memory_space<vmem>>, vector<1x8x8xbf16>
    %40 = vector.shape_cast %39 : vector<1x8x8xbf16> to vector<8x8xbf16>
    %cst_34 = arith.constant dense<0.000000e+00> : vector<80x8xf32>
    %41 = tpu.matmul %38, %40, %cst_34 {dimension_numbers = #tpu.dot_dimension_numbers<[1], [0], [0], [1], [0, 0, 1, 1], [], []>} : vector<80x8xbf16>, vector<8x8xbf16>, vector<80x8xf32> -> vector<80x8xf32>
    %42 = arith.addf %36, %41 : vector<80x8xf32>
    %c0_35 = arith.constant 0 : index
    %c28 = arith.constant 28 : index
    %c0_36 = arith.constant 0 : index
    %43 = vector.load %arg1[%c0_35, %c28, %c0_36] : memref<1x116x8xbf16, #tpu.memory_space<vmem>>, vector<1x80x8xbf16>
    %44 = vector.shape_cast %43 : vector<1x80x8xbf16> to vector<80x8xbf16>
    %c7_37 = arith.constant 7 : index
    %c0_38 = arith.constant 0 : index
    %c0_39 = arith.constant 0 : index
    %45 = vector.load %arg2[%c7_37, %c0_38, %c0_39] : memref<9x8x8xbf16, #tpu.memory_space<vmem>>, vector<1x8x8xbf16>
    %46 = vector.shape_cast %45 : vector<1x8x8xbf16> to vector<8x8xbf16>
    %cst_40 = arith.constant dense<0.000000e+00> : vector<80x8xf32>
    %47 = tpu.matmul %44, %46, %cst_40 {dimension_numbers = #tpu.dot_dimension_numbers<[1], [0], [0], [1], [0, 0, 1, 1], [], []>} : vector<80x8xbf16>, vector<8x8xbf16>, vector<80x8xf32> -> vector<80x8xf32>
    %48 = arith.addf %42, %47 : vector<80x8xf32>
    %c0_41 = arith.constant 0 : index
    %c29 = arith.constant 29 : index
    %c0_42 = arith.constant 0 : index
    %49 = vector.load %arg1[%c0_41, %c29, %c0_42] : memref<1x116x8xbf16, #tpu.memory_space<vmem>>, vector<1x80x8xbf16>
    %50 = vector.shape_cast %49 : vector<1x80x8xbf16> to vector<80x8xbf16>
    %c8_43 = arith.constant 8 : index
    %c0_44 = arith.constant 0 : index
    %c0_45 = arith.constant 0 : index
    %51 = vector.load %arg2[%c8_43, %c0_44, %c0_45] : memref<9x8x8xbf16, #tpu.memory_space<vmem>>, vector<1x8x8xbf16>
    %52 = vector.shape_cast %51 : vector<1x8x8xbf16> to vector<8x8xbf16>
    %cst_46 = arith.constant dense<0.000000e+00> : vector<80x8xf32>
    %53 = tpu.matmul %50, %52, %cst_46 {dimension_numbers = #tpu.dot_dimension_numbers<[1], [0], [0], [1], [0, 0, 1, 1], [], []>} : vector<80x8xbf16>, vector<8x8xbf16>, vector<80x8xf32> -> vector<80x8xf32>
    %54 = arith.addf %48, %53 : vector<80x8xf32>
    %c0_47 = arith.constant 0 : index
    %c0_48 = arith.constant 0 : index
    %55 = vector.load %arg3[%c0_47, %c0_48] : memref<1x8xf32, #tpu.memory_space<vmem>>, vector<1x8xf32>
    %56 = vector.broadcast %55 : vector<1x8xf32> to vector<80x8xf32>
    %57 = arith.addf %54, %56 : vector<80x8xf32>
    %c0_49 = arith.constant 0 : index
    %c0_50 = arith.constant 0 : index
    %c0_51 = arith.constant 0 : index
    %58 = vector.load %arg5[%c0_49, %c0_50, %c0_51] : memref<1x80x8xbf16, #tpu.memory_space<vmem>>, vector<1x80x8xbf16>
    %59 = vector.shape_cast %58 : vector<1x80x8xbf16> to vector<80x8xbf16>
    %60 = arith.extf %59 : vector<80x8xbf16> to vector<80x8xf32>
    %61 = arith.addf %57, %60 : vector<80x8xf32>
    %cst_52 = arith.constant 0.000000e+00 : f32
    %62 = vector.broadcast %cst_52 : f32 to vector<80x8xf32>
    %63 = arith.maximumf %61, %62 : vector<80x8xf32>
    %c0_53 = arith.constant 0 : index
    %c0_54 = arith.constant 0 : index
    %64 = vector.load %arg4[%c0_53, %c0_54] : memref<80x1xf32, #tpu.memory_space<vmem>>, vector<80x1xf32>
    %65 = vector.broadcast %64 : vector<80x1xf32> to vector<80x8xf32>
    %66 = arith.mulf %63, %65 : vector<80x8xf32>
    %67 = arith.truncf %66 : vector<80x8xf32> to vector<80x8xbf16>
    %c0_55 = arith.constant 0 : index
    %c0_56 = arith.constant 0 : index
    %c0_57 = arith.constant 0 : index
    %68 = vector.load %arg6[%c0_55, %c0_56, %c0_57] : memref<1x80x8xbf16, #tpu.memory_space<vmem>>, vector<1x80x8xbf16>
    %69 = vector.shape_cast %68 : vector<1x80x8xbf16> to vector<80x8xbf16>
    %70 = vector.shape_cast %67 : vector<80x8xbf16> to vector<1x80x8xbf16>
    tpu.vector_store %arg6[%c0_55, %c0_56, %c0_57], %70 {strides = array<i32>} : memref<1x80x8xbf16, #tpu.memory_space<vmem>>, vector<1x80x8xbf16>,
    return
  }
  func.func @transform_0(%arg0: i32) -> (i32, i32, i32) {
    %c0_i32 = arith.constant 0 : i32
    %c0_i32_0 = arith.constant 0 : i32
    %c0_i32_1 = arith.constant 0 : i32
    return %arg0, %c0_i32, %c0_i32_0 : i32, i32, i32
  }
  func.func @transform_1(%arg0: i32) -> (i32, i32, i32) {
    %c0_i32 = arith.constant 0 : i32
    %c0_i32_0 = arith.constant 0 : i32
    %c0_i32_1 = arith.constant 0 : i32
    %c0_i32_2 = arith.constant 0 : i32
    return %c0_i32, %c0_i32_0, %c0_i32_1 : i32, i32, i32
  }
  func.func @transform_2(%arg0: i32) -> (i32, i32) {
    %c0_i32 = arith.constant 0 : i32
    %c0_i32_0 = arith.constant 0 : i32
    %c0_i32_1 = arith.constant 0 : i32
    return %c0_i32, %c0_i32_0 : i32, i32
  }
  func.func @transform_3(%arg0: i32) -> (i32, i32) {
    %c0_i32 = arith.constant 0 : i32
    %c0_i32_0 = arith.constant 0 : i32
    %c0_i32_1 = arith.constant 0 : i32
    return %c0_i32, %c0_i32_0 : i32, i32
  }
  func.func @transform_4(%arg0: i32) -> (i32, i32, i32) {
    %c0_i32 = arith.constant 0 : i32
    %c0_i32_0 = arith.constant 0 : i32
    %c0_i32_1 = arith.constant 0 : i32
    return %arg0, %c0_i32, %c0_i32_0 : i32, i32, i32
  }
  func.func @transform_5(%arg0: i32) -> (i32, i32, i32) {
    %c0_i32 = arith.constant 0 : i32
    %c0_i32_0 = arith.constant 0 : i32
    %c0_i32_1 = arith.constant 0 : i32
    return %arg0, %c0_i32, %c0_i32_0 : i32, i32, i32
  }
}

module attributes {stable_mosaic.version = 11 : i64} {
  func.func @_matmul_bias_kernel(%arg0: i32, %arg1: memref<32x72xbf16, #tpu.memory_space<vmem>>, %arg2: memref<72x16xbf16, #tpu.memory_space<vmem>>, %arg3: memref<1x16xf32, #tpu.memory_space<vmem>>, %arg4: memref<32x16xbf16, #tpu.memory_space<vmem>>) attributes {dimension_semantics = [#tpu.dimension_semantics<parallel>], iteration_bounds = array<i64: 1>, scalar_prefetch = 0 : i64, scratch_operands = 0 : i64, tpu.core_type = #tpu.core_type<tc>, window_params = [{transform_indices = @transform_0, window_bounds = array<i64: 32, 72>}, {pipeline_mode = #tpu.pipeline_mode<synchronous>, transform_indices = @transform_1, window_bounds = array<i64: 72, 16>}, {pipeline_mode = #tpu.pipeline_mode<synchronous>, transform_indices = @transform_2, window_bounds = array<i64: 1, 16>}, {transform_indices = @transform_3, window_bounds = array<i64: 32, 16>}]} {
    %c0 = arith.constant 0 : index
    %c0_0 = arith.constant 0 : index
    %0 = vector.load %arg1[%c0, %c0_0] : memref<32x72xbf16, #tpu.memory_space<vmem>>, vector<32x72xbf16>
    %c0_1 = arith.constant 0 : index
    %c0_2 = arith.constant 0 : index
    %1 = vector.load %arg2[%c0_1, %c0_2] : memref<72x16xbf16, #tpu.memory_space<vmem>>, vector<72x16xbf16>
    %cst = arith.constant dense<0.000000e+00> : vector<32x16xf32>
    %2 = tpu.matmul %0, %1, %cst {dimension_numbers = #tpu.dot_dimension_numbers<[1], [0], [0], [1], [0, 0, 1, 1], [], []>} : vector<32x72xbf16>, vector<72x16xbf16>, vector<32x16xf32> -> vector<32x16xf32>
    %c0_3 = arith.constant 0 : index
    %c0_4 = arith.constant 0 : index
    %3 = vector.load %arg3[%c0_3, %c0_4] : memref<1x16xf32, #tpu.memory_space<vmem>>, vector<1x16xf32>
    %4 = vector.broadcast %3 : vector<1x16xf32> to vector<32x16xf32>
    %5 = arith.addf %2, %4 : vector<32x16xf32>
    %cst_5 = arith.constant 0.000000e+00 : f32
    %6 = vector.broadcast %cst_5 : f32 to vector<32x16xf32>
    %7 = arith.maximumf %5, %6 : vector<32x16xf32>
    %8 = arith.truncf %7 : vector<32x16xf32> to vector<32x16xbf16>
    %c0_6 = arith.constant 0 : index
    %c0_7 = arith.constant 0 : index
    %9 = vector.load %arg4[%c0_6, %c0_7] : memref<32x16xbf16, #tpu.memory_space<vmem>>, vector<32x16xbf16>
    tpu.vector_store %arg4[%c0_6, %c0_7], %8 {strides = array<i32>} : memref<32x16xbf16, #tpu.memory_space<vmem>>, vector<32x16xbf16>,
    return
  }
  func.func @transform_0(%arg0: i32) -> (i32, i32) {
    %c0_i32 = arith.constant 0 : i32
    %c0_i32_0 = arith.constant 0 : i32
    return %arg0, %c0_i32 : i32, i32
  }
  func.func @transform_1(%arg0: i32) -> (i32, i32) {
    %c0_i32 = arith.constant 0 : i32
    %c0_i32_0 = arith.constant 0 : i32
    %c0_i32_1 = arith.constant 0 : i32
    return %c0_i32, %c0_i32_0 : i32, i32
  }
  func.func @transform_2(%arg0: i32) -> (i32, i32) {
    %c0_i32 = arith.constant 0 : i32
    %c0_i32_0 = arith.constant 0 : i32
    %c0_i32_1 = arith.constant 0 : i32
    return %c0_i32, %c0_i32_0 : i32, i32
  }
  func.func @transform_3(%arg0: i32) -> (i32, i32) {
    %c0_i32 = arith.constant 0 : i32
    %c0_i32_0 = arith.constant 0 : i32
    return %arg0, %c0_i32 : i32, i32
  }
}

module attributes {stable_mosaic.version = 11 : i64} {
  func.func @_conv_tap_res_kernel(%arg0: i32, %arg1: memref<1x52x16xbf16, #tpu.memory_space<vmem>>, %arg2: memref<9x16x16xbf16, #tpu.memory_space<vmem>>, %arg3: memref<1x16xf32, #tpu.memory_space<vmem>>, %arg4: memref<24x1xf32, #tpu.memory_space<vmem>>, %arg5: memref<1x24x16xbf16, #tpu.memory_space<vmem>>, %arg6: memref<1x24x16xbf16, #tpu.memory_space<vmem>>) attributes {dimension_semantics = [#tpu.dimension_semantics<parallel>], iteration_bounds = array<i64: 2>, scalar_prefetch = 0 : i64, scratch_operands = 0 : i64, tpu.core_type = #tpu.core_type<tc>, window_params = [{transform_indices = @transform_0, window_bounds = array<i64: 1, 52, 16>}, {pipeline_mode = #tpu.pipeline_mode<synchronous>, transform_indices = @transform_1, window_bounds = array<i64: 9, 16, 16>}, {pipeline_mode = #tpu.pipeline_mode<synchronous>, transform_indices = @transform_2, window_bounds = array<i64: 1, 16>}, {pipeline_mode = #tpu.pipeline_mode<synchronous>, transform_indices = @transform_3, window_bounds = array<i64: 24, 1>}, {transform_indices = @transform_4, window_bounds = array<i64: 1, 24, 16>}, {transform_indices = @transform_5, window_bounds = array<i64: 1, 24, 16>}]} {
    %cst = arith.constant 0.000000e+00 : f32
    %0 = vector.broadcast %cst : f32 to vector<24x16xf32>
    %c0 = arith.constant 0 : index
    %c7 = arith.constant 7 : index
    %c0_0 = arith.constant 0 : index
    %1 = vector.load %arg1[%c0, %c7, %c0_0] : memref<1x52x16xbf16, #tpu.memory_space<vmem>>, vector<1x24x16xbf16>
    %2 = vector.shape_cast %1 : vector<1x24x16xbf16> to vector<24x16xbf16>
    %c0_1 = arith.constant 0 : index
    %c0_2 = arith.constant 0 : index
    %c0_3 = arith.constant 0 : index
    %3 = vector.load %arg2[%c0_1, %c0_2, %c0_3] : memref<9x16x16xbf16, #tpu.memory_space<vmem>>, vector<1x16x16xbf16>
    %4 = vector.shape_cast %3 : vector<1x16x16xbf16> to vector<16x16xbf16>
    %cst_4 = arith.constant dense<0.000000e+00> : vector<24x16xf32>
    %5 = tpu.matmul %2, %4, %cst_4 {dimension_numbers = #tpu.dot_dimension_numbers<[1], [0], [0], [1], [0, 0, 1, 1], [], []>} : vector<24x16xbf16>, vector<16x16xbf16>, vector<24x16xf32> -> vector<24x16xf32>
    %6 = arith.addf %0, %5 : vector<24x16xf32>
    %c0_5 = arith.constant 0 : index
    %c8 = arith.constant 8 : index
    %c0_6 = arith.constant 0 : index
    %7 = vector.load %arg1[%c0_5, %c8, %c0_6] : memref<1x52x16xbf16, #tpu.memory_space<vmem>>, vector<1x24x16xbf16>
    %8 = vector.shape_cast %7 : vector<1x24x16xbf16> to vector<24x16xbf16>
    %c1 = arith.constant 1 : index
    %c0_7 = arith.constant 0 : index
    %c0_8 = arith.constant 0 : index
    %9 = vector.load %arg2[%c1, %c0_7, %c0_8] : memref<9x16x16xbf16, #tpu.memory_space<vmem>>, vector<1x16x16xbf16>
    %10 = vector.shape_cast %9 : vector<1x16x16xbf16> to vector<16x16xbf16>
    %cst_9 = arith.constant dense<0.000000e+00> : vector<24x16xf32>
    %11 = tpu.matmul %8, %10, %cst_9 {dimension_numbers = #tpu.dot_dimension_numbers<[1], [0], [0], [1], [0, 0, 1, 1], [], []>} : vector<24x16xbf16>, vector<16x16xbf16>, vector<24x16xf32> -> vector<24x16xf32>
    %12 = arith.addf %6, %11 : vector<24x16xf32>
    %c0_10 = arith.constant 0 : index
    %c9 = arith.constant 9 : index
    %c0_11 = arith.constant 0 : index
    %13 = vector.load %arg1[%c0_10, %c9, %c0_11] : memref<1x52x16xbf16, #tpu.memory_space<vmem>>, vector<1x24x16xbf16>
    %14 = vector.shape_cast %13 : vector<1x24x16xbf16> to vector<24x16xbf16>
    %c2 = arith.constant 2 : index
    %c0_12 = arith.constant 0 : index
    %c0_13 = arith.constant 0 : index
    %15 = vector.load %arg2[%c2, %c0_12, %c0_13] : memref<9x16x16xbf16, #tpu.memory_space<vmem>>, vector<1x16x16xbf16>
    %16 = vector.shape_cast %15 : vector<1x16x16xbf16> to vector<16x16xbf16>
    %cst_14 = arith.constant dense<0.000000e+00> : vector<24x16xf32>
    %17 = tpu.matmul %14, %16, %cst_14 {dimension_numbers = #tpu.dot_dimension_numbers<[1], [0], [0], [1], [0, 0, 1, 1], [], []>} : vector<24x16xbf16>, vector<16x16xbf16>, vector<24x16xf32> -> vector<24x16xf32>
    %18 = arith.addf %12, %17 : vector<24x16xf32>
    %c0_15 = arith.constant 0 : index
    %c13 = arith.constant 13 : index
    %c0_16 = arith.constant 0 : index
    %19 = vector.load %arg1[%c0_15, %c13, %c0_16] : memref<1x52x16xbf16, #tpu.memory_space<vmem>>, vector<1x24x16xbf16>
    %20 = vector.shape_cast %19 : vector<1x24x16xbf16> to vector<24x16xbf16>
    %c3 = arith.constant 3 : index
    %c0_17 = arith.constant 0 : index
    %c0_18 = arith.constant 0 : index
    %21 = vector.load %arg2[%c3, %c0_17, %c0_18] : memref<9x16x16xbf16, #tpu.memory_space<vmem>>, vector<1x16x16xbf16>
    %22 = vector.shape_cast %21 : vector<1x16x16xbf16> to vector<16x16xbf16>
    %cst_19 = arith.constant dense<0.000000e+00> : vector<24x16xf32>
    %23 = tpu.matmul %20, %22, %cst_19 {dimension_numbers = #tpu.dot_dimension_numbers<[1], [0], [0], [1], [0, 0, 1, 1], [], []>} : vector<24x16xbf16>, vector<16x16xbf16>, vector<24x16xf32> -> vector<24x16xf32>
    %24 = arith.addf %18, %23 : vector<24x16xf32>
    %c0_20 = arith.constant 0 : index
    %c14 = arith.constant 14 : index
    %c0_21 = arith.constant 0 : index
    %25 = vector.load %arg1[%c0_20, %c14, %c0_21] : memref<1x52x16xbf16, #tpu.memory_space<vmem>>, vector<1x24x16xbf16>
    %26 = vector.shape_cast %25 : vector<1x24x16xbf16> to vector<24x16xbf16>
    %c4 = arith.constant 4 : index
    %c0_22 = arith.constant 0 : index
    %c0_23 = arith.constant 0 : index
    %27 = vector.load %arg2[%c4, %c0_22, %c0_23] : memref<9x16x16xbf16, #tpu.memory_space<vmem>>, vector<1x16x16xbf16>
    %28 = vector.shape_cast %27 : vector<1x16x16xbf16> to vector<16x16xbf16>
    %cst_24 = arith.constant dense<0.000000e+00> : vector<24x16xf32>
    %29 = tpu.matmul %26, %28, %cst_24 {dimension_numbers = #tpu.dot_dimension_numbers<[1], [0], [0], [1], [0, 0, 1, 1], [], []>} : vector<24x16xbf16>, vector<16x16xbf16>, vector<24x16xf32> -> vector<24x16xf32>
    %30 = arith.addf %24, %29 : vector<24x16xf32>
    %c0_25 = arith.constant 0 : index
    %c15 = arith.constant 15 : index
    %c0_26 = arith.constant 0 : index
    %31 = vector.load %arg1[%c0_25, %c15, %c0_26] : memref<1x52x16xbf16, #tpu.memory_space<vmem>>, vector<1x24x16xbf16>
    %32 = vector.shape_cast %31 : vector<1x24x16xbf16> to vector<24x16xbf16>
    %c5 = arith.constant 5 : index
    %c0_27 = arith.constant 0 : index
    %c0_28 = arith.constant 0 : index
    %33 = vector.load %arg2[%c5, %c0_27, %c0_28] : memref<9x16x16xbf16, #tpu.memory_space<vmem>>, vector<1x16x16xbf16>
    %34 = vector.shape_cast %33 : vector<1x16x16xbf16> to vector<16x16xbf16>
    %cst_29 = arith.constant dense<0.000000e+00> : vector<24x16xf32>
    %35 = tpu.matmul %32, %34, %cst_29 {dimension_numbers = #tpu.dot_dimension_numbers<[1], [0], [0], [1], [0, 0, 1, 1], [], []>} : vector<24x16xbf16>, vector<16x16xbf16>, vector<24x16xf32> -> vector<24x16xf32>
    %36 = arith.addf %30, %35 : vector<24x16xf32>
    %c0_30 = arith.constant 0 : index
    %c19 = arith.constant 19 : index
    %c0_31 = arith.constant 0 : index
    %37 = vector.load %arg1[%c0_30, %c19, %c0_31] : memref<1x52x16xbf16, #tpu.memory_space<vmem>>, vector<1x24x16xbf16>
    %38 = vector.shape_cast %37 : vector<1x24x16xbf16> to vector<24x16xbf16>
    %c6 = arith.constant 6 : index
    %c0_32 = arith.constant 0 : index
    %c0_33 = arith.constant 0 : index
    %39 = vector.load %arg2[%c6, %c0_32, %c0_33] : memref<9x16x16xbf16, #tpu.memory_space<vmem>>, vector<1x16x16xbf16>
    %40 = vector.shape_cast %39 : vector<1x16x16xbf16> to vector<16x16xbf16>
    %cst_34 = arith.constant dense<0.000000e+00> : vector<24x16xf32>
    %41 = tpu.matmul %38, %40, %cst_34 {dimension_numbers = #tpu.dot_dimension_numbers<[1], [0], [0], [1], [0, 0, 1, 1], [], []>} : vector<24x16xbf16>, vector<16x16xbf16>, vector<24x16xf32> -> vector<24x16xf32>
    %42 = arith.addf %36, %41 : vector<24x16xf32>
    %c0_35 = arith.constant 0 : index
    %c20 = arith.constant 20 : index
    %c0_36 = arith.constant 0 : index
    %43 = vector.load %arg1[%c0_35, %c20, %c0_36] : memref<1x52x16xbf16, #tpu.memory_space<vmem>>, vector<1x24x16xbf16>
    %44 = vector.shape_cast %43 : vector<1x24x16xbf16> to vector<24x16xbf16>
    %c7_37 = arith.constant 7 : index
    %c0_38 = arith.constant 0 : index
    %c0_39 = arith.constant 0 : index
    %45 = vector.load %arg2[%c7_37, %c0_38, %c0_39] : memref<9x16x16xbf16, #tpu.memory_space<vmem>>, vector<1x16x16xbf16>
    %46 = vector.shape_cast %45 : vector<1x16x16xbf16> to vector<16x16xbf16>
    %cst_40 = arith.constant dense<0.000000e+00> : vector<24x16xf32>
    %47 = tpu.matmul %44, %46, %cst_40 {dimension_numbers = #tpu.dot_dimension_numbers<[1], [0], [0], [1], [0, 0, 1, 1], [], []>} : vector<24x16xbf16>, vector<16x16xbf16>, vector<24x16xf32> -> vector<24x16xf32>
    %48 = arith.addf %42, %47 : vector<24x16xf32>
    %c0_41 = arith.constant 0 : index
    %c21 = arith.constant 21 : index
    %c0_42 = arith.constant 0 : index
    %49 = vector.load %arg1[%c0_41, %c21, %c0_42] : memref<1x52x16xbf16, #tpu.memory_space<vmem>>, vector<1x24x16xbf16>
    %50 = vector.shape_cast %49 : vector<1x24x16xbf16> to vector<24x16xbf16>
    %c8_43 = arith.constant 8 : index
    %c0_44 = arith.constant 0 : index
    %c0_45 = arith.constant 0 : index
    %51 = vector.load %arg2[%c8_43, %c0_44, %c0_45] : memref<9x16x16xbf16, #tpu.memory_space<vmem>>, vector<1x16x16xbf16>
    %52 = vector.shape_cast %51 : vector<1x16x16xbf16> to vector<16x16xbf16>
    %cst_46 = arith.constant dense<0.000000e+00> : vector<24x16xf32>
    %53 = tpu.matmul %50, %52, %cst_46 {dimension_numbers = #tpu.dot_dimension_numbers<[1], [0], [0], [1], [0, 0, 1, 1], [], []>} : vector<24x16xbf16>, vector<16x16xbf16>, vector<24x16xf32> -> vector<24x16xf32>
    %54 = arith.addf %48, %53 : vector<24x16xf32>
    %c0_47 = arith.constant 0 : index
    %c0_48 = arith.constant 0 : index
    %55 = vector.load %arg3[%c0_47, %c0_48] : memref<1x16xf32, #tpu.memory_space<vmem>>, vector<1x16xf32>
    %56 = vector.broadcast %55 : vector<1x16xf32> to vector<24x16xf32>
    %57 = arith.addf %54, %56 : vector<24x16xf32>
    %c0_49 = arith.constant 0 : index
    %c0_50 = arith.constant 0 : index
    %c0_51 = arith.constant 0 : index
    %58 = vector.load %arg5[%c0_49, %c0_50, %c0_51] : memref<1x24x16xbf16, #tpu.memory_space<vmem>>, vector<1x24x16xbf16>
    %59 = vector.shape_cast %58 : vector<1x24x16xbf16> to vector<24x16xbf16>
    %60 = arith.extf %59 : vector<24x16xbf16> to vector<24x16xf32>
    %61 = arith.addf %57, %60 : vector<24x16xf32>
    %cst_52 = arith.constant 0.000000e+00 : f32
    %62 = vector.broadcast %cst_52 : f32 to vector<24x16xf32>
    %63 = arith.maximumf %61, %62 : vector<24x16xf32>
    %c0_53 = arith.constant 0 : index
    %c0_54 = arith.constant 0 : index
    %64 = vector.load %arg4[%c0_53, %c0_54] : memref<24x1xf32, #tpu.memory_space<vmem>>, vector<24x1xf32>
    %65 = vector.broadcast %64 : vector<24x1xf32> to vector<24x16xf32>
    %66 = arith.mulf %63, %65 : vector<24x16xf32>
    %67 = arith.truncf %66 : vector<24x16xf32> to vector<24x16xbf16>
    %c0_55 = arith.constant 0 : index
    %c0_56 = arith.constant 0 : index
    %c0_57 = arith.constant 0 : index
    %68 = vector.load %arg6[%c0_55, %c0_56, %c0_57] : memref<1x24x16xbf16, #tpu.memory_space<vmem>>, vector<1x24x16xbf16>
    %69 = vector.shape_cast %68 : vector<1x24x16xbf16> to vector<24x16xbf16>
    %70 = vector.shape_cast %67 : vector<24x16xbf16> to vector<1x24x16xbf16>
    tpu.vector_store %arg6[%c0_55, %c0_56, %c0_57], %70 {strides = array<i32>} : memref<1x24x16xbf16, #tpu.memory_space<vmem>>, vector<1x24x16xbf16>,
    return
  }
  func.func @transform_0(%arg0: i32) -> (i32, i32, i32) {
    %c0_i32 = arith.constant 0 : i32
    %c0_i32_0 = arith.constant 0 : i32
    %c0_i32_1 = arith.constant 0 : i32
    return %arg0, %c0_i32, %c0_i32_0 : i32, i32, i32
  }
  func.func @transform_1(%arg0: i32) -> (i32, i32, i32) {
    %c0_i32 = arith.constant 0 : i32
    %c0_i32_0 = arith.constant 0 : i32
    %c0_i32_1 = arith.constant 0 : i32
    %c0_i32_2 = arith.constant 0 : i32
    return %c0_i32, %c0_i32_0, %c0_i32_1 : i32, i32, i32
  }
  func.func @transform_2(%arg0: i32) -> (i32, i32) {
    %c0_i32 = arith.constant 0 : i32
    %c0_i32_0 = arith.constant 0 : i32
    %c0_i32_1 = arith.constant 0 : i32
    return %c0_i32, %c0_i32_0 : i32, i32
  }
  func.func @transform_3(%arg0: i32) -> (i32, i32) {
    %c0_i32 = arith.constant 0 : i32
    %c0_i32_0 = arith.constant 0 : i32
    %c0_i32_1 = arith.constant 0 : i32
    return %c0_i32, %c0_i32_0 : i32, i32
  }
  func.func @transform_4(%arg0: i32) -> (i32, i32, i32) {
    %c0_i32 = arith.constant 0 : i32
    %c0_i32_0 = arith.constant 0 : i32
    %c0_i32_1 = arith.constant 0 : i32
    return %arg0, %c0_i32, %c0_i32_0 : i32, i32, i32
  }
  func.func @transform_5(%arg0: i32) -> (i32, i32, i32) {
    %c0_i32 = arith.constant 0 : i32
    %c0_i32_0 = arith.constant 0 : i32
    %c0_i32_1 = arith.constant 0 : i32
    return %arg0, %c0_i32, %c0_i32_0 : i32, i32, i32
  }
}

module attributes {stable_mosaic.version = 11 : i64} {
  func.func @_conv_tap_kernel(%arg0: i32, %arg1: memref<1x52x16xbf16, #tpu.memory_space<vmem>>, %arg2: memref<9x16x16xbf16, #tpu.memory_space<vmem>>, %arg3: memref<1x16xf32, #tpu.memory_space<vmem>>, %arg4: memref<24x1xf32, #tpu.memory_space<vmem>>, %arg5: memref<1x24x16xbf16, #tpu.memory_space<vmem>>) attributes {dimension_semantics = [#tpu.dimension_semantics<parallel>], iteration_bounds = array<i64: 2>, scalar_prefetch = 0 : i64, scratch_operands = 0 : i64, tpu.core_type = #tpu.core_type<tc>, window_params = [{transform_indices = @transform_0, window_bounds = array<i64: 1, 52, 16>}, {pipeline_mode = #tpu.pipeline_mode<synchronous>, transform_indices = @transform_1, window_bounds = array<i64: 9, 16, 16>}, {pipeline_mode = #tpu.pipeline_mode<synchronous>, transform_indices = @transform_2, window_bounds = array<i64: 1, 16>}, {pipeline_mode = #tpu.pipeline_mode<synchronous>, transform_indices = @transform_3, window_bounds = array<i64: 24, 1>}, {transform_indices = @transform_4, window_bounds = array<i64: 1, 24, 16>}]} {
    %cst = arith.constant 0.000000e+00 : f32
    %0 = vector.broadcast %cst : f32 to vector<24x16xf32>
    %c0 = arith.constant 0 : index
    %c7 = arith.constant 7 : index
    %c0_0 = arith.constant 0 : index
    %1 = vector.load %arg1[%c0, %c7, %c0_0] : memref<1x52x16xbf16, #tpu.memory_space<vmem>>, vector<1x24x16xbf16>
    %2 = vector.shape_cast %1 : vector<1x24x16xbf16> to vector<24x16xbf16>
    %c0_1 = arith.constant 0 : index
    %c0_2 = arith.constant 0 : index
    %c0_3 = arith.constant 0 : index
    %3 = vector.load %arg2[%c0_1, %c0_2, %c0_3] : memref<9x16x16xbf16, #tpu.memory_space<vmem>>, vector<1x16x16xbf16>
    %4 = vector.shape_cast %3 : vector<1x16x16xbf16> to vector<16x16xbf16>
    %cst_4 = arith.constant dense<0.000000e+00> : vector<24x16xf32>
    %5 = tpu.matmul %2, %4, %cst_4 {dimension_numbers = #tpu.dot_dimension_numbers<[1], [0], [0], [1], [0, 0, 1, 1], [], []>} : vector<24x16xbf16>, vector<16x16xbf16>, vector<24x16xf32> -> vector<24x16xf32>
    %6 = arith.addf %0, %5 : vector<24x16xf32>
    %c0_5 = arith.constant 0 : index
    %c8 = arith.constant 8 : index
    %c0_6 = arith.constant 0 : index
    %7 = vector.load %arg1[%c0_5, %c8, %c0_6] : memref<1x52x16xbf16, #tpu.memory_space<vmem>>, vector<1x24x16xbf16>
    %8 = vector.shape_cast %7 : vector<1x24x16xbf16> to vector<24x16xbf16>
    %c1 = arith.constant 1 : index
    %c0_7 = arith.constant 0 : index
    %c0_8 = arith.constant 0 : index
    %9 = vector.load %arg2[%c1, %c0_7, %c0_8] : memref<9x16x16xbf16, #tpu.memory_space<vmem>>, vector<1x16x16xbf16>
    %10 = vector.shape_cast %9 : vector<1x16x16xbf16> to vector<16x16xbf16>
    %cst_9 = arith.constant dense<0.000000e+00> : vector<24x16xf32>
    %11 = tpu.matmul %8, %10, %cst_9 {dimension_numbers = #tpu.dot_dimension_numbers<[1], [0], [0], [1], [0, 0, 1, 1], [], []>} : vector<24x16xbf16>, vector<16x16xbf16>, vector<24x16xf32> -> vector<24x16xf32>
    %12 = arith.addf %6, %11 : vector<24x16xf32>
    %c0_10 = arith.constant 0 : index
    %c9 = arith.constant 9 : index
    %c0_11 = arith.constant 0 : index
    %13 = vector.load %arg1[%c0_10, %c9, %c0_11] : memref<1x52x16xbf16, #tpu.memory_space<vmem>>, vector<1x24x16xbf16>
    %14 = vector.shape_cast %13 : vector<1x24x16xbf16> to vector<24x16xbf16>
    %c2 = arith.constant 2 : index
    %c0_12 = arith.constant 0 : index
    %c0_13 = arith.constant 0 : index
    %15 = vector.load %arg2[%c2, %c0_12, %c0_13] : memref<9x16x16xbf16, #tpu.memory_space<vmem>>, vector<1x16x16xbf16>
    %16 = vector.shape_cast %15 : vector<1x16x16xbf16> to vector<16x16xbf16>
    %cst_14 = arith.constant dense<0.000000e+00> : vector<24x16xf32>
    %17 = tpu.matmul %14, %16, %cst_14 {dimension_numbers = #tpu.dot_dimension_numbers<[1], [0], [0], [1], [0, 0, 1, 1], [], []>} : vector<24x16xbf16>, vector<16x16xbf16>, vector<24x16xf32> -> vector<24x16xf32>
    %18 = arith.addf %12, %17 : vector<24x16xf32>
    %c0_15 = arith.constant 0 : index
    %c13 = arith.constant 13 : index
    %c0_16 = arith.constant 0 : index
    %19 = vector.load %arg1[%c0_15, %c13, %c0_16] : memref<1x52x16xbf16, #tpu.memory_space<vmem>>, vector<1x24x16xbf16>
    %20 = vector.shape_cast %19 : vector<1x24x16xbf16> to vector<24x16xbf16>
    %c3 = arith.constant 3 : index
    %c0_17 = arith.constant 0 : index
    %c0_18 = arith.constant 0 : index
    %21 = vector.load %arg2[%c3, %c0_17, %c0_18] : memref<9x16x16xbf16, #tpu.memory_space<vmem>>, vector<1x16x16xbf16>
    %22 = vector.shape_cast %21 : vector<1x16x16xbf16> to vector<16x16xbf16>
    %cst_19 = arith.constant dense<0.000000e+00> : vector<24x16xf32>
    %23 = tpu.matmul %20, %22, %cst_19 {dimension_numbers = #tpu.dot_dimension_numbers<[1], [0], [0], [1], [0, 0, 1, 1], [], []>} : vector<24x16xbf16>, vector<16x16xbf16>, vector<24x16xf32> -> vector<24x16xf32>
    %24 = arith.addf %18, %23 : vector<24x16xf32>
    %c0_20 = arith.constant 0 : index
    %c14 = arith.constant 14 : index
    %c0_21 = arith.constant 0 : index
    %25 = vector.load %arg1[%c0_20, %c14, %c0_21] : memref<1x52x16xbf16, #tpu.memory_space<vmem>>, vector<1x24x16xbf16>
    %26 = vector.shape_cast %25 : vector<1x24x16xbf16> to vector<24x16xbf16>
    %c4 = arith.constant 4 : index
    %c0_22 = arith.constant 0 : index
    %c0_23 = arith.constant 0 : index
    %27 = vector.load %arg2[%c4, %c0_22, %c0_23] : memref<9x16x16xbf16, #tpu.memory_space<vmem>>, vector<1x16x16xbf16>
    %28 = vector.shape_cast %27 : vector<1x16x16xbf16> to vector<16x16xbf16>
    %cst_24 = arith.constant dense<0.000000e+00> : vector<24x16xf32>
    %29 = tpu.matmul %26, %28, %cst_24 {dimension_numbers = #tpu.dot_dimension_numbers<[1], [0], [0], [1], [0, 0, 1, 1], [], []>} : vector<24x16xbf16>, vector<16x16xbf16>, vector<24x16xf32> -> vector<24x16xf32>
    %30 = arith.addf %24, %29 : vector<24x16xf32>
    %c0_25 = arith.constant 0 : index
    %c15 = arith.constant 15 : index
    %c0_26 = arith.constant 0 : index
    %31 = vector.load %arg1[%c0_25, %c15, %c0_26] : memref<1x52x16xbf16, #tpu.memory_space<vmem>>, vector<1x24x16xbf16>
    %32 = vector.shape_cast %31 : vector<1x24x16xbf16> to vector<24x16xbf16>
    %c5 = arith.constant 5 : index
    %c0_27 = arith.constant 0 : index
    %c0_28 = arith.constant 0 : index
    %33 = vector.load %arg2[%c5, %c0_27, %c0_28] : memref<9x16x16xbf16, #tpu.memory_space<vmem>>, vector<1x16x16xbf16>
    %34 = vector.shape_cast %33 : vector<1x16x16xbf16> to vector<16x16xbf16>
    %cst_29 = arith.constant dense<0.000000e+00> : vector<24x16xf32>
    %35 = tpu.matmul %32, %34, %cst_29 {dimension_numbers = #tpu.dot_dimension_numbers<[1], [0], [0], [1], [0, 0, 1, 1], [], []>} : vector<24x16xbf16>, vector<16x16xbf16>, vector<24x16xf32> -> vector<24x16xf32>
    %36 = arith.addf %30, %35 : vector<24x16xf32>
    %c0_30 = arith.constant 0 : index
    %c19 = arith.constant 19 : index
    %c0_31 = arith.constant 0 : index
    %37 = vector.load %arg1[%c0_30, %c19, %c0_31] : memref<1x52x16xbf16, #tpu.memory_space<vmem>>, vector<1x24x16xbf16>
    %38 = vector.shape_cast %37 : vector<1x24x16xbf16> to vector<24x16xbf16>
    %c6 = arith.constant 6 : index
    %c0_32 = arith.constant 0 : index
    %c0_33 = arith.constant 0 : index
    %39 = vector.load %arg2[%c6, %c0_32, %c0_33] : memref<9x16x16xbf16, #tpu.memory_space<vmem>>, vector<1x16x16xbf16>
    %40 = vector.shape_cast %39 : vector<1x16x16xbf16> to vector<16x16xbf16>
    %cst_34 = arith.constant dense<0.000000e+00> : vector<24x16xf32>
    %41 = tpu.matmul %38, %40, %cst_34 {dimension_numbers = #tpu.dot_dimension_numbers<[1], [0], [0], [1], [0, 0, 1, 1], [], []>} : vector<24x16xbf16>, vector<16x16xbf16>, vector<24x16xf32> -> vector<24x16xf32>
    %42 = arith.addf %36, %41 : vector<24x16xf32>
    %c0_35 = arith.constant 0 : index
    %c20 = arith.constant 20 : index
    %c0_36 = arith.constant 0 : index
    %43 = vector.load %arg1[%c0_35, %c20, %c0_36] : memref<1x52x16xbf16, #tpu.memory_space<vmem>>, vector<1x24x16xbf16>
    %44 = vector.shape_cast %43 : vector<1x24x16xbf16> to vector<24x16xbf16>
    %c7_37 = arith.constant 7 : index
    %c0_38 = arith.constant 0 : index
    %c0_39 = arith.constant 0 : index
    %45 = vector.load %arg2[%c7_37, %c0_38, %c0_39] : memref<9x16x16xbf16, #tpu.memory_space<vmem>>, vector<1x16x16xbf16>
    %46 = vector.shape_cast %45 : vector<1x16x16xbf16> to vector<16x16xbf16>
    %cst_40 = arith.constant dense<0.000000e+00> : vector<24x16xf32>
    %47 = tpu.matmul %44, %46, %cst_40 {dimension_numbers = #tpu.dot_dimension_numbers<[1], [0], [0], [1], [0, 0, 1, 1], [], []>} : vector<24x16xbf16>, vector<16x16xbf16>, vector<24x16xf32> -> vector<24x16xf32>
    %48 = arith.addf %42, %47 : vector<24x16xf32>
    %c0_41 = arith.constant 0 : index
    %c21 = arith.constant 21 : index
    %c0_42 = arith.constant 0 : index
    %49 = vector.load %arg1[%c0_41, %c21, %c0_42] : memref<1x52x16xbf16, #tpu.memory_space<vmem>>, vector<1x24x16xbf16>
    %50 = vector.shape_cast %49 : vector<1x24x16xbf16> to vector<24x16xbf16>
    %c8_43 = arith.constant 8 : index
    %c0_44 = arith.constant 0 : index
    %c0_45 = arith.constant 0 : index
    %51 = vector.load %arg2[%c8_43, %c0_44, %c0_45] : memref<9x16x16xbf16, #tpu.memory_space<vmem>>, vector<1x16x16xbf16>
    %52 = vector.shape_cast %51 : vector<1x16x16xbf16> to vector<16x16xbf16>
    %cst_46 = arith.constant dense<0.000000e+00> : vector<24x16xf32>
    %53 = tpu.matmul %50, %52, %cst_46 {dimension_numbers = #tpu.dot_dimension_numbers<[1], [0], [0], [1], [0, 0, 1, 1], [], []>} : vector<24x16xbf16>, vector<16x16xbf16>, vector<24x16xf32> -> vector<24x16xf32>
    %54 = arith.addf %48, %53 : vector<24x16xf32>
    %c0_47 = arith.constant 0 : index
    %c0_48 = arith.constant 0 : index
    %55 = vector.load %arg3[%c0_47, %c0_48] : memref<1x16xf32, #tpu.memory_space<vmem>>, vector<1x16xf32>
    %56 = vector.broadcast %55 : vector<1x16xf32> to vector<24x16xf32>
    %57 = arith.addf %54, %56 : vector<24x16xf32>
    %cst_49 = arith.constant 0.000000e+00 : f32
    %58 = vector.broadcast %cst_49 : f32 to vector<24x16xf32>
    %59 = arith.maximumf %57, %58 : vector<24x16xf32>
    %c0_50 = arith.constant 0 : index
    %c0_51 = arith.constant 0 : index
    %60 = vector.load %arg4[%c0_50, %c0_51] : memref<24x1xf32, #tpu.memory_space<vmem>>, vector<24x1xf32>
    %61 = vector.broadcast %60 : vector<24x1xf32> to vector<24x16xf32>
    %62 = arith.mulf %59, %61 : vector<24x16xf32>
    %63 = arith.truncf %62 : vector<24x16xf32> to vector<24x16xbf16>
    %c0_52 = arith.constant 0 : index
    %c0_53 = arith.constant 0 : index
    %c0_54 = arith.constant 0 : index
    %64 = vector.load %arg5[%c0_52, %c0_53, %c0_54] : memref<1x24x16xbf16, #tpu.memory_space<vmem>>, vector<1x24x16xbf16>
    %65 = vector.shape_cast %64 : vector<1x24x16xbf16> to vector<24x16xbf16>
    %66 = vector.shape_cast %63 : vector<24x16xbf16> to vector<1x24x16xbf16>
    tpu.vector_store %arg5[%c0_52, %c0_53, %c0_54], %66 {strides = array<i32>} : memref<1x24x16xbf16, #tpu.memory_space<vmem>>, vector<1x24x16xbf16>,
    return
  }
  func.func @transform_0(%arg0: i32) -> (i32, i32, i32) {
    %c0_i32 = arith.constant 0 : i32
    %c0_i32_0 = arith.constant 0 : i32
    %c0_i32_1 = arith.constant 0 : i32
    return %arg0, %c0_i32, %c0_i32_0 : i32, i32, i32
  }
  func.func @transform_1(%arg0: i32) -> (i32, i32, i32) {
    %c0_i32 = arith.constant 0 : i32
    %c0_i32_0 = arith.constant 0 : i32
    %c0_i32_1 = arith.constant 0 : i32
    %c0_i32_2 = arith.constant 0 : i32
    return %c0_i32, %c0_i32_0, %c0_i32_1 : i32, i32, i32
  }
  func.func @transform_2(%arg0: i32) -> (i32, i32) {
    %c0_i32 = arith.constant 0 : i32
    %c0_i32_0 = arith.constant 0 : i32
    %c0_i32_1 = arith.constant 0 : i32
    return %c0_i32, %c0_i32_0 : i32, i32
  }
  func.func @transform_3(%arg0: i32) -> (i32, i32) {
    %c0_i32 = arith.constant 0 : i32
    %c0_i32_0 = arith.constant 0 : i32
    %c0_i32_1 = arith.constant 0 : i32
    return %c0_i32, %c0_i32_0 : i32, i32
  }
  func.func @transform_4(%arg0: i32) -> (i32, i32, i32) {
    %c0_i32 = arith.constant 0 : i32
    %c0_i32_0 = arith.constant 0 : i32
    %c0_i32_1 = arith.constant 0 : i32
    return %arg0, %c0_i32, %c0_i32_0 : i32, i32, i32
  }
}

module attributes {stable_mosaic.version = 11 : i64} {
  func.func @_conv_tap_dual_kernel(%arg0: i32, %arg1: memref<1x52x16xbf16, #tpu.memory_space<vmem>>, %arg2: memref<9x16x16xbf16, #tpu.memory_space<vmem>>, %arg3: memref<1x16xf32, #tpu.memory_space<vmem>>, %arg4: memref<24x1xf32, #tpu.memory_space<vmem>>, %arg5: memref<1x24x8xbf16, #tpu.memory_space<vmem>>, %arg6: memref<8x16xbf16, #tpu.memory_space<vmem>>, %arg7: memref<1x24x16xbf16, #tpu.memory_space<vmem>>) attributes {dimension_semantics = [#tpu.dimension_semantics<parallel>], iteration_bounds = array<i64: 2>, scalar_prefetch = 0 : i64, scratch_operands = 0 : i64, tpu.core_type = #tpu.core_type<tc>, window_params = [{transform_indices = @transform_0, window_bounds = array<i64: 1, 52, 16>}, {pipeline_mode = #tpu.pipeline_mode<synchronous>, transform_indices = @transform_1, window_bounds = array<i64: 9, 16, 16>}, {pipeline_mode = #tpu.pipeline_mode<synchronous>, transform_indices = @transform_2, window_bounds = array<i64: 1, 16>}, {pipeline_mode = #tpu.pipeline_mode<synchronous>, transform_indices = @transform_3, window_bounds = array<i64: 24, 1>}, {transform_indices = @transform_4, window_bounds = array<i64: 1, 24, 8>}, {pipeline_mode = #tpu.pipeline_mode<synchronous>, transform_indices = @transform_5, window_bounds = array<i64: 8, 16>}, {transform_indices = @transform_6, window_bounds = array<i64: 1, 24, 16>}]} {
    %cst = arith.constant 0.000000e+00 : f32
    %0 = vector.broadcast %cst : f32 to vector<24x16xf32>
    %c0 = arith.constant 0 : index
    %c7 = arith.constant 7 : index
    %c0_0 = arith.constant 0 : index
    %1 = vector.load %arg1[%c0, %c7, %c0_0] : memref<1x52x16xbf16, #tpu.memory_space<vmem>>, vector<1x24x16xbf16>
    %2 = vector.shape_cast %1 : vector<1x24x16xbf16> to vector<24x16xbf16>
    %c0_1 = arith.constant 0 : index
    %c0_2 = arith.constant 0 : index
    %c0_3 = arith.constant 0 : index
    %3 = vector.load %arg2[%c0_1, %c0_2, %c0_3] : memref<9x16x16xbf16, #tpu.memory_space<vmem>>, vector<1x16x16xbf16>
    %4 = vector.shape_cast %3 : vector<1x16x16xbf16> to vector<16x16xbf16>
    %cst_4 = arith.constant dense<0.000000e+00> : vector<24x16xf32>
    %5 = tpu.matmul %2, %4, %cst_4 {dimension_numbers = #tpu.dot_dimension_numbers<[1], [0], [0], [1], [0, 0, 1, 1], [], []>} : vector<24x16xbf16>, vector<16x16xbf16>, vector<24x16xf32> -> vector<24x16xf32>
    %6 = arith.addf %0, %5 : vector<24x16xf32>
    %c0_5 = arith.constant 0 : index
    %c8 = arith.constant 8 : index
    %c0_6 = arith.constant 0 : index
    %7 = vector.load %arg1[%c0_5, %c8, %c0_6] : memref<1x52x16xbf16, #tpu.memory_space<vmem>>, vector<1x24x16xbf16>
    %8 = vector.shape_cast %7 : vector<1x24x16xbf16> to vector<24x16xbf16>
    %c1 = arith.constant 1 : index
    %c0_7 = arith.constant 0 : index
    %c0_8 = arith.constant 0 : index
    %9 = vector.load %arg2[%c1, %c0_7, %c0_8] : memref<9x16x16xbf16, #tpu.memory_space<vmem>>, vector<1x16x16xbf16>
    %10 = vector.shape_cast %9 : vector<1x16x16xbf16> to vector<16x16xbf16>
    %cst_9 = arith.constant dense<0.000000e+00> : vector<24x16xf32>
    %11 = tpu.matmul %8, %10, %cst_9 {dimension_numbers = #tpu.dot_dimension_numbers<[1], [0], [0], [1], [0, 0, 1, 1], [], []>} : vector<24x16xbf16>, vector<16x16xbf16>, vector<24x16xf32> -> vector<24x16xf32>
    %12 = arith.addf %6, %11 : vector<24x16xf32>
    %c0_10 = arith.constant 0 : index
    %c9 = arith.constant 9 : index
    %c0_11 = arith.constant 0 : index
    %13 = vector.load %arg1[%c0_10, %c9, %c0_11] : memref<1x52x16xbf16, #tpu.memory_space<vmem>>, vector<1x24x16xbf16>
    %14 = vector.shape_cast %13 : vector<1x24x16xbf16> to vector<24x16xbf16>
    %c2 = arith.constant 2 : index
    %c0_12 = arith.constant 0 : index
    %c0_13 = arith.constant 0 : index
    %15 = vector.load %arg2[%c2, %c0_12, %c0_13] : memref<9x16x16xbf16, #tpu.memory_space<vmem>>, vector<1x16x16xbf16>
    %16 = vector.shape_cast %15 : vector<1x16x16xbf16> to vector<16x16xbf16>
    %cst_14 = arith.constant dense<0.000000e+00> : vector<24x16xf32>
    %17 = tpu.matmul %14, %16, %cst_14 {dimension_numbers = #tpu.dot_dimension_numbers<[1], [0], [0], [1], [0, 0, 1, 1], [], []>} : vector<24x16xbf16>, vector<16x16xbf16>, vector<24x16xf32> -> vector<24x16xf32>
    %18 = arith.addf %12, %17 : vector<24x16xf32>
    %c0_15 = arith.constant 0 : index
    %c13 = arith.constant 13 : index
    %c0_16 = arith.constant 0 : index
    %19 = vector.load %arg1[%c0_15, %c13, %c0_16] : memref<1x52x16xbf16, #tpu.memory_space<vmem>>, vector<1x24x16xbf16>
    %20 = vector.shape_cast %19 : vector<1x24x16xbf16> to vector<24x16xbf16>
    %c3 = arith.constant 3 : index
    %c0_17 = arith.constant 0 : index
    %c0_18 = arith.constant 0 : index
    %21 = vector.load %arg2[%c3, %c0_17, %c0_18] : memref<9x16x16xbf16, #tpu.memory_space<vmem>>, vector<1x16x16xbf16>
    %22 = vector.shape_cast %21 : vector<1x16x16xbf16> to vector<16x16xbf16>
    %cst_19 = arith.constant dense<0.000000e+00> : vector<24x16xf32>
    %23 = tpu.matmul %20, %22, %cst_19 {dimension_numbers = #tpu.dot_dimension_numbers<[1], [0], [0], [1], [0, 0, 1, 1], [], []>} : vector<24x16xbf16>, vector<16x16xbf16>, vector<24x16xf32> -> vector<24x16xf32>
    %24 = arith.addf %18, %23 : vector<24x16xf32>
    %c0_20 = arith.constant 0 : index
    %c14 = arith.constant 14 : index
    %c0_21 = arith.constant 0 : index
    %25 = vector.load %arg1[%c0_20, %c14, %c0_21] : memref<1x52x16xbf16, #tpu.memory_space<vmem>>, vector<1x24x16xbf16>
    %26 = vector.shape_cast %25 : vector<1x24x16xbf16> to vector<24x16xbf16>
    %c4 = arith.constant 4 : index
    %c0_22 = arith.constant 0 : index
    %c0_23 = arith.constant 0 : index
    %27 = vector.load %arg2[%c4, %c0_22, %c0_23] : memref<9x16x16xbf16, #tpu.memory_space<vmem>>, vector<1x16x16xbf16>
    %28 = vector.shape_cast %27 : vector<1x16x16xbf16> to vector<16x16xbf16>
    %cst_24 = arith.constant dense<0.000000e+00> : vector<24x16xf32>
    %29 = tpu.matmul %26, %28, %cst_24 {dimension_numbers = #tpu.dot_dimension_numbers<[1], [0], [0], [1], [0, 0, 1, 1], [], []>} : vector<24x16xbf16>, vector<16x16xbf16>, vector<24x16xf32> -> vector<24x16xf32>
    %30 = arith.addf %24, %29 : vector<24x16xf32>
    %c0_25 = arith.constant 0 : index
    %c15 = arith.constant 15 : index
    %c0_26 = arith.constant 0 : index
    %31 = vector.load %arg1[%c0_25, %c15, %c0_26] : memref<1x52x16xbf16, #tpu.memory_space<vmem>>, vector<1x24x16xbf16>
    %32 = vector.shape_cast %31 : vector<1x24x16xbf16> to vector<24x16xbf16>
    %c5 = arith.constant 5 : index
    %c0_27 = arith.constant 0 : index
    %c0_28 = arith.constant 0 : index
    %33 = vector.load %arg2[%c5, %c0_27, %c0_28] : memref<9x16x16xbf16, #tpu.memory_space<vmem>>, vector<1x16x16xbf16>
    %34 = vector.shape_cast %33 : vector<1x16x16xbf16> to vector<16x16xbf16>
    %cst_29 = arith.constant dense<0.000000e+00> : vector<24x16xf32>
    %35 = tpu.matmul %32, %34, %cst_29 {dimension_numbers = #tpu.dot_dimension_numbers<[1], [0], [0], [1], [0, 0, 1, 1], [], []>} : vector<24x16xbf16>, vector<16x16xbf16>, vector<24x16xf32> -> vector<24x16xf32>
    %36 = arith.addf %30, %35 : vector<24x16xf32>
    %c0_30 = arith.constant 0 : index
    %c19 = arith.constant 19 : index
    %c0_31 = arith.constant 0 : index
    %37 = vector.load %arg1[%c0_30, %c19, %c0_31] : memref<1x52x16xbf16, #tpu.memory_space<vmem>>, vector<1x24x16xbf16>
    %38 = vector.shape_cast %37 : vector<1x24x16xbf16> to vector<24x16xbf16>
    %c6 = arith.constant 6 : index
    %c0_32 = arith.constant 0 : index
    %c0_33 = arith.constant 0 : index
    %39 = vector.load %arg2[%c6, %c0_32, %c0_33] : memref<9x16x16xbf16, #tpu.memory_space<vmem>>, vector<1x16x16xbf16>
    %40 = vector.shape_cast %39 : vector<1x16x16xbf16> to vector<16x16xbf16>
    %cst_34 = arith.constant dense<0.000000e+00> : vector<24x16xf32>
    %41 = tpu.matmul %38, %40, %cst_34 {dimension_numbers = #tpu.dot_dimension_numbers<[1], [0], [0], [1], [0, 0, 1, 1], [], []>} : vector<24x16xbf16>, vector<16x16xbf16>, vector<24x16xf32> -> vector<24x16xf32>
    %42 = arith.addf %36, %41 : vector<24x16xf32>
    %c0_35 = arith.constant 0 : index
    %c20 = arith.constant 20 : index
    %c0_36 = arith.constant 0 : index
    %43 = vector.load %arg1[%c0_35, %c20, %c0_36] : memref<1x52x16xbf16, #tpu.memory_space<vmem>>, vector<1x24x16xbf16>
    %44 = vector.shape_cast %43 : vector<1x24x16xbf16> to vector<24x16xbf16>
    %c7_37 = arith.constant 7 : index
    %c0_38 = arith.constant 0 : index
    %c0_39 = arith.constant 0 : index
    %45 = vector.load %arg2[%c7_37, %c0_38, %c0_39] : memref<9x16x16xbf16, #tpu.memory_space<vmem>>, vector<1x16x16xbf16>
    %46 = vector.shape_cast %45 : vector<1x16x16xbf16> to vector<16x16xbf16>
    %cst_40 = arith.constant dense<0.000000e+00> : vector<24x16xf32>
    %47 = tpu.matmul %44, %46, %cst_40 {dimension_numbers = #tpu.dot_dimension_numbers<[1], [0], [0], [1], [0, 0, 1, 1], [], []>} : vector<24x16xbf16>, vector<16x16xbf16>, vector<24x16xf32> -> vector<24x16xf32>
    %48 = arith.addf %42, %47 : vector<24x16xf32>
    %c0_41 = arith.constant 0 : index
    %c21 = arith.constant 21 : index
    %c0_42 = arith.constant 0 : index
    %49 = vector.load %arg1[%c0_41, %c21, %c0_42] : memref<1x52x16xbf16, #tpu.memory_space<vmem>>, vector<1x24x16xbf16>
    %50 = vector.shape_cast %49 : vector<1x24x16xbf16> to vector<24x16xbf16>
    %c8_43 = arith.constant 8 : index
    %c0_44 = arith.constant 0 : index
    %c0_45 = arith.constant 0 : index
    %51 = vector.load %arg2[%c8_43, %c0_44, %c0_45] : memref<9x16x16xbf16, #tpu.memory_space<vmem>>, vector<1x16x16xbf16>
    %52 = vector.shape_cast %51 : vector<1x16x16xbf16> to vector<16x16xbf16>
    %cst_46 = arith.constant dense<0.000000e+00> : vector<24x16xf32>
    %53 = tpu.matmul %50, %52, %cst_46 {dimension_numbers = #tpu.dot_dimension_numbers<[1], [0], [0], [1], [0, 0, 1, 1], [], []>} : vector<24x16xbf16>, vector<16x16xbf16>, vector<24x16xf32> -> vector<24x16xf32>
    %54 = arith.addf %48, %53 : vector<24x16xf32>
    %c0_47 = arith.constant 0 : index
    %c0_48 = arith.constant 0 : index
    %c0_49 = arith.constant 0 : index
    %55 = vector.load %arg5[%c0_47, %c0_48, %c0_49] : memref<1x24x8xbf16, #tpu.memory_space<vmem>>, vector<1x24x8xbf16>
    %56 = vector.shape_cast %55 : vector<1x24x8xbf16> to vector<24x8xbf16>
    %c0_50 = arith.constant 0 : index
    %c0_51 = arith.constant 0 : index
    %57 = vector.load %arg6[%c0_50, %c0_51] : memref<8x16xbf16, #tpu.memory_space<vmem>>, vector<8x16xbf16>
    %cst_52 = arith.constant dense<0.000000e+00> : vector<24x16xf32>
    %58 = tpu.matmul %56, %57, %cst_52 {dimension_numbers = #tpu.dot_dimension_numbers<[1], [0], [0], [1], [0, 0, 1, 1], [], []>} : vector<24x8xbf16>, vector<8x16xbf16>, vector<24x16xf32> -> vector<24x16xf32>
    %59 = arith.addf %54, %58 : vector<24x16xf32>
    %c0_53 = arith.constant 0 : index
    %c0_54 = arith.constant 0 : index
    %60 = vector.load %arg3[%c0_53, %c0_54] : memref<1x16xf32, #tpu.memory_space<vmem>>, vector<1x16xf32>
    %61 = vector.broadcast %60 : vector<1x16xf32> to vector<24x16xf32>
    %62 = arith.addf %59, %61 : vector<24x16xf32>
    %cst_55 = arith.constant 0.000000e+00 : f32
    %63 = vector.broadcast %cst_55 : f32 to vector<24x16xf32>
    %64 = arith.maximumf %62, %63 : vector<24x16xf32>
    %c0_56 = arith.constant 0 : index
    %c0_57 = arith.constant 0 : index
    %65 = vector.load %arg4[%c0_56, %c0_57] : memref<24x1xf32, #tpu.memory_space<vmem>>, vector<24x1xf32>
    %66 = vector.broadcast %65 : vector<24x1xf32> to vector<24x16xf32>
    %67 = arith.mulf %64, %66 : vector<24x16xf32>
    %68 = arith.truncf %67 : vector<24x16xf32> to vector<24x16xbf16>
    %c0_58 = arith.constant 0 : index
    %c0_59 = arith.constant 0 : index
    %c0_60 = arith.constant 0 : index
    %69 = vector.load %arg7[%c0_58, %c0_59, %c0_60] : memref<1x24x16xbf16, #tpu.memory_space<vmem>>, vector<1x24x16xbf16>
    %70 = vector.shape_cast %69 : vector<1x24x16xbf16> to vector<24x16xbf16>
    %71 = vector.shape_cast %68 : vector<24x16xbf16> to vector<1x24x16xbf16>
    tpu.vector_store %arg7[%c0_58, %c0_59, %c0_60], %71 {strides = array<i32>} : memref<1x24x16xbf16, #tpu.memory_space<vmem>>, vector<1x24x16xbf16>,
    return
  }
  func.func @transform_0(%arg0: i32) -> (i32, i32, i32) {
    %c0_i32 = arith.constant 0 : i32
    %c0_i32_0 = arith.constant 0 : i32
    %c0_i32_1 = arith.constant 0 : i32
    return %arg0, %c0_i32, %c0_i32_0 : i32, i32, i32
  }
  func.func @transform_1(%arg0: i32) -> (i32, i32, i32) {
    %c0_i32 = arith.constant 0 : i32
    %c0_i32_0 = arith.constant 0 : i32
    %c0_i32_1 = arith.constant 0 : i32
    %c0_i32_2 = arith.constant 0 : i32
    return %c0_i32, %c0_i32_0, %c0_i32_1 : i32, i32, i32
  }
  func.func @transform_2(%arg0: i32) -> (i32, i32) {
    %c0_i32 = arith.constant 0 : i32
    %c0_i32_0 = arith.constant 0 : i32
    %c0_i32_1 = arith.constant 0 : i32
    return %c0_i32, %c0_i32_0 : i32, i32
  }
  func.func @transform_3(%arg0: i32) -> (i32, i32) {
    %c0_i32 = arith.constant 0 : i32
    %c0_i32_0 = arith.constant 0 : i32
    %c0_i32_1 = arith.constant 0 : i32
    return %c0_i32, %c0_i32_0 : i32, i32
  }
  func.func @transform_4(%arg0: i32) -> (i32, i32, i32) {
    %c0_i32 = arith.constant 0 : i32
    %c0_i32_0 = arith.constant 0 : i32
    %c0_i32_1 = arith.constant 0 : i32
    return %arg0, %c0_i32, %c0_i32_0 : i32, i32, i32
  }
  func.func @transform_5(%arg0: i32) -> (i32, i32) {
    %c0_i32 = arith.constant 0 : i32
    %c0_i32_0 = arith.constant 0 : i32
    %c0_i32_1 = arith.constant 0 : i32
    return %c0_i32, %c0_i32_0 : i32, i32
  }
  func.func @transform_6(%arg0: i32) -> (i32, i32, i32) {
    %c0_i32 = arith.constant 0 : i32
    %c0_i32_0 = arith.constant 0 : i32
    %c0_i32_1 = arith.constant 0 : i32
    return %arg0, %c0_i32, %c0_i32_0 : i32, i32, i32
  }
}

module attributes {stable_mosaic.version = 11 : i64} {
  func.func @_matmul_bias_kernel(%arg0: i32, %arg1: memref<8x144xbf16, #tpu.memory_space<vmem>>, %arg2: memref<144x32xbf16, #tpu.memory_space<vmem>>, %arg3: memref<1x32xf32, #tpu.memory_space<vmem>>, %arg4: memref<8x32xbf16, #tpu.memory_space<vmem>>) attributes {dimension_semantics = [#tpu.dimension_semantics<parallel>], iteration_bounds = array<i64: 1>, scalar_prefetch = 0 : i64, scratch_operands = 0 : i64, tpu.core_type = #tpu.core_type<tc>, window_params = [{transform_indices = @transform_0, window_bounds = array<i64: 8, 144>}, {pipeline_mode = #tpu.pipeline_mode<synchronous>, transform_indices = @transform_1, window_bounds = array<i64: 144, 32>}, {pipeline_mode = #tpu.pipeline_mode<synchronous>, transform_indices = @transform_2, window_bounds = array<i64: 1, 32>}, {transform_indices = @transform_3, window_bounds = array<i64: 8, 32>}]} {
    %c0 = arith.constant 0 : index
    %c0_0 = arith.constant 0 : index
    %0 = vector.load %arg1[%c0, %c0_0] : memref<8x144xbf16, #tpu.memory_space<vmem>>, vector<8x144xbf16>
    %c0_1 = arith.constant 0 : index
    %c0_2 = arith.constant 0 : index
    %1 = vector.load %arg2[%c0_1, %c0_2] : memref<144x32xbf16, #tpu.memory_space<vmem>>, vector<144x32xbf16>
    %cst = arith.constant dense<0.000000e+00> : vector<8x32xf32>
    %2 = tpu.matmul %0, %1, %cst {dimension_numbers = #tpu.dot_dimension_numbers<[1], [0], [0], [1], [0, 0, 1, 1], [], []>} : vector<8x144xbf16>, vector<144x32xbf16>, vector<8x32xf32> -> vector<8x32xf32>
    %c0_3 = arith.constant 0 : index
    %c0_4 = arith.constant 0 : index
    %3 = vector.load %arg3[%c0_3, %c0_4] : memref<1x32xf32, #tpu.memory_space<vmem>>, vector<1x32xf32>
    %4 = vector.broadcast %3 : vector<1x32xf32> to vector<8x32xf32>
    %5 = arith.addf %2, %4 : vector<8x32xf32>
    %cst_5 = arith.constant 0.000000e+00 : f32
    %6 = vector.broadcast %cst_5 : f32 to vector<8x32xf32>
    %7 = arith.maximumf %5, %6 : vector<8x32xf32>
    %8 = arith.truncf %7 : vector<8x32xf32> to vector<8x32xbf16>
    %c0_6 = arith.constant 0 : index
    %c0_7 = arith.constant 0 : index
    %9 = vector.load %arg4[%c0_6, %c0_7] : memref<8x32xbf16, #tpu.memory_space<vmem>>, vector<8x32xbf16>
    tpu.vector_store %arg4[%c0_6, %c0_7], %8 {strides = array<i32>} : memref<8x32xbf16, #tpu.memory_space<vmem>>, vector<8x32xbf16>,
    return
  }
  func.func @transform_0(%arg0: i32) -> (i32, i32) {
    %c0_i32 = arith.constant 0 : i32
    %c0_i32_0 = arith.constant 0 : i32
    return %arg0, %c0_i32 : i32, i32
  }
  func.func @transform_1(%arg0: i32) -> (i32, i32) {
    %c0_i32 = arith.constant 0 : i32
    %c0_i32_0 = arith.constant 0 : i32
    %c0_i32_1 = arith.constant 0 : i32
    return %c0_i32, %c0_i32_0 : i32, i32
  }
  func.func @transform_2(%arg0: i32) -> (i32, i32) {
    %c0_i32 = arith.constant 0 : i32
    %c0_i32_0 = arith.constant 0 : i32
    %c0_i32_1 = arith.constant 0 : i32
    return %c0_i32, %c0_i32_0 : i32, i32
  }
  func.func @transform_3(%arg0: i32) -> (i32, i32) {
    %c0_i32 = arith.constant 0 : i32
    %c0_i32_0 = arith.constant 0 : i32
    return %arg0, %c0_i32 : i32, i32
  }
}

module attributes {stable_mosaic.version = 11 : i64} {
  func.func @_conv_tap_dual_kernel(%arg0: i32, %arg1: memref<1x32x32xbf16, #tpu.memory_space<vmem>>, %arg2: memref<9x32x32xbf16, #tpu.memory_space<vmem>>, %arg3: memref<1x32xf32, #tpu.memory_space<vmem>>, %arg4: memref<8x1xf32, #tpu.memory_space<vmem>>, %arg5: memref<1x8x16xbf16, #tpu.memory_space<vmem>>, %arg6: memref<16x32xbf16, #tpu.memory_space<vmem>>, %arg7: memref<1x8x32xbf16, #tpu.memory_space<vmem>>) attributes {dimension_semantics = [#tpu.dimension_semantics<parallel>], iteration_bounds = array<i64: 2>, scalar_prefetch = 0 : i64, scratch_operands = 0 : i64, tpu.core_type = #tpu.core_type<tc>, window_params = [{transform_indices = @transform_0, window_bounds = array<i64: 1, 32, 32>}, {pipeline_mode = #tpu.pipeline_mode<synchronous>, transform_indices = @transform_1, window_bounds = array<i64: 9, 32, 32>}, {pipeline_mode = #tpu.pipeline_mode<synchronous>, transform_indices = @transform_2, window_bounds = array<i64: 1, 32>}, {pipeline_mode = #tpu.pipeline_mode<synchronous>, transform_indices = @transform_3, window_bounds = array<i64: 8, 1>}, {transform_indices = @transform_4, window_bounds = array<i64: 1, 8, 16>}, {pipeline_mode = #tpu.pipeline_mode<synchronous>, transform_indices = @transform_5, window_bounds = array<i64: 16, 32>}, {transform_indices = @transform_6, window_bounds = array<i64: 1, 8, 32>}]} {
    %cst = arith.constant 0.000000e+00 : f32
    %0 = vector.broadcast %cst : f32 to vector<8x32xf32>
    %c0 = arith.constant 0 : index
    %c7 = arith.constant 7 : index
    %c0_0 = arith.constant 0 : index
    %1 = vector.load %arg1[%c0, %c7, %c0_0] : memref<1x32x32xbf16, #tpu.memory_space<vmem>>, vector<1x8x32xbf16>
    %2 = vector.shape_cast %1 : vector<1x8x32xbf16> to vector<8x32xbf16>
    %c0_1 = arith.constant 0 : index
    %c0_2 = arith.constant 0 : index
    %c0_3 = arith.constant 0 : index
    %3 = vector.load %arg2[%c0_1, %c0_2, %c0_3] : memref<9x32x32xbf16, #tpu.memory_space<vmem>>, vector<1x32x32xbf16>
    %4 = vector.shape_cast %3 : vector<1x32x32xbf16> to vector<32x32xbf16>
    %cst_4 = arith.constant dense<0.000000e+00> : vector<8x32xf32>
    %5 = tpu.matmul %2, %4, %cst_4 {dimension_numbers = #tpu.dot_dimension_numbers<[1], [0], [0], [1], [0, 0, 1, 1], [], []>} : vector<8x32xbf16>, vector<32x32xbf16>, vector<8x32xf32> -> vector<8x32xf32>
    %6 = arith.addf %0, %5 : vector<8x32xf32>
    %c0_5 = arith.constant 0 : index
    %c8 = arith.constant 8 : index
    %c0_6 = arith.constant 0 : index
    %7 = vector.load %arg1[%c0_5, %c8, %c0_6] : memref<1x32x32xbf16, #tpu.memory_space<vmem>>, vector<1x8x32xbf16>
    %8 = vector.shape_cast %7 : vector<1x8x32xbf16> to vector<8x32xbf16>
    %c1 = arith.constant 1 : index
    %c0_7 = arith.constant 0 : index
    %c0_8 = arith.constant 0 : index
    %9 = vector.load %arg2[%c1, %c0_7, %c0_8] : memref<9x32x32xbf16, #tpu.memory_space<vmem>>, vector<1x32x32xbf16>
    %10 = vector.shape_cast %9 : vector<1x32x32xbf16> to vector<32x32xbf16>
    %cst_9 = arith.constant dense<0.000000e+00> : vector<8x32xf32>
    %11 = tpu.matmul %8, %10, %cst_9 {dimension_numbers = #tpu.dot_dimension_numbers<[1], [0], [0], [1], [0, 0, 1, 1], [], []>} : vector<8x32xbf16>, vector<32x32xbf16>, vector<8x32xf32> -> vector<8x32xf32>
    %12 = arith.addf %6, %11 : vector<8x32xf32>
    %c0_10 = arith.constant 0 : index
    %c9 = arith.constant 9 : index
    %c0_11 = arith.constant 0 : index
    %13 = vector.load %arg1[%c0_10, %c9, %c0_11] : memref<1x32x32xbf16, #tpu.memory_space<vmem>>, vector<1x8x32xbf16>
    %14 = vector.shape_cast %13 : vector<1x8x32xbf16> to vector<8x32xbf16>
    %c2 = arith.constant 2 : index
    %c0_12 = arith.constant 0 : index
    %c0_13 = arith.constant 0 : index
    %15 = vector.load %arg2[%c2, %c0_12, %c0_13] : memref<9x32x32xbf16, #tpu.memory_space<vmem>>, vector<1x32x32xbf16>
    %16 = vector.shape_cast %15 : vector<1x32x32xbf16> to vector<32x32xbf16>
    %cst_14 = arith.constant dense<0.000000e+00> : vector<8x32xf32>
    %17 = tpu.matmul %14, %16, %cst_14 {dimension_numbers = #tpu.dot_dimension_numbers<[1], [0], [0], [1], [0, 0, 1, 1], [], []>} : vector<8x32xbf16>, vector<32x32xbf16>, vector<8x32xf32> -> vector<8x32xf32>
    %18 = arith.addf %12, %17 : vector<8x32xf32>
    %c0_15 = arith.constant 0 : index
    %c11 = arith.constant 11 : index
    %c0_16 = arith.constant 0 : index
    %19 = vector.load %arg1[%c0_15, %c11, %c0_16] : memref<1x32x32xbf16, #tpu.memory_space<vmem>>, vector<1x8x32xbf16>
    %20 = vector.shape_cast %19 : vector<1x8x32xbf16> to vector<8x32xbf16>
    %c3 = arith.constant 3 : index
    %c0_17 = arith.constant 0 : index
    %c0_18 = arith.constant 0 : index
    %21 = vector.load %arg2[%c3, %c0_17, %c0_18] : memref<9x32x32xbf16, #tpu.memory_space<vmem>>, vector<1x32x32xbf16>
    %22 = vector.shape_cast %21 : vector<1x32x32xbf16> to vector<32x32xbf16>
    %cst_19 = arith.constant dense<0.000000e+00> : vector<8x32xf32>
    %23 = tpu.matmul %20, %22, %cst_19 {dimension_numbers = #tpu.dot_dimension_numbers<[1], [0], [0], [1], [0, 0, 1, 1], [], []>} : vector<8x32xbf16>, vector<32x32xbf16>, vector<8x32xf32> -> vector<8x32xf32>
    %24 = arith.addf %18, %23 : vector<8x32xf32>
    %c0_20 = arith.constant 0 : index
    %c12 = arith.constant 12 : index
    %c0_21 = arith.constant 0 : index
    %25 = vector.load %arg1[%c0_20, %c12, %c0_21] : memref<1x32x32xbf16, #tpu.memory_space<vmem>>, vector<1x8x32xbf16>
    %26 = vector.shape_cast %25 : vector<1x8x32xbf16> to vector<8x32xbf16>
    %c4 = arith.constant 4 : index
    %c0_22 = arith.constant 0 : index
    %c0_23 = arith.constant 0 : index
    %27 = vector.load %arg2[%c4, %c0_22, %c0_23] : memref<9x32x32xbf16, #tpu.memory_space<vmem>>, vector<1x32x32xbf16>
    %28 = vector.shape_cast %27 : vector<1x32x32xbf16> to vector<32x32xbf16>
    %cst_24 = arith.constant dense<0.000000e+00> : vector<8x32xf32>
    %29 = tpu.matmul %26, %28, %cst_24 {dimension_numbers = #tpu.dot_dimension_numbers<[1], [0], [0], [1], [0, 0, 1, 1], [], []>} : vector<8x32xbf16>, vector<32x32xbf16>, vector<8x32xf32> -> vector<8x32xf32>
    %30 = arith.addf %24, %29 : vector<8x32xf32>
    %c0_25 = arith.constant 0 : index
    %c13 = arith.constant 13 : index
    %c0_26 = arith.constant 0 : index
    %31 = vector.load %arg1[%c0_25, %c13, %c0_26] : memref<1x32x32xbf16, #tpu.memory_space<vmem>>, vector<1x8x32xbf16>
    %32 = vector.shape_cast %31 : vector<1x8x32xbf16> to vector<8x32xbf16>
    %c5 = arith.constant 5 : index
    %c0_27 = arith.constant 0 : index
    %c0_28 = arith.constant 0 : index
    %33 = vector.load %arg2[%c5, %c0_27, %c0_28] : memref<9x32x32xbf16, #tpu.memory_space<vmem>>, vector<1x32x32xbf16>
    %34 = vector.shape_cast %33 : vector<1x32x32xbf16> to vector<32x32xbf16>
    %cst_29 = arith.constant dense<0.000000e+00> : vector<8x32xf32>
    %35 = tpu.matmul %32, %34, %cst_29 {dimension_numbers = #tpu.dot_dimension_numbers<[1], [0], [0], [1], [0, 0, 1, 1], [], []>} : vector<8x32xbf16>, vector<32x32xbf16>, vector<8x32xf32> -> vector<8x32xf32>
    %36 = arith.addf %30, %35 : vector<8x32xf32>
    %c0_30 = arith.constant 0 : index
    %c15 = arith.constant 15 : index
    %c0_31 = arith.constant 0 : index
    %37 = vector.load %arg1[%c0_30, %c15, %c0_31] : memref<1x32x32xbf16, #tpu.memory_space<vmem>>, vector<1x8x32xbf16>
    %38 = vector.shape_cast %37 : vector<1x8x32xbf16> to vector<8x32xbf16>
    %c6 = arith.constant 6 : index
    %c0_32 = arith.constant 0 : index
    %c0_33 = arith.constant 0 : index
    %39 = vector.load %arg2[%c6, %c0_32, %c0_33] : memref<9x32x32xbf16, #tpu.memory_space<vmem>>, vector<1x32x32xbf16>
    %40 = vector.shape_cast %39 : vector<1x32x32xbf16> to vector<32x32xbf16>
    %cst_34 = arith.constant dense<0.000000e+00> : vector<8x32xf32>
    %41 = tpu.matmul %38, %40, %cst_34 {dimension_numbers = #tpu.dot_dimension_numbers<[1], [0], [0], [1], [0, 0, 1, 1], [], []>} : vector<8x32xbf16>, vector<32x32xbf16>, vector<8x32xf32> -> vector<8x32xf32>
    %42 = arith.addf %36, %41 : vector<8x32xf32>
    %c0_35 = arith.constant 0 : index
    %c16 = arith.constant 16 : index
    %c0_36 = arith.constant 0 : index
    %43 = vector.load %arg1[%c0_35, %c16, %c0_36] : memref<1x32x32xbf16, #tpu.memory_space<vmem>>, vector<1x8x32xbf16>
    %44 = vector.shape_cast %43 : vector<1x8x32xbf16> to vector<8x32xbf16>
    %c7_37 = arith.constant 7 : index
    %c0_38 = arith.constant 0 : index
    %c0_39 = arith.constant 0 : index
    %45 = vector.load %arg2[%c7_37, %c0_38, %c0_39] : memref<9x32x32xbf16, #tpu.memory_space<vmem>>, vector<1x32x32xbf16>
    %46 = vector.shape_cast %45 : vector<1x32x32xbf16> to vector<32x32xbf16>
    %cst_40 = arith.constant dense<0.000000e+00> : vector<8x32xf32>
    %47 = tpu.matmul %44, %46, %cst_40 {dimension_numbers = #tpu.dot_dimension_numbers<[1], [0], [0], [1], [0, 0, 1, 1], [], []>} : vector<8x32xbf16>, vector<32x32xbf16>, vector<8x32xf32> -> vector<8x32xf32>
    %48 = arith.addf %42, %47 : vector<8x32xf32>
    %c0_41 = arith.constant 0 : index
    %c17 = arith.constant 17 : index
    %c0_42 = arith.constant 0 : index
    %49 = vector.load %arg1[%c0_41, %c17, %c0_42] : memref<1x32x32xbf16, #tpu.memory_space<vmem>>, vector<1x8x32xbf16>
    %50 = vector.shape_cast %49 : vector<1x8x32xbf16> to vector<8x32xbf16>
    %c8_43 = arith.constant 8 : index
    %c0_44 = arith.constant 0 : index
    %c0_45 = arith.constant 0 : index
    %51 = vector.load %arg2[%c8_43, %c0_44, %c0_45] : memref<9x32x32xbf16, #tpu.memory_space<vmem>>, vector<1x32x32xbf16>
    %52 = vector.shape_cast %51 : vector<1x32x32xbf16> to vector<32x32xbf16>
    %cst_46 = arith.constant dense<0.000000e+00> : vector<8x32xf32>
    %53 = tpu.matmul %50, %52, %cst_46 {dimension_numbers = #tpu.dot_dimension_numbers<[1], [0], [0], [1], [0, 0, 1, 1], [], []>} : vector<8x32xbf16>, vector<32x32xbf16>, vector<8x32xf32> -> vector<8x32xf32>
    %54 = arith.addf %48, %53 : vector<8x32xf32>
    %c0_47 = arith.constant 0 : index
    %c0_48 = arith.constant 0 : index
    %c0_49 = arith.constant 0 : index
    %55 = vector.load %arg5[%c0_47, %c0_48, %c0_49] : memref<1x8x16xbf16, #tpu.memory_space<vmem>>, vector<1x8x16xbf16>
    %56 = vector.shape_cast %55 : vector<1x8x16xbf16> to vector<8x16xbf16>
    %c0_50 = arith.constant 0 : index
    %c0_51 = arith.constant 0 : index
    %57 = vector.load %arg6[%c0_50, %c0_51] : memref<16x32xbf16, #tpu.memory_space<vmem>>, vector<16x32xbf16>
    %cst_52 = arith.constant dense<0.000000e+00> : vector<8x32xf32>
    %58 = tpu.matmul %56, %57, %cst_52 {dimension_numbers = #tpu.dot_dimension_numbers<[1], [0], [0], [1], [0, 0, 1, 1], [], []>} : vector<8x16xbf16>, vector<16x32xbf16>, vector<8x32xf32> -> vector<8x32xf32>
    %59 = arith.addf %54, %58 : vector<8x32xf32>
    %c0_53 = arith.constant 0 : index
    %c0_54 = arith.constant 0 : index
    %60 = vector.load %arg3[%c0_53, %c0_54] : memref<1x32xf32, #tpu.memory_space<vmem>>, vector<1x32xf32>
    %61 = vector.broadcast %60 : vector<1x32xf32> to vector<8x32xf32>
    %62 = arith.addf %59, %61 : vector<8x32xf32>
    %cst_55 = arith.constant 0.000000e+00 : f32
    %63 = vector.broadcast %cst_55 : f32 to vector<8x32xf32>
    %64 = arith.maximumf %62, %63 : vector<8x32xf32>
    %c0_56 = arith.constant 0 : index
    %c0_57 = arith.constant 0 : index
    %65 = vector.load %arg4[%c0_56, %c0_57] : memref<8x1xf32, #tpu.memory_space<vmem>>, vector<8x1xf32>
    %66 = vector.broadcast %65 : vector<8x1xf32> to vector<8x32xf32>
    %67 = arith.mulf %64, %66 : vector<8x32xf32>
    %68 = arith.truncf %67 : vector<8x32xf32> to vector<8x32xbf16>
    %c0_58 = arith.constant 0 : index
    %c0_59 = arith.constant 0 : index
    %c0_60 = arith.constant 0 : index
    %69 = vector.load %arg7[%c0_58, %c0_59, %c0_60] : memref<1x8x32xbf16, #tpu.memory_space<vmem>>, vector<1x8x32xbf16>
    %70 = vector.shape_cast %69 : vector<1x8x32xbf16> to vector<8x32xbf16>
    %71 = vector.shape_cast %68 : vector<8x32xbf16> to vector<1x8x32xbf16>
    tpu.vector_store %arg7[%c0_58, %c0_59, %c0_60], %71 {strides = array<i32>} : memref<1x8x32xbf16, #tpu.memory_space<vmem>>, vector<1x8x32xbf16>,
    return
  }
  func.func @transform_0(%arg0: i32) -> (i32, i32, i32) {
    %c0_i32 = arith.constant 0 : i32
    %c0_i32_0 = arith.constant 0 : i32
    %c0_i32_1 = arith.constant 0 : i32
    return %arg0, %c0_i32, %c0_i32_0 : i32, i32, i32
  }
  func.func @transform_1(%arg0: i32) -> (i32, i32, i32) {
    %c0_i32 = arith.constant 0 : i32
    %c0_i32_0 = arith.constant 0 : i32
    %c0_i32_1 = arith.constant 0 : i32
    %c0_i32_2 = arith.constant 0 : i32
    return %c0_i32, %c0_i32_0, %c0_i32_1 : i32, i32, i32
  }
  func.func @transform_2(%arg0: i32) -> (i32, i32) {
    %c0_i32 = arith.constant 0 : i32
    %c0_i32_0 = arith.constant 0 : i32
    %c0_i32_1 = arith.constant 0 : i32
    return %c0_i32, %c0_i32_0 : i32, i32
  }
  func.func @transform_3(%arg0: i32) -> (i32, i32) {
    %c0_i32 = arith.constant 0 : i32
    %c0_i32_0 = arith.constant 0 : i32
    %c0_i32_1 = arith.constant 0 : i32
    return %c0_i32, %c0_i32_0 : i32, i32
  }
  func.func @transform_4(%arg0: i32) -> (i32, i32, i32) {
    %c0_i32 = arith.constant 0 : i32
    %c0_i32_0 = arith.constant 0 : i32
    %c0_i32_1 = arith.constant 0 : i32
    return %arg0, %c0_i32, %c0_i32_0 : i32, i32, i32
  }
  func.func @transform_5(%arg0: i32) -> (i32, i32) {
    %c0_i32 = arith.constant 0 : i32
    %c0_i32_0 = arith.constant 0 : i32
    %c0_i32_1 = arith.constant 0 : i32
    return %c0_i32, %c0_i32_0 : i32, i32
  }
  func.func @transform_6(%arg0: i32) -> (i32, i32, i32) {
    %c0_i32 = arith.constant 0 : i32
    %c0_i32_0 = arith.constant 0 : i32
    %c0_i32_1 = arith.constant 0 : i32
    return %arg0, %c0_i32, %c0_i32_0 : i32, i32, i32
  }
}

module attributes {stable_mosaic.version = 11 : i64} {
  func.func @_conv_tap_kernel(%arg0: i32, %arg1: memref<1x32x32xbf16, #tpu.memory_space<vmem>>, %arg2: memref<9x32x32xbf16, #tpu.memory_space<vmem>>, %arg3: memref<1x32xf32, #tpu.memory_space<vmem>>, %arg4: memref<8x1xf32, #tpu.memory_space<vmem>>, %arg5: memref<1x8x32xbf16, #tpu.memory_space<vmem>>) attributes {dimension_semantics = [#tpu.dimension_semantics<parallel>], iteration_bounds = array<i64: 2>, scalar_prefetch = 0 : i64, scratch_operands = 0 : i64, tpu.core_type = #tpu.core_type<tc>, window_params = [{transform_indices = @transform_0, window_bounds = array<i64: 1, 32, 32>}, {pipeline_mode = #tpu.pipeline_mode<synchronous>, transform_indices = @transform_1, window_bounds = array<i64: 9, 32, 32>}, {pipeline_mode = #tpu.pipeline_mode<synchronous>, transform_indices = @transform_2, window_bounds = array<i64: 1, 32>}, {pipeline_mode = #tpu.pipeline_mode<synchronous>, transform_indices = @transform_3, window_bounds = array<i64: 8, 1>}, {transform_indices = @transform_4, window_bounds = array<i64: 1, 8, 32>}]} {
    %cst = arith.constant 0.000000e+00 : f32
    %0 = vector.broadcast %cst : f32 to vector<8x32xf32>
    %c0 = arith.constant 0 : index
    %c7 = arith.constant 7 : index
    %c0_0 = arith.constant 0 : index
    %1 = vector.load %arg1[%c0, %c7, %c0_0] : memref<1x32x32xbf16, #tpu.memory_space<vmem>>, vector<1x8x32xbf16>
    %2 = vector.shape_cast %1 : vector<1x8x32xbf16> to vector<8x32xbf16>
    %c0_1 = arith.constant 0 : index
    %c0_2 = arith.constant 0 : index
    %c0_3 = arith.constant 0 : index
    %3 = vector.load %arg2[%c0_1, %c0_2, %c0_3] : memref<9x32x32xbf16, #tpu.memory_space<vmem>>, vector<1x32x32xbf16>
    %4 = vector.shape_cast %3 : vector<1x32x32xbf16> to vector<32x32xbf16>
    %cst_4 = arith.constant dense<0.000000e+00> : vector<8x32xf32>
    %5 = tpu.matmul %2, %4, %cst_4 {dimension_numbers = #tpu.dot_dimension_numbers<[1], [0], [0], [1], [0, 0, 1, 1], [], []>} : vector<8x32xbf16>, vector<32x32xbf16>, vector<8x32xf32> -> vector<8x32xf32>
    %6 = arith.addf %0, %5 : vector<8x32xf32>
    %c0_5 = arith.constant 0 : index
    %c8 = arith.constant 8 : index
    %c0_6 = arith.constant 0 : index
    %7 = vector.load %arg1[%c0_5, %c8, %c0_6] : memref<1x32x32xbf16, #tpu.memory_space<vmem>>, vector<1x8x32xbf16>
    %8 = vector.shape_cast %7 : vector<1x8x32xbf16> to vector<8x32xbf16>
    %c1 = arith.constant 1 : index
    %c0_7 = arith.constant 0 : index
    %c0_8 = arith.constant 0 : index
    %9 = vector.load %arg2[%c1, %c0_7, %c0_8] : memref<9x32x32xbf16, #tpu.memory_space<vmem>>, vector<1x32x32xbf16>
    %10 = vector.shape_cast %9 : vector<1x32x32xbf16> to vector<32x32xbf16>
    %cst_9 = arith.constant dense<0.000000e+00> : vector<8x32xf32>
    %11 = tpu.matmul %8, %10, %cst_9 {dimension_numbers = #tpu.dot_dimension_numbers<[1], [0], [0], [1], [0, 0, 1, 1], [], []>} : vector<8x32xbf16>, vector<32x32xbf16>, vector<8x32xf32> -> vector<8x32xf32>
    %12 = arith.addf %6, %11 : vector<8x32xf32>
    %c0_10 = arith.constant 0 : index
    %c9 = arith.constant 9 : index
    %c0_11 = arith.constant 0 : index
    %13 = vector.load %arg1[%c0_10, %c9, %c0_11] : memref<1x32x32xbf16, #tpu.memory_space<vmem>>, vector<1x8x32xbf16>
    %14 = vector.shape_cast %13 : vector<1x8x32xbf16> to vector<8x32xbf16>
    %c2 = arith.constant 2 : index
    %c0_12 = arith.constant 0 : index
    %c0_13 = arith.constant 0 : index
    %15 = vector.load %arg2[%c2, %c0_12, %c0_13] : memref<9x32x32xbf16, #tpu.memory_space<vmem>>, vector<1x32x32xbf16>
    %16 = vector.shape_cast %15 : vector<1x32x32xbf16> to vector<32x32xbf16>
    %cst_14 = arith.constant dense<0.000000e+00> : vector<8x32xf32>
    %17 = tpu.matmul %14, %16, %cst_14 {dimension_numbers = #tpu.dot_dimension_numbers<[1], [0], [0], [1], [0, 0, 1, 1], [], []>} : vector<8x32xbf16>, vector<32x32xbf16>, vector<8x32xf32> -> vector<8x32xf32>
    %18 = arith.addf %12, %17 : vector<8x32xf32>
    %c0_15 = arith.constant 0 : index
    %c11 = arith.constant 11 : index
    %c0_16 = arith.constant 0 : index
    %19 = vector.load %arg1[%c0_15, %c11, %c0_16] : memref<1x32x32xbf16, #tpu.memory_space<vmem>>, vector<1x8x32xbf16>
    %20 = vector.shape_cast %19 : vector<1x8x32xbf16> to vector<8x32xbf16>
    %c3 = arith.constant 3 : index
    %c0_17 = arith.constant 0 : index
    %c0_18 = arith.constant 0 : index
    %21 = vector.load %arg2[%c3, %c0_17, %c0_18] : memref<9x32x32xbf16, #tpu.memory_space<vmem>>, vector<1x32x32xbf16>
    %22 = vector.shape_cast %21 : vector<1x32x32xbf16> to vector<32x32xbf16>
    %cst_19 = arith.constant dense<0.000000e+00> : vector<8x32xf32>
    %23 = tpu.matmul %20, %22, %cst_19 {dimension_numbers = #tpu.dot_dimension_numbers<[1], [0], [0], [1], [0, 0, 1, 1], [], []>} : vector<8x32xbf16>, vector<32x32xbf16>, vector<8x32xf32> -> vector<8x32xf32>
    %24 = arith.addf %18, %23 : vector<8x32xf32>
    %c0_20 = arith.constant 0 : index
    %c12 = arith.constant 12 : index
    %c0_21 = arith.constant 0 : index
    %25 = vector.load %arg1[%c0_20, %c12, %c0_21] : memref<1x32x32xbf16, #tpu.memory_space<vmem>>, vector<1x8x32xbf16>
    %26 = vector.shape_cast %25 : vector<1x8x32xbf16> to vector<8x32xbf16>
    %c4 = arith.constant 4 : index
    %c0_22 = arith.constant 0 : index
    %c0_23 = arith.constant 0 : index
    %27 = vector.load %arg2[%c4, %c0_22, %c0_23] : memref<9x32x32xbf16, #tpu.memory_space<vmem>>, vector<1x32x32xbf16>
    %28 = vector.shape_cast %27 : vector<1x32x32xbf16> to vector<32x32xbf16>
    %cst_24 = arith.constant dense<0.000000e+00> : vector<8x32xf32>
    %29 = tpu.matmul %26, %28, %cst_24 {dimension_numbers = #tpu.dot_dimension_numbers<[1], [0], [0], [1], [0, 0, 1, 1], [], []>} : vector<8x32xbf16>, vector<32x32xbf16>, vector<8x32xf32> -> vector<8x32xf32>
    %30 = arith.addf %24, %29 : vector<8x32xf32>
    %c0_25 = arith.constant 0 : index
    %c13 = arith.constant 13 : index
    %c0_26 = arith.constant 0 : index
    %31 = vector.load %arg1[%c0_25, %c13, %c0_26] : memref<1x32x32xbf16, #tpu.memory_space<vmem>>, vector<1x8x32xbf16>
    %32 = vector.shape_cast %31 : vector<1x8x32xbf16> to vector<8x32xbf16>
    %c5 = arith.constant 5 : index
    %c0_27 = arith.constant 0 : index
    %c0_28 = arith.constant 0 : index
    %33 = vector.load %arg2[%c5, %c0_27, %c0_28] : memref<9x32x32xbf16, #tpu.memory_space<vmem>>, vector<1x32x32xbf16>
    %34 = vector.shape_cast %33 : vector<1x32x32xbf16> to vector<32x32xbf16>
    %cst_29 = arith.constant dense<0.000000e+00> : vector<8x32xf32>
    %35 = tpu.matmul %32, %34, %cst_29 {dimension_numbers = #tpu.dot_dimension_numbers<[1], [0], [0], [1], [0, 0, 1, 1], [], []>} : vector<8x32xbf16>, vector<32x32xbf16>, vector<8x32xf32> -> vector<8x32xf32>
    %36 = arith.addf %30, %35 : vector<8x32xf32>
    %c0_30 = arith.constant 0 : index
    %c15 = arith.constant 15 : index
    %c0_31 = arith.constant 0 : index
    %37 = vector.load %arg1[%c0_30, %c15, %c0_31] : memref<1x32x32xbf16, #tpu.memory_space<vmem>>, vector<1x8x32xbf16>
    %38 = vector.shape_cast %37 : vector<1x8x32xbf16> to vector<8x32xbf16>
    %c6 = arith.constant 6 : index
    %c0_32 = arith.constant 0 : index
    %c0_33 = arith.constant 0 : index
    %39 = vector.load %arg2[%c6, %c0_32, %c0_33] : memref<9x32x32xbf16, #tpu.memory_space<vmem>>, vector<1x32x32xbf16>
    %40 = vector.shape_cast %39 : vector<1x32x32xbf16> to vector<32x32xbf16>
    %cst_34 = arith.constant dense<0.000000e+00> : vector<8x32xf32>
    %41 = tpu.matmul %38, %40, %cst_34 {dimension_numbers = #tpu.dot_dimension_numbers<[1], [0], [0], [1], [0, 0, 1, 1], [], []>} : vector<8x32xbf16>, vector<32x32xbf16>, vector<8x32xf32> -> vector<8x32xf32>
    %42 = arith.addf %36, %41 : vector<8x32xf32>
    %c0_35 = arith.constant 0 : index
    %c16 = arith.constant 16 : index
    %c0_36 = arith.constant 0 : index
    %43 = vector.load %arg1[%c0_35, %c16, %c0_36] : memref<1x32x32xbf16, #tpu.memory_space<vmem>>, vector<1x8x32xbf16>
    %44 = vector.shape_cast %43 : vector<1x8x32xbf16> to vector<8x32xbf16>
    %c7_37 = arith.constant 7 : index
    %c0_38 = arith.constant 0 : index
    %c0_39 = arith.constant 0 : index
    %45 = vector.load %arg2[%c7_37, %c0_38, %c0_39] : memref<9x32x32xbf16, #tpu.memory_space<vmem>>, vector<1x32x32xbf16>
    %46 = vector.shape_cast %45 : vector<1x32x32xbf16> to vector<32x32xbf16>
    %cst_40 = arith.constant dense<0.000000e+00> : vector<8x32xf32>
    %47 = tpu.matmul %44, %46, %cst_40 {dimension_numbers = #tpu.dot_dimension_numbers<[1], [0], [0], [1], [0, 0, 1, 1], [], []>} : vector<8x32xbf16>, vector<32x32xbf16>, vector<8x32xf32> -> vector<8x32xf32>
    %48 = arith.addf %42, %47 : vector<8x32xf32>
    %c0_41 = arith.constant 0 : index
    %c17 = arith.constant 17 : index
    %c0_42 = arith.constant 0 : index
    %49 = vector.load %arg1[%c0_41, %c17, %c0_42] : memref<1x32x32xbf16, #tpu.memory_space<vmem>>, vector<1x8x32xbf16>
    %50 = vector.shape_cast %49 : vector<1x8x32xbf16> to vector<8x32xbf16>
    %c8_43 = arith.constant 8 : index
    %c0_44 = arith.constant 0 : index
    %c0_45 = arith.constant 0 : index
    %51 = vector.load %arg2[%c8_43, %c0_44, %c0_45] : memref<9x32x32xbf16, #tpu.memory_space<vmem>>, vector<1x32x32xbf16>
    %52 = vector.shape_cast %51 : vector<1x32x32xbf16> to vector<32x32xbf16>
    %cst_46 = arith.constant dense<0.000000e+00> : vector<8x32xf32>
    %53 = tpu.matmul %50, %52, %cst_46 {dimension_numbers = #tpu.dot_dimension_numbers<[1], [0], [0], [1], [0, 0, 1, 1], [], []>} : vector<8x32xbf16>, vector<32x32xbf16>, vector<8x32xf32> -> vector<8x32xf32>
    %54 = arith.addf %48, %53 : vector<8x32xf32>
    %c0_47 = arith.constant 0 : index
    %c0_48 = arith.constant 0 : index
    %55 = vector.load %arg3[%c0_47, %c0_48] : memref<1x32xf32, #tpu.memory_space<vmem>>, vector<1x32xf32>
    %56 = vector.broadcast %55 : vector<1x32xf32> to vector<8x32xf32>
    %57 = arith.addf %54, %56 : vector<8x32xf32>
    %cst_49 = arith.constant 0.000000e+00 : f32
    %58 = vector.broadcast %cst_49 : f32 to vector<8x32xf32>
    %59 = arith.maximumf %57, %58 : vector<8x32xf32>
    %c0_50 = arith.constant 0 : index
    %c0_51 = arith.constant 0 : index
    %60 = vector.load %arg4[%c0_50, %c0_51] : memref<8x1xf32, #tpu.memory_space<vmem>>, vector<8x1xf32>
    %61 = vector.broadcast %60 : vector<8x1xf32> to vector<8x32xf32>
    %62 = arith.mulf %59, %61 : vector<8x32xf32>
    %63 = arith.truncf %62 : vector<8x32xf32> to vector<8x32xbf16>
    %c0_52 = arith.constant 0 : index
    %c0_53 = arith.constant 0 : index
    %c0_54 = arith.constant 0 : index
    %64 = vector.load %arg5[%c0_52, %c0_53, %c0_54] : memref<1x8x32xbf16, #tpu.memory_space<vmem>>, vector<1x8x32xbf16>
    %65 = vector.shape_cast %64 : vector<1x8x32xbf16> to vector<8x32xbf16>
    %66 = vector.shape_cast %63 : vector<8x32xbf16> to vector<1x8x32xbf16>
    tpu.vector_store %arg5[%c0_52, %c0_53, %c0_54], %66 {strides = array<i32>} : memref<1x8x32xbf16, #tpu.memory_space<vmem>>, vector<1x8x32xbf16>,
    return
  }
  func.func @transform_0(%arg0: i32) -> (i32, i32, i32) {
    %c0_i32 = arith.constant 0 : i32
    %c0_i32_0 = arith.constant 0 : i32
    %c0_i32_1 = arith.constant 0 : i32
    return %arg0, %c0_i32, %c0_i32_0 : i32, i32, i32
  }
  func.func @transform_1(%arg0: i32) -> (i32, i32, i32) {
    %c0_i32 = arith.constant 0 : i32
    %c0_i32_0 = arith.constant 0 : i32
    %c0_i32_1 = arith.constant 0 : i32
    %c0_i32_2 = arith.constant 0 : i32
    return %c0_i32, %c0_i32_0, %c0_i32_1 : i32, i32, i32
  }
  func.func @transform_2(%arg0: i32) -> (i32, i32) {
    %c0_i32 = arith.constant 0 : i32
    %c0_i32_0 = arith.constant 0 : i32
    %c0_i32_1 = arith.constant 0 : i32
    return %c0_i32, %c0_i32_0 : i32, i32
  }
  func.func @transform_3(%arg0: i32) -> (i32, i32) {
    %c0_i32 = arith.constant 0 : i32
    %c0_i32_0 = arith.constant 0 : i32
    %c0_i32_1 = arith.constant 0 : i32
    return %c0_i32, %c0_i32_0 : i32, i32
  }
  func.func @transform_4(%arg0: i32) -> (i32, i32, i32) {
    %c0_i32 = arith.constant 0 : i32
    %c0_i32_0 = arith.constant 0 : i32
    %c0_i32_1 = arith.constant 0 : i32
    return %arg0, %c0_i32, %c0_i32_0 : i32, i32, i32
  }
}

module attributes {stable_mosaic.version = 11 : i64} {
  func.func @_conv_tap_res_kernel(%arg0: i32, %arg1: memref<1x32x32xbf16, #tpu.memory_space<vmem>>, %arg2: memref<9x32x32xbf16, #tpu.memory_space<vmem>>, %arg3: memref<1x32xf32, #tpu.memory_space<vmem>>, %arg4: memref<8x1xf32, #tpu.memory_space<vmem>>, %arg5: memref<1x8x32xbf16, #tpu.memory_space<vmem>>, %arg6: memref<1x8x32xbf16, #tpu.memory_space<vmem>>) attributes {dimension_semantics = [#tpu.dimension_semantics<parallel>], iteration_bounds = array<i64: 2>, scalar_prefetch = 0 : i64, scratch_operands = 0 : i64, tpu.core_type = #tpu.core_type<tc>, window_params = [{transform_indices = @transform_0, window_bounds = array<i64: 1, 32, 32>}, {pipeline_mode = #tpu.pipeline_mode<synchronous>, transform_indices = @transform_1, window_bounds = array<i64: 9, 32, 32>}, {pipeline_mode = #tpu.pipeline_mode<synchronous>, transform_indices = @transform_2, window_bounds = array<i64: 1, 32>}, {pipeline_mode = #tpu.pipeline_mode<synchronous>, transform_indices = @transform_3, window_bounds = array<i64: 8, 1>}, {transform_indices = @transform_4, window_bounds = array<i64: 1, 8, 32>}, {transform_indices = @transform_5, window_bounds = array<i64: 1, 8, 32>}]} {
    %cst = arith.constant 0.000000e+00 : f32
    %0 = vector.broadcast %cst : f32 to vector<8x32xf32>
    %c0 = arith.constant 0 : index
    %c7 = arith.constant 7 : index
    %c0_0 = arith.constant 0 : index
    %1 = vector.load %arg1[%c0, %c7, %c0_0] : memref<1x32x32xbf16, #tpu.memory_space<vmem>>, vector<1x8x32xbf16>
    %2 = vector.shape_cast %1 : vector<1x8x32xbf16> to vector<8x32xbf16>
    %c0_1 = arith.constant 0 : index
    %c0_2 = arith.constant 0 : index
    %c0_3 = arith.constant 0 : index
    %3 = vector.load %arg2[%c0_1, %c0_2, %c0_3] : memref<9x32x32xbf16, #tpu.memory_space<vmem>>, vector<1x32x32xbf16>
    %4 = vector.shape_cast %3 : vector<1x32x32xbf16> to vector<32x32xbf16>
    %cst_4 = arith.constant dense<0.000000e+00> : vector<8x32xf32>
    %5 = tpu.matmul %2, %4, %cst_4 {dimension_numbers = #tpu.dot_dimension_numbers<[1], [0], [0], [1], [0, 0, 1, 1], [], []>} : vector<8x32xbf16>, vector<32x32xbf16>, vector<8x32xf32> -> vector<8x32xf32>
    %6 = arith.addf %0, %5 : vector<8x32xf32>
    %c0_5 = arith.constant 0 : index
    %c8 = arith.constant 8 : index
    %c0_6 = arith.constant 0 : index
    %7 = vector.load %arg1[%c0_5, %c8, %c0_6] : memref<1x32x32xbf16, #tpu.memory_space<vmem>>, vector<1x8x32xbf16>
    %8 = vector.shape_cast %7 : vector<1x8x32xbf16> to vector<8x32xbf16>
    %c1 = arith.constant 1 : index
    %c0_7 = arith.constant 0 : index
    %c0_8 = arith.constant 0 : index
    %9 = vector.load %arg2[%c1, %c0_7, %c0_8] : memref<9x32x32xbf16, #tpu.memory_space<vmem>>, vector<1x32x32xbf16>
    %10 = vector.shape_cast %9 : vector<1x32x32xbf16> to vector<32x32xbf16>
    %cst_9 = arith.constant dense<0.000000e+00> : vector<8x32xf32>
    %11 = tpu.matmul %8, %10, %cst_9 {dimension_numbers = #tpu.dot_dimension_numbers<[1], [0], [0], [1], [0, 0, 1, 1], [], []>} : vector<8x32xbf16>, vector<32x32xbf16>, vector<8x32xf32> -> vector<8x32xf32>
    %12 = arith.addf %6, %11 : vector<8x32xf32>
    %c0_10 = arith.constant 0 : index
    %c9 = arith.constant 9 : index
    %c0_11 = arith.constant 0 : index
    %13 = vector.load %arg1[%c0_10, %c9, %c0_11] : memref<1x32x32xbf16, #tpu.memory_space<vmem>>, vector<1x8x32xbf16>
    %14 = vector.shape_cast %13 : vector<1x8x32xbf16> to vector<8x32xbf16>
    %c2 = arith.constant 2 : index
    %c0_12 = arith.constant 0 : index
    %c0_13 = arith.constant 0 : index
    %15 = vector.load %arg2[%c2, %c0_12, %c0_13] : memref<9x32x32xbf16, #tpu.memory_space<vmem>>, vector<1x32x32xbf16>
    %16 = vector.shape_cast %15 : vector<1x32x32xbf16> to vector<32x32xbf16>
    %cst_14 = arith.constant dense<0.000000e+00> : vector<8x32xf32>
    %17 = tpu.matmul %14, %16, %cst_14 {dimension_numbers = #tpu.dot_dimension_numbers<[1], [0], [0], [1], [0, 0, 1, 1], [], []>} : vector<8x32xbf16>, vector<32x32xbf16>, vector<8x32xf32> -> vector<8x32xf32>
    %18 = arith.addf %12, %17 : vector<8x32xf32>
    %c0_15 = arith.constant 0 : index
    %c11 = arith.constant 11 : index
    %c0_16 = arith.constant 0 : index
    %19 = vector.load %arg1[%c0_15, %c11, %c0_16] : memref<1x32x32xbf16, #tpu.memory_space<vmem>>, vector<1x8x32xbf16>
    %20 = vector.shape_cast %19 : vector<1x8x32xbf16> to vector<8x32xbf16>
    %c3 = arith.constant 3 : index
    %c0_17 = arith.constant 0 : index
    %c0_18 = arith.constant 0 : index
    %21 = vector.load %arg2[%c3, %c0_17, %c0_18] : memref<9x32x32xbf16, #tpu.memory_space<vmem>>, vector<1x32x32xbf16>
    %22 = vector.shape_cast %21 : vector<1x32x32xbf16> to vector<32x32xbf16>
    %cst_19 = arith.constant dense<0.000000e+00> : vector<8x32xf32>
    %23 = tpu.matmul %20, %22, %cst_19 {dimension_numbers = #tpu.dot_dimension_numbers<[1], [0], [0], [1], [0, 0, 1, 1], [], []>} : vector<8x32xbf16>, vector<32x32xbf16>, vector<8x32xf32> -> vector<8x32xf32>
    %24 = arith.addf %18, %23 : vector<8x32xf32>
    %c0_20 = arith.constant 0 : index
    %c12 = arith.constant 12 : index
    %c0_21 = arith.constant 0 : index
    %25 = vector.load %arg1[%c0_20, %c12, %c0_21] : memref<1x32x32xbf16, #tpu.memory_space<vmem>>, vector<1x8x32xbf16>
    %26 = vector.shape_cast %25 : vector<1x8x32xbf16> to vector<8x32xbf16>
    %c4 = arith.constant 4 : index
    %c0_22 = arith.constant 0 : index
    %c0_23 = arith.constant 0 : index
    %27 = vector.load %arg2[%c4, %c0_22, %c0_23] : memref<9x32x32xbf16, #tpu.memory_space<vmem>>, vector<1x32x32xbf16>
    %28 = vector.shape_cast %27 : vector<1x32x32xbf16> to vector<32x32xbf16>
    %cst_24 = arith.constant dense<0.000000e+00> : vector<8x32xf32>
    %29 = tpu.matmul %26, %28, %cst_24 {dimension_numbers = #tpu.dot_dimension_numbers<[1], [0], [0], [1], [0, 0, 1, 1], [], []>} : vector<8x32xbf16>, vector<32x32xbf16>, vector<8x32xf32> -> vector<8x32xf32>
    %30 = arith.addf %24, %29 : vector<8x32xf32>
    %c0_25 = arith.constant 0 : index
    %c13 = arith.constant 13 : index
    %c0_26 = arith.constant 0 : index
    %31 = vector.load %arg1[%c0_25, %c13, %c0_26] : memref<1x32x32xbf16, #tpu.memory_space<vmem>>, vector<1x8x32xbf16>
    %32 = vector.shape_cast %31 : vector<1x8x32xbf16> to vector<8x32xbf16>
    %c5 = arith.constant 5 : index
    %c0_27 = arith.constant 0 : index
    %c0_28 = arith.constant 0 : index
    %33 = vector.load %arg2[%c5, %c0_27, %c0_28] : memref<9x32x32xbf16, #tpu.memory_space<vmem>>, vector<1x32x32xbf16>
    %34 = vector.shape_cast %33 : vector<1x32x32xbf16> to vector<32x32xbf16>
    %cst_29 = arith.constant dense<0.000000e+00> : vector<8x32xf32>
    %35 = tpu.matmul %32, %34, %cst_29 {dimension_numbers = #tpu.dot_dimension_numbers<[1], [0], [0], [1], [0, 0, 1, 1], [], []>} : vector<8x32xbf16>, vector<32x32xbf16>, vector<8x32xf32> -> vector<8x32xf32>
    %36 = arith.addf %30, %35 : vector<8x32xf32>
    %c0_30 = arith.constant 0 : index
    %c15 = arith.constant 15 : index
    %c0_31 = arith.constant 0 : index
    %37 = vector.load %arg1[%c0_30, %c15, %c0_31] : memref<1x32x32xbf16, #tpu.memory_space<vmem>>, vector<1x8x32xbf16>
    %38 = vector.shape_cast %37 : vector<1x8x32xbf16> to vector<8x32xbf16>
    %c6 = arith.constant 6 : index
    %c0_32 = arith.constant 0 : index
    %c0_33 = arith.constant 0 : index
    %39 = vector.load %arg2[%c6, %c0_32, %c0_33] : memref<9x32x32xbf16, #tpu.memory_space<vmem>>, vector<1x32x32xbf16>
    %40 = vector.shape_cast %39 : vector<1x32x32xbf16> to vector<32x32xbf16>
    %cst_34 = arith.constant dense<0.000000e+00> : vector<8x32xf32>
    %41 = tpu.matmul %38, %40, %cst_34 {dimension_numbers = #tpu.dot_dimension_numbers<[1], [0], [0], [1], [0, 0, 1, 1], [], []>} : vector<8x32xbf16>, vector<32x32xbf16>, vector<8x32xf32> -> vector<8x32xf32>
    %42 = arith.addf %36, %41 : vector<8x32xf32>
    %c0_35 = arith.constant 0 : index
    %c16 = arith.constant 16 : index
    %c0_36 = arith.constant 0 : index
    %43 = vector.load %arg1[%c0_35, %c16, %c0_36] : memref<1x32x32xbf16, #tpu.memory_space<vmem>>, vector<1x8x32xbf16>
    %44 = vector.shape_cast %43 : vector<1x8x32xbf16> to vector<8x32xbf16>
    %c7_37 = arith.constant 7 : index
    %c0_38 = arith.constant 0 : index
    %c0_39 = arith.constant 0 : index
    %45 = vector.load %arg2[%c7_37, %c0_38, %c0_39] : memref<9x32x32xbf16, #tpu.memory_space<vmem>>, vector<1x32x32xbf16>
    %46 = vector.shape_cast %45 : vector<1x32x32xbf16> to vector<32x32xbf16>
    %cst_40 = arith.constant dense<0.000000e+00> : vector<8x32xf32>
    %47 = tpu.matmul %44, %46, %cst_40 {dimension_numbers = #tpu.dot_dimension_numbers<[1], [0], [0], [1], [0, 0, 1, 1], [], []>} : vector<8x32xbf16>, vector<32x32xbf16>, vector<8x32xf32> -> vector<8x32xf32>
    %48 = arith.addf %42, %47 : vector<8x32xf32>
    %c0_41 = arith.constant 0 : index
    %c17 = arith.constant 17 : index
    %c0_42 = arith.constant 0 : index
    %49 = vector.load %arg1[%c0_41, %c17, %c0_42] : memref<1x32x32xbf16, #tpu.memory_space<vmem>>, vector<1x8x32xbf16>
    %50 = vector.shape_cast %49 : vector<1x8x32xbf16> to vector<8x32xbf16>
    %c8_43 = arith.constant 8 : index
    %c0_44 = arith.constant 0 : index
    %c0_45 = arith.constant 0 : index
    %51 = vector.load %arg2[%c8_43, %c0_44, %c0_45] : memref<9x32x32xbf16, #tpu.memory_space<vmem>>, vector<1x32x32xbf16>
    %52 = vector.shape_cast %51 : vector<1x32x32xbf16> to vector<32x32xbf16>
    %cst_46 = arith.constant dense<0.000000e+00> : vector<8x32xf32>
    %53 = tpu.matmul %50, %52, %cst_46 {dimension_numbers = #tpu.dot_dimension_numbers<[1], [0], [0], [1], [0, 0, 1, 1], [], []>} : vector<8x32xbf16>, vector<32x32xbf16>, vector<8x32xf32> -> vector<8x32xf32>
    %54 = arith.addf %48, %53 : vector<8x32xf32>
    %c0_47 = arith.constant 0 : index
    %c0_48 = arith.constant 0 : index
    %55 = vector.load %arg3[%c0_47, %c0_48] : memref<1x32xf32, #tpu.memory_space<vmem>>, vector<1x32xf32>
    %56 = vector.broadcast %55 : vector<1x32xf32> to vector<8x32xf32>
    %57 = arith.addf %54, %56 : vector<8x32xf32>
    %c0_49 = arith.constant 0 : index
    %c0_50 = arith.constant 0 : index
    %c0_51 = arith.constant 0 : index
    %58 = vector.load %arg5[%c0_49, %c0_50, %c0_51] : memref<1x8x32xbf16, #tpu.memory_space<vmem>>, vector<1x8x32xbf16>
    %59 = vector.shape_cast %58 : vector<1x8x32xbf16> to vector<8x32xbf16>
    %60 = arith.extf %59 : vector<8x32xbf16> to vector<8x32xf32>
    %61 = arith.addf %57, %60 : vector<8x32xf32>
    %cst_52 = arith.constant 0.000000e+00 : f32
    %62 = vector.broadcast %cst_52 : f32 to vector<8x32xf32>
    %63 = arith.maximumf %61, %62 : vector<8x32xf32>
    %c0_53 = arith.constant 0 : index
    %c0_54 = arith.constant 0 : index
    %64 = vector.load %arg4[%c0_53, %c0_54] : memref<8x1xf32, #tpu.memory_space<vmem>>, vector<8x1xf32>
    %65 = vector.broadcast %64 : vector<8x1xf32> to vector<8x32xf32>
    %66 = arith.mulf %63, %65 : vector<8x32xf32>
    %67 = arith.truncf %66 : vector<8x32xf32> to vector<8x32xbf16>
    %c0_55 = arith.constant 0 : index
    %c0_56 = arith.constant 0 : index
    %c0_57 = arith.constant 0 : index
    %68 = vector.load %arg6[%c0_55, %c0_56, %c0_57] : memref<1x8x32xbf16, #tpu.memory_space<vmem>>, vector<1x8x32xbf16>
    %69 = vector.shape_cast %68 : vector<1x8x32xbf16> to vector<8x32xbf16>
    %70 = vector.shape_cast %67 : vector<8x32xbf16> to vector<1x8x32xbf16>
    tpu.vector_store %arg6[%c0_55, %c0_56, %c0_57], %70 {strides = array<i32>} : memref<1x8x32xbf16, #tpu.memory_space<vmem>>, vector<1x8x32xbf16>,
    return
  }
  func.func @transform_0(%arg0: i32) -> (i32, i32, i32) {
    %c0_i32 = arith.constant 0 : i32
    %c0_i32_0 = arith.constant 0 : i32
    %c0_i32_1 = arith.constant 0 : i32
    return %arg0, %c0_i32, %c0_i32_0 : i32, i32, i32
  }
  func.func @transform_1(%arg0: i32) -> (i32, i32, i32) {
    %c0_i32 = arith.constant 0 : i32
    %c0_i32_0 = arith.constant 0 : i32
    %c0_i32_1 = arith.constant 0 : i32
    %c0_i32_2 = arith.constant 0 : i32
    return %c0_i32, %c0_i32_0, %c0_i32_1 : i32, i32, i32
  }
  func.func @transform_2(%arg0: i32) -> (i32, i32) {
    %c0_i32 = arith.constant 0 : i32
    %c0_i32_0 = arith.constant 0 : i32
    %c0_i32_1 = arith.constant 0 : i32
    return %c0_i32, %c0_i32_0 : i32, i32
  }
  func.func @transform_3(%arg0: i32) -> (i32, i32) {
    %c0_i32 = arith.constant 0 : i32
    %c0_i32_0 = arith.constant 0 : i32
    %c0_i32_1 = arith.constant 0 : i32
    return %c0_i32, %c0_i32_0 : i32, i32
  }
  func.func @transform_4(%arg0: i32) -> (i32, i32, i32) {
    %c0_i32 = arith.constant 0 : i32
    %c0_i32_0 = arith.constant 0 : i32
    %c0_i32_1 = arith.constant 0 : i32
    return %arg0, %c0_i32, %c0_i32_0 : i32, i32, i32
  }
  func.func @transform_5(%arg0: i32) -> (i32, i32, i32) {
    %c0_i32 = arith.constant 0 : i32
    %c0_i32_0 = arith.constant 0 : i32
    %c0_i32_1 = arith.constant 0 : i32
    return %arg0, %c0_i32, %c0_i32_0 : i32, i32, i32
  }
}

module attributes {stable_mosaic.version = 11 : i64} {
  func.func @_matmul_bias_kernel(%arg0: i32, %arg1: memref<2x288xbf16, #tpu.memory_space<vmem>>, %arg2: memref<288x64xbf16, #tpu.memory_space<vmem>>, %arg3: memref<1x64xf32, #tpu.memory_space<vmem>>, %arg4: memref<2x64xbf16, #tpu.memory_space<vmem>>) attributes {dimension_semantics = [#tpu.dimension_semantics<parallel>], iteration_bounds = array<i64: 1>, scalar_prefetch = 0 : i64, scratch_operands = 0 : i64, tpu.core_type = #tpu.core_type<tc>, window_params = [{transform_indices = @transform_0, window_bounds = array<i64: 2, 288>}, {pipeline_mode = #tpu.pipeline_mode<synchronous>, transform_indices = @transform_1, window_bounds = array<i64: 288, 64>}, {pipeline_mode = #tpu.pipeline_mode<synchronous>, transform_indices = @transform_2, window_bounds = array<i64: 1, 64>}, {transform_indices = @transform_3, window_bounds = array<i64: 2, 64>}]} {
    %c0 = arith.constant 0 : index
    %c0_0 = arith.constant 0 : index
    %0 = vector.load %arg1[%c0, %c0_0] : memref<2x288xbf16, #tpu.memory_space<vmem>>, vector<2x288xbf16>
    %c0_1 = arith.constant 0 : index
    %c0_2 = arith.constant 0 : index
    %1 = vector.load %arg2[%c0_1, %c0_2] : memref<288x64xbf16, #tpu.memory_space<vmem>>, vector<288x64xbf16>
    %cst = arith.constant dense<0.000000e+00> : vector<2x64xf32>
    %2 = tpu.matmul %0, %1, %cst {dimension_numbers = #tpu.dot_dimension_numbers<[1], [0], [0], [1], [0, 0, 1, 1], [], []>} : vector<2x288xbf16>, vector<288x64xbf16>, vector<2x64xf32> -> vector<2x64xf32>
    %c0_3 = arith.constant 0 : index
    %c0_4 = arith.constant 0 : index
    %3 = vector.load %arg3[%c0_3, %c0_4] : memref<1x64xf32, #tpu.memory_space<vmem>>, vector<1x64xf32>
    %4 = vector.broadcast %3 : vector<1x64xf32> to vector<2x64xf32>
    %5 = arith.addf %2, %4 : vector<2x64xf32>
    %cst_5 = arith.constant 0.000000e+00 : f32
    %6 = vector.broadcast %cst_5 : f32 to vector<2x64xf32>
    %7 = arith.maximumf %5, %6 : vector<2x64xf32>
    %8 = arith.truncf %7 : vector<2x64xf32> to vector<2x64xbf16>
    %c0_6 = arith.constant 0 : index
    %c0_7 = arith.constant 0 : index
    %9 = vector.load %arg4[%c0_6, %c0_7] : memref<2x64xbf16, #tpu.memory_space<vmem>>, vector<2x64xbf16>
    tpu.vector_store %arg4[%c0_6, %c0_7], %8 {strides = array<i32>} : memref<2x64xbf16, #tpu.memory_space<vmem>>, vector<2x64xbf16>,
    return
  }
  func.func @transform_0(%arg0: i32) -> (i32, i32) {
    %c0_i32 = arith.constant 0 : i32
    %c0_i32_0 = arith.constant 0 : i32
    return %arg0, %c0_i32 : i32, i32
  }
  func.func @transform_1(%arg0: i32) -> (i32, i32) {
    %c0_i32 = arith.constant 0 : i32
    %c0_i32_0 = arith.constant 0 : i32
    %c0_i32_1 = arith.constant 0 : i32
    return %c0_i32, %c0_i32_0 : i32, i32
  }
  func.func @transform_2(%arg0: i32) -> (i32, i32) {
    %c0_i32 = arith.constant 0 : i32
    %c0_i32_0 = arith.constant 0 : i32
    %c0_i32_1 = arith.constant 0 : i32
    return %c0_i32, %c0_i32_0 : i32, i32
  }
  func.func @transform_3(%arg0: i32) -> (i32, i32) {
    %c0_i32 = arith.constant 0 : i32
    %c0_i32_0 = arith.constant 0 : i32
    return %arg0, %c0_i32 : i32, i32
  }
}

module attributes {stable_mosaic.version = 11 : i64} {
  func.func @_conv_tap_dual_kernel(%arg0: i32, %arg1: memref<1x25x64xbf16, #tpu.memory_space<vmem>>, %arg2: memref<9x64x64xbf16, #tpu.memory_space<vmem>>, %arg3: memref<1x64xf32, #tpu.memory_space<vmem>>, %arg4: memref<3x1xf32, #tpu.memory_space<vmem>>, %arg5: memref<1x3x32xbf16, #tpu.memory_space<vmem>>, %arg6: memref<32x64xbf16, #tpu.memory_space<vmem>>, %arg7: memref<1x3x64xbf16, #tpu.memory_space<vmem>>) attributes {dimension_semantics = [#tpu.dimension_semantics<parallel>], iteration_bounds = array<i64: 2>, scalar_prefetch = 0 : i64, scratch_operands = 0 : i64, tpu.core_type = #tpu.core_type<tc>, window_params = [{transform_indices = @transform_0, window_bounds = array<i64: 1, 25, 64>}, {pipeline_mode = #tpu.pipeline_mode<synchronous>, transform_indices = @transform_1, window_bounds = array<i64: 9, 64, 64>}, {pipeline_mode = #tpu.pipeline_mode<synchronous>, transform_indices = @transform_2, window_bounds = array<i64: 1, 64>}, {pipeline_mode = #tpu.pipeline_mode<synchronous>, transform_indices = @transform_3, window_bounds = array<i64: 3, 1>}, {transform_indices = @transform_4, window_bounds = array<i64: 1, 3, 32>}, {pipeline_mode = #tpu.pipeline_mode<synchronous>, transform_indices = @transform_5, window_bounds = array<i64: 32, 64>}, {transform_indices = @transform_6, window_bounds = array<i64: 1, 3, 64>}]} {
    %cst = arith.constant 0.000000e+00 : f32
    %0 = vector.broadcast %cst : f32 to vector<3x64xf32>
    %c0 = arith.constant 0 : index
    %c7 = arith.constant 7 : index
    %c0_0 = arith.constant 0 : index
    %1 = vector.load %arg1[%c0, %c7, %c0_0] : memref<1x25x64xbf16, #tpu.memory_space<vmem>>, vector<1x3x64xbf16>
    %2 = vector.shape_cast %1 : vector<1x3x64xbf16> to vector<3x64xbf16>
    %c0_1 = arith.constant 0 : index
    %c0_2 = arith.constant 0 : index
    %c0_3 = arith.constant 0 : index
    %3 = vector.load %arg2[%c0_1, %c0_2, %c0_3] : memref<9x64x64xbf16, #tpu.memory_space<vmem>>, vector<1x64x64xbf16>
    %4 = vector.shape_cast %3 : vector<1x64x64xbf16> to vector<64x64xbf16>
    %cst_4 = arith.constant dense<0.000000e+00> : vector<3x64xf32>
    %5 = tpu.matmul %2, %4, %cst_4 {dimension_numbers = #tpu.dot_dimension_numbers<[1], [0], [0], [1], [0, 0, 1, 1], [], []>} : vector<3x64xbf16>, vector<64x64xbf16>, vector<3x64xf32> -> vector<3x64xf32>
    %6 = arith.addf %0, %5 : vector<3x64xf32>
    %c0_5 = arith.constant 0 : index
    %c8 = arith.constant 8 : index
    %c0_6 = arith.constant 0 : index
    %7 = vector.load %arg1[%c0_5, %c8, %c0_6] : memref<1x25x64xbf16, #tpu.memory_space<vmem>>, vector<1x3x64xbf16>
    %8 = vector.shape_cast %7 : vector<1x3x64xbf16> to vector<3x64xbf16>
    %c1 = arith.constant 1 : index
    %c0_7 = arith.constant 0 : index
    %c0_8 = arith.constant 0 : index
    %9 = vector.load %arg2[%c1, %c0_7, %c0_8] : memref<9x64x64xbf16, #tpu.memory_space<vmem>>, vector<1x64x64xbf16>
    %10 = vector.shape_cast %9 : vector<1x64x64xbf16> to vector<64x64xbf16>
    %cst_9 = arith.constant dense<0.000000e+00> : vector<3x64xf32>
    %11 = tpu.matmul %8, %10, %cst_9 {dimension_numbers = #tpu.dot_dimension_numbers<[1], [0], [0], [1], [0, 0, 1, 1], [], []>} : vector<3x64xbf16>, vector<64x64xbf16>, vector<3x64xf32> -> vector<3x64xf32>
    %12 = arith.addf %6, %11 : vector<3x64xf32>
    %c0_10 = arith.constant 0 : index
    %c9 = arith.constant 9 : index
    %c0_11 = arith.constant 0 : index
    %13 = vector.load %arg1[%c0_10, %c9, %c0_11] : memref<1x25x64xbf16, #tpu.memory_space<vmem>>, vector<1x3x64xbf16>
    %14 = vector.shape_cast %13 : vector<1x3x64xbf16> to vector<3x64xbf16>
    %c2 = arith.constant 2 : index
    %c0_12 = arith.constant 0 : index
    %c0_13 = arith.constant 0 : index
    %15 = vector.load %arg2[%c2, %c0_12, %c0_13] : memref<9x64x64xbf16, #tpu.memory_space<vmem>>, vector<1x64x64xbf16>
    %16 = vector.shape_cast %15 : vector<1x64x64xbf16> to vector<64x64xbf16>
    %cst_14 = arith.constant dense<0.000000e+00> : vector<3x64xf32>
    %17 = tpu.matmul %14, %16, %cst_14 {dimension_numbers = #tpu.dot_dimension_numbers<[1], [0], [0], [1], [0, 0, 1, 1], [], []>} : vector<3x64xbf16>, vector<64x64xbf16>, vector<3x64xf32> -> vector<3x64xf32>
    %18 = arith.addf %12, %17 : vector<3x64xf32>
    %c0_15 = arith.constant 0 : index
    %c10 = arith.constant 10 : index
    %c0_16 = arith.constant 0 : index
    %19 = vector.load %arg1[%c0_15, %c10, %c0_16] : memref<1x25x64xbf16, #tpu.memory_space<vmem>>, vector<1x3x64xbf16>
    %20 = vector.shape_cast %19 : vector<1x3x64xbf16> to vector<3x64xbf16>
    %c3 = arith.constant 3 : index
    %c0_17 = arith.constant 0 : index
    %c0_18 = arith.constant 0 : index
    %21 = vector.load %arg2[%c3, %c0_17, %c0_18] : memref<9x64x64xbf16, #tpu.memory_space<vmem>>, vector<1x64x64xbf16>
    %22 = vector.shape_cast %21 : vector<1x64x64xbf16> to vector<64x64xbf16>
    %cst_19 = arith.constant dense<0.000000e+00> : vector<3x64xf32>
    %23 = tpu.matmul %20, %22, %cst_19 {dimension_numbers = #tpu.dot_dimension_numbers<[1], [0], [0], [1], [0, 0, 1, 1], [], []>} : vector<3x64xbf16>, vector<64x64xbf16>, vector<3x64xf32> -> vector<3x64xf32>
    %24 = arith.addf %18, %23 : vector<3x64xf32>
    %c0_20 = arith.constant 0 : index
    %c11 = arith.constant 11 : index
    %c0_21 = arith.constant 0 : index
    %25 = vector.load %arg1[%c0_20, %c11, %c0_21] : memref<1x25x64xbf16, #tpu.memory_space<vmem>>, vector<1x3x64xbf16>
    %26 = vector.shape_cast %25 : vector<1x3x64xbf16> to vector<3x64xbf16>
    %c4 = arith.constant 4 : index
    %c0_22 = arith.constant 0 : index
    %c0_23 = arith.constant 0 : index
    %27 = vector.load %arg2[%c4, %c0_22, %c0_23] : memref<9x64x64xbf16, #tpu.memory_space<vmem>>, vector<1x64x64xbf16>
    %28 = vector.shape_cast %27 : vector<1x64x64xbf16> to vector<64x64xbf16>
    %cst_24 = arith.constant dense<0.000000e+00> : vector<3x64xf32>
    %29 = tpu.matmul %26, %28, %cst_24 {dimension_numbers = #tpu.dot_dimension_numbers<[1], [0], [0], [1], [0, 0, 1, 1], [], []>} : vector<3x64xbf16>, vector<64x64xbf16>, vector<3x64xf32> -> vector<3x64xf32>
    %30 = arith.addf %24, %29 : vector<3x64xf32>
    %c0_25 = arith.constant 0 : index
    %c12 = arith.constant 12 : index
    %c0_26 = arith.constant 0 : index
    %31 = vector.load %arg1[%c0_25, %c12, %c0_26] : memref<1x25x64xbf16, #tpu.memory_space<vmem>>, vector<1x3x64xbf16>
    %32 = vector.shape_cast %31 : vector<1x3x64xbf16> to vector<3x64xbf16>
    %c5 = arith.constant 5 : index
    %c0_27 = arith.constant 0 : index
    %c0_28 = arith.constant 0 : index
    %33 = vector.load %arg2[%c5, %c0_27, %c0_28] : memref<9x64x64xbf16, #tpu.memory_space<vmem>>, vector<1x64x64xbf16>
    %34 = vector.shape_cast %33 : vector<1x64x64xbf16> to vector<64x64xbf16>
    %cst_29 = arith.constant dense<0.000000e+00> : vector<3x64xf32>
    %35 = tpu.matmul %32, %34, %cst_29 {dimension_numbers = #tpu.dot_dimension_numbers<[1], [0], [0], [1], [0, 0, 1, 1], [], []>} : vector<3x64xbf16>, vector<64x64xbf16>, vector<3x64xf32> -> vector<3x64xf32>
    %36 = arith.addf %30, %35 : vector<3x64xf32>
    %c0_30 = arith.constant 0 : index
    %c13 = arith.constant 13 : index
    %c0_31 = arith.constant 0 : index
    %37 = vector.load %arg1[%c0_30, %c13, %c0_31] : memref<1x25x64xbf16, #tpu.memory_space<vmem>>, vector<1x3x64xbf16>
    %38 = vector.shape_cast %37 : vector<1x3x64xbf16> to vector<3x64xbf16>
    %c6 = arith.constant 6 : index
    %c0_32 = arith.constant 0 : index
    %c0_33 = arith.constant 0 : index
    %39 = vector.load %arg2[%c6, %c0_32, %c0_33] : memref<9x64x64xbf16, #tpu.memory_space<vmem>>, vector<1x64x64xbf16>
    %40 = vector.shape_cast %39 : vector<1x64x64xbf16> to vector<64x64xbf16>
    %cst_34 = arith.constant dense<0.000000e+00> : vector<3x64xf32>
    %41 = tpu.matmul %38, %40, %cst_34 {dimension_numbers = #tpu.dot_dimension_numbers<[1], [0], [0], [1], [0, 0, 1, 1], [], []>} : vector<3x64xbf16>, vector<64x64xbf16>, vector<3x64xf32> -> vector<3x64xf32>
    %42 = arith.addf %36, %41 : vector<3x64xf32>
    %c0_35 = arith.constant 0 : index
    %c14 = arith.constant 14 : index
    %c0_36 = arith.constant 0 : index
    %43 = vector.load %arg1[%c0_35, %c14, %c0_36] : memref<1x25x64xbf16, #tpu.memory_space<vmem>>, vector<1x3x64xbf16>
    %44 = vector.shape_cast %43 : vector<1x3x64xbf16> to vector<3x64xbf16>
    %c7_37 = arith.constant 7 : index
    %c0_38 = arith.constant 0 : index
    %c0_39 = arith.constant 0 : index
    %45 = vector.load %arg2[%c7_37, %c0_38, %c0_39] : memref<9x64x64xbf16, #tpu.memory_space<vmem>>, vector<1x64x64xbf16>
    %46 = vector.shape_cast %45 : vector<1x64x64xbf16> to vector<64x64xbf16>
    %cst_40 = arith.constant dense<0.000000e+00> : vector<3x64xf32>
    %47 = tpu.matmul %44, %46, %cst_40 {dimension_numbers = #tpu.dot_dimension_numbers<[1], [0], [0], [1], [0, 0, 1, 1], [], []>} : vector<3x64xbf16>, vector<64x64xbf16>, vector<3x64xf32> -> vector<3x64xf32>
    %48 = arith.addf %42, %47 : vector<3x64xf32>
    %c0_41 = arith.constant 0 : index
    %c15 = arith.constant 15 : index
    %c0_42 = arith.constant 0 : index
    %49 = vector.load %arg1[%c0_41, %c15, %c0_42] : memref<1x25x64xbf16, #tpu.memory_space<vmem>>, vector<1x3x64xbf16>
    %50 = vector.shape_cast %49 : vector<1x3x64xbf16> to vector<3x64xbf16>
    %c8_43 = arith.constant 8 : index
    %c0_44 = arith.constant 0 : index
    %c0_45 = arith.constant 0 : index
    %51 = vector.load %arg2[%c8_43, %c0_44, %c0_45] : memref<9x64x64xbf16, #tpu.memory_space<vmem>>, vector<1x64x64xbf16>
    %52 = vector.shape_cast %51 : vector<1x64x64xbf16> to vector<64x64xbf16>
    %cst_46 = arith.constant dense<0.000000e+00> : vector<3x64xf32>
    %53 = tpu.matmul %50, %52, %cst_46 {dimension_numbers = #tpu.dot_dimension_numbers<[1], [0], [0], [1], [0, 0, 1, 1], [], []>} : vector<3x64xbf16>, vector<64x64xbf16>, vector<3x64xf32> -> vector<3x64xf32>
    %54 = arith.addf %48, %53 : vector<3x64xf32>
    %c0_47 = arith.constant 0 : index
    %c0_48 = arith.constant 0 : index
    %c0_49 = arith.constant 0 : index
    %55 = vector.load %arg5[%c0_47, %c0_48, %c0_49] : memref<1x3x32xbf16, #tpu.memory_space<vmem>>, vector<1x3x32xbf16>
    %56 = vector.shape_cast %55 : vector<1x3x32xbf16> to vector<3x32xbf16>
    %c0_50 = arith.constant 0 : index
    %c0_51 = arith.constant 0 : index
    %57 = vector.load %arg6[%c0_50, %c0_51] : memref<32x64xbf16, #tpu.memory_space<vmem>>, vector<32x64xbf16>
    %cst_52 = arith.constant dense<0.000000e+00> : vector<3x64xf32>
    %58 = tpu.matmul %56, %57, %cst_52 {dimension_numbers = #tpu.dot_dimension_numbers<[1], [0], [0], [1], [0, 0, 1, 1], [], []>} : vector<3x32xbf16>, vector<32x64xbf16>, vector<3x64xf32> -> vector<3x64xf32>
    %59 = arith.addf %54, %58 : vector<3x64xf32>
    %c0_53 = arith.constant 0 : index
    %c0_54 = arith.constant 0 : index
    %60 = vector.load %arg3[%c0_53, %c0_54] : memref<1x64xf32, #tpu.memory_space<vmem>>, vector<1x64xf32>
    %61 = vector.broadcast %60 : vector<1x64xf32> to vector<3x64xf32>
    %62 = arith.addf %59, %61 : vector<3x64xf32>
    %cst_55 = arith.constant 0.000000e+00 : f32
    %63 = vector.broadcast %cst_55 : f32 to vector<3x64xf32>
    %64 = arith.maximumf %62, %63 : vector<3x64xf32>
    %c0_56 = arith.constant 0 : index
    %c0_57 = arith.constant 0 : index
    %65 = vector.load %arg4[%c0_56, %c0_57] : memref<3x1xf32, #tpu.memory_space<vmem>>, vector<3x1xf32>
    %66 = vector.broadcast %65 : vector<3x1xf32> to vector<3x64xf32>
    %67 = arith.mulf %64, %66 : vector<3x64xf32>
    %68 = arith.truncf %67 : vector<3x64xf32> to vector<3x64xbf16>
    %c0_58 = arith.constant 0 : index
    %c0_59 = arith.constant 0 : index
    %c0_60 = arith.constant 0 : index
    %69 = vector.load %arg7[%c0_58, %c0_59, %c0_60] : memref<1x3x64xbf16, #tpu.memory_space<vmem>>, vector<1x3x64xbf16>
    %70 = vector.shape_cast %69 : vector<1x3x64xbf16> to vector<3x64xbf16>
    %71 = vector.shape_cast %68 : vector<3x64xbf16> to vector<1x3x64xbf16>
    tpu.vector_store %arg7[%c0_58, %c0_59, %c0_60], %71 {strides = array<i32>} : memref<1x3x64xbf16, #tpu.memory_space<vmem>>, vector<1x3x64xbf16>,
    return
  }
  func.func @transform_0(%arg0: i32) -> (i32, i32, i32) {
    %c0_i32 = arith.constant 0 : i32
    %c0_i32_0 = arith.constant 0 : i32
    %c0_i32_1 = arith.constant 0 : i32
    return %arg0, %c0_i32, %c0_i32_0 : i32, i32, i32
  }
  func.func @transform_1(%arg0: i32) -> (i32, i32, i32) {
    %c0_i32 = arith.constant 0 : i32
    %c0_i32_0 = arith.constant 0 : i32
    %c0_i32_1 = arith.constant 0 : i32
    %c0_i32_2 = arith.constant 0 : i32
    return %c0_i32, %c0_i32_0, %c0_i32_1 : i32, i32, i32
  }
  func.func @transform_2(%arg0: i32) -> (i32, i32) {
    %c0_i32 = arith.constant 0 : i32
    %c0_i32_0 = arith.constant 0 : i32
    %c0_i32_1 = arith.constant 0 : i32
    return %c0_i32, %c0_i32_0 : i32, i32
  }
  func.func @transform_3(%arg0: i32) -> (i32, i32) {
    %c0_i32 = arith.constant 0 : i32
    %c0_i32_0 = arith.constant 0 : i32
    %c0_i32_1 = arith.constant 0 : i32
    return %c0_i32, %c0_i32_0 : i32, i32
  }
  func.func @transform_4(%arg0: i32) -> (i32, i32, i32) {
    %c0_i32 = arith.constant 0 : i32
    %c0_i32_0 = arith.constant 0 : i32
    %c0_i32_1 = arith.constant 0 : i32
    return %arg0, %c0_i32, %c0_i32_0 : i32, i32, i32
  }
  func.func @transform_5(%arg0: i32) -> (i32, i32) {
    %c0_i32 = arith.constant 0 : i32
    %c0_i32_0 = arith.constant 0 : i32
    %c0_i32_1 = arith.constant 0 : i32
    return %c0_i32, %c0_i32_0 : i32, i32
  }
  func.func @transform_6(%arg0: i32) -> (i32, i32, i32) {
    %c0_i32 = arith.constant 0 : i32
    %c0_i32_0 = arith.constant 0 : i32
    %c0_i32_1 = arith.constant 0 : i32
    return %arg0, %c0_i32, %c0_i32_0 : i32, i32, i32
  }
}

module attributes {stable_mosaic.version = 11 : i64} {
  func.func @_conv_tap_kernel(%arg0: i32, %arg1: memref<1x25x64xbf16, #tpu.memory_space<vmem>>, %arg2: memref<9x64x64xbf16, #tpu.memory_space<vmem>>, %arg3: memref<1x64xf32, #tpu.memory_space<vmem>>, %arg4: memref<3x1xf32, #tpu.memory_space<vmem>>, %arg5: memref<1x3x64xbf16, #tpu.memory_space<vmem>>) attributes {dimension_semantics = [#tpu.dimension_semantics<parallel>], iteration_bounds = array<i64: 2>, scalar_prefetch = 0 : i64, scratch_operands = 0 : i64, tpu.core_type = #tpu.core_type<tc>, window_params = [{transform_indices = @transform_0, window_bounds = array<i64: 1, 25, 64>}, {pipeline_mode = #tpu.pipeline_mode<synchronous>, transform_indices = @transform_1, window_bounds = array<i64: 9, 64, 64>}, {pipeline_mode = #tpu.pipeline_mode<synchronous>, transform_indices = @transform_2, window_bounds = array<i64: 1, 64>}, {pipeline_mode = #tpu.pipeline_mode<synchronous>, transform_indices = @transform_3, window_bounds = array<i64: 3, 1>}, {transform_indices = @transform_4, window_bounds = array<i64: 1, 3, 64>}]} {
    %cst = arith.constant 0.000000e+00 : f32
    %0 = vector.broadcast %cst : f32 to vector<3x64xf32>
    %c0 = arith.constant 0 : index
    %c7 = arith.constant 7 : index
    %c0_0 = arith.constant 0 : index
    %1 = vector.load %arg1[%c0, %c7, %c0_0] : memref<1x25x64xbf16, #tpu.memory_space<vmem>>, vector<1x3x64xbf16>
    %2 = vector.shape_cast %1 : vector<1x3x64xbf16> to vector<3x64xbf16>
    %c0_1 = arith.constant 0 : index
    %c0_2 = arith.constant 0 : index
    %c0_3 = arith.constant 0 : index
    %3 = vector.load %arg2[%c0_1, %c0_2, %c0_3] : memref<9x64x64xbf16, #tpu.memory_space<vmem>>, vector<1x64x64xbf16>
    %4 = vector.shape_cast %3 : vector<1x64x64xbf16> to vector<64x64xbf16>
    %cst_4 = arith.constant dense<0.000000e+00> : vector<3x64xf32>
    %5 = tpu.matmul %2, %4, %cst_4 {dimension_numbers = #tpu.dot_dimension_numbers<[1], [0], [0], [1], [0, 0, 1, 1], [], []>} : vector<3x64xbf16>, vector<64x64xbf16>, vector<3x64xf32> -> vector<3x64xf32>
    %6 = arith.addf %0, %5 : vector<3x64xf32>
    %c0_5 = arith.constant 0 : index
    %c8 = arith.constant 8 : index
    %c0_6 = arith.constant 0 : index
    %7 = vector.load %arg1[%c0_5, %c8, %c0_6] : memref<1x25x64xbf16, #tpu.memory_space<vmem>>, vector<1x3x64xbf16>
    %8 = vector.shape_cast %7 : vector<1x3x64xbf16> to vector<3x64xbf16>
    %c1 = arith.constant 1 : index
    %c0_7 = arith.constant 0 : index
    %c0_8 = arith.constant 0 : index
    %9 = vector.load %arg2[%c1, %c0_7, %c0_8] : memref<9x64x64xbf16, #tpu.memory_space<vmem>>, vector<1x64x64xbf16>
    %10 = vector.shape_cast %9 : vector<1x64x64xbf16> to vector<64x64xbf16>
    %cst_9 = arith.constant dense<0.000000e+00> : vector<3x64xf32>
    %11 = tpu.matmul %8, %10, %cst_9 {dimension_numbers = #tpu.dot_dimension_numbers<[1], [0], [0], [1], [0, 0, 1, 1], [], []>} : vector<3x64xbf16>, vector<64x64xbf16>, vector<3x64xf32> -> vector<3x64xf32>
    %12 = arith.addf %6, %11 : vector<3x64xf32>
    %c0_10 = arith.constant 0 : index
    %c9 = arith.constant 9 : index
    %c0_11 = arith.constant 0 : index
    %13 = vector.load %arg1[%c0_10, %c9, %c0_11] : memref<1x25x64xbf16, #tpu.memory_space<vmem>>, vector<1x3x64xbf16>
    %14 = vector.shape_cast %13 : vector<1x3x64xbf16> to vector<3x64xbf16>
    %c2 = arith.constant 2 : index
    %c0_12 = arith.constant 0 : index
    %c0_13 = arith.constant 0 : index
    %15 = vector.load %arg2[%c2, %c0_12, %c0_13] : memref<9x64x64xbf16, #tpu.memory_space<vmem>>, vector<1x64x64xbf16>
    %16 = vector.shape_cast %15 : vector<1x64x64xbf16> to vector<64x64xbf16>
    %cst_14 = arith.constant dense<0.000000e+00> : vector<3x64xf32>
    %17 = tpu.matmul %14, %16, %cst_14 {dimension_numbers = #tpu.dot_dimension_numbers<[1], [0], [0], [1], [0, 0, 1, 1], [], []>} : vector<3x64xbf16>, vector<64x64xbf16>, vector<3x64xf32> -> vector<3x64xf32>
    %18 = arith.addf %12, %17 : vector<3x64xf32>
    %c0_15 = arith.constant 0 : index
    %c10 = arith.constant 10 : index
    %c0_16 = arith.constant 0 : index
    %19 = vector.load %arg1[%c0_15, %c10, %c0_16] : memref<1x25x64xbf16, #tpu.memory_space<vmem>>, vector<1x3x64xbf16>
    %20 = vector.shape_cast %19 : vector<1x3x64xbf16> to vector<3x64xbf16>
    %c3 = arith.constant 3 : index
    %c0_17 = arith.constant 0 : index
    %c0_18 = arith.constant 0 : index
    %21 = vector.load %arg2[%c3, %c0_17, %c0_18] : memref<9x64x64xbf16, #tpu.memory_space<vmem>>, vector<1x64x64xbf16>
    %22 = vector.shape_cast %21 : vector<1x64x64xbf16> to vector<64x64xbf16>
    %cst_19 = arith.constant dense<0.000000e+00> : vector<3x64xf32>
    %23 = tpu.matmul %20, %22, %cst_19 {dimension_numbers = #tpu.dot_dimension_numbers<[1], [0], [0], [1], [0, 0, 1, 1], [], []>} : vector<3x64xbf16>, vector<64x64xbf16>, vector<3x64xf32> -> vector<3x64xf32>
    %24 = arith.addf %18, %23 : vector<3x64xf32>
    %c0_20 = arith.constant 0 : index
    %c11 = arith.constant 11 : index
    %c0_21 = arith.constant 0 : index
    %25 = vector.load %arg1[%c0_20, %c11, %c0_21] : memref<1x25x64xbf16, #tpu.memory_space<vmem>>, vector<1x3x64xbf16>
    %26 = vector.shape_cast %25 : vector<1x3x64xbf16> to vector<3x64xbf16>
    %c4 = arith.constant 4 : index
    %c0_22 = arith.constant 0 : index
    %c0_23 = arith.constant 0 : index
    %27 = vector.load %arg2[%c4, %c0_22, %c0_23] : memref<9x64x64xbf16, #tpu.memory_space<vmem>>, vector<1x64x64xbf16>
    %28 = vector.shape_cast %27 : vector<1x64x64xbf16> to vector<64x64xbf16>
    %cst_24 = arith.constant dense<0.000000e+00> : vector<3x64xf32>
    %29 = tpu.matmul %26, %28, %cst_24 {dimension_numbers = #tpu.dot_dimension_numbers<[1], [0], [0], [1], [0, 0, 1, 1], [], []>} : vector<3x64xbf16>, vector<64x64xbf16>, vector<3x64xf32> -> vector<3x64xf32>
    %30 = arith.addf %24, %29 : vector<3x64xf32>
    %c0_25 = arith.constant 0 : index
    %c12 = arith.constant 12 : index
    %c0_26 = arith.constant 0 : index
    %31 = vector.load %arg1[%c0_25, %c12, %c0_26] : memref<1x25x64xbf16, #tpu.memory_space<vmem>>, vector<1x3x64xbf16>
    %32 = vector.shape_cast %31 : vector<1x3x64xbf16> to vector<3x64xbf16>
    %c5 = arith.constant 5 : index
    %c0_27 = arith.constant 0 : index
    %c0_28 = arith.constant 0 : index
    %33 = vector.load %arg2[%c5, %c0_27, %c0_28] : memref<9x64x64xbf16, #tpu.memory_space<vmem>>, vector<1x64x64xbf16>
    %34 = vector.shape_cast %33 : vector<1x64x64xbf16> to vector<64x64xbf16>
    %cst_29 = arith.constant dense<0.000000e+00> : vector<3x64xf32>
    %35 = tpu.matmul %32, %34, %cst_29 {dimension_numbers = #tpu.dot_dimension_numbers<[1], [0], [0], [1], [0, 0, 1, 1], [], []>} : vector<3x64xbf16>, vector<64x64xbf16>, vector<3x64xf32> -> vector<3x64xf32>
    %36 = arith.addf %30, %35 : vector<3x64xf32>
    %c0_30 = arith.constant 0 : index
    %c13 = arith.constant 13 : index
    %c0_31 = arith.constant 0 : index
    %37 = vector.load %arg1[%c0_30, %c13, %c0_31] : memref<1x25x64xbf16, #tpu.memory_space<vmem>>, vector<1x3x64xbf16>
    %38 = vector.shape_cast %37 : vector<1x3x64xbf16> to vector<3x64xbf16>
    %c6 = arith.constant 6 : index
    %c0_32 = arith.constant 0 : index
    %c0_33 = arith.constant 0 : index
    %39 = vector.load %arg2[%c6, %c0_32, %c0_33] : memref<9x64x64xbf16, #tpu.memory_space<vmem>>, vector<1x64x64xbf16>
    %40 = vector.shape_cast %39 : vector<1x64x64xbf16> to vector<64x64xbf16>
    %cst_34 = arith.constant dense<0.000000e+00> : vector<3x64xf32>
    %41 = tpu.matmul %38, %40, %cst_34 {dimension_numbers = #tpu.dot_dimension_numbers<[1], [0], [0], [1], [0, 0, 1, 1], [], []>} : vector<3x64xbf16>, vector<64x64xbf16>, vector<3x64xf32> -> vector<3x64xf32>
    %42 = arith.addf %36, %41 : vector<3x64xf32>
    %c0_35 = arith.constant 0 : index
    %c14 = arith.constant 14 : index
    %c0_36 = arith.constant 0 : index
    %43 = vector.load %arg1[%c0_35, %c14, %c0_36] : memref<1x25x64xbf16, #tpu.memory_space<vmem>>, vector<1x3x64xbf16>
    %44 = vector.shape_cast %43 : vector<1x3x64xbf16> to vector<3x64xbf16>
    %c7_37 = arith.constant 7 : index
    %c0_38 = arith.constant 0 : index
    %c0_39 = arith.constant 0 : index
    %45 = vector.load %arg2[%c7_37, %c0_38, %c0_39] : memref<9x64x64xbf16, #tpu.memory_space<vmem>>, vector<1x64x64xbf16>
    %46 = vector.shape_cast %45 : vector<1x64x64xbf16> to vector<64x64xbf16>
    %cst_40 = arith.constant dense<0.000000e+00> : vector<3x64xf32>
    %47 = tpu.matmul %44, %46, %cst_40 {dimension_numbers = #tpu.dot_dimension_numbers<[1], [0], [0], [1], [0, 0, 1, 1], [], []>} : vector<3x64xbf16>, vector<64x64xbf16>, vector<3x64xf32> -> vector<3x64xf32>
    %48 = arith.addf %42, %47 : vector<3x64xf32>
    %c0_41 = arith.constant 0 : index
    %c15 = arith.constant 15 : index
    %c0_42 = arith.constant 0 : index
    %49 = vector.load %arg1[%c0_41, %c15, %c0_42] : memref<1x25x64xbf16, #tpu.memory_space<vmem>>, vector<1x3x64xbf16>
    %50 = vector.shape_cast %49 : vector<1x3x64xbf16> to vector<3x64xbf16>
    %c8_43 = arith.constant 8 : index
    %c0_44 = arith.constant 0 : index
    %c0_45 = arith.constant 0 : index
    %51 = vector.load %arg2[%c8_43, %c0_44, %c0_45] : memref<9x64x64xbf16, #tpu.memory_space<vmem>>, vector<1x64x64xbf16>
    %52 = vector.shape_cast %51 : vector<1x64x64xbf16> to vector<64x64xbf16>
    %cst_46 = arith.constant dense<0.000000e+00> : vector<3x64xf32>
    %53 = tpu.matmul %50, %52, %cst_46 {dimension_numbers = #tpu.dot_dimension_numbers<[1], [0], [0], [1], [0, 0, 1, 1], [], []>} : vector<3x64xbf16>, vector<64x64xbf16>, vector<3x64xf32> -> vector<3x64xf32>
    %54 = arith.addf %48, %53 : vector<3x64xf32>
    %c0_47 = arith.constant 0 : index
    %c0_48 = arith.constant 0 : index
    %55 = vector.load %arg3[%c0_47, %c0_48] : memref<1x64xf32, #tpu.memory_space<vmem>>, vector<1x64xf32>
    %56 = vector.broadcast %55 : vector<1x64xf32> to vector<3x64xf32>
    %57 = arith.addf %54, %56 : vector<3x64xf32>
    %cst_49 = arith.constant 0.000000e+00 : f32
    %58 = vector.broadcast %cst_49 : f32 to vector<3x64xf32>
    %59 = arith.maximumf %57, %58 : vector<3x64xf32>
    %c0_50 = arith.constant 0 : index
    %c0_51 = arith.constant 0 : index
    %60 = vector.load %arg4[%c0_50, %c0_51] : memref<3x1xf32, #tpu.memory_space<vmem>>, vector<3x1xf32>
    %61 = vector.broadcast %60 : vector<3x1xf32> to vector<3x64xf32>
    %62 = arith.mulf %59, %61 : vector<3x64xf32>
    %63 = arith.truncf %62 : vector<3x64xf32> to vector<3x64xbf16>
    %c0_52 = arith.constant 0 : index
    %c0_53 = arith.constant 0 : index
    %c0_54 = arith.constant 0 : index
    %64 = vector.load %arg5[%c0_52, %c0_53, %c0_54] : memref<1x3x64xbf16, #tpu.memory_space<vmem>>, vector<1x3x64xbf16>
    %65 = vector.shape_cast %64 : vector<1x3x64xbf16> to vector<3x64xbf16>
    %66 = vector.shape_cast %63 : vector<3x64xbf16> to vector<1x3x64xbf16>
    tpu.vector_store %arg5[%c0_52, %c0_53, %c0_54], %66 {strides = array<i32>} : memref<1x3x64xbf16, #tpu.memory_space<vmem>>, vector<1x3x64xbf16>,
    return
  }
  func.func @transform_0(%arg0: i32) -> (i32, i32, i32) {
    %c0_i32 = arith.constant 0 : i32
    %c0_i32_0 = arith.constant 0 : i32
    %c0_i32_1 = arith.constant 0 : i32
    return %arg0, %c0_i32, %c0_i32_0 : i32, i32, i32
  }
  func.func @transform_1(%arg0: i32) -> (i32, i32, i32) {
    %c0_i32 = arith.constant 0 : i32
    %c0_i32_0 = arith.constant 0 : i32
    %c0_i32_1 = arith.constant 0 : i32
    %c0_i32_2 = arith.constant 0 : i32
    return %c0_i32, %c0_i32_0, %c0_i32_1 : i32, i32, i32
  }
  func.func @transform_2(%arg0: i32) -> (i32, i32) {
    %c0_i32 = arith.constant 0 : i32
    %c0_i32_0 = arith.constant 0 : i32
    %c0_i32_1 = arith.constant 0 : i32
    return %c0_i32, %c0_i32_0 : i32, i32
  }
  func.func @transform_3(%arg0: i32) -> (i32, i32) {
    %c0_i32 = arith.constant 0 : i32
    %c0_i32_0 = arith.constant 0 : i32
    %c0_i32_1 = arith.constant 0 : i32
    return %c0_i32, %c0_i32_0 : i32, i32
  }
  func.func @transform_4(%arg0: i32) -> (i32, i32, i32) {
    %c0_i32 = arith.constant 0 : i32
    %c0_i32_0 = arith.constant 0 : i32
    %c0_i32_1 = arith.constant 0 : i32
    return %arg0, %c0_i32, %c0_i32_0 : i32, i32, i32
  }
}

module attributes {stable_mosaic.version = 11 : i64} {
  func.func @_conv_tap_res_kernel(%arg0: i32, %arg1: memref<1x25x64xbf16, #tpu.memory_space<vmem>>, %arg2: memref<9x64x64xbf16, #tpu.memory_space<vmem>>, %arg3: memref<1x64xf32, #tpu.memory_space<vmem>>, %arg4: memref<3x1xf32, #tpu.memory_space<vmem>>, %arg5: memref<1x3x64xbf16, #tpu.memory_space<vmem>>, %arg6: memref<1x3x64xbf16, #tpu.memory_space<vmem>>) attributes {dimension_semantics = [#tpu.dimension_semantics<parallel>], iteration_bounds = array<i64: 2>, scalar_prefetch = 0 : i64, scratch_operands = 0 : i64, tpu.core_type = #tpu.core_type<tc>, window_params = [{transform_indices = @transform_0, window_bounds = array<i64: 1, 25, 64>}, {pipeline_mode = #tpu.pipeline_mode<synchronous>, transform_indices = @transform_1, window_bounds = array<i64: 9, 64, 64>}, {pipeline_mode = #tpu.pipeline_mode<synchronous>, transform_indices = @transform_2, window_bounds = array<i64: 1, 64>}, {pipeline_mode = #tpu.pipeline_mode<synchronous>, transform_indices = @transform_3, window_bounds = array<i64: 3, 1>}, {transform_indices = @transform_4, window_bounds = array<i64: 1, 3, 64>}, {transform_indices = @transform_5, window_bounds = array<i64: 1, 3, 64>}]} {
    %cst = arith.constant 0.000000e+00 : f32
    %0 = vector.broadcast %cst : f32 to vector<3x64xf32>
    %c0 = arith.constant 0 : index
    %c7 = arith.constant 7 : index
    %c0_0 = arith.constant 0 : index
    %1 = vector.load %arg1[%c0, %c7, %c0_0] : memref<1x25x64xbf16, #tpu.memory_space<vmem>>, vector<1x3x64xbf16>
    %2 = vector.shape_cast %1 : vector<1x3x64xbf16> to vector<3x64xbf16>
    %c0_1 = arith.constant 0 : index
    %c0_2 = arith.constant 0 : index
    %c0_3 = arith.constant 0 : index
    %3 = vector.load %arg2[%c0_1, %c0_2, %c0_3] : memref<9x64x64xbf16, #tpu.memory_space<vmem>>, vector<1x64x64xbf16>
    %4 = vector.shape_cast %3 : vector<1x64x64xbf16> to vector<64x64xbf16>
    %cst_4 = arith.constant dense<0.000000e+00> : vector<3x64xf32>
    %5 = tpu.matmul %2, %4, %cst_4 {dimension_numbers = #tpu.dot_dimension_numbers<[1], [0], [0], [1], [0, 0, 1, 1], [], []>} : vector<3x64xbf16>, vector<64x64xbf16>, vector<3x64xf32> -> vector<3x64xf32>
    %6 = arith.addf %0, %5 : vector<3x64xf32>
    %c0_5 = arith.constant 0 : index
    %c8 = arith.constant 8 : index
    %c0_6 = arith.constant 0 : index
    %7 = vector.load %arg1[%c0_5, %c8, %c0_6] : memref<1x25x64xbf16, #tpu.memory_space<vmem>>, vector<1x3x64xbf16>
    %8 = vector.shape_cast %7 : vector<1x3x64xbf16> to vector<3x64xbf16>
    %c1 = arith.constant 1 : index
    %c0_7 = arith.constant 0 : index
    %c0_8 = arith.constant 0 : index
    %9 = vector.load %arg2[%c1, %c0_7, %c0_8] : memref<9x64x64xbf16, #tpu.memory_space<vmem>>, vector<1x64x64xbf16>
    %10 = vector.shape_cast %9 : vector<1x64x64xbf16> to vector<64x64xbf16>
    %cst_9 = arith.constant dense<0.000000e+00> : vector<3x64xf32>
    %11 = tpu.matmul %8, %10, %cst_9 {dimension_numbers = #tpu.dot_dimension_numbers<[1], [0], [0], [1], [0, 0, 1, 1], [], []>} : vector<3x64xbf16>, vector<64x64xbf16>, vector<3x64xf32> -> vector<3x64xf32>
    %12 = arith.addf %6, %11 : vector<3x64xf32>
    %c0_10 = arith.constant 0 : index
    %c9 = arith.constant 9 : index
    %c0_11 = arith.constant 0 : index
    %13 = vector.load %arg1[%c0_10, %c9, %c0_11] : memref<1x25x64xbf16, #tpu.memory_space<vmem>>, vector<1x3x64xbf16>
    %14 = vector.shape_cast %13 : vector<1x3x64xbf16> to vector<3x64xbf16>
    %c2 = arith.constant 2 : index
    %c0_12 = arith.constant 0 : index
    %c0_13 = arith.constant 0 : index
    %15 = vector.load %arg2[%c2, %c0_12, %c0_13] : memref<9x64x64xbf16, #tpu.memory_space<vmem>>, vector<1x64x64xbf16>
    %16 = vector.shape_cast %15 : vector<1x64x64xbf16> to vector<64x64xbf16>
    %cst_14 = arith.constant dense<0.000000e+00> : vector<3x64xf32>
    %17 = tpu.matmul %14, %16, %cst_14 {dimension_numbers = #tpu.dot_dimension_numbers<[1], [0], [0], [1], [0, 0, 1, 1], [], []>} : vector<3x64xbf16>, vector<64x64xbf16>, vector<3x64xf32> -> vector<3x64xf32>
    %18 = arith.addf %12, %17 : vector<3x64xf32>
    %c0_15 = arith.constant 0 : index
    %c10 = arith.constant 10 : index
    %c0_16 = arith.constant 0 : index
    %19 = vector.load %arg1[%c0_15, %c10, %c0_16] : memref<1x25x64xbf16, #tpu.memory_space<vmem>>, vector<1x3x64xbf16>
    %20 = vector.shape_cast %19 : vector<1x3x64xbf16> to vector<3x64xbf16>
    %c3 = arith.constant 3 : index
    %c0_17 = arith.constant 0 : index
    %c0_18 = arith.constant 0 : index
    %21 = vector.load %arg2[%c3, %c0_17, %c0_18] : memref<9x64x64xbf16, #tpu.memory_space<vmem>>, vector<1x64x64xbf16>
    %22 = vector.shape_cast %21 : vector<1x64x64xbf16> to vector<64x64xbf16>
    %cst_19 = arith.constant dense<0.000000e+00> : vector<3x64xf32>
    %23 = tpu.matmul %20, %22, %cst_19 {dimension_numbers = #tpu.dot_dimension_numbers<[1], [0], [0], [1], [0, 0, 1, 1], [], []>} : vector<3x64xbf16>, vector<64x64xbf16>, vector<3x64xf32> -> vector<3x64xf32>
    %24 = arith.addf %18, %23 : vector<3x64xf32>
    %c0_20 = arith.constant 0 : index
    %c11 = arith.constant 11 : index
    %c0_21 = arith.constant 0 : index
    %25 = vector.load %arg1[%c0_20, %c11, %c0_21] : memref<1x25x64xbf16, #tpu.memory_space<vmem>>, vector<1x3x64xbf16>
    %26 = vector.shape_cast %25 : vector<1x3x64xbf16> to vector<3x64xbf16>
    %c4 = arith.constant 4 : index
    %c0_22 = arith.constant 0 : index
    %c0_23 = arith.constant 0 : index
    %27 = vector.load %arg2[%c4, %c0_22, %c0_23] : memref<9x64x64xbf16, #tpu.memory_space<vmem>>, vector<1x64x64xbf16>
    %28 = vector.shape_cast %27 : vector<1x64x64xbf16> to vector<64x64xbf16>
    %cst_24 = arith.constant dense<0.000000e+00> : vector<3x64xf32>
    %29 = tpu.matmul %26, %28, %cst_24 {dimension_numbers = #tpu.dot_dimension_numbers<[1], [0], [0], [1], [0, 0, 1, 1], [], []>} : vector<3x64xbf16>, vector<64x64xbf16>, vector<3x64xf32> -> vector<3x64xf32>
    %30 = arith.addf %24, %29 : vector<3x64xf32>
    %c0_25 = arith.constant 0 : index
    %c12 = arith.constant 12 : index
    %c0_26 = arith.constant 0 : index
    %31 = vector.load %arg1[%c0_25, %c12, %c0_26] : memref<1x25x64xbf16, #tpu.memory_space<vmem>>, vector<1x3x64xbf16>
    %32 = vector.shape_cast %31 : vector<1x3x64xbf16> to vector<3x64xbf16>
    %c5 = arith.constant 5 : index
    %c0_27 = arith.constant 0 : index
    %c0_28 = arith.constant 0 : index
    %33 = vector.load %arg2[%c5, %c0_27, %c0_28] : memref<9x64x64xbf16, #tpu.memory_space<vmem>>, vector<1x64x64xbf16>
    %34 = vector.shape_cast %33 : vector<1x64x64xbf16> to vector<64x64xbf16>
    %cst_29 = arith.constant dense<0.000000e+00> : vector<3x64xf32>
    %35 = tpu.matmul %32, %34, %cst_29 {dimension_numbers = #tpu.dot_dimension_numbers<[1], [0], [0], [1], [0, 0, 1, 1], [], []>} : vector<3x64xbf16>, vector<64x64xbf16>, vector<3x64xf32> -> vector<3x64xf32>
    %36 = arith.addf %30, %35 : vector<3x64xf32>
    %c0_30 = arith.constant 0 : index
    %c13 = arith.constant 13 : index
    %c0_31 = arith.constant 0 : index
    %37 = vector.load %arg1[%c0_30, %c13, %c0_31] : memref<1x25x64xbf16, #tpu.memory_space<vmem>>, vector<1x3x64xbf16>
    %38 = vector.shape_cast %37 : vector<1x3x64xbf16> to vector<3x64xbf16>
    %c6 = arith.constant 6 : index
    %c0_32 = arith.constant 0 : index
    %c0_33 = arith.constant 0 : index
    %39 = vector.load %arg2[%c6, %c0_32, %c0_33] : memref<9x64x64xbf16, #tpu.memory_space<vmem>>, vector<1x64x64xbf16>
    %40 = vector.shape_cast %39 : vector<1x64x64xbf16> to vector<64x64xbf16>
    %cst_34 = arith.constant dense<0.000000e+00> : vector<3x64xf32>
    %41 = tpu.matmul %38, %40, %cst_34 {dimension_numbers = #tpu.dot_dimension_numbers<[1], [0], [0], [1], [0, 0, 1, 1], [], []>} : vector<3x64xbf16>, vector<64x64xbf16>, vector<3x64xf32> -> vector<3x64xf32>
    %42 = arith.addf %36, %41 : vector<3x64xf32>
    %c0_35 = arith.constant 0 : index
    %c14 = arith.constant 14 : index
    %c0_36 = arith.constant 0 : index
    %43 = vector.load %arg1[%c0_35, %c14, %c0_36] : memref<1x25x64xbf16, #tpu.memory_space<vmem>>, vector<1x3x64xbf16>
    %44 = vector.shape_cast %43 : vector<1x3x64xbf16> to vector<3x64xbf16>
    %c7_37 = arith.constant 7 : index
    %c0_38 = arith.constant 0 : index
    %c0_39 = arith.constant 0 : index
    %45 = vector.load %arg2[%c7_37, %c0_38, %c0_39] : memref<9x64x64xbf16, #tpu.memory_space<vmem>>, vector<1x64x64xbf16>
    %46 = vector.shape_cast %45 : vector<1x64x64xbf16> to vector<64x64xbf16>
    %cst_40 = arith.constant dense<0.000000e+00> : vector<3x64xf32>
    %47 = tpu.matmul %44, %46, %cst_40 {dimension_numbers = #tpu.dot_dimension_numbers<[1], [0], [0], [1], [0, 0, 1, 1], [], []>} : vector<3x64xbf16>, vector<64x64xbf16>, vector<3x64xf32> -> vector<3x64xf32>
    %48 = arith.addf %42, %47 : vector<3x64xf32>
    %c0_41 = arith.constant 0 : index
    %c15 = arith.constant 15 : index
    %c0_42 = arith.constant 0 : index
    %49 = vector.load %arg1[%c0_41, %c15, %c0_42] : memref<1x25x64xbf16, #tpu.memory_space<vmem>>, vector<1x3x64xbf16>
    %50 = vector.shape_cast %49 : vector<1x3x64xbf16> to vector<3x64xbf16>
    %c8_43 = arith.constant 8 : index
    %c0_44 = arith.constant 0 : index
    %c0_45 = arith.constant 0 : index
    %51 = vector.load %arg2[%c8_43, %c0_44, %c0_45] : memref<9x64x64xbf16, #tpu.memory_space<vmem>>, vector<1x64x64xbf16>
    %52 = vector.shape_cast %51 : vector<1x64x64xbf16> to vector<64x64xbf16>
    %cst_46 = arith.constant dense<0.000000e+00> : vector<3x64xf32>
    %53 = tpu.matmul %50, %52, %cst_46 {dimension_numbers = #tpu.dot_dimension_numbers<[1], [0], [0], [1], [0, 0, 1, 1], [], []>} : vector<3x64xbf16>, vector<64x64xbf16>, vector<3x64xf32> -> vector<3x64xf32>
    %54 = arith.addf %48, %53 : vector<3x64xf32>
    %c0_47 = arith.constant 0 : index
    %c0_48 = arith.constant 0 : index
    %55 = vector.load %arg3[%c0_47, %c0_48] : memref<1x64xf32, #tpu.memory_space<vmem>>, vector<1x64xf32>
    %56 = vector.broadcast %55 : vector<1x64xf32> to vector<3x64xf32>
    %57 = arith.addf %54, %56 : vector<3x64xf32>
    %c0_49 = arith.constant 0 : index
    %c0_50 = arith.constant 0 : index
    %c0_51 = arith.constant 0 : index
    %58 = vector.load %arg5[%c0_49, %c0_50, %c0_51] : memref<1x3x64xbf16, #tpu.memory_space<vmem>>, vector<1x3x64xbf16>
    %59 = vector.shape_cast %58 : vector<1x3x64xbf16> to vector<3x64xbf16>
    %60 = arith.extf %59 : vector<3x64xbf16> to vector<3x64xf32>
    %61 = arith.addf %57, %60 : vector<3x64xf32>
    %cst_52 = arith.constant 0.000000e+00 : f32
    %62 = vector.broadcast %cst_52 : f32 to vector<3x64xf32>
    %63 = arith.maximumf %61, %62 : vector<3x64xf32>
    %c0_53 = arith.constant 0 : index
    %c0_54 = arith.constant 0 : index
    %64 = vector.load %arg4[%c0_53, %c0_54] : memref<3x1xf32, #tpu.memory_space<vmem>>, vector<3x1xf32>
    %65 = vector.broadcast %64 : vector<3x1xf32> to vector<3x64xf32>
    %66 = arith.mulf %63, %65 : vector<3x64xf32>
    %67 = arith.truncf %66 : vector<3x64xf32> to vector<3x64xbf16>
    %c0_55 = arith.constant 0 : index
    %c0_56 = arith.constant 0 : index
    %c0_57 = arith.constant 0 : index
    %68 = vector.load %arg6[%c0_55, %c0_56, %c0_57] : memref<1x3x64xbf16, #tpu.memory_space<vmem>>, vector<1x3x64xbf16>
    %69 = vector.shape_cast %68 : vector<1x3x64xbf16> to vector<3x64xbf16>
    %70 = vector.shape_cast %67 : vector<3x64xbf16> to vector<1x3x64xbf16>
    tpu.vector_store %arg6[%c0_55, %c0_56, %c0_57], %70 {strides = array<i32>} : memref<1x3x64xbf16, #tpu.memory_space<vmem>>, vector<1x3x64xbf16>,
    return
  }
  func.func @transform_0(%arg0: i32) -> (i32, i32, i32) {
    %c0_i32 = arith.constant 0 : i32
    %c0_i32_0 = arith.constant 0 : i32
    %c0_i32_1 = arith.constant 0 : i32
    return %arg0, %c0_i32, %c0_i32_0 : i32, i32, i32
  }
  func.func @transform_1(%arg0: i32) -> (i32, i32, i32) {
    %c0_i32 = arith.constant 0 : i32
    %c0_i32_0 = arith.constant 0 : i32
    %c0_i32_1 = arith.constant 0 : i32
    %c0_i32_2 = arith.constant 0 : i32
    return %c0_i32, %c0_i32_0, %c0_i32_1 : i32, i32, i32
  }
  func.func @transform_2(%arg0: i32) -> (i32, i32) {
    %c0_i32 = arith.constant 0 : i32
    %c0_i32_0 = arith.constant 0 : i32
    %c0_i32_1 = arith.constant 0 : i32
    return %c0_i32, %c0_i32_0 : i32, i32
  }
  func.func @transform_3(%arg0: i32) -> (i32, i32) {
    %c0_i32 = arith.constant 0 : i32
    %c0_i32_0 = arith.constant 0 : i32
    %c0_i32_1 = arith.constant 0 : i32
    return %c0_i32, %c0_i32_0 : i32, i32
  }
  func.func @transform_4(%arg0: i32) -> (i32, i32, i32) {
    %c0_i32 = arith.constant 0 : i32
    %c0_i32_0 = arith.constant 0 : i32
    %c0_i32_1 = arith.constant 0 : i32
    return %arg0, %c0_i32, %c0_i32_0 : i32, i32, i32
  }
  func.func @transform_5(%arg0: i32) -> (i32, i32, i32) {
    %c0_i32 = arith.constant 0 : i32
    %c0_i32_0 = arith.constant 0 : i32
    %c0_i32_1 = arith.constant 0 : i32
    return %arg0, %c0_i32, %c0_i32_0 : i32, i32, i32
  }
}

</mosaic_0001>

<bundles_post_ra>
// kernel: forward.17
= control target key start
LH: loop header
LB: loop body
LE: loop exit
PB: predicated region body
PF: predicated region fallthrough
CT: control target
= control target key end

     0   :  { %s1827_s12 = smov 0   ;;  %s2117_s0 = inlined_call_operand.vmem [shape: bf16[512,392], index: 0, kind: input, shape index: {}]   ;;  %s2118_s1 = inlined_call_operand.vmem [shape: bf16[392,8], index: 1, kind: input, shape index: {}]   ;;  %s2119_s2 = inlined_call_operand.vmem [shape: f32[1,8], index: 2, kind: input, shape index: {}]   ;;  %s2120_s3 = inlined_call_operand.vmem [shape: bf16[512,8], index: 3, kind: output, shape index: {}]  }
   0x1 LB: > { %s1373_s13 = sadd.s32 4294967295, %s1804_s12   ;;  %p1377_p0 = scmp.ge.s32.totalorder %s1804_s12, 1  ;;  %s1804_s12 = sphi %s1827_s12, %s13_s12  }
   0x2   : > { %p139_p1 = scmp.lt.s32.totalorder %s1804_s12, 3 }
   0x4   : > { %p140_p2 = pnand %p1377_p0, %p139_p1 }
   0x5   : > { %v1677_v0 = vld [vmem:[%s2118_s1 + $0x40] sm:$0xff] (!%p140_p2)   ;;  %v1806_v1 = vmov (!%p140_p2), 0   ;;  %v1680_v4 = vld [vmem:[%s2118_s1 + $0x48] sm:$0xff] (!%p140_p2)   ;;  %v1683_v7 = vld [vmem:[%s2118_s1 + $0x50] sm:$0xff] (!%p140_p2)   ;;  %s1378_s5 = sshll.u32 (!%p140_p2), %s1373_s13, 5  ;;  %vm749_vm0 = vcmask (!%p140_p2), 64512  }
   0x6   : > { %143 = sbr.rel (%p140_p2) target bundleno = 385 (0x181), region = 32  ;;  %963 = vmatprep.subr.bf16.mxu1 (!%p140_p2), %v1806_v1  ;;  %v1678_v2 = vld [vmem:[%s2118_s1 + $0x80] sm:$0xff] (!%p140_p2)   ;;  %1556 = vmatprep.subr.bf16.mxu0 (!%p140_p2), %v1677_v0  ;;  %v1681_v5 = vld [vmem:[%s2118_s1 + $0x88] sm:$0xff] (!%p140_p2)   ;;  %v1684_v8 = vld [vmem:[%s2118_s1 + $0x90] sm:$0xff] (!%p140_p2)   ;;  %p165_p3 = scmp.lt.s32.totalorder (!%p140_p2), %s1378_s5, 63  ;;  %vm798_vm1 = vcmask (!%p140_p2), 1043456  }
   0x7   : > { %v1679_v3 = vld [vmem:[%s2118_s1] sm:$0xff] (!%p140_p2)   ;;  %964 = vmatpush1.bf16.msra.mxu1 (!%p140_p2), %v1678_v2  ;;  %v1682_v6 = vld [vmem:[%s2118_s1 + $0x8] sm:$0xff] (!%p140_p2)   ;;  %v1685_v9 = vld [vmem:[%s2118_s1 + $0x10] sm:$0xff] (!%p140_p2)   ;;  %vm1284_vm2 = vcmask (!%p140_p2), 60416  }
   0x8   : > { %1557 = vmatpush3.bf16.msra.mxu0 (!%p140_p2), %v1679_v3  ;;  %965 = vmatprep.subr.bf16.mxu1 (!%p140_p2), %v1806_v1  ;;  %v1686_v10 = vld [vmem:[%s2118_s1 + $0x58] sm:$0xff] (!%p140_p2)   ;;  %v1689_v13 = vld [vmem:[%s2118_s1 + $0x60] sm:$0xff] (!%p140_p2)   ;;  %v1692_v16 = vld [vmem:[%s2118_s1 + $0x68] sm:$0xff] (!%p140_p2)  }
   0x9   : > { %1558 = vmatprep.subr.bf16.mxu0 (!%p140_p2), %v1680_v4  ;;  %v1687_v11 = vld [vmem:[%s2118_s1 + $0x98] sm:$0xff] (!%p140_p2)   ;;  %v1690_v14 = vld [vmem:[%s2118_s1 + $0xa0] sm:$0xff] (!%p140_p2)   ;;  %v1693_v17 = vld [vmem:[%s2118_s1 + $0xa8] sm:$0xff] (!%p140_p2)  }
   0xa   : > { %v1688_v12 = vld [vmem:[%s2118_s1 + $0x18] sm:$0xff] (!%p140_p2)   ;;  %v1691_v15 = vld [vmem:[%s2118_s1 + $0x20] sm:$0xff] (!%p140_p2)   ;;  %v1694_v18 = vld [vmem:[%s2118_s1 + $0x28] sm:$0xff] (!%p140_p2)  }
   0xb   : > { %966 = vmatpush1.bf16.msra.mxu1 (!%p140_p2), %v1681_v5  ;;  %v1695_v19 = vld [vmem:[%s2118_s1 + $0x70] sm:$0xff] (!%p140_p2)   ;;  %v1698_v22 = vld [vmem:[%s2118_s1 + $0x78] sm:$0xff] (!%p140_p2)   ;;  %v1704_v27 = vld [vmem:[%s2118_s1 + $0xc0] ss:$0 sps:$4 sm:$0xff] (!%p140_p2)  }
   0xc   : > { %1559 = vmatpush3.bf16.msra.mxu0 (!%p140_p2), %v1682_v6  ;;  %967 = vmatprep.subr.bf16.mxu1 (!%p140_p2), %v1806_v1  ;;  %v1696_v20 = vld [vmem:[%s2118_s1 + $0xb0] sm:$0xff] (!%p140_p2)   ;;  %v1699_v24 = vld [vmem:[%s2118_s1 + $0xb8] sm:$0xff] (!%p140_p2)   ;;  %v800_v29 = vsel (!%p140_p2), %vm798_vm1, %v1704_v27, 0 }
   0xd   : > { %1560 = vmatprep.subr.bf16.mxu0 %v1683_v7  ;;  %s2122_s5 = smov (!%p165_p3, %s1378_s5), 63  ;;  %v1697_v21 = vld [vmem:[%s2118_s1 + $0x30] sm:$0xff]   ;;  %v1700_v26 = vld [vmem:[%s2118_s1 + $0x38] sm:$0xff]  }
   0xe   : > { %s1523_s23 = sshll.u32 %s2122_s5, 4  ;;  %s1382_s20 = sshll.u32 %s2122_s5, 2 }
   0xf   : > { %968 = vmatpush1.bf16.msra.mxu1 %v1684_v8  ;;  %s1904_s30 = scalar_lea.vmem %s2117_s0, %s1523_s23  ;;  %s2018_s23 = scalar_lea.vmem %s2120_s3, %s1382_s20 }
  0x10   : > { %1561 = vmatpush3.bf16.msra.mxu0 %v1685_v9  ;;  %969 = vmatprep.subr.bf16.mxu1 %v1806_v1  ;;  %v1703_v23 = vld [vmem:[%s1904_s30 + $0x4] ss:$16 sps:$4 sm:$0xff]   ;;  %v1707_v25 = vld [vmem:[%s1904_s30 + $0xc] ss:$16 sps:$4 sm:$0xff]   ;;  %v1701_v28 = vld [vmem:[%s1904_s30] ss:$16 sps:$4 sm:$0xff]  }
  0x11   : > { %1562 = vmatprep.subr.bf16.mxu0 %v1686_v10  ;;  %834 = vmatprep.mubr.bf16.mxu0 %v1703_v23  ;;  %v1708_v30 = vld [vmem:[%s1904_s30 + $0x24] ss:$16 sps:$4 sm:$0xff]   ;;  %v1705_v31 = vld [vmem:[%s1904_s30 + $0x8] ss:$16 sps:$4 sm:$0xff]   ;;  %v1711_v32 = vld [vmem:[%s1904_s30 + $0x2c] ss:$16 sps:$4 sm:$0xff]  }
  0x12   : > { %1473 = vmatprep.mubr.msk.bf16.mxu1 %vm749_vm0, %v1707_v25  ;;  %v1710_v33 = vld [vmem:[%s1904_s30 + $0x20] ss:$16 sps:$4 sm:$0xff]   ;;  %v1714_v34 = vld [vmem:[%s1904_s30 + $0x44] ss:$16 sps:$4 sm:$0xff]   ;;  %v1713_v35 = vld [vmem:[%s1904_s30 + $0x28] ss:$16 sps:$4 sm:$0xff]  }
  0x13   : > { %970 = vmatpush1.bf16.msra.mxu1 %v1687_v11  ;;  %v1717_v36 = vld [vmem:[%s1904_s30 + $0x4c] ss:$16 sps:$4 sm:$0xff]   ;;  %v1716_v37 = vld [vmem:[%s1904_s30 + $0x40] ss:$16 sps:$4 sm:$0xff]   ;;  %v1720_v38 = vld [vmem:[%s1904_s30 + $0x64] ss:$16 sps:$4 sm:$0xff]  }
  0x14   : > { %1563 = vmatpush3.bf16.msra.mxu0 %v1688_v12  ;;  %971 = vmatprep.subr.bf16.mxu1 %v1806_v1  ;;  %v1719_v39 = vld [vmem:[%s1904_s30 + $0x48] ss:$16 sps:$4 sm:$0xff]   ;;  %v1723_v40 = vld [vmem:[%s1904_s30 + $0x6c] ss:$16 sps:$4 sm:$0xff]   ;;  %v1722_v41 = vld [vmem:[%s1904_s30 + $0x60] ss:$16 sps:$4 sm:$0xff]  }
  0x15   : > { %1564 = vmatprep.subr.bf16.mxu0 %v1689_v13  ;;  %v1726_v42 = vld [vmem:[%s1904_s30 + $0x84] ss:$16 sps:$4 sm:$0xff]   ;;  %v1725_v43 = vld [vmem:[%s1904_s30 + $0x68] ss:$16 sps:$4 sm:$0xff]   ;;  %v1729_v44 = vld [vmem:[%s1904_s30 + $0x8c] ss:$16 sps:$4 sm:$0xff]  }
  0x16   : > { %v1728_v45 = vld [vmem:[%s1904_s30 + $0x80] ss:$16 sps:$4 sm:$0xff]   ;;  %v1732_v46 = vld [vmem:[%s1904_s30 + $0xa4] ss:$16 sps:$4 sm:$0xff]   ;;  %v1731_v47 = vld [vmem:[%s1904_s30 + $0x88] ss:$16 sps:$4 sm:$0xff]  }
  0x17   : > { %972 = vmatpush1.bf16.msra.mxu1 %v1690_v14  ;;  %v1735_v48 = vld [vmem:[%s1904_s30 + $0xac] ss:$16 sps:$4 sm:$0xff]   ;;  %v1734_v49 = vld [vmem:[%s1904_s30 + $0xa0] ss:$16 sps:$4 sm:$0xff]   ;;  %v1738_v50 = vld [vmem:[%s1904_s30 + $0xc4] ss:$16 sps:$4 sm:$0xff]  }
  0x18   : > { %1565 = vmatpush3.bf16.msra.mxu0 %v1691_v15  ;;  %973 = vmatprep.subr.bf16.mxu1 %v1806_v1  ;;  %v1737_v51 = vld [vmem:[%s1904_s30 + $0xa8] ss:$16 sps:$4 sm:$0xff]   ;;  %v1741_v52 = vld [vmem:[%s1904_s30 + $0xcc] ss:$16 sps:$4 sm:$0xff]   ;;  %v1740_v53 = vld [vmem:[%s1904_s30 + $0xc0] ss:$16 sps:$4 sm:$0xff]  }
  0x19   : > { %1566 = vmatprep.subr.bf16.mxu0 %v1692_v16  ;;  %v1744_v54 = vld [vmem:[%s1904_s30 + $0xe4] ss:$16 sps:$4 sm:$0xff]   ;;  %v1743_v55 = vld [vmem:[%s1904_s30 + $0xc8] ss:$16 sps:$4 sm:$0xff]   ;;  %v1747_v56 = vld [vmem:[%s1904_s30 + $0xec] ss:$16 sps:$4 sm:$0xff]  }
  0x1a   : > { %v1746_v57 = vld [vmem:[%s1904_s30 + $0xe0] ss:$16 sps:$4 sm:$0xff]   ;;  %v1750_v58 = vld [vmem:[%s1904_s30 + $0x104] ss:$16 sps:$4 sm:$0xff]   ;;  %v1749_v59 = vld [vmem:[%s1904_s30 + $0xe8] ss:$16 sps:$4 sm:$0xff]  }
  0x1b   : > { %974 = vmatpush1.bf16.msra.mxu1 %v1693_v17  ;;  %v1753_v60 = vld [vmem:[%s1904_s30 + $0x10c] ss:$16 sps:$4 sm:$0xff]   ;;  %v1752_v61 = vld [vmem:[%s1904_s30 + $0x100] ss:$16 sps:$4 sm:$0xff]   ;;  %v1756_v62 = vld [vmem:[%s1904_s30 + $0x124] ss:$16 sps:$4 sm:$0xff]  }
  0x1c   : > { %1567 = vmatpush3.bf16.msra.mxu0 %v1694_v18  ;;  %975 = vmatprep.subr.bf16.mxu1 %v1806_v1  ;;  %v1755_v63 = vld [vmem:[%s1904_s30 + $0x108] ss:$16 sps:$4 sm:$0xff]   ;;  %v1759_v0 = vld [vmem:[%s1904_s30 + $0x12c] ss:$16 sps:$4 sm:$0xff]   ;;  %v1762_v2 = vld [vmem:[%s1904_s30 + $0x144] ss:$16 sps:$4 sm:$0xff]  }
  0x1d   : > { %1568 = vmatprep.subr.bf16.mxu0 %v1695_v19  ;;  %v1761_v3 = vld [vmem:[%s1904_s30 + $0x128] ss:$16 sps:$4 sm:$0xff]   ;;  %v1765_v4 = vld [vmem:[%s1904_s30 + $0x14c] ss:$16 sps:$4 sm:$0xff]   ;;  %v1764_v5 = vld [vmem:[%s1904_s30 + $0x140] ss:$16 sps:$4 sm:$0xff]  }
  0x1e   : > { %v1768_v6 = vld [vmem:[%s1904_s30 + $0x164] ss:$16 sps:$4 sm:$0xff]   ;;  %v1767_v7 = vld [vmem:[%s1904_s30 + $0x148] ss:$16 sps:$4 sm:$0xff]   ;;  %v1771_v8 = vld [vmem:[%s1904_s30 + $0x16c] ss:$16 sps:$4 sm:$0xff]  }
  0x1f   : > { %976 = vmatpush1.bf16.msra.mxu1 %v1696_v20  ;;  %v1770_v9 = vld [vmem:[%s1904_s30 + $0x160] ss:$16 sps:$4 sm:$0xff]   ;;  %v1774_v10 = vld [vmem:[%s1904_s30 + $0x184] ss:$16 sps:$4 sm:$0xff]   ;;  %v1773_v11 = vld [vmem:[%s1904_s30 + $0x168] ss:$16 sps:$4 sm:$0xff]  }
  0x20   : > { %1569 = vmatpush3.bf16.msra.mxu0 %v1697_v21  ;;  %977 = vmatprep.subr.bf16.mxu1 %v1806_v1  ;;  %v1777_v12 = vld [vmem:[%s1904_s30 + $0x18c] ss:$16 sps:$4 sm:$0xff]   ;;  %v1776_v13 = vld [vmem:[%s1904_s30 + $0x180] ss:$16 sps:$4 sm:$0xff]   ;;  %v1780_v14 = vld [vmem:[%s1904_s30 + $0x1a4] ss:$16 sps:$4 sm:$0xff]  }
  0x21   : > { %1570 = vmatprep.subr.bf16.mxu0 %v1698_v22  ;;  %v1779_v15 = vld [vmem:[%s1904_s30 + $0x188] ss:$16 sps:$4 sm:$0xff]   ;;  %v1783_v16 = vld [vmem:[%s1904_s30 + $0x1ac] ss:$16 sps:$4 sm:$0xff]   ;;  %v1782_v17 = vld [vmem:[%s1904_s30 + $0x1a0] ss:$16 sps:$4 sm:$0xff]  }
  0x22   : > { %v1786_v18 = vld [vmem:[%s1904_s30 + $0x1c4] ss:$16 sps:$4 sm:$0xff]   ;;  %v1785_v19 = vld [vmem:[%s1904_s30 + $0x1a8] ss:$16 sps:$4 sm:$0xff]   ;;  %v1789_v20 = vld [vmem:[%s1904_s30 + $0x1cc] ss:$16 sps:$4 sm:$0xff]  }
  0x23   : > { %978 = vmatpush1.bf16.msra.mxu1 %v1699_v24  ;;  %v1788_v21 = vld [vmem:[%s1904_s30 + $0x1c0] ss:$16 sps:$4 sm:$0xff]   ;;  %v1792_v22 = vld [vmem:[%s1904_s30 + $0x1e4] ss:$16 sps:$4 sm:$0xff]   ;;  %v1791_v23 = vld [vmem:[%s1904_s30 + $0x1c8] ss:$16 sps:$4 sm:$0xff]  }
  0x24   : > { %1571 = vmatpush3.bf16.msra.mxu0 %v1700_v26  ;;  %979 = vmatprep.subr.bf16.mxu1 %v1806_v1  ;;  %v1758_v1 = vld [vmem:[%s1904_s30 + $0x120] ss:$16 sps:$4 sm:$0xff]   ;;  %v1795_v24 = vld [vmem:[%s1904_s30 + $0x1ec] ss:$16 sps:$4 sm:$0xff]   ;;  %v1797_v26 = vld [vmem:[%s1904_s30 + $0x1e8] ss:$16 sps:$4 sm:$0xff]  }
  0x25   : > { %v1794_v25 = vld [vmem:[%s1904_s30 + $0x1e0] ss:$16 sps:$4 sm:$0xff]  }
  0x27   : > { %835 = vmatmul.mubr.bf16.vlgmr.msra.gmra.mrb[0].mxu0 %v1701_v28  ;;  %980 = vmatpush1.bf16.msra.mxu1 %v800_v29  ;;  %v2010_v29 = vld [vmem:[%s2119_s2] ss:$0 sm:$0xff] }
  0x28   : > { %842 = vmatprep.mubr.bf16.mxu0 %v1708_v30 }
  0x2a   : > { %996 = vmatmul.mubr.bf16.vlgmr.msra.gmra.mrb[0].mxu1 %v1705_v31 }
  0x2b   : > { %1474 = vmatprep.mubr.msk.bf16.mxu1 %vm749_vm0, %v1711_v32 }
  0x2f   : > { %843 = vmatmul.mubr.bf16.gmra.mrb[4].mxu0 %v1710_v33 }
  0x30   : > { %850 = vmatprep.mubr.bf16.mxu0 %v1714_v34 }
  0x32   : > { %1004 = vmatmul.mubr.bf16.gmra.mrb[4].mxu1 %v1713_v35 }
  0x33   : > { %1475 = vmatprep.mubr.msk.bf16.mxu1 %vm749_vm0, %v1717_v36 }
  0x37   : > { %851 = vmatmul.mubr.bf16.gmra.mrb[8].mxu0 %v1716_v37 }
  0x38   : > { %858 = vmatprep.mubr.bf16.mxu0 %v1720_v38 }
  0x3a   : > { %1012 = vmatmul.mubr.bf16.gmra.mrb[8].mxu1 %v1719_v39 }
  0x3b   : > { %1476 = vmatprep.mubr.msk.bf16.mxu1 %vm749_vm0, %v1723_v40 }
  0x3f   : > { %859 = vmatmul.mubr.bf16.gmra.mrb[12].mxu0 %v1722_v41 }
  0x40   : > { %866 = vmatprep.mubr.bf16.mxu0 %v1726_v42 }
  0x42   : > { %1020 = vmatmul.mubr.bf16.gmra.mrb[12].mxu1 %v1725_v43 }
  0x43   : > { %1477 = vmatprep.mubr.msk.bf16.mxu1 %vm749_vm0, %v1729_v44 }
  0x47   : > { %867 = vmatmul.mubr.bf16.gmra.mrb[16].mxu0 %v1728_v45 }
  0x48   : > { %874 = vmatprep.mubr.bf16.mxu0 %v1732_v46 }
  0x4a   : > { %1028 = vmatmul.mubr.bf16.gmra.mrb[16].mxu1 %v1731_v47 }
  0x4b   : > { %1478 = vmatprep.mubr.msk.bf16.mxu1 %vm749_vm0, %v1735_v48 }
  0x4f   : > { %875 = vmatmul.mubr.bf16.gmra.mrb[20].mxu0 %v1734_v49 }
  0x50   : > { %882 = vmatprep.mubr.bf16.mxu0 %v1738_v50 }
  0x52   : > { %1036 = vmatmul.mubr.bf16.gmra.mrb[20].mxu1 %v1737_v51 }
  0x53   : > { %1479 = vmatprep.mubr.msk.bf16.mxu1 %vm749_vm0, %v1741_v52 }
  0x57   : > { %883 = vmatmul.mubr.bf16.gmra.mrb[24].mxu0 %v1740_v53 }
  0x58   : > { %890 = vmatprep.mubr.bf16.mxu0 %v1744_v54 }
  0x5a   : > { %1044 = vmatmul.mubr.bf16.gmra.mrb[24].mxu1 %v1743_v55 }
  0x5b   : > { %1480 = vmatprep.mubr.msk.bf16.mxu1 %vm749_vm0, %v1747_v56 }
  0x5f   : > { %891 = vmatmul.mubr.bf16.gmra.mrb[28].mxu0 %v1746_v57 }
  0x60   : > { %898 = vmatprep.mubr.bf16.mxu0 %v1750_v58 }
  0x62   : > { %1052 = vmatmul.mubr.bf16.gmra.mrb[28].mxu1 %v1749_v59 }
  0x63   : > { %1481 = vmatprep.mubr.msk.bf16.mxu1 %vm749_vm0, %v1753_v60 }
  0x67   : > { %899 = vmatmul.mubr.bf16.gmra.mrb[32].mxu0 %v1752_v61 }
  0x68   : > { %906 = vmatprep.mubr.bf16.mxu0 %v1756_v62 }
  0x6a   : > { %1060 = vmatmul.mubr.bf16.gmra.mrb[32].mxu1 %v1755_v63 }
  0x6b   : > { %1482 = vmatprep.mubr.msk.bf16.mxu1 %vm749_vm0, %v1759_v0 }
  0x6f   : > { %907 = vmatmul.mubr.bf16.gmra.mrb[36].mxu0 %v1758_v1 }
  0x70   : > { %914 = vmatprep.mubr.bf16.mxu0 %v1762_v2 }
  0x72   : > { %1068 = vmatmul.mubr.bf16.gmra.mrb[36].mxu1 %v1761_v3 }
  0x73   : > { %1483 = vmatprep.mubr.msk.bf16.mxu1 %vm749_vm0, %v1765_v4 }
  0x77   : > { %915 = vmatmul.mubr.bf16.gmra.mrb[40].mxu0 %v1764_v5 }
  0x78   : > { %922 = vmatprep.mubr.bf16.mxu0 %v1768_v6 }
  0x7a   : > { %1076 = vmatmul.mubr.bf16.gmra.mrb[40].mxu1 %v1767_v7 }
  0x7b   : > { %1484 = vmatprep.mubr.msk.bf16.mxu1 %vm749_vm0, %v1771_v8 }
  0x7f   : > { %923 = vmatmul.mubr.bf16.gmra.mrb[44].mxu0 %v1770_v9 }
  0x80   : > { %930 = vmatprep.mubr.bf16.mxu0 %v1774_v10 }
  0x82   : > { %1084 = vmatmul.mubr.bf16.gmra.mrb[44].mxu1 %v1773_v11 }
  0x83   : > { %1485 = vmatprep.mubr.msk.bf16.mxu1 %vm749_vm0, %v1777_v12 }
  0x87   : > { %931 = vmatmul.mubr.bf16.gmra.mrb[48].mxu0 %v1776_v13 }
  0x88   : > { %938 = vmatprep.mubr.bf16.mxu0 %v1780_v14 }
  0x8a   : > { %1092 = vmatmul.mubr.bf16.gmra.mrb[48].mxu1 %v1779_v15 }
  0x8b   : > { %1486 = vmatprep.mubr.msk.bf16.mxu1 %vm749_vm0, %v1783_v16 }
  0x8f   : > { %939 = vmatmul.mubr.bf16.gmra.mrb[52].mxu0 %v1782_v17 }
  0x90   : > { %946 = vmatprep.mubr.bf16.mxu0 %v1786_v18 }
  0x92   : > { %1100 = vmatmul.mubr.bf16.gmra.mrb[52].mxu1 %v1785_v19 }
  0x93   : > { %1487 = vmatprep.mubr.msk.bf16.mxu1 %vm749_vm0, %v1789_v20 }
  0x97   : > { %947 = vmatmul.mubr.bf16.gmra.mrb[56].mxu0 %v1788_v21 }
  0x98   : > { %954 = vmatprep.mubr.bf16.mxu0 %v1792_v22 }
  0x9a   : > { %1108 = vmatmul.mubr.bf16.gmra.mrb[56].mxu1 %v1791_v23 }
  0x9b   : > { %1488 = vmatprep.mubr.msk.bf16.mxu1 %vm749_vm0, %v1795_v24 }
  0x9f   : > { %955 = vmatmul.mubr.bf16.gmra.mrb[60].mxu0 %v1794_v25 }
  0xa2   : > { %1116 = vmatmul.mubr.bf16.gmra.mrb[60].mxu1 %v1797_v26 }
  0xfa   : > { %v1572_v27 = vpop.f32.mrb[0].mxu0 }
  0xfb   : > { %v1573_v28 = vpop.f32.mrb[1].mxu0 }
  0xfc   : > { %v1574_v30 = vadd.f32 %v1573_v28, %v1572_v27  ;;  %v1575_v31 = vpop.f32.mrb[2].mxu0 }
  0xfd   : > { %v1576_v32 = vpop.f32.mrb[3].mxu0  ;;  %v997_v33 = vpop.f32.mrb[0].mxu1 }
  0xfe   : > { %v1577_v34 = vadd.f32 %v1576_v32, %v1575_v31  ;;  %v837_v35 = vadd.f32 %v1574_v30, %v2010_v29  ;;  %v999_v36 = vpop.f32.mrb[1].mxu1 }
  0xff   : > { %v1000_v37 = vpop.f32.mrb[2].mxu1 }
 0x100   : > { %v998_v38 = vadd.f32 %v997_v33, %v837_v35  ;;  %v840_v39 = vadd.f32 %v1577_v34, %v2010_v29  ;;  %v1002_v40 = vpop.f32.mrb[3].mxu1 }
 0x102   : > { %v1124_v41 = vmax.f32 %v998_v38, 0.0  ;;  %v1001_v42 = vadd.f32 %v1000_v37, %v840_v39  ;;  %v1578_v43 = vpop.f32.mrb[4].mxu0 }
 0x103   : > { %v1579_v44 = vpop.f32.mrb[5].mxu0 }
 0x104   : > { %v1524_v45 = vpack.c.bf16 %v1124_v41, %v1124_v41  ;;  %v1125_v46 = vmax.f32 %v1001_v42, 0.0  ;;  %v1580_v47 = vadd.f32 %v1579_v44, %v1578_v43  ;;  %v1581_v48 = vpop.f32.mrb[6].mxu0 }
 0x105   : > { %v1582_v49 = vpop.f32.mrb[7].mxu0  ;;  %v1005_v50 = vpop.f32.mrb[4].mxu1 }
 0x106   : > { %1285 = vst.msk [vmem:[%s2018_s23] sm:$0xf] %vm1284_vm2, %v1524_v45  ;;  %v1525_v51 = vpack.c.bf16 %v1125_v46, %v1125_v46  ;;  %v1583_v52 = vadd.f32 %v1582_v49, %v1581_v48  ;;  %v845_v53 = vadd.f32 %v1580_v47, %v2010_v29  ;;  %v1007_v54 = vpop.f32.mrb[5].mxu1 }
 0x107   : > { %v1008_v55 = vpop.f32.mrb[6].mxu1 }
 0x108   : > { %1286 = vst.msk [vmem:[%s2018_s23 + $0x4] sm:$0xf] %vm1284_vm2, %v1525_v51  ;;  %v1006_v56 = vadd.f32 %v1005_v50, %v845_v53  ;;  %v848_v57 = vadd.f32 %v1583_v52, %v2010_v29  ;;  %v1010_v58 = vpop.f32.mrb[7].mxu1 }
 0x10a   : > { %v1126_v59 = vmax.f32 %v1006_v56, 0.0  ;;  %v1009_v60 = vadd.f32 %v1008_v55, %v848_v57  ;;  %v1584_v61 = vpop.f32.mrb[8].mxu0 }
 0x10b   : > { %v1585_v62 = vpop.f32.mrb[9].mxu0 }
 0x10c   : > { %v1526_v63 = vpack.c.bf16 %v1126_v59, %v1126_v59  ;;  %v1127_v0 = vmax.f32 %v1009_v60, 0.0  ;;  %v1586_v1 = vadd.f32 %v1585_v62, %v1584_v61  ;;  %v1587_v2 = vpop.f32.mrb[10].mxu0 }
 0x10d   : > { %v1588_v3 = vpop.f32.mrb[11].mxu0  ;;  %v1013_v4 = vpop.f32.mrb[8].mxu1 }
 0x10e   : > { %1287 = vst.msk [vmem:[%s2018_s23 + $0x8] sm:$0xf] %vm1284_vm2, %v1526_v63  ;;  %v1527_v5 = vpack.c.bf16 %v1127_v0, %v1127_v0  ;;  %v1589_v6 = vadd.f32 %v1588_v3, %v1587_v2  ;;  %v853_v7 = vadd.f32 %v1586_v1, %v2010_v29  ;;  %v1015_v8 = vpop.f32.mrb[9].mxu1 }
 0x10f   : > { %v1016_v9 = vpop.f32.mrb[10].mxu1 }
 0x110   : > { %1288 = vst.msk [vmem:[%s2018_s23 + $0xc] sm:$0xf] %vm1284_vm2, %v1527_v5  ;;  %v1014_v10 = vadd.f32 %v1013_v4, %v853_v7  ;;  %v856_v11 = vadd.f32 %v1589_v6, %v2010_v29  ;;  %v1018_v12 = vpop.f32.mrb[11].mxu1 }
 0x112   : > { %v1128_v13 = vmax.f32 %v1014_v10, 0.0  ;;  %v1017_v14 = vadd.f32 %v1016_v9, %v856_v11  ;;  %v1590_v15 = vpop.f32.mrb[12].mxu0 }
 0x113   : > { %v1591_v16 = vpop.f32.mrb[13].mxu0 }
 0x114   : > { %v1528_v17 = vpack.c.bf16 %v1128_v13, %v1128_v13  ;;  %v1129_v18 = vmax.f32 %v1017_v14, 0.0  ;;  %v1592_v19 = vadd.f32 %v1591_v16, %v1590_v15  ;;  %v1593_v20 = vpop.f32.mrb[14].mxu0 }
 0x115   : > { %v1594_v21 = vpop.f32.mrb[15].mxu0  ;;  %v1021_v22 = vpop.f32.mrb[12].mxu1 }
 0x116   : > { %1289 = vst.msk [vmem:[%s2018_s23 + $0x10] sm:$0xf] %vm1284_vm2, %v1528_v17  ;;  %v1529_v23 = vpack.c.bf16 %v1129_v18, %v1129_v18  ;;  %v1595_v24 = vadd.f32 %v1594_v21, %v1593_v20  ;;  %v861_v25 = vadd.f32 %v1592_v19, %v2010_v29  ;;  %v1023_v26 = vpop.f32.mrb[13].mxu1 }
 0x117   : > { %v1024_v27 = vpop.f32.mrb[14].mxu1 }
 0x118   : > { %1290 = vst.msk [vmem:[%s2018_s23 + $0x14] sm:$0xf] %vm1284_vm2, %v1529_v23  ;;  %v1022_v28 = vadd.f32 %v1021_v22, %v861_v25  ;;  %v864_v30 = vadd.f32 %v1595_v24, %v2010_v29  ;;  %v1026_v31 = vpop.f32.mrb[15].mxu1 }
 0x11a   : > { %v1130_v32 = vmax.f32 %v1022_v28, 0.0  ;;  %v1025_v33 = vadd.f32 %v1024_v27, %v864_v30  ;;  %v1596_v34 = vpop.f32.mrb[16].mxu0 }
 0x11b   : > { %v1597_v35 = vpop.f32.mrb[17].mxu0 }
 0x11c   : > { %v1530_v36 = vpack.c.bf16 %v1130_v32, %v1130_v32  ;;  %v1131_v37 = vmax.f32 %v1025_v33, 0.0  ;;  %v1598_v38 = vadd.f32 %v1597_v35, %v1596_v34  ;;  %v1599_v39 = vpop.f32.mrb[18].mxu0 }
 0x11d   : > { %v1600_v40 = vpop.f32.mrb[19].mxu0  ;;  %v1029_v41 = vpop.f32.mrb[16].mxu1 }
 0x11e   : > { %1291 = vst.msk [vmem:[%s2018_s23 + $0x18] sm:$0xf] %vm1284_vm2, %v1530_v36  ;;  %v1531_v42 = vpack.c.bf16 %v1131_v37, %v1131_v37  ;;  %v1601_v43 = vadd.f32 %v1600_v40, %v1599_v39  ;;  %v869_v44 = vadd.f32 %v1598_v38, %v2010_v29  ;;  %v1031_v45 = vpop.f32.mrb[17].mxu1 }
 0x11f   : > { %v1032_v46 = vpop.f32.mrb[18].mxu1 }
 0x120   : > { %1292 = vst.msk [vmem:[%s2018_s23 + $0x1c] sm:$0xf] %vm1284_vm2, %v1531_v42  ;;  %v1030_v47 = vadd.f32 %v1029_v41, %v869_v44  ;;  %v872_v48 = vadd.f32 %v1601_v43, %v2010_v29  ;;  %v1034_v49 = vpop.f32.mrb[19].mxu1 }
 0x122   : > { %v1132_v50 = vmax.f32 %v1030_v47, 0.0  ;;  %v1033_v51 = vadd.f32 %v1032_v46, %v872_v48  ;;  %v1602_v52 = vpop.f32.mrb[20].mxu0 }
 0x123   : > { %v1603_v53 = vpop.f32.mrb[21].mxu0 }
 0x124   : > { %v1532_v54 = vpack.c.bf16 %v1132_v50, %v1132_v50  ;;  %v1133_v55 = vmax.f32 %v1033_v51, 0.0  ;;  %v1604_v56 = vadd.f32 %v1603_v53, %v1602_v52  ;;  %v1605_v57 = vpop.f32.mrb[22].mxu0 }
 0x125   : > { %v1606_v58 = vpop.f32.mrb[23].mxu0  ;;  %v1037_v59 = vpop.f32.mrb[20].mxu1 }
 0x126   : > { %1293 = vst.msk [vmem:[%s2018_s23 + $0x20] sm:$0xf] %vm1284_vm2, %v1532_v54  ;;  %v1533_v60 = vpack.c.bf16 %v1133_v55, %v1133_v55  ;;  %v1607_v61 = vadd.f32 %v1606_v58, %v1605_v57  ;;  %v877_v62 = vadd.f32 %v1604_v56, %v2010_v29  ;;  %v1039_v63 = vpop.f32.mrb[21].mxu1 }
 0x127   : > { %v1040_v0 = vpop.f32.mrb[22].mxu1 }
 0x128   : > { %1294 = vst.msk [vmem:[%s2018_s23 + $0x24] sm:$0xf] %vm1284_vm2, %v1533_v60  ;;  %v1038_v1 = vadd.f32 %v1037_v59, %v877_v62  ;;  %v880_v2 = vadd.f32 %v1607_v61, %v2010_v29  ;;  %v1042_v3 = vpop.f32.mrb[23].mxu1 }
 0x12a   : > { %v1134_v4 = vmax.f32 %v1038_v1, 0.0  ;;  %v1041_v5 = vadd.f32 %v1040_v0, %v880_v2  ;;  %v1608_v6 = vpop.f32.mrb[24].mxu0 }
 0x12b   : > { %v1609_v7 = vpop.f32.mrb[25].mxu0 }
 0x12c   : > { %v1534_v8 = vpack.c.bf16 %v1134_v4, %v1134_v4  ;;  %v1135_v9 = vmax.f32 %v1041_v5, 0.0  ;;  %v1610_v10 = vadd.f32 %v1609_v7, %v1608_v6  ;;  %v1611_v11 = vpop.f32.mrb[26].mxu0 }
 0x12d   : > { %v1612_v12 = vpop.f32.mrb[27].mxu0  ;;  %v1045_v13 = vpop.f32.mrb[24].mxu1 }
 0x12e   : > { %1295 = vst.msk [vmem:[%s2018_s23 + $0x28] sm:$0xf] %vm1284_vm2, %v1534_v8  ;;  %v1535_v14 = vpack.c.bf16 %v1135_v9, %v1135_v9  ;;  %v1613_v15 = vadd.f32 %v1612_v12, %v1611_v11  ;;  %v885_v16 = vadd.f32 %v1610_v10, %v2010_v29  ;;  %v1047_v17 = vpop.f32.mrb[25].mxu1 }
 0x12f   : > { %v1048_v18 = vpop.f32.mrb[26].mxu1 }
 0x130   : > { %1296 = vst.msk [vmem:[%s2018_s23 + $0x2c] sm:$0xf] %vm1284_vm2, %v1535_v14  ;;  %v1046_v19 = vadd.f32 %v1045_v13, %v885_v16  ;;  %v888_v20 = vadd.f32 %v1613_v15, %v2010_v29  ;;  %v1050_v21 = vpop.f32.mrb[27].mxu1 }
 0x132   : > { %v1136_v22 = vmax.f32 %v1046_v19, 0.0  ;;  %v1049_v23 = vadd.f32 %v1048_v18, %v888_v20  ;;  %v1614_v24 = vpop.f32.mrb[28].mxu0 }
 0x133   : > { %v1615_v25 = vpop.f32.mrb[29].mxu0 }
 0x134   : > { %v1536_v26 = vpack.c.bf16 %v1136_v22, %v1136_v22  ;;  %v1137_v27 = vmax.f32 %v1049_v23, 0.0  ;;  %v1616_v28 = vadd.f32 %v1615_v25, %v1614_v24  ;;  %v1617_v30 = vpop.f32.mrb[30].mxu0 }
 0x135   : > { %v1618_v31 = vpop.f32.mrb[31].mxu0  ;;  %v1053_v32 = vpop.f32.mrb[28].mxu1 }
 0x136   : > { %1297 = vst.msk [vmem:[%s2018_s23 + $0x30] sm:$0xf] %vm1284_vm2, %v1536_v26  ;;  %v1537_v33 = vpack.c.bf16 %v1137_v27, %v1137_v27  ;;  %v1619_v34 = vadd.f32 %v1618_v31, %v1617_v30  ;;  %v893_v35 = vadd.f32 %v1616_v28, %v2010_v29  ;;  %v1055_v36 = vpop.f32.mrb[29].mxu1 }
 0x137   : > { %v1056_v37 = vpop.f32.mrb[30].mxu1 }
 0x138   : > { %1298 = vst.msk [vmem:[%s2018_s23 + $0x34] sm:$0xf] %vm1284_vm2, %v1537_v33  ;;  %v1054_v38 = vadd.f32 %v1053_v32, %v893_v35  ;;  %v896_v39 = vadd.f32 %v1619_v34, %v2010_v29  ;;  %v1058_v40 = vpop.f32.mrb[31].mxu1 }
 0x13a   : > { %v1138_v41 = vmax.f32 %v1054_v38, 0.0  ;;  %v1057_v42 = vadd.f32 %v1056_v37, %v896_v39  ;;  %v1620_v43 = vpop.f32.mrb[32].mxu0 }
 0x13b   : > { %v1621_v44 = vpop.f32.mrb[33].mxu0 }
 0x13c   : > { %v1538_v45 = vpack.c.bf16 %v1138_v41, %v1138_v41  ;;  %v1139_v46 = vmax.f32 %v1057_v42, 0.0  ;;  %v1622_v47 = vadd.f32 %v1621_v44, %v1620_v43  ;;  %v1623_v48 = vpop.f32.mrb[34].mxu0 }
 0x13d   : > { %v1624_v49 = vpop.f32.mrb[35].mxu0  ;;  %v1061_v50 = vpop.f32.mrb[32].mxu1 }
 0x13e   : > { %1299 = vst.msk [vmem:[%s2018_s23 + $0x38] sm:$0xf] %vm1284_vm2, %v1538_v45  ;;  %v1539_v51 = vpack.c.bf16 %v1139_v46, %v1139_v46  ;;  %v1625_v52 = vadd.f32 %v1624_v49, %v1623_v48  ;;  %v901_v53 = vadd.f32 %v1622_v47, %v2010_v29  ;;  %v1063_v54 = vpop.f32.mrb[33].mxu1 }
 0x13f   : > { %v1064_v55 = vpop.f32.mrb[34].mxu1 }
 0x140   : > { %1300 = vst.msk [vmem:[%s2018_s23 + $0x3c] sm:$0xf] %vm1284_vm2, %v1539_v51  ;;  %v1062_v56 = vadd.f32 %v1061_v50, %v901_v53  ;;  %v904_v57 = vadd.f32 %v1625_v52, %v2010_v29  ;;  %v1066_v58 = vpop.f32.mrb[35].mxu1 }
 0x142   : > { %v1140_v59 = vmax.f32 %v1062_v56, 0.0  ;;  %v1065_v60 = vadd.f32 %v1064_v55, %v904_v57  ;;  %v1626_v61 = vpop.f32.mrb[36].mxu0 }
 0x143   : > { %v1627_v62 = vpop.f32.mrb[37].mxu0 }
 0x144   : > { %v1540_v63 = vpack.c.bf16 %v1140_v59, %v1140_v59  ;;  %v1141_v0 = vmax.f32 %v1065_v60, 0.0  ;;  %v1628_v1 = vadd.f32 %v1627_v62, %v1626_v61  ;;  %v1629_v2 = vpop.f32.mrb[38].mxu0 }
 0x145   : > { %v1630_v3 = vpop.f32.mrb[39].mxu0  ;;  %v1069_v4 = vpop.f32.mrb[36].mxu1 }
 0x146   : > { %1301 = vst.msk [vmem:[%s2018_s23 + $0x40] sm:$0xf] %vm1284_vm2, %v1540_v63  ;;  %v1541_v5 = vpack.c.bf16 %v1141_v0, %v1141_v0  ;;  %v1631_v6 = vadd.f32 %v1630_v3, %v1629_v2  ;;  %v909_v7 = vadd.f32 %v1628_v1, %v2010_v29  ;;  %v1071_v8 = vpop.f32.mrb[37].mxu1 }
 0x147   : > { %v1072_v9 = vpop.f32.mrb[38].mxu1 }
 0x148   : > { %1302 = vst.msk [vmem:[%s2018_s23 + $0x44] sm:$0xf] %vm1284_vm2, %v1541_v5  ;;  %v1070_v10 = vadd.f32 %v1069_v4, %v909_v7  ;;  %v912_v11 = vadd.f32 %v1631_v6, %v2010_v29  ;;  %v1074_v12 = vpop.f32.mrb[39].mxu1 }
 0x14a   : > { %v1142_v13 = vmax.f32 %v1070_v10, 0.0  ;;  %v1073_v14 = vadd.f32 %v1072_v9, %v912_v11  ;;  %v1632_v15 = vpop.f32.mrb[40].mxu0 }
 0x14b   : > { %v1633_v16 = vpop.f32.mrb[41].mxu0 }
 0x14c   : > { %v1542_v17 = vpack.c.bf16 %v1142_v13, %v1142_v13  ;;  %v1143_v18 = vmax.f32 %v1073_v14, 0.0  ;;  %v1634_v19 = vadd.f32 %v1633_v16, %v1632_v15  ;;  %v1635_v20 = vpop.f32.mrb[42].mxu0 }
 0x14d   : > { %v1636_v21 = vpop.f32.mrb[43].mxu0  ;;  %v1077_v22 = vpop.f32.mrb[40].mxu1 }
 0x14e   : > { %1303 = vst.msk [vmem:[%s2018_s23 + $0x48] sm:$0xf] %vm1284_vm2, %v1542_v17  ;;  %v1543_v23 = vpack.c.bf16 %v1143_v18, %v1143_v18  ;;  %v1637_v24 = vadd.f32 %v1636_v21, %v1635_v20  ;;  %v917_v25 = vadd.f32 %v1634_v19, %v2010_v29  ;;  %v1079_v26 = vpop.f32.mrb[41].mxu1 }
 0x14f   : > { %v1080_v27 = vpop.f32.mrb[42].mxu1 }
 0x150   : > { %1304 = vst.msk [vmem:[%s2018_s23 + $0x4c] sm:$0xf] %vm1284_vm2, %v1543_v23  ;;  %v1078_v28 = vadd.f32 %v1077_v22, %v917_v25  ;;  %v920_v30 = vadd.f32 %v1637_v24, %v2010_v29  ;;  %v1082_v31 = vpop.f32.mrb[43].mxu1 }
 0x152   : > { %v1144_v32 = vmax.f32 %v1078_v28, 0.0  ;;  %v1081_v33 = vadd.f32 %v1080_v27, %v920_v30  ;;  %v1638_v34 = vpop.f32.mrb[44].mxu0 }
 0x153   : > { %v1639_v35 = vpop.f32.mrb[45].mxu0 }
 0x154   : > { %v1544_v36 = vpack.c.bf16 %v1144_v32, %v1144_v32  ;;  %v1145_v37 = vmax.f32 %v1081_v33, 0.0  ;;  %v1640_v38 = vadd.f32 %v1639_v35, %v1638_v34  ;;  %v1641_v39 = vpop.f32.mrb[46].mxu0 }
 0x155   : > { %v1642_v40 = vpop.f32.mrb[47].mxu0  ;;  %v1085_v41 = vpop.f32.mrb[44].mxu1 }
 0x156   : > { %1305 = vst.msk [vmem:[%s2018_s23 + $0x50] sm:$0xf] %vm1284_vm2, %v1544_v36  ;;  %v1545_v42 = vpack.c.bf16 %v1145_v37, %v1145_v37  ;;  %v1643_v43 = vadd.f32 %v1642_v40, %v1641_v39  ;;  %v925_v44 = vadd.f32 %v1640_v38, %v2010_v29  ;;  %v1087_v45 = vpop.f32.mrb[45].mxu1 }
 0x157   : > { %v1088_v46 = vpop.f32.mrb[46].mxu1 }
 0x158   : > { %1306 = vst.msk [vmem:[%s2018_s23 + $0x54] sm:$0xf] %vm1284_vm2, %v1545_v42  ;;  %v1086_v47 = vadd.f32 %v1085_v41, %v925_v44  ;;  %v928_v48 = vadd.f32 %v1643_v43, %v2010_v29  ;;  %v1090_v49 = vpop.f32.mrb[47].mxu1 }
 0x15a   : > { %v1146_v50 = vmax.f32 %v1086_v47, 0.0  ;;  %v1089_v51 = vadd.f32 %v1088_v46, %v928_v48  ;;  %v1644_v52 = vpop.f32.mrb[48].mxu0 }
 0x15b   : > { %v1645_v53 = vpop.f32.mrb[49].mxu0 }
 0x15c   : > { %v1546_v54 = vpack.c.bf16 %v1146_v50, %v1146_v50  ;;  %v1147_v55 = vmax.f32 %v1089_v51, 0.0  ;;  %v1646_v56 = vadd.f32 %v1645_v53, %v1644_v52  ;;  %v1647_v57 = vpop.f32.mrb[50].mxu0 }
 0x15d   : > { %v1648_v58 = vpop.f32.mrb[51].mxu0  ;;  %v1093_v59 = vpop.f32.mrb[48].mxu1 }
 0x15e   : > { %1307 = vst.msk [vmem:[%s2018_s23 + $0x58] sm:$0xf] %vm1284_vm2, %v1546_v54  ;;  %v1547_v60 = vpack.c.bf16 %v1147_v55, %v1147_v55  ;;  %v1649_v61 = vadd.f32 %v1648_v58, %v1647_v57  ;;  %v933_v62 = vadd.f32 %v1646_v56, %v2010_v29  ;;  %v1095_v63 = vpop.f32.mrb[49].mxu1 }
 0x15f   : > { %v1096_v0 = vpop.f32.mrb[50].mxu1 }
 0x160   : > { %1308 = vst.msk [vmem:[%s2018_s23 + $0x5c] sm:$0xf] %vm1284_vm2, %v1547_v60  ;;  %v1094_v1 = vadd.f32 %v1093_v59, %v933_v62  ;;  %v936_v2 = vadd.f32 %v1649_v61, %v2010_v29  ;;  %v1098_v3 = vpop.f32.mrb[51].mxu1 }
 0x162   : > { %v1148_v4 = vmax.f32 %v1094_v1, 0.0  ;;  %v1097_v5 = vadd.f32 %v1096_v0, %v936_v2  ;;  %v1650_v6 = vpop.f32.mrb[52].mxu0 }
 0x163   : > { %v1651_v7 = vpop.f32.mrb[53].mxu0 }
 0x164   : > { %v1548_v8 = vpack.c.bf16 %v1148_v4, %v1148_v4  ;;  %v1149_v9 = vmax.f32 %v1097_v5, 0.0  ;;  %v1652_v10 = vadd.f32 %v1651_v7, %v1650_v6  ;;  %v1653_v11 = vpop.f32.mrb[54].mxu0 }
 0x165   : > { %v1654_v12 = vpop.f32.mrb[55].mxu0  ;;  %v1101_v13 = vpop.f32.mrb[52].mxu1 }
 0x166   : > { %1309 = vst.msk [vmem:[%s2018_s23 + $0x60] sm:$0xf] %vm1284_vm2, %v1548_v8  ;;  %v1549_v14 = vpack.c.bf16 %v1149_v9, %v1149_v9  ;;  %v1655_v15 = vadd.f32 %v1654_v12, %v1653_v11  ;;  %v941_v16 = vadd.f32 %v1652_v10, %v2010_v29  ;;  %v1103_v17 = vpop.f32.mrb[53].mxu1 }
 0x167   : > { %v1104_v18 = vpop.f32.mrb[54].mxu1 }
 0x168   : > { %1310 = vst.msk [vmem:[%s2018_s23 + $0x64] sm:$0xf] %vm1284_vm2, %v1549_v14  ;;  %v1102_v19 = vadd.f32 %v1101_v13, %v941_v16  ;;  %v944_v20 = vadd.f32 %v1655_v15, %v2010_v29  ;;  %v1106_v21 = vpop.f32.mrb[55].mxu1 }
 0x16a   : > { %v1150_v22 = vmax.f32 %v1102_v19, 0.0  ;;  %v1105_v23 = vadd.f32 %v1104_v18, %v944_v20  ;;  %v1656_v24 = vpop.f32.mrb[56].mxu0 }
 0x16b   : > { %v1657_v25 = vpop.f32.mrb[57].mxu0 }
 0x16c   : > { %v1550_v26 = vpack.c.bf16 %v1150_v22, %v1150_v22  ;;  %v1151_v27 = vmax.f32 %v1105_v23, 0.0  ;;  %v1658_v28 = vadd.f32 %v1657_v25, %v1656_v24  ;;  %v1659_v30 = vpop.f32.mrb[58].mxu0 }
 0x16d   : > { %v1660_v31 = vpop.f32.mrb[59].mxu0  ;;  %v1109_v32 = vpop.f32.mrb[56].mxu1 }
 0x16e   : > { %1311 = vst.msk [vmem:[%s2018_s23 + $0x68] sm:$0xf] %vm1284_vm2, %v1550_v26  ;;  %v1551_v33 = vpack.c.bf16 %v1151_v27, %v1151_v27  ;;  %v1661_v34 = vadd.f32 %v1660_v31, %v1659_v30  ;;  %v949_v35 = vadd.f32 %v1658_v28, %v2010_v29  ;;  %v1111_v36 = vpop.f32.mrb[57].mxu1 }
 0x16f   : > { %v1112_v37 = vpop.f32.mrb[58].mxu1 }
 0x170   : > { %1312 = vst.msk [vmem:[%s2018_s23 + $0x6c] sm:$0xf] %vm1284_vm2, %v1551_v33  ;;  %v1110_v38 = vadd.f32 %v1109_v32, %v949_v35  ;;  %v952_v39 = vadd.f32 %v1661_v34, %v2010_v29  ;;  %v1114_v40 = vpop.f32.mrb[59].mxu1 }
 0x172   : > { %v1152_v41 = vmax.f32 %v1110_v38, 0.0  ;;  %v1113_v42 = vadd.f32 %v1112_v37, %v952_v39  ;;  %v1662_v43 = vpop.f32.mrb[60].mxu0 }
 0x173   : > { %v1663_v44 = vpop.f32.mrb[61].mxu0 }
 0x174   : > { %v1552_v45 = vpack.c.bf16 %v1152_v41, %v1152_v41  ;;  %v1153_v46 = vmax.f32 %v1113_v42, 0.0  ;;  %v1664_v47 = vadd.f32 %v1663_v44, %v1662_v43  ;;  %v1665_v48 = vpop.f32.mrb[62].mxu0 }
 0x175   : > { %v1666_v49 = vpop.f32.mrb[63].mxu0  ;;  %v1117_v50 = vpop.f32.mrb[60].mxu1 }
 0x176   : > { %1313 = vst.msk [vmem:[%s2018_s23 + $0x70] sm:$0xf] %vm1284_vm2, %v1552_v45  ;;  %v1553_v51 = vpack.c.bf16 %v1153_v46, %v1153_v46  ;;  %v1667_v52 = vadd.f32 %v1666_v49, %v1665_v48  ;;  %v957_v53 = vadd.f32 %v1664_v47, %v2010_v29  ;;  %v1119_v54 = vpop.f32.mrb[61].mxu1 }
 0x177   : > { %v1120_v55 = vpop.f32.mrb[62].mxu1 }
 0x178   : > { %1314 = vst.msk [vmem:[%s2018_s23 + $0x74] sm:$0xf] %vm1284_vm2, %v1553_v51  ;;  %v1118_v56 = vadd.f32 %v1117_v50, %v957_v53  ;;  %v960_v57 = vadd.f32 %v1667_v52, %v2010_v29  ;;  %v1122_v58 = vpop.f32.mrb[63].mxu1 }
 0x17a   : > { %v1154_v59 = vmax.f32 %v1118_v56, 0.0  ;;  %v1121_v60 = vadd.f32 %v1120_v55, %v960_v57 }
 0x17c   : > { %v1554_v61 = vpack.c.bf16 %v1154_v59, %v1154_v59  ;;  %v1155_v62 = vmax.f32 %v1121_v60, 0.0 }
 0x17e   : > { %1315 = vst.msk [vmem:[%s2018_s23 + $0x78] sm:$0xf] %vm1284_vm2, %v1554_v61  ;;  %v1555_v63 = vpack.c.bf16 %v1155_v62, %v1155_v62 }
 0x180   : > { %1316 = vst.msk [vmem:[%s2018_s23 + $0x7c] sm:$0xf] %vm1284_vm2, %v1555_v63 }
 0x181 PF: > { %s13_s12 = sadd.s32 1, %s1804_s12  }
 0x182   : > { %p10_p4 = scmp.ge.s32.totalorder %s13_s12, 4  }
 0x184   :  { %12 = sbr.rel (!%p10_p4) target bundleno = 1 (0x1), region = 62 }

// kernel: forward.18
= control target key start
LH: loop header
LB: loop body
LE: loop exit
PB: predicated region body
PF: predicated region fallthrough
CT: control target
= control target key end

     0   :  { %s2229_s15 = smov 0   ;;  %s2718_s0 = inlined_call_operand.vmem [shape: bf16[2,116,8], index: 0, kind: input, shape index: {}]   ;;  %s2719_s1 = inlined_call_operand.vmem [shape: bf16[9,8,8], index: 1, kind: input, shape index: {}]   ;;  %s2720_s2 = inlined_call_operand.vmem [shape: f32[1,8], index: 2, kind: input, shape index: {}]   ;;  %s2721_s3 = inlined_call_operand.vmem [shape: f32[80,1], index: 3, kind: input, shape index: {}]   ;;  %s2722_s4 = inlined_call_operand.vmem [shape: bf16[2,80,8], index: 4, kind: output, shape index: {}]  }
   0x1 LB: > { %s1775_s16 = sadd.s32 4294967295, %s2199_s15   ;;  %p1779_p0 = scmp.ge.s32.totalorder %s2199_s15, 1  ;;  %s2199_s15 = sphi %s2229_s15, %s14_s15  }
   0x2   : > { %p162_p1 = scmp.lt.s32.totalorder %s2199_s15, 3 }
   0x4   : > { %p163_p2 = pnand %p1779_p0, %p162_p1 }
   0x5   : > { %v1782_v0 = vld [vmem:[%s2719_s1 + $0x4] sm:$0xf] (!%p163_p2)  ;;  %vm254_vm0 = vcmask (!%p163_p2), 1043456   ;;  %p188_p3 = scmp.lt.s32.totalorder (!%p163_p2), %s1775_s16, 1  ;;  %v2201_v1 = vmov (!%p163_p2), 0.0   ;;  %vm2202_vm1 = vmmov (!%p163_p2), 0  }
   0x6   : > { %166 = sbr.rel (%p163_p2) target bundleno = 421 (0x1a5), region = 36  ;;  %1945 = vmatprep.subr.bf16.mxu0 (!%p163_p2), %v2201_v1  ;;  %2143 = vmatprep.subr.bf16.mxu1 (!%p163_p2), %v2201_v1  ;;  %v256_v2 = vsel (!%p163_p2), %vm254_vm0, %v1782_v0, 0  ;;  %v1804_v3 = vld [vmem:[%s2719_s1 + $0x8] sm:$0xf] (!%p163_p2)  ;;  %vm238_vm2 = vcmask (!%p163_p2), 64512   ;;  %vm863_vm5 = vcmask (!%p163_p2), 1046528  }
   0x7   : > { %1946 = vmatpush3.bf16.msra.mxu0 (!%p163_p2), %v256_v2  ;;  %2144 = vmatpush3.bf16.msra.mxu1 (!%p163_p2), %v256_v2  ;;  %v586_v4 = vsel (!%p163_p2), %vm254_vm0, %v1804_v3, 0  ;;  %v210_v5 = vld [vmem:[%s2719_s1] sm:$0xf] (!%p163_p2)  ;;  %vm339_vm3 = vsmask.f32 (!%p163_p2), 4352  ;;  %vm1318_vm7 = vcmask (!%p163_p2), 1045504  }
   0x8   : > { %1947 = vmatprep.mubr.msk.bf16.mxu0 (!%p163_p2), %vm2202_vm1, %v2201_v1  ;;  %1959 = vmatprep.mubr.msk.bf16.mxu1 (!%p163_p2), %vm2202_vm1, %v2201_v1  ;;  %v409_v15 = vsel (!%p163_p2), %vm254_vm0, %v210_v5, 0  ;;  %v1816_v41 = vld [vmem:[%s2719_s1 + $0xc] sm:$0xf] (!%p163_p2)  ;;  %v1828_v50 = vld [vmem:[%s2719_s1 + $0x10] sm:$0xf] (!%p163_p2)  ;;  %vm1709_vm9 = vcmask (!%p163_p2), 60416  }
   0x9   : > { %1989 = vmatprep.subr.bf16.mxu0 (!%p163_p2), %v2201_v1  ;;  %1967 = vmatprep.subr.bf16.mxu1 (!%p163_p2), %v2201_v1  ;;  %v772_v49 = vsel (!%p163_p2), %vm254_vm0, %v1816_v41, 0  ;;  %vm525_vm4 = vsmask.f32 (!%p163_p2), 7424  ;;  %v891_v59 = vsel (!%p163_p2), %vm254_vm0, %v1828_v50, 0  ;;  %vm982_vm6 = vsmask.f32 (!%p163_p2), 6400 }
   0xa   : > { %vm1437_vm8 = vsmask.f32 (!%p163_p2), 5376 }
   0xd   : > { %s2724_s16 = smov (!%p188_p3, %s1775_s16), 1 }
   0xe   : > { %s2145_s21 = smul.u32 60, %s2724_s16 }
   0xf   : > { %s2146_s11 = smul.u32 40, %s2724_s16 }
  0x10   : > { %s2258_s24 = scalar_lea.vmem %s2718_s0, %s2145_s21 }
  0x11   : > { %v199_v6 = vld [vmem:[%s2258_s24] sm:$0x8]  ;;  %v200_v7 = vld [vmem:[%s2258_s24 + $0x4] sm:$0xf]  ;;  %v201_v8 = vld [vmem:[%s2258_s24 + $0x8] sm:$0xf]  ;;  %s2679_s14 = scalar_lea.vmem %s2722_s4, %s2146_s11 }
  0x12   : > { %v1783_v9 = vcombine.low %v200_v7, %v201_v8  ;;  %v1793_v10 = vcombine.low %v199_v6, %v200_v7  ;;  %v206_v11 = vld [vmem:[%s2258_s24 + $0x1c] sm:$0xf]  ;;  %v2269_v12 = vld [vmem:[%s2258_s24 + $0x20] sm:$0xf]  ;;  %v202_v13 = vld [vmem:[%s2258_s24 + $0xc] sm:$0xf] }
  0x13   : > { %v1786_v14 = vcombine.low %v206_v11, %v2269_v12  ;;  %v1794_v16 = vcombine.low %v201_v8, %v202_v13  ;;  %v203_v17 = vld [vmem:[%s2258_s24 + $0x10] sm:$0xf]  ;;  %v208_v18 = vld [vmem:[%s2258_s24 + $0x24] sm:$0xf]  ;;  %v2278_v19 = vld [vmem:[%s2258_s24 + $0x28] sm:$0xf] }
  0x14   : > { %1948 = vmatmul.mubr.msk.bf16.vlgmr.msra.gmra.mrb[0].mxu0 %vm238_vm2, %v1783_v9  ;;  %v341_v20 = vshrl.u32 %v1793_v10, 16  ;;  %v344_v21 = vshll.u32 %v1793_v10, 16  ;;  %v204_v24 = vld [vmem:[%s2258_s24 + $0x14] sm:$0xf]  ;;  %v1784_v25 = vcombine.low %v202_v13, %v203_v17  ;;  %v1787_v27 = vcombine.low %v208_v18, %v2278_v19  ;;  %v2171_v28 = vld [vmem:[%s2258_s24 + $0x4] sm:$0xff]   ;;  %v2172_v34 = vld [vmem:[%s2258_s24 + $0xc] sm:$0xff]  }
  0x15   : > { %1960 = vmatmul.mubr.msk.bf16.vlgmr.msra.gmra.mrb[0].mxu1 %vm238_vm2, %v1786_v14  ;;  %1990 = vmatpush3.bf16.msra.mxu0 %v586_v4  ;;  %v349_v22 = vshrl.u32 %v1794_v16, 16  ;;  %v352_v23 = vshll.u32 %v1794_v16, 16  ;;  %v1795_v32 = vcombine.low %v203_v17, %v204_v24  ;;  %v205_v33 = vld [vmem:[%s2258_s24 + $0x18] sm:$0xf]  ;;  %v529_v35 = vshll.u32 %v2171_v28, 16  ;;  %v2314_v57 = vld [vmem:[%s2258_s24 + $0x28] sm:$0xff]  }
  0x16   : > { %1968 = vmatpush3.bf16.msra.mxu1 %v409_v15  ;;  %1951 = vmatprep.mubr.msk.bf16.mxu0 %vm2202_vm1, %v2201_v1  ;;  %v343_v26 = vrot.slane %v341_v20, 3  ;;  %v346_v29 = vrot.slane %v344_v21, 4  ;;  %v1785_v40 = vcombine.low %v204_v24, %v205_v33  ;;  %v1796_v42 = vcombine.low %v205_v33, %v206_v11  ;;  %v2173_v54 = vld [vmem:[%s2258_s24 + $0x14] sm:$0xff]   ;;  %v2320_v60 = vld [vmem:[%s2258_s24 + $0x30] ss:$0 sps:$4 sm:$0x11]  }
  0x17   : > { %1963 = vmatprep.mubr.msk.bf16.mxu1 %vm2202_vm1, %v2201_v1  ;;  %2011 = vmatprep.subr.bf16.mxu1 %v2201_v1  ;;  %v351_v30 = vrot.slane %v349_v22, 3  ;;  %v354_v31 = vrot.slane %v352_v23, 4  ;;  %v358_v38 = vshrl.u32 %v1795_v32, 16  ;;  %v361_v39 = vshll.u32 %v1795_v32, 16  ;;  %v2174_v11 = vld [vmem:[%s2258_s24 + $0x1c] sm:$0xff]  }
  0x18   : > { %2033 = vmatprep.subr.bf16.mxu0 %v2201_v1  ;;  %v347_v36 = vor.u32 %v346_v29, %v343_v26  ;;  %v527_v43 = vshrl.u32 %v2171_v28, 16  ;;  %v531_v44 = vrot.slane %v529_v35, 1  ;;  %v534_v45 = vshll.u32 %v2172_v34, 16  ;;  %v2176_v41 = vld [vmem:[%s2258_s24 + $0x2c] ss:$0 sps:$4 sm:$0x11]  }
  0x19   : > { %v355_v37 = vor.u32 %v354_v31, %v351_v30  ;;  %v360_v47 = vrot.slane %v358_v38, 3  ;;  %v363_v48 = vrot.slane %v361_v39, 4  ;;  %v367_v53 = vshrl.u32 %v1796_v42, 16  ;;  %v671_v30 = vld [vmem:[%s2258_s24 + $0x8] sm:$0xf] }
  0x1a   : > { %v532_v51 = vor.u32 %v531_v44, %v527_v43  ;;  %v536_v52 = vrot.slane %v534_v45, 1  ;;  %v370_v56 = vshll.u32 %v1796_v42, 16  ;;  %v1797_v58 = vcombine.low %v2269_v12, %v208_v18  ;;  %v672_v31 = vld [vmem:[%s2258_s24 + $0xc] sm:$0xf]  ;;  %v2368_v43 = vld [vmem:[%s2258_s24 + $0x10] sm:$0xff]  }
  0x1b   : > { %v356_v46 = vsel %vm339_vm3, %v347_v36, %v355_v37  ;;  %v364_v55 = vor.u32 %v363_v48, %v360_v47  ;;  %v369_v62 = vrot.slane %v367_v53, 3  ;;  %v538_v63 = vshrl.u32 %v2172_v34, 16 }
  0x1c   : > { %1952 = vmatmul.mubr.msk.bf16.gmra.mrb[4].mxu0 %vm238_vm2, %v1784_v25  ;;  %v537_v61 = vsel %vm525_vm4, %v532_v51, %v536_v52  ;;  %v542_v0 = vshll.u32 %v2173_v54, 16  ;;  %v372_v3 = vrot.slane %v370_v56, 4  ;;  %v744_v4 = vshll.u32 %v2314_v57, 16  ;;  %v2382_v56 = vld [vmem:[%s2258_s24 + $0x18] sm:$0xff]  }
  0x1d   : > { %1964 = vmatmul.mubr.msk.bf16.gmra.mrb[4].mxu1 %vm238_vm2, %v1787_v27  ;;  %1955 = vmatprep.mubr.msk.bf16.mxu0 %vm2202_vm1, %v2201_v1  ;;  %v365_v2 = vsel %vm339_vm3, %v355_v37, %v364_v55  ;;  %v748_v6 = vshrl.u32 %v2314_v57, 16  ;;  %v752_v7 = vshll.u32 %v2320_v60, 16  ;;  %v540_v8 = vor.u32 %v538_v63, %v536_v52  ;;  %v2175_v27 = vld [vmem:[%s2258_s24 + $0x24] sm:$0xff]  }
  0x1e   : > { %1969 = vmatprep.mubr.msk.bf16.mxu1 %vm2202_vm1, %v2201_v1  ;;  %v2328_v5 = vrot.slane %v744_v4, 1  ;;  %v544_v9 = vrot.slane %v542_v0, 1  ;;  %v376_v10 = vshrl.u32 %v1797_v58, 16  ;;  %v373_v12 = vor.u32 %v372_v3, %v369_v62 }
  0x1f   : > { %v379_v13 = vshll.u32 %v1797_v58, 16  ;;  %v754_v15 = vrot.slane %v752_v7, 1  ;;  %v546_v18 = vshrl.u32 %v2173_v54, 16  ;;  %v550_v20 = vshll.u32 %v2174_v11, 16  ;;  %v857_v58 = vld [vmem:[%s2258_s24 + $0x8] sm:$0xe] }
  0x20   : > { %v750_v14 = vor.u32 %v748_v6, %v2328_v5  ;;  %v545_v17 = vsel %vm525_vm4, %v540_v8, %v544_v9  ;;  %v1798_v21 = vcombine.low %v2278_v19, %v2278_v19  ;;  %v374_v22 = vsel %vm339_vm3, %v364_v55, %v373_v12 }
  0x21   : > { %v378_v23 = vrot.slane %v376_v10, 3  ;;  %v381_v24 = vrot.slane %v379_v13, 4  ;;  %v548_v25 = vor.u32 %v546_v18, %v544_v9  ;;  %v552_v26 = vrot.slane %v550_v20, 1 }
  0x22   : > { %v2343_v16 = vsel %vm525_vm4, %v750_v14, %v754_v15  ;;  %v385_v29 = vshrl.u32 %v1798_v21, 16  ;;  %v388_v19 = vshll.u32 %v1798_v21, 16  ;;  %v554_v33 = vshrl.u32 %v2174_v11, 16  ;;  %v2403_v11 = vld [vmem:[%s2258_s24 + $0x20] sm:$0xff]  }
  0x23   : > { %v382_v28 = vor.u32 %v381_v24, %v378_v23  ;;  %v553_v32 = vsel %vm525_vm4, %v548_v25, %v552_v26  ;;  %v558_v34 = vshll.u32 %v2175_v27, 16  ;;  %v1817_v38 = vcombine.low %v671_v30, %v672_v31 }
  0x24   : > { %1956 = vmatmul.mubr.msk.bf16.gmra.mrb[8].mxu0 %vm238_vm2, %v1785_v40  ;;  %v387_v36 = vrot.slane %v385_v29, 3  ;;  %v390_v37 = vrot.slane %v388_v19, 4  ;;  %v556_v39 = vor.u32 %v554_v33, %v552_v26  ;;  %v566_v47 = vshll.u32 %v2176_v41, 16  ;;  %v2448_v33 = vld [vmem:[%s2258_s24 + $0x10] sm:$0xf] }
  0x25   : > { %1970 = vmatmul.mubr.msk.bf16.vlgmr.msra.gmra.mrb[8].mxu1 %vm238_vm2, %v356_v46  ;;  %1991 = vmatprep.mubr.msk.bf16.mxu0 %vm2202_vm1, %v2201_v1  ;;  %v383_v35 = vsel %vm339_vm3, %v373_v12, %v382_v28  ;;  %v560_v40 = vrot.slane %v558_v34, 1  ;;  %v715_v44 = vshll.u32 %v1817_v38, 16  ;;  %v562_v46 = vshrl.u32 %v2175_v27, 16  ;;  %v1842_v12 = vld [vmem:[%s2719_s1 + $0x18] sm:$0xf] }
  0x26   : > { %2012 = vmatpush3.bf16.msra.mxu1 %v772_v49  ;;  %1973 = vmatprep.mubr.msk.bf16.mxu1 %vm2202_vm1, %v2201_v1  ;;  %v391_v42 = vor.u32 %v390_v37, %v387_v36  ;;  %v713_v49 = vshrl.u32 %v1817_v38, 16  ;;  %v720_v51 = vshll.u32 %v2368_v43, 16  ;;  %v568_v53 = vrot.slane %v566_v47, 1 }
  0x27   : > { %2055 = vmatprep.subr.bf16.mxu1 %v2201_v1  ;;  %v561_v45 = vsel %vm525_vm4, %v556_v39, %v560_v40  ;;  %v717_v50 = vrot.slane %v715_v44, 1  ;;  %v564_v52 = vor.u32 %v562_v46, %v560_v40  ;;  %v1829_v62 = vcombine.low %v857_v58, %v672_v31 }
  0x28   : > { %v392_v48 = vsel %vm339_vm3, %v382_v28, %v391_v42  ;;  %v722_v55 = vrot.slane %v720_v51, 1  ;;  %v724_v0 = vshrl.u32 %v2368_v43, 16  ;;  %v865_v8 = vrot.slane %v2368_v43, 1 }
  0x29   : > { %v718_v54 = vor.u32 %v717_v50, %v713_v49  ;;  %v864_v7 = vrot.slane %v1829_v62, 1  ;;  %v1227_v15 = vsel %vm254_vm0, %v1842_v12, 0  ;;  %v736_v18 = vshll.u32 %v2403_v11, 16 }
  0x2a   : > { %v726_v9 = vor.u32 %v724_v0, %v722_v55  ;;  %v867_v20 = vrot.slane %v2382_v56, 1  ;;  %v740_v25 = vshrl.u32 %v2403_v11, 16  ;;  %v869_v26 = vrot.slane %v2403_v11, 1 }
  0x2b   : > { %v723_v63 = vsel %vm525_vm4, %v718_v54, %v722_v55  ;;  %v866_v13 = vsel %vm863_vm5, %v864_v7, %v865_v8  ;;  %v871_v19 = vrot.slane %v2314_v57, 1  ;;  %v984_v30 = vshrl.u32 %v1829_v62, 16  ;;  %v2499_v7 = vld [vmem:[%s2258_s24 + $0x24] sm:$0xff]  }
  0x2c   : > { %1992 = vmatmul.mubr.msk.bf16.vlgmr.msra.gmra.mrb[12].mxu0 %vm238_vm2, %v537_v61  ;;  %v569_v61 = vsel %vm525_vm4, %v564_v52, %v568_v53  ;;  %v868_v23 = vsel %vm863_vm5, %v865_v8, %v867_v20  ;;  %v870_v28 = vsel %vm863_vm5, %v867_v20, %v869_v26  ;;  %v987_v31 = vshll.u32 %v1829_v62, 16 }
  0x2d   : > { %1974 = vmatmul.mubr.msk.bf16.gmra.mrb[12].mxu1 %vm238_vm2, %v365_v2  ;;  %2034 = vmatpush3.bf16.msra.mxu0 %v891_v59  ;;  %v1835_v59 = vld [vmem:[%s2719_s1 + $0x14] sm:$0xf]  ;;  %v728_v2 = vshll.u32 %v2382_v56, 16  ;;  %v872_v34 = vsel %vm863_vm5, %v869_v26, %v871_v19  ;;  %v991_v36 = vrot.slane %v724_v0, 1  ;;  %v986_v37 = vrot.slane %v984_v30, 1 }
  0x2e   : > { %1977 = vmatprep.mubr.msk.bf16.mxu1 %vm2202_vm1, %v2201_v1  ;;  %1995 = vmatprep.mubr.msk.bf16.mxu0 %vm2202_vm1, %v2201_v1  ;;  %v1032_v3 = vsel %vm254_vm0, %v1835_v59, 0  ;;  %v989_v38 = vrot.slane %v987_v31, 2  ;;  %v992_v39 = vrot.slane %v720_v51, 2  ;;  %v873_v40 = vrot.slane %v2320_v60, 1  ;;  %v2476_v51 = vld [vmem:[%s2258_s24 + $0x1c] sm:$0xff]  }
  0x2f   : > { %2077 = vmatprep.subr.bf16.mxu0 %v2201_v1  ;;  %v730_v10 = vrot.slane %v728_v2, 1  ;;  %v996_v54 = vrot.slane %v728_v2, 2  ;;  %v1179_v62 = vshll.u32 %v2476_v51, 16  ;;  %v1000_v12 = vrot.slane %v736_v18, 2 }
  0x30   : > { %v990_v43 = vor.u32 %v989_v38, %v986_v37  ;;  %v993_v46 = vor.u32 %v992_v39, %v991_v36  ;;  %v874_v60 = vsel %vm863_vm5, %v871_v19, %v873_v40  ;;  %v1188_v20 = vshll.u32 %v2499_v7, 16  ;;  %v1602_v19 = vld [vmem:[%s2721_s3 + $0x18] sm:$0xff]  ;;  %v2561_v39 = vld [vmem:[%s2258_s24 + $0x34] ss:$0 sps:$4 sm:$0x33]  }
  0x31   : > { %v731_v14 = vsel %vm525_vm4, %v726_v9, %v730_v10 }
  0x32   : > { %v994_v52 = vsel %vm982_vm6, %v990_v43, %v993_v46  ;;  %v1606_v43 = vld [vmem:[%s2721_s3 + $0x38] sm:$0xff] }
  0x34   : > { %1996 = vmatmul.mubr.msk.bf16.gmra.mrb[16].mxu0 %vm238_vm2, %v545_v17  ;;  %v732_v17 = vshrl.u32 %v2382_v56, 16 }
  0x35   : > { %1978 = vmatmul.mubr.msk.bf16.gmra.mrb[16].mxu1 %vm238_vm2, %v374_v22  ;;  %1999 = vmatprep.mubr.msk.bf16.mxu0 %vm2202_vm1, %v2201_v1  ;;  %v738_v22 = vrot.slane %v736_v18, 1  ;;  %v1601_v18 = vld [vmem:[%s2721_s3 + $0x10] sm:$0xff] }
  0x36   : > { %1981 = vmatprep.mubr.msk.bf16.mxu1 %vm2202_vm1, %v2201_v1  ;;  %v734_v21 = vor.u32 %v732_v17, %v730_v10  ;;  %v995_v53 = vrot.slane %v732_v17, 1  ;;  %v999_v10 = vrot.slane %v740_v25, 1  ;;  %v1185_v17 = vshrl.u32 %v2499_v7, 16 }
  0x37   : > { %v742_v27 = vor.u32 %v740_v25, %v738_v22  ;;  %v2530_v25 = vld [vmem:[%s2258_s24 + $0x2c] sm:$0xff]  }
  0x38   : > { %v739_v24 = vsel %vm525_vm4, %v734_v21, %v738_v22  ;;  %v997_v56 = vor.u32 %v996_v54, %v995_v53  ;;  %v1001_v11 = vor.u32 %v1000_v12, %v999_v10  ;;  %v1600_v21 = vld [vmem:[%s2721_s3 + $0x8] sm:$0xff]  ;;  %v1197_v57 = vshll.u32 %v2530_v25, 16 }
  0x39   : > { %v747_v29 = vsel %vm525_vm4, %v742_v27, %v2328_v5  ;;  %v1003_v27 = vrot.slane %v748_v6, 1  ;;  %v1194_v6 = vshrl.u32 %v2530_v25, 16 }
  0x3a   : > { %v998_v8 = vsel %vm982_vm6, %v993_v46, %v997_v56  ;;  %v1002_v26 = vsel %vm982_vm6, %v997_v56, %v1001_v11  ;;  %v1199_v38 = vrot.slane %v1197_v57, 2  ;;  %v1605_v46 = vld [vmem:[%s2721_s3 + $0x30] sm:$0xff] }
  0x3b   : > { %v1196_v37 = vrot.slane %v1194_v6, 1 }
  0x3c   : > { %2000 = vmatmul.mubr.msk.bf16.gmra.mrb[20].mxu0 %vm238_vm2, %v553_v32  ;;  %v1117_v32 = vld [vmem:[%s2258_s24 + $0xc] sm:$0xe] }
  0x3d   : > { %1982 = vmatmul.mubr.msk.bf16.gmra.mrb[20].mxu1 %vm238_vm2, %v383_v35  ;;  %2003 = vmatprep.mubr.msk.bf16.mxu0 %vm2202_vm1, %v2201_v1  ;;  %v1843_v5 = vcombine.low %v1117_v32, %v2448_v33  ;;  %v2453_v35 = vld [vmem:[%s2258_s24 + $0x14] sm:$0xff]  }
  0x3e   : > { %1985 = vmatprep.mubr.msk.bf16.mxu1 %vm2202_vm1, %v2201_v1  ;;  %v1167_v44 = vshrl.u32 %v2453_v35, 16 }
  0x3f   : > { %v1159_v41 = vshrl.u32 %v1843_v5, 16  ;;  %v1162_v42 = vshll.u32 %v1843_v5, 16  ;;  %v1603_v5 = vld [vmem:[%s2721_s3 + $0x20] sm:$0xff] }
  0x40   : > { %v1169_v49 = vrot.slane %v1167_v44, 1  ;;  %v1446_v10 = vrot.slane %v1167_v44, 2 }
  0x41   : > { %v1161_v47 = vrot.slane %v1159_v41, 1 }
  0x44   : > { %2004 = vmatmul.mubr.msk.bf16.gmra.mrb[24].mxu0 %vm238_vm2, %v561_v45  ;;  %v1170_v45 = vshll.u32 %v2453_v35, 16 }
  0x45   : > { %1986 = vmatmul.mubr.msk.bf16.gmra.mrb[24].mxu1 %vm238_vm2, %v392_v48  ;;  %2007 = vmatprep.mubr.msk.bf16.mxu0 %vm2202_vm1, %v2201_v1  ;;  %v1164_v48 = vrot.slane %v1162_v42, 2 }
  0x46   : > { %2013 = vmatprep.mubr.msk.bf16.mxu1 %vm2202_vm1, %v2201_v1  ;;  %v1172_v50 = vrot.slane %v1170_v45, 2  ;;  %v1447_v12 = vrot.slane %v1170_v45, 3  ;;  %v1451_v45 = vrot.slane %v1179_v62, 3 }
  0x47   : > { %v1165_v58 = vor.u32 %v1164_v48, %v1161_v47  ;;  %v1206_v47 = vshll.u32 %v2561_v39, 16 }
  0x48   : > { %v1173_v59 = vor.u32 %v1172_v50, %v1169_v49  ;;  %v1312_v49 = vld [vmem:[%s2258_s24 + $0xc] sm:$0xc] }
  0x49   : > { %v1608_v50 = vld [vmem:[%s2721_s3 + $0x48] sm:$0xff] }
  0x4a   : > { %v1174_v0 = vsel %vm982_vm6, %v1165_v58, %v1173_v59 }
  0x4c   : > { %2008 = vmatmul.mubr.msk.bf16.gmra.mrb[28].mxu0 %vm238_vm2, %v569_v61  ;;  %v1176_v61 = vshrl.u32 %v2476_v51, 16 }
  0x4d   : > { %2014 = vmatmul.mubr.msk.bf16.vlgmr.msra.gmra.mrb[28].mxu1 %vm238_vm2, %v723_v63  ;;  %2035 = vmatprep.mubr.msk.bf16.mxu0 %vm2202_vm1, %v2201_v1  ;;  %v1861_v63 = vld [vmem:[%s2719_s1 + $0x20] sm:$0xf] }
  0x4e   : > { %2056 = vmatpush3.bf16.msra.mxu1 %v1032_v3  ;;  %2017 = vmatprep.mubr.msk.bf16.mxu1 %vm2202_vm1, %v2201_v1  ;;  %v1178_v2 = vrot.slane %v1176_v61, 1  ;;  %v1181_v3 = vrot.slane %v1179_v62, 2  ;;  %v1487_v9 = vsel %vm254_vm0, %v1861_v63, 0  ;;  %v1450_v44 = vrot.slane %v1176_v61, 2 }
  0x4f   : > { %2099 = vmatprep.subr.bf16.mxu1 %v2201_v1  ;;  %v1455_v62 = vrot.slane %v1188_v20, 3 }
  0x54   : > { %2036 = vmatmul.mubr.msk.bf16.vlgmr.msra.gmra.mrb[32].mxu0 %vm238_vm2, %v866_v13  ;;  %v2203_v13 = vmov 0  }
  0x55   : > { %2018 = vmatmul.mubr.msk.bf16.gmra.mrb[32].mxu1 %vm238_vm2, %v731_v14  ;;  %2078 = vmatpush3.bf16.msra.mxu0 %v1227_v15  ;;  %v1599_v14 = vld [vmem:[%s2721_s3] sm:$0xff]  ;;  %v1182_v15 = vor.u32 %v1181_v3, %v1178_v2  ;;  %v1320_v3 = vrot.slane %v2453_v35, 2 }
  0x56   : > { %2021 = vmatprep.mubr.msk.bf16.mxu1 %vm2202_vm1, %v2201_v1  ;;  %2039 = vmatprep.mubr.msk.bf16.mxu0 %vm2202_vm1, %v2201_v1 }
  0x57   : > { %2121 = vmatprep.subr.bf16.mxu0 %v2201_v1  ;;  %2158 = vset.pattern.permute.xlu0 %v2203_v13  ;;  %v1183_v22 = vsel %vm982_vm6, %v1173_v59, %v1182_v15  ;;  %v1855_v59 = vcombine.low %v1312_v49, %v2448_v33 }
  0x58   : > { %1611 = vperm.xlu0 %2158, %v1599_v14   ;;  %2159 = vset.pattern.permute.xlu1 %v2203_v13 }
  0x59   : > { %1621 = vperm.xlu1 %2159, %v1601_v18   ;;  %v1439_v56 = vshrl.u32 %v1855_v59, 16  ;;  %v1319_v2 = vrot.slane %v1855_v59, 2 }
  0x5b   : > { %v1441_v33 = vrot.slane %v1439_v56, 2  ;;  %v1321_v13 = vsel %vm1318_vm7, %v1319_v2, %v1320_v3 }
  0x5c   : > { %2040 = vmatmul.mubr.msk.bf16.gmra.mrb[36].mxu0 %vm238_vm2, %v868_v23  ;;  %v1187_v23 = vrot.slane %v1185_v17, 1  ;;  %1616 = vperm.xlu0 %2158, %v1600_v21   ;;  %v1452_v21 = vor.u32 %v1451_v45, %v1450_v44 }
  0x5d   : > { %2022 = vmatmul.mubr.msk.bf16.gmra.mrb[36].mxu1 %vm238_vm2, %v739_v24  ;;  %2043 = vmatprep.mubr.msk.bf16.mxu0 %vm2202_vm1, %v2201_v1  ;;  %v1190_v24 = vrot.slane %v1188_v20, 2  ;;  %v1459_v20 = vrot.slane %v1197_v57, 3 }
  0x5e   : > { %2025 = vmatprep.mubr.msk.bf16.mxu1 %vm2202_vm1, %v2201_v1  ;;  %1626 = vperm.xlu1 %2159, %v1602_v19  }
  0x5f   : > { %v1191_v30 = vor.u32 %v1190_v24, %v1187_v23 }
  0x60   : > { %1631 = vperm.xlu0 %2158, %v1603_v5  }
  0x61   : > { %v1192_v36 = vsel %vm982_vm6, %v1182_v15, %v1191_v30  ;;  %v1448_v15 = vor.u32 %v1447_v12, %v1446_v10 }
  0x63   : > { %v1453_v61 = vsel %vm1437_vm8, %v1448_v15, %v1452_v21 }
  0x64   : > { %2044 = vmatmul.mubr.msk.bf16.gmra.mrb[40].mxu0 %vm238_vm2, %v870_v28  ;;  %v1004_v28 = vrot.slane %v744_v4, 2  ;;  %1641 = vperm.xlu0 %2158, %v1605_v46  }
  0x65   : > { %2026 = vmatmul.mubr.msk.bf16.gmra.mrb[40].mxu1 %vm238_vm2, %v747_v29  ;;  %2047 = vmatprep.mubr.msk.bf16.mxu0 %vm2202_vm1, %v2201_v1  ;;  %v2188_v29 = vld [vmem:[%s2258_s24 + $0x30] ss:$0 sps:$4 sm:$0x33]  }
  0x66   : > { %2029 = vmatprep.mubr.msk.bf16.mxu1 %vm2202_vm1, %v2201_v1  ;;  %v1005_v4 = vor.u32 %v1004_v28, %v1003_v27  ;;  %v1008_v31 = vshrl.u32 %v2188_v29, 16  ;;  %v1011_v32 = vshll.u32 %v2188_v29, 16  ;;  %v2192_v27 = vld [vmem:[%s2258_s24 + $0x34] ss:$0 sps:$4 sm:$0x77]  }
  0x67   : > { %v1463_v19 = vshrl.u32 %v2192_v27, 16 }
  0x68   : > { %v1006_v40 = vsel %vm982_vm6, %v1001_v11, %v1005_v4  ;;  %v1010_v41 = vrot.slane %v1008_v31, 1  ;;  %v1013_v42 = vrot.slane %v1011_v32, 2  ;;  %v1322_v11 = vrot.slane %v2476_v51, 2 }
  0x69   : > { %v1454_v51 = vrot.slane %v1185_v17, 2  ;;  %v1465_v57 = vrot.slane %v1463_v19, 2 }
  0x6a   : > { %v1014_v48 = vor.u32 %v1013_v42, %v1010_v41  ;;  %v1323_v18 = vsel %vm1318_vm7, %v1320_v3, %v1322_v11 }
  0x6b   : > { %v1456_v24 = vor.u32 %v1455_v62, %v1454_v51 }
  0x6c   : > { %2048 = vmatmul.mubr.msk.bf16.gmra.mrb[44].mxu0 %vm238_vm2, %v872_v34  ;;  %v1604_v34 = vld [vmem:[%s2721_s3 + $0x28] sm:$0xff]  ;;  %v1015_v58 = vsel %vm982_vm6, %v1005_v4, %v1014_v48 }
  0x6d   : > { %2030 = vmatmul.mubr.msk.bf16.gmra.mrb[44].mxu1 %vm238_vm2, %v2343_v16  ;;  %2051 = vmatprep.mubr.msk.bf16.mxu0 %vm2202_vm1, %v2201_v1  ;;  %v1854_v16 = vld [vmem:[%s2719_s1 + $0x1c] sm:$0xf]  ;;  %v1457_v17 = vsel %vm1437_vm8, %v1452_v21, %v1456_v24 }
  0x6e   : > { %2057 = vmatprep.mubr.msk.bf16.mxu1 %vm2202_vm1, %v2201_v1  ;;  %v1346_v55 = vsel %vm254_vm0, %v1854_v16, 0  ;;  %1636 = vperm.xlu1 %2159, %v1604_v34   ;;  %v1203_v16 = vshrl.u32 %v2561_v39, 16 }
  0x70   : > { %v1205_v54 = vrot.slane %v1203_v16, 1 }
  0x72   : > { %1646 = vperm.xlu1 %2159, %v1606_v43  }
  0x74   : > { %2052 = vmatmul.mubr.msk.bf16.gmra.mrb[48].mxu0 %vm238_vm2, %v874_v60  ;;  %v1200_v60 = vor.u32 %v1199_v38, %v1196_v37 }
  0x75   : > { %2058 = vmatmul.mubr.msk.bf16.vlgmr.msra.gmra.mrb[48].mxu1 %vm238_vm2, %v994_v52  ;;  %2079 = vmatprep.mubr.msk.bf16.mxu0 %vm2202_vm1, %v2201_v1  ;;  %v1607_v52 = vld [vmem:[%s2721_s3 + $0x40] sm:$0xff] }
  0x76   : > { %2100 = vmatpush3.bf16.msra.mxu1 %v1346_v55  ;;  %2061 = vmatprep.mubr.msk.bf16.mxu1 %vm2202_vm1, %v2201_v1  ;;  %v1201_v53 = vsel %vm982_vm6, %v1191_v30, %v1200_v60  ;;  %v1208_v55 = vrot.slane %v1206_v47, 2  ;;  %v1466_v30 = vshll.u32 %v2192_v27, 16 }
  0x77   : > { %1656 = vperm.xlu1 %2159, %v1608_v50   ;;  %1651 = vperm.xlu0 %2158, %v1607_v52  }
  0x78   : > { %v1209_v63 = vor.u32 %v1208_v55, %v1205_v54  ;;  %v1468_v4 = vrot.slane %v1466_v30, 3 }
  0x7a   : > { %v1469_v32 = vor.u32 %v1468_v4, %v1465_v57 }
  0x7c   : > { %2080 = vmatmul.mubr.msk.bf16.vlgmr.msra.gmra.mrb[52].mxu0 %vm238_vm2, %v1174_v0  ;;  %v1442_v0 = vshll.u32 %v1855_v59, 16 }
  0x7d   : > { %2062 = vmatmul.mubr.msk.bf16.gmra.mrb[52].mxu1 %vm238_vm2, %v998_v8  ;;  %2122 = vmatpush3.bf16.msra.mxu0 %v1487_v9  ;;  %v1210_v8 = vsel %vm982_vm6, %v1200_v60, %v1209_v63 }
  0x7e   : > { %2065 = vmatprep.mubr.msk.bf16.mxu1 %vm2202_vm1, %v2201_v1  ;;  %2083 = vmatprep.mubr.msk.bf16.mxu0 %vm2202_vm1, %v2201_v1  ;;  %v1444_v9 = vrot.slane %v1442_v0, 3 }
  0x80   : > { %v1445_v14 = vor.u32 %v1444_v9, %v1441_v33 }
  0x82   : > { %v1449_v35 = vsel %vm1437_vm8, %v1445_v14, %v1448_v15 }
  0x84   : > { %2084 = vmatmul.mubr.msk.bf16.gmra.mrb[56].mxu0 %vm238_vm2, %v1183_v22  ;;  %v1324_v22 = vrot.slane %v2499_v7, 2  ;;  %v1458_v7 = vrot.slane %v1194_v6, 2  ;;  %v1328_v6 = vrot.slane %v2561_v39, 2 }
  0x85   : > { %2066 = vmatmul.mubr.msk.bf16.gmra.mrb[56].mxu1 %vm238_vm2, %v1002_v26  ;;  %2087 = vmatprep.mubr.msk.bf16.mxu0 %vm2202_vm1, %v2201_v1  ;;  %v1326_v26 = vrot.slane %v2530_v25, 2 }
  0x86   : > { %2069 = vmatprep.mubr.msk.bf16.mxu1 %vm2202_vm1, %v2201_v1  ;;  %v1325_v23 = vsel %vm1318_vm7, %v1322_v11, %v1324_v22  ;;  %v1460_v29 = vor.u32 %v1459_v20, %v1458_v7 }
  0x87   : > { %v1327_v28 = vsel %vm1318_vm7, %v1324_v22, %v1326_v26  ;;  %v1329_v31 = vsel %vm1318_vm7, %v1326_v26, %v1328_v6 }
  0x88   : > { %v1461_v25 = vsel %vm1437_vm8, %v1456_v24, %v1460_v29  ;;  %v1470_v34 = vsel %vm1437_vm8, %v1460_v29, %v1469_v32 }
  0x8c   : > { %2088 = vmatmul.mubr.msk.bf16.gmra.mrb[60].mxu0 %vm238_vm2, %v1192_v36 }
  0x8d   : > { %2070 = vmatmul.mubr.msk.bf16.gmra.mrb[60].mxu1 %vm238_vm2, %v1006_v40  ;;  %2091 = vmatprep.mubr.msk.bf16.mxu0 %vm2202_vm1, %v2201_v1 }
  0x8e   : > { %2073 = vmatprep.mubr.msk.bf16.mxu1 %vm2202_vm1, %v2201_v1 }
  0x94   : > { %2092 = vmatmul.mubr.msk.bf16.gmra.mrb[64].mxu0 %vm238_vm2, %v1201_v53 }
  0x95   : > { %2074 = vmatmul.mubr.msk.bf16.gmra.mrb[64].mxu1 %vm238_vm2, %v1015_v58  ;;  %2095 = vmatprep.mubr.msk.bf16.mxu0 %vm2202_vm1, %v2201_v1 }
  0x96   : > { %2101 = vmatprep.mubr.msk.bf16.mxu1 %vm2202_vm1, %v2201_v1 }
  0x9c   : > { %2096 = vmatmul.mubr.msk.bf16.gmra.mrb[68].mxu0 %vm238_vm2, %v1210_v8 }
  0x9d   : > { %2102 = vmatmul.mubr.msk.bf16.vlgmr.msra.gmra.mrb[68].mxu1 %vm238_vm2, %v1321_v13  ;;  %2123 = vmatprep.mubr.msk.bf16.mxu0 %vm2202_vm1, %v2201_v1 }
  0x9e   : > { %2105 = vmatprep.mubr.msk.bf16.mxu1 %vm2202_vm1, %v2201_v1 }
  0xa4   : > { %2124 = vmatmul.mubr.msk.bf16.vlgmr.msra.gmra.mrb[72].mxu0 %vm238_vm2, %v1449_v35 }
  0xa5   : > { %2106 = vmatmul.mubr.msk.bf16.gmra.mrb[72].mxu1 %vm238_vm2, %v1323_v18  ;;  %2127 = vmatprep.mubr.msk.bf16.mxu0 %vm2202_vm1, %v2201_v1 }
  0xa6   : > { %2109 = vmatprep.mubr.msk.bf16.mxu1 %vm2202_vm1, %v2201_v1 }
  0xac   : > { %2128 = vmatmul.mubr.msk.bf16.gmra.mrb[76].mxu0 %vm238_vm2, %v1453_v61 }
  0xad   : > { %2110 = vmatmul.mubr.msk.bf16.gmra.mrb[76].mxu1 %vm238_vm2, %v1325_v23  ;;  %2131 = vmatprep.mubr.msk.bf16.mxu0 %vm2202_vm1, %v2201_v1 }
  0xae   : > { %2113 = vmatprep.mubr.msk.bf16.mxu1 %vm2202_vm1, %v2201_v1 }
  0xb4   : > { %2132 = vmatmul.mubr.msk.bf16.gmra.mrb[80].mxu0 %vm238_vm2, %v1457_v17 }
  0xb5   : > { %2114 = vmatmul.mubr.msk.bf16.gmra.mrb[80].mxu1 %vm238_vm2, %v1327_v28  ;;  %2135 = vmatprep.mubr.msk.bf16.mxu0 %vm2202_vm1, %v2201_v1 }
  0xb6   : > { %2117 = vmatprep.mubr.msk.bf16.mxu1 %vm2202_vm1, %v2201_v1 }
  0xbc   : > { %2136 = vmatmul.mubr.msk.bf16.gmra.mrb[84].mxu0 %vm238_vm2, %v1461_v25 }
  0xbd   : > { %2118 = vmatmul.mubr.msk.bf16.gmra.mrb[84].mxu1 %vm238_vm2, %v1329_v31  ;;  %2139 = vmatprep.mubr.msk.bf16.mxu0 %vm2202_vm1, %v2201_v1 }
  0xc4   : > { %2140 = vmatmul.mubr.msk.bf16.gmra.mrb[88].mxu0 %vm238_vm2, %v1470_v34 }
  0xe7   : > { %v292_v5 = vpop.f32.mrb[0].mxu0 }
  0xe8   : > { %v1949_v36 = vpop.f32.mrb[1].mxu0  ;;  %v316_v37 = vpop.f32.mrb[0].mxu1 }
  0xe9   : > { %v295_v38 = vpop.f32.mrb[2].mxu0  ;;  %v1961_v39 = vpop.f32.mrb[1].mxu1 }
  0xea   : > { %v1950_v40 = vpop.f32.mrb[3].mxu0  ;;  %v319_v41 = vpop.f32.mrb[2].mxu1 }
  0xeb   : > { %v1962_v42 = vpop.f32.mrb[3].mxu1 }
  0xef   : > { %v300_v43 = vpop.f32.mrb[4].mxu0 }
  0xf0   : > { %v1953_v46 = vpop.f32.mrb[5].mxu0  ;;  %v324_v60 = vpop.f32.mrb[4].mxu1 }
  0xf1   : > { %v303_v16 = vpop.f32.mrb[6].mxu0  ;;  %v1965_v47 = vpop.f32.mrb[5].mxu1 }
  0xf2   : > { %v1954_v48 = vpop.f32.mrb[7].mxu0  ;;  %v327_v1 = vpop.f32.mrb[6].mxu1 }
  0xf3   : > { %v1966_v49 = vpop.f32.mrb[7].mxu1 }
  0xf7   : > { %v308_v50 = vpop.f32.mrb[8].mxu0 }
  0xf8   : > { %v445_v52 = vpop.f32.mrb[8].mxu1  ;;  %v1957_v53 = vpop.f32.mrb[9].mxu0 }
  0xf9   : > { %v446_v54 = vadd.f32 %v445_v52, %v292_v5  ;;  %v1971_v55 = vpop.f32.mrb[9].mxu1  ;;  %v311_v58 = vpop.f32.mrb[10].mxu0 }
  0xfa   : > { %v448_v59 = vpop.f32.mrb[10].mxu1  ;;  %v1958_v56 = vpop.f32.mrb[11].mxu0 }
  0xfb   : > { %v449_v63 = vadd.f32 %v448_v59, %v295_v38  ;;  %v1972_v0 = vpop.f32.mrb[11].mxu1 }
  0xff   : > { %v622_v2 = vpop.f32.mrb[12].mxu0 }
 0x100   : > { %v453_v3 = vpop.f32.mrb[12].mxu1  ;;  %v661_v33 = vadd.f32 %v622_v2, %v446_v54  ;;  %v1993_v8 = vpop.f32.mrb[13].mxu0 }
 0x101   : > { %v454_v9 = vadd.f32 %v453_v3, %v300_v43  ;;  %v1975_v10 = vpop.f32.mrb[13].mxu1  ;;  %v625_v12 = vpop.f32.mrb[14].mxu0 }
 0x102   : > { %v456_v13 = vpop.f32.mrb[14].mxu1  ;;  %v662_v14 = vadd.f32 %v625_v12, %v449_v63  ;;  %v1994_v15 = vpop.f32.mrb[15].mxu0 }
 0x103   : > { %v457_v11 = vadd.f32 %v456_v13, %v303_v16  ;;  %v1976_v35 = vpop.f32.mrb[15].mxu1 }
 0x107   : > { %v630_v44 = vpop.f32.mrb[16].mxu0 }
 0x108   : > { %v461_v45 = vpop.f32.mrb[16].mxu1  ;;  %v663_v18 = vadd.f32 %v630_v44, %v454_v9  ;;  %v1997_v21 = vpop.f32.mrb[17].mxu0 }
 0x109   : > { %v462_v22 = vadd.f32 %v461_v45, %v308_v50  ;;  %v1979_v61 = vpop.f32.mrb[17].mxu1  ;;  %v633_v51 = vpop.f32.mrb[18].mxu0 }
 0x10a   : > { %v464_v62 = vpop.f32.mrb[18].mxu1  ;;  %v664_v23 = vadd.f32 %v633_v51, %v457_v11  ;;  %v1998_v24 = vpop.f32.mrb[19].mxu0 }
 0x10b   : > { %v465_v26 = vadd.f32 %v464_v62, %v311_v58  ;;  %v1980_v17 = vpop.f32.mrb[19].mxu1 }
 0x10f   : > { %v638_v7 = vpop.f32.mrb[20].mxu0 }
 0x110   : > { %v469_v20 = vpop.f32.mrb[20].mxu1  ;;  %v665_v27 = vadd.f32 %v638_v7, %v462_v22  ;;  %v2001_v28 = vpop.f32.mrb[21].mxu0 }
 0x111   : > { %v470_v29 = vadd.f32 %v469_v20, %v316_v37  ;;  %v1983_v19 = vpop.f32.mrb[21].mxu1  ;;  %v641_v30 = vpop.f32.mrb[22].mxu0 }
 0x112   : > { %v472_v6 = vpop.f32.mrb[22].mxu1  ;;  %v666_v25 = vadd.f32 %v641_v30, %v465_v26  ;;  %v2002_v57 = vpop.f32.mrb[23].mxu0 }
 0x113   : > { %v473_v4 = vadd.f32 %v472_v6, %v319_v41  ;;  %v1984_v31 = vpop.f32.mrb[23].mxu1 }
 0x117   : > { %v646_v32 = vpop.f32.mrb[24].mxu0 }
 0x118   : > { %v477_v34 = vpop.f32.mrb[24].mxu1  ;;  %v667_v5 = vadd.f32 %v646_v32, %v470_v29  ;;  %v2005_v36 = vpop.f32.mrb[25].mxu0 }
 0x119   : > { %v478_v38 = vadd.f32 %v477_v34, %v324_v60  ;;  %v1987_v39 = vpop.f32.mrb[25].mxu1  ;;  %v649_v40 = vpop.f32.mrb[26].mxu0 }
 0x11a   : > { %v480_v42 = vpop.f32.mrb[26].mxu1  ;;  %v668_v43 = vadd.f32 %v649_v40, %v473_v4  ;;  %v2006_v46 = vpop.f32.mrb[27].mxu0 }
 0x11b   : > { %v481_v16 = vadd.f32 %v480_v42, %v327_v1  ;;  %v1988_v47 = vpop.f32.mrb[27].mxu1 }
 0x11f   : > { %v654_v37 = vpop.f32.mrb[28].mxu0 }
 0x120   : > { %v669_v48 = vadd.f32 %v654_v37, %v478_v38  ;;  %v808_v49 = vpop.f32.mrb[28].mxu1  ;;  %v2009_v50 = vpop.f32.mrb[29].mxu0 }
 0x121   : > { %v847_v52 = vadd.f32 %v808_v49, %v661_v33  ;;  %v2015_v53 = vpop.f32.mrb[29].mxu1  ;;  %v657_v41 = vpop.f32.mrb[30].mxu0 }
 0x122   : > { %v670_v54 = vadd.f32 %v657_v41, %v481_v16  ;;  %v811_v55 = vpop.f32.mrb[30].mxu1  ;;  %v2010_v58 = vpop.f32.mrb[31].mxu0 }
 0x123   : > { %v848_v59 = vadd.f32 %v811_v55, %v662_v14  ;;  %v2016_v56 = vpop.f32.mrb[31].mxu1 }
 0x127   : > { %v927_v60 = vpop.f32.mrb[32].mxu0 }
 0x128   : > { %v816_v63 = vpop.f32.mrb[32].mxu1  ;;  %v966_v0 = vadd.f32 %v927_v60, %v847_v52  ;;  %v2037_v2 = vpop.f32.mrb[33].mxu0 }
 0x129   : > { %v849_v3 = vadd.f32 %v816_v63, %v663_v18  ;;  %v2019_v8 = vpop.f32.mrb[33].mxu1  ;;  %v930_v1 = vpop.f32.mrb[34].mxu0 }
 0x12a   : > { %v819_v9 = vpop.f32.mrb[34].mxu1  ;;  %v967_v10 = vadd.f32 %v930_v1, %v848_v59  ;;  %v2038_v12 = vpop.f32.mrb[35].mxu0 }
 0x12b   : > { %v850_v13 = vadd.f32 %v819_v9, %v664_v23  ;;  %v2020_v15 = vpop.f32.mrb[35].mxu1 }
 0x12f   : > { %v935_v33 = vpop.f32.mrb[36].mxu0 }
 0x130   : > { %v824_v11 = vpop.f32.mrb[36].mxu1  ;;  %v968_v35 = vadd.f32 %v935_v33, %v849_v3  ;;  %v2041_v44 = vpop.f32.mrb[37].mxu0 }
 0x131   : > { %v851_v45 = vadd.f32 %v824_v11, %v665_v27  ;;  %v2023_v21 = vpop.f32.mrb[37].mxu1  ;;  %v938_v14 = vpop.f32.mrb[38].mxu0 }
 0x132   : > { %v827_v22 = vpop.f32.mrb[38].mxu1  ;;  %v969_v61 = vadd.f32 %v938_v14, %v850_v13  ;;  %v2042_v51 = vpop.f32.mrb[39].mxu0 }
 0x133   : > { %v852_v62 = vadd.f32 %v827_v22, %v666_v25  ;;  %v2024_v24 = vpop.f32.mrb[39].mxu1 }
 0x137   : > { %v943_v18 = vpop.f32.mrb[40].mxu0 }
 0x138   : > { %v832_v26 = vpop.f32.mrb[40].mxu1  ;;  %v970_v17 = vadd.f32 %v943_v18, %v851_v45  ;;  %v2045_v7 = vpop.f32.mrb[41].mxu0 }
 0x139   : > { %v853_v20 = vadd.f32 %v832_v26, %v667_v5  ;;  %v2027_v28 = vpop.f32.mrb[41].mxu1  ;;  %v946_v23 = vpop.f32.mrb[42].mxu0 }
 0x13a   : > { %v835_v29 = vpop.f32.mrb[42].mxu1  ;;  %v971_v19 = vadd.f32 %v946_v23, %v852_v62  ;;  %v2046_v30 = vpop.f32.mrb[43].mxu0 }
 0x13b   : > { %v854_v6 = vadd.f32 %v835_v29, %v668_v43  ;;  %v2028_v57 = vpop.f32.mrb[43].mxu1 }
 0x13f   : > { %v951_v27 = vpop.f32.mrb[44].mxu0 }
 0x140   : > { %v840_v4 = vpop.f32.mrb[44].mxu1  ;;  %v972_v31 = vadd.f32 %v951_v27, %v853_v20  ;;  %v2049_v32 = vpop.f32.mrb[45].mxu0 }
 0x141   : > { %v855_v34 = vadd.f32 %v840_v4, %v669_v48  ;;  %v2031_v36 = vpop.f32.mrb[45].mxu1  ;;  %v954_v25 = vpop.f32.mrb[46].mxu0 }
 0x142   : > { %v843_v38 = vpop.f32.mrb[46].mxu1  ;;  %v973_v39 = vadd.f32 %v954_v25, %v854_v6  ;;  %v2050_v40 = vpop.f32.mrb[47].mxu0 }
 0x143   : > { %v856_v42 = vadd.f32 %v843_v38, %v670_v54  ;;  %v2032_v46 = vpop.f32.mrb[47].mxu1 }
 0x147   : > { %v959_v5 = vpop.f32.mrb[48].mxu0 }
 0x148   : > { %v974_v16 = vadd.f32 %v959_v5, %v855_v34  ;;  %v1068_v47 = vpop.f32.mrb[48].mxu1  ;;  %v2053_v37 = vpop.f32.mrb[49].mxu0 }
 0x149   : > { %v1107_v49 = vadd.f32 %v1068_v47, %v966_v0  ;;  %v2059_v50 = vpop.f32.mrb[49].mxu1  ;;  %v962_v43 = vpop.f32.mrb[50].mxu0 }
 0x14a   : > { %v975_v52 = vadd.f32 %v962_v43, %v856_v42  ;;  %v1071_v53 = vpop.f32.mrb[50].mxu1  ;;  %v2054_v41 = vpop.f32.mrb[51].mxu0 }
 0x14b   : > { %v1108_v55 = vadd.f32 %v1071_v53, %v967_v10  ;;  %v2060_v58 = vpop.f32.mrb[51].mxu1 }
 0x14f   : > { %v1263_v48 = vpop.f32.mrb[52].mxu0 }
 0x150   : > { %v1076_v59 = vpop.f32.mrb[52].mxu1  ;;  %v1302_v56 = vadd.f32 %v1263_v48, %v1107_v49  ;;  %v2081_v60 = vpop.f32.mrb[53].mxu0 }
 0x151   : > { %v1109_v63 = vadd.f32 %v1076_v59, %v968_v35  ;;  %v2063_v2 = vpop.f32.mrb[53].mxu1  ;;  %v1266_v54 = vpop.f32.mrb[54].mxu0 }
 0x152   : > { %v1079_v3 = vpop.f32.mrb[54].mxu1  ;;  %v1303_v8 = vadd.f32 %v1266_v54, %v1108_v55  ;;  %v2082_v1 = vpop.f32.mrb[55].mxu0 }
 0x153   : > { %v1110_v9 = vadd.f32 %v1079_v3, %v969_v61  ;;  %v2064_v12 = vpop.f32.mrb[55].mxu1  ;;  %v1612_v55 = vpop.permute.xlu0 %1611 }
 0x157   : > { %v1271_v0 = vpop.f32.mrb[56].mxu0 }
 0x158   : > { %v1084_v13 = vpop.f32.mrb[56].mxu1  ;;  %v1304_v15 = vadd.f32 %v1271_v0, %v1109_v63  ;;  %v2085_v33 = vpop.f32.mrb[57].mxu0 }
 0x159   : > { %v1111_v11 = vadd.f32 %v1084_v13, %v970_v17  ;;  %v2067_v44 = vpop.f32.mrb[57].mxu1  ;;  %v1274_v10 = vpop.f32.mrb[58].mxu0 }
 0x15a   : > { %v1087_v45 = vpop.f32.mrb[58].mxu1  ;;  %v1305_v21 = vadd.f32 %v1274_v10, %v1110_v9  ;;  %v2086_v14 = vpop.f32.mrb[59].mxu0 }
 0x15b   : > { %v1112_v22 = vadd.f32 %v1087_v45, %v971_v19  ;;  %v2068_v51 = vpop.f32.mrb[59].mxu1  ;;  %v1617_v13 = vpop.permute.xlu0 %1616 }
 0x15f   : > { %v1279_v35 = vpop.f32.mrb[60].mxu0 }
 0x160   : > { %v1092_v62 = vpop.f32.mrb[60].mxu1  ;;  %v2656_v24 = vadd.f32 %v1279_v35, %v1111_v11  ;;  %v2089_v18 = vpop.f32.mrb[61].mxu0 }
 0x161   : > { %v1113_v26 = vadd.f32 %v1092_v62, %v972_v31  ;;  %v2071_v61 = vpop.f32.mrb[61].mxu1  ;;  %v1282_v7 = vpop.f32.mrb[62].mxu0 }
 0x162   : > { %v1095_v20 = vpop.f32.mrb[62].mxu1  ;;  %v2658_v28 = vadd.f32 %v1282_v7, %v1112_v22  ;;  %v2090_v23 = vpop.f32.mrb[63].mxu0 }
 0x163   : > { %v1114_v17 = vadd.f32 %v1095_v20, %v973_v39  ;;  %v2072_v29 = vpop.f32.mrb[63].mxu1 }
 0x167   : > { %v1287_v30 = vpop.f32.mrb[64].mxu0 }
 0x168   : > { %v1100_v6 = vpop.f32.mrb[64].mxu1  ;;  %v2660_v57 = vadd.f32 %v1287_v30, %v1113_v26  ;;  %v2093_v19 = vpop.f32.mrb[65].mxu0 }
 0x169   : > { %v1115_v27 = vadd.f32 %v1100_v6, %v974_v16  ;;  %v2075_v4 = vpop.f32.mrb[65].mxu1  ;;  %v1290_v32 = vpop.f32.mrb[66].mxu0 }
 0x16a   : > { %v1103_v34 = vpop.f32.mrb[66].mxu1  ;;  %v2662_v36 = vadd.f32 %v1290_v32, %v1114_v17  ;;  %v2094_v31 = vpop.f32.mrb[67].mxu0 }
 0x16b   : > { %v1116_v25 = vadd.f32 %v1103_v34, %v975_v52  ;;  %v2076_v38 = vpop.f32.mrb[67].mxu1  ;;  %v2671_v52 = vld [vmem:[%s2720_s2] ss:$0 sm:$0xff] }
 0x16f   : > { %v1295_v40 = vpop.f32.mrb[68].mxu0 }
 0x170   : > { %v2664_v42 = vadd.f32 %v1295_v40, %v1115_v27  ;;  %v1382_v46 = vpop.f32.mrb[68].mxu1  ;;  %v2097_v39 = vpop.f32.mrb[69].mxu0 }
 0x171   : > { %v1421_v5 = vadd.f32 %v1382_v46, %v1302_v56  ;;  %v2103_v47 = vpop.f32.mrb[69].mxu1  ;;  %v1298_v37 = vpop.f32.mrb[70].mxu0 }
 0x172   : > { %v2666_v49 = vadd.f32 %v1298_v37, %v1116_v25  ;;  %v1385_v50 = vpop.f32.mrb[70].mxu1  ;;  %v2098_v16 = vpop.f32.mrb[71].mxu0 }
 0x173   : > { %v1422_v43 = vadd.f32 %v1385_v50, %v1303_v8  ;;  %v2104_v53 = vpop.f32.mrb[71].mxu1 }
 0x177   : > { %v1523_v41 = vpop.f32.mrb[72].mxu0 }
 0x178   : > { %v1390_v58 = vpop.f32.mrb[72].mxu1  ;;  %v1562_v48 = vadd.f32 %v1523_v41, %v1421_v5  ;;  %v2125_v59 = vpop.f32.mrb[73].mxu0 }
 0x179   : > { %v1423_v56 = vadd.f32 %v1390_v58, %v1304_v15  ;;  %v2107_v60 = vpop.f32.mrb[73].mxu1  ;;  %v1526_v63 = vpop.f32.mrb[74].mxu0 }
 0x17a   : > { %v1579_v2 = vadd.f32 %v2671_v52, %v1562_v48  ;;  %v1393_v54 = vpop.f32.mrb[74].mxu1  ;;  %v1563_v3 = vadd.f32 %v1526_v63, %v1422_v43  ;;  %v2126_v8 = vpop.f32.mrb[75].mxu0 }
 0x17b   : > { %v1424_v1 = vadd.f32 %v1393_v54, %v1305_v21  ;;  %v2108_v9 = vpop.f32.mrb[75].mxu1  ;;  %v1622_v15 = vpop.permute.xlu1 %1621 }
 0x17c   : > { %v1580_v12 = vadd.f32 %v2671_v52, %v1563_v3  ;;  %v1589_v0 = vmax.f32 %v1579_v2, 0.0 }
 0x17e   : > { %v1659_v33 = vmul.f32 %v1612_v55, %v1589_v0  ;;  %v1590_v11 = vmax.f32 %v1580_v12, 0.0 }
 0x17f   : > { %v1531_v44 = vpop.f32.mrb[76].mxu0  ;;  %v1627_v19 = vpop.permute.xlu1 %1626 }
 0x180   : > { %v1881_v10 = vpack.c.bf16 %v1659_v33, %v1659_v33  ;;  %v1660_v45 = vmul.f32 %v1617_v13, %v1590_v11  ;;  %v1398_v21 = vpop.f32.mrb[76].mxu1  ;;  %v1564_v14 = vadd.f32 %v1531_v44, %v1423_v56  ;;  %v2129_v22 = vpop.f32.mrb[77].mxu0 }
 0x181   : > { %v1425_v51 = vadd.f32 %v1398_v21, %v2656_v24  ;;  %v2111_v35 = vpop.f32.mrb[77].mxu1  ;;  %v1534_v62 = vpop.f32.mrb[78].mxu0 }
 0x182   : > { %1710 = vst.msk [vmem:[%s2679_s14] sm:$0xf] %vm1709_vm9, %v1881_v10  ;;  %v1882_v18 = vpack.c.bf16 %v1660_v45, %v1660_v45  ;;  %v1581_v26 = vadd.f32 %v2671_v52, %v1564_v14  ;;  %v1401_v61 = vpop.f32.mrb[78].mxu1  ;;  %v1565_v7 = vadd.f32 %v1534_v62, %v1424_v1  ;;  %v2130_v20 = vpop.f32.mrb[79].mxu0 }
 0x183   : > { %v1426_v23 = vadd.f32 %v1401_v61, %v2658_v28  ;;  %v2112_v17 = vpop.f32.mrb[79].mxu1  ;;  %v1637_v58 = vpop.permute.xlu1 %1636 }
 0x184   : > { %1711 = vst.msk [vmem:[%s2679_s14 + $0x4] sm:$0xf] %vm1709_vm9, %v1882_v18  ;;  %v1591_v29 = vmax.f32 %v1581_v26, 0.0  ;;  %v1582_v30 = vadd.f32 %v2671_v52, %v1565_v7 }
 0x186   : > { %v1661_v24 = vmul.f32 %v1622_v15, %v1591_v29  ;;  %v1592_v6 = vmax.f32 %v1582_v30, 0.0 }
 0x187   : > { %v1539_v27 = vpop.f32.mrb[80].mxu0  ;;  %v1647_v45 = vpop.permute.xlu1 %1646 }
 0x188   : > { %v1883_v4 = vpack.c.bf16 %v1661_v24, %v1661_v24  ;;  %v1662_v32 = vmul.f32 %v1627_v19, %v1592_v6  ;;  %v1406_v34 = vpop.f32.mrb[80].mxu1  ;;  %v1566_v31 = vadd.f32 %v1539_v27, %v1425_v51  ;;  %v2133_v25 = vpop.f32.mrb[81].mxu0 }
 0x189   : > { %v1427_v38 = vadd.f32 %v1406_v34, %v2660_v57  ;;  %v2115_v28 = vpop.f32.mrb[81].mxu1  ;;  %v1542_v40 = vpop.f32.mrb[82].mxu0 }
 0x18a   : > { %1712 = vst.msk [vmem:[%s2679_s14 + $0x8] sm:$0xf] %vm1709_vm9, %v1883_v4  ;;  %v1884_v46 = vpack.c.bf16 %v1662_v32, %v1662_v32  ;;  %v1583_v39 = vadd.f32 %v2671_v52, %v1566_v31  ;;  %v1409_v5 = vpop.f32.mrb[82].mxu1  ;;  %v1567_v47 = vadd.f32 %v1542_v40, %v1426_v23  ;;  %v2134_v37 = vpop.f32.mrb[83].mxu0 }
 0x18b   : > { %v1428_v50 = vadd.f32 %v1409_v5, %v2662_v36  ;;  %v2116_v16 = vpop.f32.mrb[83].mxu1  ;;  %v1632_v57 = vpop.permute.xlu0 %1631 }
 0x18c   : > { %1713 = vst.msk [vmem:[%s2679_s14 + $0xc] sm:$0xf] %vm1709_vm9, %v1884_v46  ;;  %v1593_v43 = vmax.f32 %v1583_v39, 0.0  ;;  %v1584_v53 = vadd.f32 %v2671_v52, %v1567_v47  ;;  %v1657_v30 = vpop.permute.xlu1 %1656 }
 0x18e   : > { %v1663_v41 = vmul.f32 %v1632_v57, %v1593_v43  ;;  %v1594_v55 = vmax.f32 %v1584_v53, 0.0 }
 0x18f   : > { %v1547_v48 = vpop.f32.mrb[84].mxu0 }
 0x190   : > { %v1885_v59 = vpack.c.bf16 %v1663_v41, %v1663_v41  ;;  %v1664_v56 = vmul.f32 %v1637_v58, %v1594_v55  ;;  %v1414_v60 = vpop.f32.mrb[84].mxu1  ;;  %v1568_v63 = vadd.f32 %v1547_v48, %v1427_v38  ;;  %v2137_v2 = vpop.f32.mrb[85].mxu0 }
 0x191   : > { %v1429_v36 = vadd.f32 %v1414_v60, %v2664_v42  ;;  %v2119_v54 = vpop.f32.mrb[85].mxu1  ;;  %v1550_v3 = vpop.f32.mrb[86].mxu0 }
 0x192   : > { %1714 = vst.msk [vmem:[%s2679_s14 + $0x10] sm:$0xf] %vm1709_vm9, %v1885_v59  ;;  %v1886_v8 = vpack.c.bf16 %v1664_v56, %v1664_v56  ;;  %v1585_v1 = vadd.f32 %v2671_v52, %v1568_v63  ;;  %v1417_v9 = vpop.f32.mrb[86].mxu1  ;;  %v1569_v12 = vadd.f32 %v1550_v3, %v1428_v50  ;;  %v2138_v0 = vpop.f32.mrb[87].mxu0 }
 0x193   : > { %v1430_v13 = vadd.f32 %v1417_v9, %v2666_v49  ;;  %v2120_v33 = vpop.f32.mrb[87].mxu1  ;;  %v1642_v42 = vpop.permute.xlu0 %1641 }
 0x194   : > { %1715 = vst.msk [vmem:[%s2679_s14 + $0x14] sm:$0xf] %vm1709_vm9, %v1886_v8  ;;  %v1595_v11 = vmax.f32 %v1585_v1, 0.0  ;;  %v1586_v15 = vadd.f32 %v2671_v52, %v1569_v12 }
 0x196   : > { %v1665_v44 = vmul.f32 %v1642_v42, %v1595_v11  ;;  %v1596_v10 = vmax.f32 %v1586_v15, 0.0 }
 0x197   : > { %v1555_v21 = vpop.f32.mrb[88].mxu0  ;;  %v1652_v23 = vpop.permute.xlu0 %1651 }
 0x198   : > { %v1887_v14 = vpack.c.bf16 %v1665_v44, %v1665_v44  ;;  %v1666_v22 = vmul.f32 %v1647_v45, %v1596_v10  ;;  %v1570_v51 = vadd.f32 %v1555_v21, %v1429_v36  ;;  %v2141_v35 = vpop.f32.mrb[89].mxu0 }
 0x199   : > { %v1558_v62 = vpop.f32.mrb[90].mxu0 }
 0x19a   : > { %1716 = vst.msk [vmem:[%s2679_s14 + $0x18] sm:$0xf] %vm1709_vm9, %v1887_v14  ;;  %v1888_v49 = vpack.c.bf16 %v1666_v22, %v1666_v22  ;;  %v1587_v18 = vadd.f32 %v2671_v52, %v1570_v51  ;;  %v1571_v26 = vadd.f32 %v1558_v62, %v1430_v13  ;;  %v2142_v61 = vpop.f32.mrb[91].mxu0 }
 0x19c   : > { %1717 = vst.msk [vmem:[%s2679_s14 + $0x1c] sm:$0xf] %vm1709_vm9, %v1888_v49  ;;  %v1597_v7 = vmax.f32 %v1587_v18, 0.0  ;;  %v1588_v20 = vadd.f32 %v2671_v52, %v1571_v26 }
 0x19e   : > { %v1667_v17 = vmul.f32 %v1652_v23, %v1597_v7  ;;  %v1598_v29 = vmax.f32 %v1588_v20, 0.0 }
 0x1a0   : > { %v1889_v24 = vpack.c.bf16 %v1667_v17, %v1667_v17  ;;  %v1668_v6 = vmul.f32 %v1657_v30, %v1598_v29 }
 0x1a2   : > { %1718 = vst.msk [vmem:[%s2679_s14 + $0x20] sm:$0xf] %vm1709_vm9, %v1889_v24  ;;  %v1890_v19 = vpack.c.bf16 %v1668_v6, %v1668_v6 }
 0x1a4   : > { %1719 = vst.msk [vmem:[%s2679_s14 + $0x24] sm:$0xf] %vm1709_vm9, %v1890_v19 }
 0x1a5 PF: > { %s14_s15 = sadd.s32 1, %s2199_s15  }
 0x1a6   : > { %p11_p4 = scmp.ge.s32.totalorder %s14_s15, 4  }
 0x1a8   :  { %13 = sbr.rel (!%p11_p4) target bundleno = 1 (0x1), region = 74 }

// kernel: forward.19
= control target key start
LH: loop header
LB: loop body
LE: loop exit
PB: predicated region body
PF: predicated region fallthrough
CT: control target
= control target key end

     0   :  { %s2348_s18 = smov 0   ;;  %s2851_s0 = inlined_call_operand.vmem [shape: bf16[2,116,8], index: 0, kind: input, shape index: {}]   ;;  %s2852_s1 = inlined_call_operand.vmem [shape: bf16[9,8,8], index: 1, kind: input, shape index: {}]   ;;  %s2853_s2 = inlined_call_operand.vmem [shape: f32[1,8], index: 2, kind: input, shape index: {}]   ;;  %s2854_s3 = inlined_call_operand.vmem [shape: f32[80,1], index: 3, kind: input, shape index: {}]   ;;  %s2855_s4 = inlined_call_operand.vmem [shape: bf16[2,80,8], index: 4, kind: input, shape index: {}]   ;;  %s2856_s5 = inlined_call_operand.vmem [shape: bf16[2,80,8], index: 5, kind: output, shape index: {}]  }
   0x1 LB: > { %s1864_s19 = sadd.s32 4294967295, %s2313_s18   ;;  %p1868_p0 = scmp.ge.s32.totalorder %s2313_s18, 1  ;;  %s2313_s18 = sphi %s2348_s18, %s15_s18  }
   0x2   : > { %p197_p1 = scmp.lt.s32.totalorder %s2313_s18, 3 }
   0x4   : > { %p198_p2 = pnand %p1868_p0, %p197_p1 }
   0x5   : > { %v1872_v0 = vld [vmem:[%s2852_s1 + $0x4] sm:$0xf] (!%p198_p2)  ;;  %vm301_vm0 = vcmask (!%p198_p2), 1043456   ;;  %p230_p3 = scmp.lt.s32.totalorder (!%p198_p2), %s1864_s19, 1  ;;  %v2315_v1 = vmov (!%p198_p2), 0.0   ;;  %vm2316_vm1 = vmmov (!%p198_p2), 0  }
   0x6   : > { %201 = sbr.rel (%p198_p2) target bundleno = 423 (0x1a7), region = 40  ;;  %2059 = vmatprep.subr.bf16.mxu0 (!%p198_p2), %v2315_v1  ;;  %2257 = vmatprep.subr.bf16.mxu1 (!%p198_p2), %v2315_v1  ;;  %v303_v2 = vsel (!%p198_p2), %vm301_vm0, %v1872_v0, 0  ;;  %v1894_v3 = vld [vmem:[%s2852_s1 + $0x8] sm:$0xf] (!%p198_p2)  ;;  %vm285_vm2 = vcmask (!%p198_p2), 64512   ;;  %vm910_vm5 = vcmask (!%p198_p2), 1046528  }
   0x7   : > { %2060 = vmatpush3.bf16.msra.mxu0 (!%p198_p2), %v303_v2  ;;  %2258 = vmatpush3.bf16.msra.mxu1 (!%p198_p2), %v303_v2  ;;  %v633_v4 = vsel (!%p198_p2), %vm301_vm0, %v1894_v3, 0  ;;  %v257_v5 = vld [vmem:[%s2852_s1] sm:$0xf] (!%p198_p2)  ;;  %vm386_vm3 = vsmask.f32 (!%p198_p2), 4352  ;;  %vm1365_vm7 = vcmask (!%p198_p2), 1045504  }
   0x8   : > { %2061 = vmatprep.mubr.msk.bf16.mxu0 (!%p198_p2), %vm2316_vm1, %v2315_v1  ;;  %2073 = vmatprep.mubr.msk.bf16.mxu1 (!%p198_p2), %vm2316_vm1, %v2315_v1  ;;  %v456_v15 = vsel (!%p198_p2), %vm301_vm0, %v257_v5, 0  ;;  %v1906_v41 = vld [vmem:[%s2852_s1 + $0xc] sm:$0xf] (!%p198_p2)  ;;  %v1918_v50 = vld [vmem:[%s2852_s1 + $0x10] sm:$0xf] (!%p198_p2)  ;;  %vm1786_vm9 = vcmask (!%p198_p2), 60416  }
   0x9   : > { %2103 = vmatprep.subr.bf16.mxu0 (!%p198_p2), %v2315_v1  ;;  %2081 = vmatprep.subr.bf16.mxu1 (!%p198_p2), %v2315_v1  ;;  %v819_v49 = vsel (!%p198_p2), %vm301_vm0, %v1906_v41, 0  ;;  %vm572_vm4 = vsmask.f32 (!%p198_p2), 7424  ;;  %v938_v59 = vsel (!%p198_p2), %vm301_vm0, %v1918_v50, 0  ;;  %vm1029_vm6 = vsmask.f32 (!%p198_p2), 6400 }
   0xa   : > { %vm1484_vm8 = vsmask.f32 (!%p198_p2), 5376 }
   0xd   : > { %s2858_s19 = smov (!%p230_p3, %s1864_s19), 1 }
   0xe   : > { %s2259_s24 = smul.u32 60, %s2858_s19 }
  0x10   : > { %s2377_s27 = scalar_lea.vmem %s2851_s0, %s2259_s24 }
  0x11   : > { %v246_v6 = vld [vmem:[%s2377_s27] sm:$0x8]  ;;  %v247_v7 = vld [vmem:[%s2377_s27 + $0x4] sm:$0xf]  ;;  %v248_v8 = vld [vmem:[%s2377_s27 + $0x8] sm:$0xf] }
  0x12   : > { %v1873_v9 = vcombine.low %v247_v7, %v248_v8  ;;  %v1883_v10 = vcombine.low %v246_v6, %v247_v7  ;;  %v253_v11 = vld [vmem:[%s2377_s27 + $0x1c] sm:$0xf]  ;;  %v2388_v12 = vld [vmem:[%s2377_s27 + $0x20] sm:$0xf]  ;;  %v249_v13 = vld [vmem:[%s2377_s27 + $0xc] sm:$0xf] }
  0x13   : > { %v1876_v14 = vcombine.low %v253_v11, %v2388_v12  ;;  %v1884_v16 = vcombine.low %v248_v8, %v249_v13  ;;  %v250_v17 = vld [vmem:[%s2377_s27 + $0x10] sm:$0xf]  ;;  %v255_v18 = vld [vmem:[%s2377_s27 + $0x24] sm:$0xf]  ;;  %v2397_v19 = vld [vmem:[%s2377_s27 + $0x28] sm:$0xf] }
  0x14   : > { %2062 = vmatmul.mubr.msk.bf16.vlgmr.msra.gmra.mrb[0].mxu0 %vm285_vm2, %v1873_v9  ;;  %v388_v20 = vshrl.u32 %v1883_v10, 16  ;;  %v391_v21 = vshll.u32 %v1883_v10, 16  ;;  %v251_v24 = vld [vmem:[%s2377_s27 + $0x14] sm:$0xf]  ;;  %v1874_v25 = vcombine.low %v249_v13, %v250_v17  ;;  %v1877_v27 = vcombine.low %v255_v18, %v2397_v19  ;;  %v2285_v28 = vld [vmem:[%s2377_s27 + $0x4] sm:$0xff]   ;;  %v2286_v34 = vld [vmem:[%s2377_s27 + $0xc] sm:$0xff]  }
  0x15   : > { %2074 = vmatmul.mubr.msk.bf16.vlgmr.msra.gmra.mrb[0].mxu1 %vm285_vm2, %v1876_v14  ;;  %2104 = vmatpush3.bf16.msra.mxu0 %v633_v4  ;;  %v396_v22 = vshrl.u32 %v1884_v16, 16  ;;  %v399_v23 = vshll.u32 %v1884_v16, 16  ;;  %v1885_v32 = vcombine.low %v250_v17, %v251_v24  ;;  %v252_v33 = vld [vmem:[%s2377_s27 + $0x18] sm:$0xf]  ;;  %v576_v35 = vshll.u32 %v2285_v28, 16  ;;  %v2433_v57 = vld [vmem:[%s2377_s27 + $0x28] sm:$0xff]  }
  0x16   : > { %2082 = vmatpush3.bf16.msra.mxu1 %v456_v15  ;;  %2065 = vmatprep.mubr.msk.bf16.mxu0 %vm2316_vm1, %v2315_v1  ;;  %v390_v26 = vrot.slane %v388_v20, 3  ;;  %v393_v29 = vrot.slane %v391_v21, 4  ;;  %v1875_v40 = vcombine.low %v251_v24, %v252_v33  ;;  %v1886_v42 = vcombine.low %v252_v33, %v253_v11  ;;  %v2287_v54 = vld [vmem:[%s2377_s27 + $0x14] sm:$0xff]   ;;  %v2439_v60 = vld [vmem:[%s2377_s27 + $0x30] ss:$0 sps:$4 sm:$0x11]  }
  0x17   : > { %2077 = vmatprep.mubr.msk.bf16.mxu1 %vm2316_vm1, %v2315_v1  ;;  %2125 = vmatprep.subr.bf16.mxu1 %v2315_v1  ;;  %v398_v30 = vrot.slane %v396_v22, 3  ;;  %v401_v31 = vrot.slane %v399_v23, 4  ;;  %v405_v38 = vshrl.u32 %v1885_v32, 16  ;;  %v408_v39 = vshll.u32 %v1885_v32, 16  ;;  %v2288_v11 = vld [vmem:[%s2377_s27 + $0x1c] sm:$0xff]  }
  0x18   : > { %2147 = vmatprep.subr.bf16.mxu0 %v2315_v1  ;;  %v394_v36 = vor.u32 %v393_v29, %v390_v26  ;;  %v574_v43 = vshrl.u32 %v2285_v28, 16  ;;  %v578_v44 = vrot.slane %v576_v35, 1  ;;  %v581_v45 = vshll.u32 %v2286_v34, 16  ;;  %v2290_v41 = vld [vmem:[%s2377_s27 + $0x2c] ss:$0 sps:$4 sm:$0x11]  }
  0x19   : > { %v402_v37 = vor.u32 %v401_v31, %v398_v30  ;;  %v407_v47 = vrot.slane %v405_v38, 3  ;;  %v410_v48 = vrot.slane %v408_v39, 4  ;;  %v414_v53 = vshrl.u32 %v1886_v42, 16  ;;  %v718_v30 = vld [vmem:[%s2377_s27 + $0x8] sm:$0xf] }
  0x1a   : > { %v579_v51 = vor.u32 %v578_v44, %v574_v43  ;;  %v583_v52 = vrot.slane %v581_v45, 1  ;;  %v417_v56 = vshll.u32 %v1886_v42, 16  ;;  %v1887_v58 = vcombine.low %v2388_v12, %v255_v18  ;;  %v719_v31 = vld [vmem:[%s2377_s27 + $0xc] sm:$0xf]  ;;  %v2487_v43 = vld [vmem:[%s2377_s27 + $0x10] sm:$0xff]  }
  0x1b   : > { %v403_v46 = vsel %vm386_vm3, %v394_v36, %v402_v37  ;;  %v411_v55 = vor.u32 %v410_v48, %v407_v47  ;;  %v416_v62 = vrot.slane %v414_v53, 3  ;;  %v585_v63 = vshrl.u32 %v2286_v34, 16 }
  0x1c   : > { %2066 = vmatmul.mubr.msk.bf16.gmra.mrb[4].mxu0 %vm285_vm2, %v1874_v25  ;;  %v584_v61 = vsel %vm572_vm4, %v579_v51, %v583_v52  ;;  %v589_v0 = vshll.u32 %v2287_v54, 16  ;;  %v419_v3 = vrot.slane %v417_v56, 4  ;;  %v791_v4 = vshll.u32 %v2433_v57, 16  ;;  %v2501_v56 = vld [vmem:[%s2377_s27 + $0x18] sm:$0xff]  }
  0x1d   : > { %2078 = vmatmul.mubr.msk.bf16.gmra.mrb[4].mxu1 %vm285_vm2, %v1877_v27  ;;  %2069 = vmatprep.mubr.msk.bf16.mxu0 %vm2316_vm1, %v2315_v1  ;;  %v412_v2 = vsel %vm386_vm3, %v402_v37, %v411_v55  ;;  %v795_v6 = vshrl.u32 %v2433_v57, 16  ;;  %v799_v7 = vshll.u32 %v2439_v60, 16  ;;  %v587_v8 = vor.u32 %v585_v63, %v583_v52  ;;  %v2289_v27 = vld [vmem:[%s2377_s27 + $0x24] sm:$0xff]  }
  0x1e   : > { %2083 = vmatprep.mubr.msk.bf16.mxu1 %vm2316_vm1, %v2315_v1  ;;  %v2447_v5 = vrot.slane %v791_v4, 1  ;;  %v591_v9 = vrot.slane %v589_v0, 1  ;;  %v423_v10 = vshrl.u32 %v1887_v58, 16  ;;  %v420_v12 = vor.u32 %v419_v3, %v416_v62 }
  0x1f   : > { %v426_v13 = vshll.u32 %v1887_v58, 16  ;;  %v801_v15 = vrot.slane %v799_v7, 1  ;;  %v593_v18 = vshrl.u32 %v2287_v54, 16  ;;  %v597_v20 = vshll.u32 %v2288_v11, 16  ;;  %v904_v58 = vld [vmem:[%s2377_s27 + $0x8] sm:$0xe] }
  0x20   : > { %v797_v14 = vor.u32 %v795_v6, %v2447_v5  ;;  %v592_v17 = vsel %vm572_vm4, %v587_v8, %v591_v9  ;;  %v1888_v21 = vcombine.low %v2397_v19, %v2397_v19  ;;  %v421_v22 = vsel %vm386_vm3, %v411_v55, %v420_v12 }
  0x21   : > { %v425_v23 = vrot.slane %v423_v10, 3  ;;  %v428_v24 = vrot.slane %v426_v13, 4  ;;  %v595_v25 = vor.u32 %v593_v18, %v591_v9  ;;  %v599_v26 = vrot.slane %v597_v20, 1 }
  0x22   : > { %v2462_v16 = vsel %vm572_vm4, %v797_v14, %v801_v15  ;;  %v432_v29 = vshrl.u32 %v1888_v21, 16  ;;  %v435_v19 = vshll.u32 %v1888_v21, 16  ;;  %v601_v33 = vshrl.u32 %v2288_v11, 16  ;;  %v2522_v11 = vld [vmem:[%s2377_s27 + $0x20] sm:$0xff]  }
  0x23   : > { %v429_v28 = vor.u32 %v428_v24, %v425_v23  ;;  %v600_v32 = vsel %vm572_vm4, %v595_v25, %v599_v26  ;;  %v605_v34 = vshll.u32 %v2289_v27, 16  ;;  %v1907_v38 = vcombine.low %v718_v30, %v719_v31 }
  0x24   : > { %2070 = vmatmul.mubr.msk.bf16.gmra.mrb[8].mxu0 %vm285_vm2, %v1875_v40  ;;  %v434_v36 = vrot.slane %v432_v29, 3  ;;  %v437_v37 = vrot.slane %v435_v19, 4  ;;  %v603_v39 = vor.u32 %v601_v33, %v599_v26  ;;  %v613_v47 = vshll.u32 %v2290_v41, 16  ;;  %v2567_v33 = vld [vmem:[%s2377_s27 + $0x10] sm:$0xf] }
  0x25   : > { %2084 = vmatmul.mubr.msk.bf16.vlgmr.msra.gmra.mrb[8].mxu1 %vm285_vm2, %v403_v46  ;;  %2105 = vmatprep.mubr.msk.bf16.mxu0 %vm2316_vm1, %v2315_v1  ;;  %v430_v35 = vsel %vm386_vm3, %v420_v12, %v429_v28  ;;  %v607_v40 = vrot.slane %v605_v34, 1  ;;  %v762_v44 = vshll.u32 %v1907_v38, 16  ;;  %v609_v46 = vshrl.u32 %v2289_v27, 16  ;;  %v1932_v12 = vld [vmem:[%s2852_s1 + $0x18] sm:$0xf] }
  0x26   : > { %2126 = vmatpush3.bf16.msra.mxu1 %v819_v49  ;;  %2087 = vmatprep.mubr.msk.bf16.mxu1 %vm2316_vm1, %v2315_v1  ;;  %v438_v42 = vor.u32 %v437_v37, %v434_v36  ;;  %v760_v49 = vshrl.u32 %v1907_v38, 16  ;;  %v767_v51 = vshll.u32 %v2487_v43, 16  ;;  %v615_v53 = vrot.slane %v613_v47, 1 }
  0x27   : > { %2169 = vmatprep.subr.bf16.mxu1 %v2315_v1  ;;  %v608_v45 = vsel %vm572_vm4, %v603_v39, %v607_v40  ;;  %v764_v50 = vrot.slane %v762_v44, 1  ;;  %v611_v52 = vor.u32 %v609_v46, %v607_v40  ;;  %v1919_v62 = vcombine.low %v904_v58, %v719_v31 }
  0x28   : > { %v439_v48 = vsel %vm386_vm3, %v429_v28, %v438_v42  ;;  %v769_v55 = vrot.slane %v767_v51, 1  ;;  %v771_v0 = vshrl.u32 %v2487_v43, 16  ;;  %v912_v8 = vrot.slane %v2487_v43, 1 }
  0x29   : > { %v765_v54 = vor.u32 %v764_v50, %v760_v49  ;;  %v911_v7 = vrot.slane %v1919_v62, 1  ;;  %v1274_v15 = vsel %vm301_vm0, %v1932_v12, 0  ;;  %v783_v18 = vshll.u32 %v2522_v11, 16 }
  0x2a   : > { %v773_v9 = vor.u32 %v771_v0, %v769_v55  ;;  %v914_v20 = vrot.slane %v2501_v56, 1  ;;  %v787_v25 = vshrl.u32 %v2522_v11, 16  ;;  %v916_v26 = vrot.slane %v2522_v11, 1 }
  0x2b   : > { %v770_v63 = vsel %vm572_vm4, %v765_v54, %v769_v55  ;;  %v913_v13 = vsel %vm910_vm5, %v911_v7, %v912_v8  ;;  %v918_v19 = vrot.slane %v2433_v57, 1  ;;  %v1031_v30 = vshrl.u32 %v1919_v62, 16  ;;  %v2618_v7 = vld [vmem:[%s2377_s27 + $0x24] sm:$0xff]  }
  0x2c   : > { %2106 = vmatmul.mubr.msk.bf16.vlgmr.msra.gmra.mrb[12].mxu0 %vm285_vm2, %v584_v61  ;;  %v616_v61 = vsel %vm572_vm4, %v611_v52, %v615_v53  ;;  %v915_v23 = vsel %vm910_vm5, %v912_v8, %v914_v20  ;;  %v917_v28 = vsel %vm910_vm5, %v914_v20, %v916_v26  ;;  %v1034_v31 = vshll.u32 %v1919_v62, 16 }
  0x2d   : > { %2088 = vmatmul.mubr.msk.bf16.gmra.mrb[12].mxu1 %vm285_vm2, %v412_v2  ;;  %2148 = vmatpush3.bf16.msra.mxu0 %v938_v59  ;;  %v1925_v59 = vld [vmem:[%s2852_s1 + $0x14] sm:$0xf]  ;;  %v775_v2 = vshll.u32 %v2501_v56, 16  ;;  %v919_v34 = vsel %vm910_vm5, %v916_v26, %v918_v19  ;;  %v1038_v36 = vrot.slane %v771_v0, 1  ;;  %v1033_v37 = vrot.slane %v1031_v30, 1 }
  0x2e   : > { %2091 = vmatprep.mubr.msk.bf16.mxu1 %vm2316_vm1, %v2315_v1  ;;  %2109 = vmatprep.mubr.msk.bf16.mxu0 %vm2316_vm1, %v2315_v1  ;;  %v1079_v3 = vsel %vm301_vm0, %v1925_v59, 0  ;;  %v1036_v38 = vrot.slane %v1034_v31, 2  ;;  %v1039_v39 = vrot.slane %v767_v51, 2  ;;  %v920_v40 = vrot.slane %v2439_v60, 1  ;;  %v2595_v51 = vld [vmem:[%s2377_s27 + $0x1c] sm:$0xff]  }
  0x2f   : > { %2191 = vmatprep.subr.bf16.mxu0 %v2315_v1  ;;  %v777_v10 = vrot.slane %v775_v2, 1  ;;  %v1043_v54 = vrot.slane %v775_v2, 2  ;;  %v1226_v62 = vshll.u32 %v2595_v51, 16  ;;  %v1047_v12 = vrot.slane %v783_v18, 2 }
  0x30   : > { %v1037_v43 = vor.u32 %v1036_v38, %v1033_v37  ;;  %v1040_v46 = vor.u32 %v1039_v39, %v1038_v36  ;;  %v921_v60 = vsel %vm910_vm5, %v918_v19, %v920_v40  ;;  %v1235_v20 = vshll.u32 %v2618_v7, 16  ;;  %v2674_v37 = vld [vmem:[%s2377_s27 + $0x34] ss:$0 sps:$4 sm:$0x33]  }
  0x31   : > { %v778_v14 = vsel %vm572_vm4, %v773_v9, %v777_v10  ;;  %v1050_v26 = vrot.slane %v795_v6, 1  ;;  %v1679_v6 = vld [vmem:[%s2854_s3 + $0x18] sm:$0xff] }
  0x32   : > { %v1041_v52 = vsel %vm1029_vm6, %v1037_v43, %v1040_v46  ;;  %v1683_v43 = vld [vmem:[%s2854_s3 + $0x38] sm:$0xff] }
  0x34   : > { %2110 = vmatmul.mubr.msk.bf16.gmra.mrb[16].mxu0 %vm285_vm2, %v592_v17  ;;  %v779_v17 = vshrl.u32 %v2501_v56, 16 }
  0x35   : > { %2092 = vmatmul.mubr.msk.bf16.gmra.mrb[16].mxu1 %vm285_vm2, %v421_v22  ;;  %2113 = vmatprep.mubr.msk.bf16.mxu0 %vm2316_vm1, %v2315_v1  ;;  %v785_v22 = vrot.slane %v783_v18, 1 }
  0x36   : > { %2095 = vmatprep.mubr.msk.bf16.mxu1 %vm2316_vm1, %v2315_v1  ;;  %v781_v21 = vor.u32 %v779_v17, %v777_v10  ;;  %v1042_v53 = vrot.slane %v779_v17, 1  ;;  %v1046_v10 = vrot.slane %v787_v25, 1  ;;  %v1232_v17 = vshrl.u32 %v2618_v7, 16 }
  0x37   : > { %v789_v27 = vor.u32 %v787_v25, %v785_v22 }
  0x38   : > { %v786_v24 = vsel %vm572_vm4, %v781_v21, %v785_v22  ;;  %v1044_v56 = vor.u32 %v1043_v54, %v1042_v53  ;;  %v1048_v11 = vor.u32 %v1047_v12, %v1046_v10  ;;  %v1234_v21 = vrot.slane %v1232_v17, 1 }
  0x39   : > { %v794_v29 = vsel %vm572_vm4, %v789_v27, %v2447_v5  ;;  %v1237_v22 = vrot.slane %v1235_v20, 2  ;;  %v1051_v27 = vrot.slane %v791_v4, 2 }
  0x3a   : > { %v1045_v8 = vsel %vm1029_vm6, %v1040_v46, %v1044_v56  ;;  %v1049_v25 = vsel %vm1029_vm6, %v1044_v56, %v1048_v11  ;;  %v1682_v46 = vld [vmem:[%s2854_s3 + $0x30] sm:$0xff] }
  0x3b   : > { %v1238_v57 = vor.u32 %v1237_v22, %v1234_v21  ;;  %v1052_v30 = vor.u32 %v1051_v27, %v1050_v26  ;;  %v1371_v22 = vrot.slane %v2618_v7, 2  ;;  %v2306_v27 = vld [vmem:[%s2377_s27 + $0x34] ss:$0 sps:$4 sm:$0x77]  }
  0x3c   : > { %2114 = vmatmul.mubr.msk.bf16.gmra.mrb[20].mxu0 %vm285_vm2, %v600_v32  ;;  %v1164_v32 = vld [vmem:[%s2377_s27 + $0xc] sm:$0xe] }
  0x3d   : > { %2096 = vmatmul.mubr.msk.bf16.gmra.mrb[20].mxu1 %vm285_vm2, %v430_v35  ;;  %2117 = vmatprep.mubr.msk.bf16.mxu0 %vm2316_vm1, %v2315_v1  ;;  %v1933_v5 = vcombine.low %v1164_v32, %v2567_v33  ;;  %v2572_v35 = vld [vmem:[%s2377_s27 + $0x14] sm:$0xff]   ;;  %v1053_v38 = vsel %vm1029_vm6, %v1048_v11, %v1052_v30  ;;  %v1369_v11 = vrot.slane %v2595_v51, 2 }
  0x3e   : > { %2099 = vmatprep.mubr.msk.bf16.mxu1 %vm2316_vm1, %v2315_v1  ;;  %v1214_v44 = vshrl.u32 %v2572_v35, 16 }
  0x3f   : > { %v1206_v41 = vshrl.u32 %v1933_v5, 16  ;;  %v1209_v42 = vshll.u32 %v1933_v5, 16 }
  0x40   : > { %v1216_v49 = vrot.slane %v1214_v44, 1  ;;  %v1493_v10 = vrot.slane %v1214_v44, 2 }
  0x41   : > { %v1208_v47 = vrot.slane %v1206_v41, 1  ;;  %v1681_v41 = vld [vmem:[%s2854_s3 + $0x28] sm:$0xff] }
  0x44   : > { %2118 = vmatmul.mubr.msk.bf16.gmra.mrb[24].mxu0 %vm285_vm2, %v608_v45  ;;  %v1217_v45 = vshll.u32 %v2572_v35, 16 }
  0x45   : > { %2100 = vmatmul.mubr.msk.bf16.gmra.mrb[24].mxu1 %vm285_vm2, %v439_v48  ;;  %2121 = vmatprep.mubr.msk.bf16.mxu0 %vm2316_vm1, %v2315_v1  ;;  %v1211_v48 = vrot.slane %v1209_v42, 2  ;;  %v1680_v42 = vld [vmem:[%s2854_s3 + $0x20] sm:$0xff] }
  0x46   : > { %2127 = vmatprep.mubr.msk.bf16.mxu1 %vm2316_vm1, %v2315_v1  ;;  %v1219_v50 = vrot.slane %v1217_v45, 2  ;;  %v1494_v12 = vrot.slane %v1217_v45, 3  ;;  %v1498_v45 = vrot.slane %v1226_v62, 3 }
  0x47   : > { %v1212_v58 = vor.u32 %v1211_v48, %v1208_v47  ;;  %v1253_v47 = vshll.u32 %v2674_v37, 16 }
  0x48   : > { %v1220_v59 = vor.u32 %v1219_v50, %v1216_v49  ;;  %v1359_v49 = vld [vmem:[%s2377_s27 + $0xc] sm:$0xc] }
  0x49   : > { %v1255_v53 = vrot.slane %v1253_v47, 2 }
  0x4a   : > { %v1221_v0 = vsel %vm1029_vm6, %v1212_v58, %v1220_v59  ;;  %v1685_v58 = vld [vmem:[%s2854_s3 + $0x48] sm:$0xff] }
  0x4c   : > { %2122 = vmatmul.mubr.msk.bf16.gmra.mrb[28].mxu0 %vm285_vm2, %v616_v61  ;;  %v1223_v61 = vshrl.u32 %v2595_v51, 16  ;;  %v1501_v51 = vrot.slane %v1232_v17, 2 }
  0x4d   : > { %2128 = vmatmul.mubr.msk.bf16.vlgmr.msra.gmra.mrb[28].mxu1 %vm285_vm2, %v770_v63  ;;  %2149 = vmatprep.mubr.msk.bf16.mxu0 %vm2316_vm1, %v2315_v1  ;;  %v1951_v63 = vld [vmem:[%s2852_s1 + $0x20] sm:$0xf] }
  0x4e   : > { %2170 = vmatpush3.bf16.msra.mxu1 %v1079_v3  ;;  %2131 = vmatprep.mubr.msk.bf16.mxu1 %vm2316_vm1, %v2315_v1  ;;  %v1225_v2 = vrot.slane %v1223_v61, 1  ;;  %v1228_v3 = vrot.slane %v1226_v62, 2  ;;  %v1534_v9 = vsel %vm301_vm0, %v1951_v63, 0  ;;  %v1497_v44 = vrot.slane %v1223_v61, 2 }
  0x4f   : > { %2213 = vmatprep.subr.bf16.mxu1 %v2315_v1  ;;  %v1502_v62 = vrot.slane %v1235_v20, 3 }
  0x50   : > { %v1499_v21 = vor.u32 %v1498_v45, %v1497_v44 }
  0x54   : > { %2150 = vmatmul.mubr.msk.bf16.vlgmr.msra.gmra.mrb[32].mxu0 %vm285_vm2, %v913_v13  ;;  %v2317_v13 = vmov 0  }
  0x55   : > { %2132 = vmatmul.mubr.msk.bf16.gmra.mrb[32].mxu1 %vm285_vm2, %v778_v14  ;;  %2192 = vmatpush3.bf16.msra.mxu0 %v1274_v15  ;;  %v1676_v14 = vld [vmem:[%s2854_s3] sm:$0xff]  ;;  %v1229_v15 = vor.u32 %v1228_v3, %v1225_v2  ;;  %v1367_v2 = vrot.slane %v2572_v35, 2 }
  0x56   : > { %2135 = vmatprep.mubr.msk.bf16.mxu1 %vm2316_vm1, %v2315_v1  ;;  %2153 = vmatprep.mubr.msk.bf16.mxu0 %vm2316_vm1, %v2315_v1 }
  0x57   : > { %2235 = vmatprep.subr.bf16.mxu0 %v2315_v1  ;;  %2272 = vset.pattern.permute.xlu0 %v2317_v13  ;;  %v1230_v18 = vsel %vm1029_vm6, %v1220_v59, %v1229_v15  ;;  %v1684_v59 = vld [vmem:[%s2854_s3 + $0x40] sm:$0xff] }
  0x58   : > { %1688 = vperm.xlu0 %2272, %v1676_v14   ;;  %2273 = vset.pattern.permute.xlu1 %v2317_v13 }
  0x5c   : > { %2154 = vmatmul.mubr.msk.bf16.gmra.mrb[36].mxu0 %vm285_vm2, %v915_v23  ;;  %v2302_v23 = vld [vmem:[%s2377_s27 + $0x30] ss:$0 sps:$4 sm:$0x33]  }
  0x5d   : > { %2136 = vmatmul.mubr.msk.bf16.gmra.mrb[36].mxu1 %vm285_vm2, %v786_v24  ;;  %2157 = vmatprep.mubr.msk.bf16.mxu0 %vm2316_vm1, %v2315_v1  ;;  %v2644_v24 = vld [vmem:[%s2377_s27 + $0x2c] sm:$0xff]   ;;  %v1055_v31 = vshrl.u32 %v2302_v23, 16  ;;  %v1058_v32 = vshll.u32 %v2302_v23, 16  ;;  %v1372_v23 = vsel %vm1365_vm7, %v1369_v11, %v1371_v22  ;;  %s2260_s27 = smul.u32 40, %s2858_s19 }
  0x5e   : > { %2139 = vmatprep.mubr.msk.bf16.mxu1 %vm2316_vm1, %v2315_v1  ;;  %v1241_v4 = vshrl.u32 %v2644_v24, 16  ;;  %v1244_v19 = vshll.u32 %v2644_v24, 16  ;;  %v1373_v26 = vrot.slane %v2644_v24, 2 }
  0x5f   : > { %v1057_v39 = vrot.slane %v1055_v31, 1  ;;  %v1060_v40 = vrot.slane %v1058_v32, 2  ;;  %s2793_s17 = scalar_lea.vmem %s2855_s4, %s2260_s27  ;;  %s2809_s24 = scalar_lea.vmem %s2856_s5, %s2260_s27 }
  0x60   : > { %v1243_v5 = vrot.slane %v1241_v4, 1  ;;  %v1246_v36 = vrot.slane %v1244_v19, 2  ;;  %v1505_v7 = vrot.slane %v1241_v4, 2  ;;  %v1506_v20 = vrot.slane %v1244_v19, 3 }
  0x61   : > { %v1061_v48 = vor.u32 %v1060_v40, %v1057_v39  ;;  %v1375_v4 = vrot.slane %v2674_v37, 2 }
  0x63   : > { %v1062_v54 = vsel %vm1029_vm6, %v1052_v30, %v1061_v48  ;;  %v1376_v31 = vsel %vm1365_vm7, %v1373_v26, %v1375_v4 }
  0x64   : > { %2158 = vmatmul.mubr.msk.bf16.gmra.mrb[40].mxu0 %vm285_vm2, %v917_v28  ;;  %v1678_v28 = vld [vmem:[%s2854_s3 + $0x10] sm:$0xff] }
  0x65   : > { %2140 = vmatmul.mubr.msk.bf16.gmra.mrb[40].mxu1 %vm285_vm2, %v794_v29  ;;  %2161 = vmatprep.mubr.msk.bf16.mxu0 %vm2316_vm1, %v2315_v1  ;;  %v1677_v29 = vld [vmem:[%s2854_s3 + $0x8] sm:$0xff] }
  0x66   : > { %2143 = vmatprep.mubr.msk.bf16.mxu1 %vm2316_vm1, %v2315_v1  ;;  %1698 = vperm.xlu1 %2273, %v1678_v28   ;;  %v1374_v28 = vsel %vm1365_vm7, %v1371_v22, %v1373_v26 }
  0x67   : > { %1693 = vperm.xlu0 %2272, %v1677_v29   ;;  %v1507_v29 = vor.u32 %v1506_v20, %v1505_v7 }
  0x6a   : > { %1703 = vperm.xlu1 %2273, %v1679_v6   ;;  %v1510_v6 = vshrl.u32 %v2306_v27, 16 }
  0x6b   : > { %1708 = vperm.xlu0 %2272, %v1680_v42  }
  0x6c   : > { %2162 = vmatmul.mubr.msk.bf16.gmra.mrb[44].mxu0 %vm285_vm2, %v919_v34  ;;  %v1239_v34 = vsel %vm1029_vm6, %v1229_v15, %v1238_v57  ;;  %v1495_v15 = vor.u32 %v1494_v12, %v1493_v10  ;;  %v1512_v19 = vrot.slane %v1510_v6, 2 }
  0x6d   : > { %2144 = vmatmul.mubr.msk.bf16.gmra.mrb[44].mxu1 %vm285_vm2, %v2462_v16  ;;  %2165 = vmatprep.mubr.msk.bf16.mxu0 %vm2316_vm1, %v2315_v1  ;;  %v1944_v16 = vld [vmem:[%s2852_s1 + $0x1c] sm:$0xf] }
  0x6e   : > { %2171 = vmatprep.mubr.msk.bf16.mxu1 %vm2316_vm1, %v2315_v1  ;;  %v1393_v55 = vsel %vm301_vm0, %v1944_v16, 0  ;;  %1713 = vperm.xlu1 %2273, %v1681_v41   ;;  %v1250_v16 = vshrl.u32 %v2674_v37, 16  ;;  %v1500_v61 = vsel %vm1484_vm8, %v1495_v15, %v1499_v21 }
  0x6f   : > { %1718 = vperm.xlu0 %2272, %v1682_v46  }
  0x72   : > { %1723 = vperm.xlu1 %2273, %v1683_v43  }
  0x73   : > { %1728 = vperm.xlu0 %2272, %v1684_v59  }
  0x74   : > { %2166 = vmatmul.mubr.msk.bf16.gmra.mrb[48].mxu0 %vm285_vm2, %v921_v60  ;;  %v1247_v60 = vor.u32 %v1246_v36, %v1243_v5 }
  0x75   : > { %2172 = vmatmul.mubr.msk.bf16.vlgmr.msra.gmra.mrb[48].mxu1 %vm285_vm2, %v1041_v52  ;;  %2193 = vmatprep.mubr.msk.bf16.mxu0 %vm2316_vm1, %v2315_v1  ;;  %v1252_v52 = vrot.slane %v1250_v16, 1 }
  0x76   : > { %2214 = vmatpush3.bf16.msra.mxu1 %v1393_v55  ;;  %2175 = vmatprep.mubr.msk.bf16.mxu1 %vm2316_vm1, %v2315_v1  ;;  %v1248_v50 = vsel %vm1029_vm6, %v1238_v57, %v1247_v60  ;;  %v1945_v55 = vcombine.low %v1359_v49, %v2567_v33  ;;  %v1513_v57 = vshll.u32 %v2306_v27, 16 }
  0x77   : > { %1733 = vperm.xlu1 %2273, %v1685_v58   ;;  %v1256_v63 = vor.u32 %v1255_v53, %v1252_v52 }
  0x78   : > { %v1486_v56 = vshrl.u32 %v1945_v55, 16  ;;  %v1489_v33 = vshll.u32 %v1945_v55, 16  ;;  %v1515_v30 = vrot.slane %v1513_v57, 3 }
  0x7a   : > { %v1488_v3 = vrot.slane %v1486_v56, 2  ;;  %v1516_v32 = vor.u32 %v1515_v30, %v1512_v19 }
  0x7c   : > { %2194 = vmatmul.mubr.msk.bf16.vlgmr.msra.gmra.mrb[52].mxu0 %vm285_vm2, %v1221_v0  ;;  %v1366_v0 = vrot.slane %v1945_v55, 2 }
  0x7d   : > { %2176 = vmatmul.mubr.msk.bf16.gmra.mrb[52].mxu1 %vm285_vm2, %v1045_v8  ;;  %2236 = vmatpush3.bf16.msra.mxu0 %v1534_v9  ;;  %v1257_v8 = vsel %vm1029_vm6, %v1247_v60, %v1256_v63  ;;  %v1491_v9 = vrot.slane %v1489_v33, 3 }
  0x7e   : > { %2179 = vmatprep.mubr.msk.bf16.mxu1 %vm2316_vm1, %v2315_v1  ;;  %2197 = vmatprep.mubr.msk.bf16.mxu0 %vm2316_vm1, %v2315_v1  ;;  %v1368_v13 = vsel %vm1365_vm7, %v1366_v0, %v1367_v2 }
  0x7f   : > { %v1492_v14 = vor.u32 %v1491_v9, %v1488_v3 }
  0x81   : > { %v1496_v35 = vsel %vm1484_vm8, %v1492_v14, %v1495_v15 }
  0x84   : > { %2198 = vmatmul.mubr.msk.bf16.gmra.mrb[56].mxu0 %vm285_vm2, %v1230_v18  ;;  %v1370_v18 = vsel %vm1365_vm7, %v1367_v2, %v1369_v11 }
  0x85   : > { %2180 = vmatmul.mubr.msk.bf16.gmra.mrb[56].mxu1 %vm285_vm2, %v1049_v25  ;;  %2201 = vmatprep.mubr.msk.bf16.mxu0 %vm2316_vm1, %v2315_v1  ;;  %v1503_v25 = vor.u32 %v1502_v62, %v1501_v51 }
  0x86   : > { %2183 = vmatprep.mubr.msk.bf16.mxu1 %vm2316_vm1, %v2315_v1 }
  0x87   : > { %v1504_v17 = vsel %vm1484_vm8, %v1499_v21, %v1503_v25  ;;  %v1508_v24 = vsel %vm1484_vm8, %v1503_v25, %v1507_v29 }
  0x8c   : > { %2202 = vmatmul.mubr.msk.bf16.gmra.mrb[60].mxu0 %vm285_vm2, %v1239_v34  ;;  %v1517_v34 = vsel %vm1484_vm8, %v1507_v29, %v1516_v32 }
  0x8d   : > { %2184 = vmatmul.mubr.msk.bf16.gmra.mrb[60].mxu1 %vm285_vm2, %v1053_v38  ;;  %2205 = vmatprep.mubr.msk.bf16.mxu0 %vm2316_vm1, %v2315_v1 }
  0x8e   : > { %2187 = vmatprep.mubr.msk.bf16.mxu1 %vm2316_vm1, %v2315_v1 }
  0x94   : > { %2206 = vmatmul.mubr.msk.bf16.gmra.mrb[64].mxu0 %vm285_vm2, %v1248_v50 }
  0x95   : > { %2188 = vmatmul.mubr.msk.bf16.gmra.mrb[64].mxu1 %vm285_vm2, %v1062_v54  ;;  %2209 = vmatprep.mubr.msk.bf16.mxu0 %vm2316_vm1, %v2315_v1 }
  0x96   : > { %2215 = vmatprep.mubr.msk.bf16.mxu1 %vm2316_vm1, %v2315_v1 }
  0x9c   : > { %2210 = vmatmul.mubr.msk.bf16.gmra.mrb[68].mxu0 %vm285_vm2, %v1257_v8 }
  0x9d   : > { %2216 = vmatmul.mubr.msk.bf16.vlgmr.msra.gmra.mrb[68].mxu1 %vm285_vm2, %v1368_v13  ;;  %2237 = vmatprep.mubr.msk.bf16.mxu0 %vm2316_vm1, %v2315_v1 }
  0x9e   : > { %2219 = vmatprep.mubr.msk.bf16.mxu1 %vm2316_vm1, %v2315_v1 }
  0xa4   : > { %2238 = vmatmul.mubr.msk.bf16.vlgmr.msra.gmra.mrb[72].mxu0 %vm285_vm2, %v1496_v35 }
  0xa5   : > { %2220 = vmatmul.mubr.msk.bf16.gmra.mrb[72].mxu1 %vm285_vm2, %v1370_v18  ;;  %2241 = vmatprep.mubr.msk.bf16.mxu0 %vm2316_vm1, %v2315_v1 }
  0xa6   : > { %2223 = vmatprep.mubr.msk.bf16.mxu1 %vm2316_vm1, %v2315_v1 }
  0xac   : > { %2242 = vmatmul.mubr.msk.bf16.gmra.mrb[76].mxu0 %vm285_vm2, %v1500_v61 }
  0xad   : > { %2224 = vmatmul.mubr.msk.bf16.gmra.mrb[76].mxu1 %vm285_vm2, %v1372_v23  ;;  %2245 = vmatprep.mubr.msk.bf16.mxu0 %vm2316_vm1, %v2315_v1 }
  0xae   : > { %2227 = vmatprep.mubr.msk.bf16.mxu1 %vm2316_vm1, %v2315_v1 }
  0xb4   : > { %2246 = vmatmul.mubr.msk.bf16.gmra.mrb[80].mxu0 %vm285_vm2, %v1504_v17 }
  0xb5   : > { %2228 = vmatmul.mubr.msk.bf16.gmra.mrb[80].mxu1 %vm285_vm2, %v1374_v28  ;;  %2249 = vmatprep.mubr.msk.bf16.mxu0 %vm2316_vm1, %v2315_v1 }
  0xb6   : > { %2231 = vmatprep.mubr.msk.bf16.mxu1 %vm2316_vm1, %v2315_v1 }
  0xbc   : > { %2250 = vmatmul.mubr.msk.bf16.gmra.mrb[84].mxu0 %vm285_vm2, %v1508_v24 }
  0xbd   : > { %2232 = vmatmul.mubr.msk.bf16.gmra.mrb[84].mxu1 %vm285_vm2, %v1376_v31  ;;  %2253 = vmatprep.mubr.msk.bf16.mxu0 %vm2316_vm1, %v2315_v1 }
  0xc4   : > { %2254 = vmatmul.mubr.msk.bf16.gmra.mrb[88].mxu0 %vm285_vm2, %v1517_v34 }
  0xe7   : > { %v339_v5 = vpop.f32.mrb[0].mxu0 }
  0xe8   : > { %v2063_v36 = vpop.f32.mrb[1].mxu0  ;;  %v363_v37 = vpop.f32.mrb[0].mxu1 }
  0xe9   : > { %v342_v38 = vpop.f32.mrb[2].mxu0  ;;  %v2075_v39 = vpop.f32.mrb[1].mxu1 }
  0xea   : > { %v2064_v40 = vpop.f32.mrb[3].mxu0  ;;  %v366_v41 = vpop.f32.mrb[2].mxu1 }
  0xeb   : > { %v2076_v42 = vpop.f32.mrb[3].mxu1 }
  0xef   : > { %v347_v43 = vpop.f32.mrb[4].mxu0 }
  0xf0   : > { %v2067_v46 = vpop.f32.mrb[5].mxu0  ;;  %v371_v60 = vpop.f32.mrb[4].mxu1 }
  0xf1   : > { %v350_v16 = vpop.f32.mrb[6].mxu0  ;;  %v2079_v47 = vpop.f32.mrb[5].mxu1 }
  0xf2   : > { %v2068_v48 = vpop.f32.mrb[7].mxu0  ;;  %v374_v1 = vpop.f32.mrb[6].mxu1 }
  0xf3   : > { %v2080_v49 = vpop.f32.mrb[7].mxu1 }
  0xf7   : > { %v355_v50 = vpop.f32.mrb[8].mxu0 }
  0xf8   : > { %v492_v52 = vpop.f32.mrb[8].mxu1  ;;  %v2071_v53 = vpop.f32.mrb[9].mxu0 }
  0xf9   : > { %v493_v54 = vadd.f32 %v492_v52, %v339_v5  ;;  %v2085_v55 = vpop.f32.mrb[9].mxu1  ;;  %v358_v58 = vpop.f32.mrb[10].mxu0 }
  0xfa   : > { %v495_v59 = vpop.f32.mrb[10].mxu1  ;;  %v2072_v56 = vpop.f32.mrb[11].mxu0 }
  0xfb   : > { %v496_v63 = vadd.f32 %v495_v59, %v342_v38  ;;  %v2086_v33 = vpop.f32.mrb[11].mxu1 }
  0xff   : > { %v669_v0 = vpop.f32.mrb[12].mxu0 }
 0x100   : > { %v500_v2 = vpop.f32.mrb[12].mxu1  ;;  %v708_v3 = vadd.f32 %v669_v0, %v493_v54  ;;  %v2107_v8 = vpop.f32.mrb[13].mxu0 }
 0x101   : > { %v501_v9 = vadd.f32 %v500_v2, %v347_v43  ;;  %v2089_v10 = vpop.f32.mrb[13].mxu1  ;;  %v672_v12 = vpop.f32.mrb[14].mxu0 }
 0x102   : > { %v503_v13 = vpop.f32.mrb[14].mxu1  ;;  %v709_v14 = vadd.f32 %v672_v12, %v496_v63  ;;  %v2108_v15 = vpop.f32.mrb[15].mxu0 }
 0x103   : > { %v504_v11 = vadd.f32 %v503_v13, %v350_v16  ;;  %v2090_v35 = vpop.f32.mrb[15].mxu1 }
 0x107   : > { %v677_v44 = vpop.f32.mrb[16].mxu0 }
 0x108   : > { %v508_v45 = vpop.f32.mrb[16].mxu1  ;;  %v710_v18 = vadd.f32 %v677_v44, %v501_v9  ;;  %v2111_v21 = vpop.f32.mrb[17].mxu0 }
 0x109   : > { %v509_v22 = vadd.f32 %v508_v45, %v355_v50  ;;  %v2093_v61 = vpop.f32.mrb[17].mxu1  ;;  %v680_v51 = vpop.f32.mrb[18].mxu0 }
 0x10a   : > { %v511_v62 = vpop.f32.mrb[18].mxu1  ;;  %v711_v23 = vadd.f32 %v680_v51, %v504_v11  ;;  %v2112_v25 = vpop.f32.mrb[19].mxu0 }
 0x10b   : > { %v512_v26 = vadd.f32 %v511_v62, %v358_v58  ;;  %v2094_v17 = vpop.f32.mrb[19].mxu1 }
 0x10f   : > { %v685_v7 = vpop.f32.mrb[20].mxu0 }
 0x110   : > { %v516_v20 = vpop.f32.mrb[20].mxu1  ;;  %v712_v27 = vadd.f32 %v685_v7, %v509_v22  ;;  %v2115_v28 = vpop.f32.mrb[21].mxu0 }
 0x111   : > { %v517_v29 = vadd.f32 %v516_v20, %v363_v37  ;;  %v2097_v6 = vpop.f32.mrb[21].mxu1  ;;  %v688_v57 = vpop.f32.mrb[22].mxu0 }
 0x112   : > { %v519_v4 = vpop.f32.mrb[22].mxu1  ;;  %v713_v24 = vadd.f32 %v688_v57, %v512_v26  ;;  %v2116_v19 = vpop.f32.mrb[23].mxu0 }
 0x113   : > { %v520_v30 = vadd.f32 %v519_v4, %v366_v41  ;;  %v2098_v31 = vpop.f32.mrb[23].mxu1 }
 0x117   : > { %v693_v32 = vpop.f32.mrb[24].mxu0 }
 0x118   : > { %v524_v34 = vpop.f32.mrb[24].mxu1  ;;  %v714_v5 = vadd.f32 %v693_v32, %v517_v29  ;;  %v2119_v36 = vpop.f32.mrb[25].mxu0 }
 0x119   : > { %v525_v38 = vadd.f32 %v524_v34, %v371_v60  ;;  %v2101_v39 = vpop.f32.mrb[25].mxu1  ;;  %v696_v40 = vpop.f32.mrb[26].mxu0 }
 0x11a   : > { %v527_v42 = vpop.f32.mrb[26].mxu1  ;;  %v715_v43 = vadd.f32 %v696_v40, %v520_v30  ;;  %v2120_v46 = vpop.f32.mrb[27].mxu0 }
 0x11b   : > { %v528_v16 = vadd.f32 %v527_v42, %v374_v1  ;;  %v2102_v47 = vpop.f32.mrb[27].mxu1 }
 0x11f   : > { %v701_v37 = vpop.f32.mrb[28].mxu0 }
 0x120   : > { %v716_v48 = vadd.f32 %v701_v37, %v525_v38  ;;  %v855_v49 = vpop.f32.mrb[28].mxu1  ;;  %v2123_v50 = vpop.f32.mrb[29].mxu0 }
 0x121   : > { %v894_v52 = vadd.f32 %v855_v49, %v708_v3  ;;  %v2129_v53 = vpop.f32.mrb[29].mxu1  ;;  %v704_v41 = vpop.f32.mrb[30].mxu0 }
 0x122   : > { %v717_v54 = vadd.f32 %v704_v41, %v528_v16  ;;  %v858_v55 = vpop.f32.mrb[30].mxu1  ;;  %v2124_v58 = vpop.f32.mrb[31].mxu0 }
 0x123   : > { %v895_v59 = vadd.f32 %v858_v55, %v709_v14  ;;  %v2130_v56 = vpop.f32.mrb[31].mxu1 }
 0x127   : > { %v974_v60 = vpop.f32.mrb[32].mxu0 }
 0x128   : > { %v863_v63 = vpop.f32.mrb[32].mxu1  ;;  %v1013_v33 = vadd.f32 %v974_v60, %v894_v52  ;;  %v2151_v0 = vpop.f32.mrb[33].mxu0 }
 0x129   : > { %v896_v2 = vadd.f32 %v863_v63, %v710_v18  ;;  %v2133_v8 = vpop.f32.mrb[33].mxu1  ;;  %v977_v1 = vpop.f32.mrb[34].mxu0 }
 0x12a   : > { %v866_v9 = vpop.f32.mrb[34].mxu1  ;;  %v1014_v10 = vadd.f32 %v977_v1, %v895_v59  ;;  %v2152_v12 = vpop.f32.mrb[35].mxu0 }
 0x12b   : > { %v897_v13 = vadd.f32 %v866_v9, %v711_v23  ;;  %v2134_v15 = vpop.f32.mrb[35].mxu1 }
 0x12f   : > { %v982_v3 = vpop.f32.mrb[36].mxu0 }
 0x130   : > { %v871_v11 = vpop.f32.mrb[36].mxu1  ;;  %v1015_v35 = vadd.f32 %v982_v3, %v896_v2  ;;  %v2155_v44 = vpop.f32.mrb[37].mxu0 }
 0x131   : > { %v898_v45 = vadd.f32 %v871_v11, %v712_v27  ;;  %v2137_v21 = vpop.f32.mrb[37].mxu1  ;;  %v985_v14 = vpop.f32.mrb[38].mxu0 }
 0x132   : > { %v874_v22 = vpop.f32.mrb[38].mxu1  ;;  %v1016_v61 = vadd.f32 %v985_v14, %v897_v13  ;;  %v2156_v51 = vpop.f32.mrb[39].mxu0 }
 0x133   : > { %v899_v62 = vadd.f32 %v874_v22, %v713_v24  ;;  %v2138_v25 = vpop.f32.mrb[39].mxu1 }
 0x137   : > { %v990_v18 = vpop.f32.mrb[40].mxu0 }
 0x138   : > { %v879_v26 = vpop.f32.mrb[40].mxu1  ;;  %v1017_v17 = vadd.f32 %v990_v18, %v898_v45  ;;  %v2159_v7 = vpop.f32.mrb[41].mxu0 }
 0x139   : > { %v900_v20 = vadd.f32 %v879_v26, %v714_v5  ;;  %v2141_v28 = vpop.f32.mrb[41].mxu1  ;;  %v993_v23 = vpop.f32.mrb[42].mxu0 }
 0x13a   : > { %v882_v29 = vpop.f32.mrb[42].mxu1  ;;  %v1018_v6 = vadd.f32 %v993_v23, %v899_v62  ;;  %v2160_v57 = vpop.f32.mrb[43].mxu0 }
 0x13b   : > { %v901_v4 = vadd.f32 %v882_v29, %v715_v43  ;;  %v2142_v19 = vpop.f32.mrb[43].mxu1 }
 0x13f   : > { %v998_v27 = vpop.f32.mrb[44].mxu0 }
 0x140   : > { %v887_v30 = vpop.f32.mrb[44].mxu1  ;;  %v1019_v31 = vadd.f32 %v998_v27, %v900_v20  ;;  %v2163_v32 = vpop.f32.mrb[45].mxu0 }
 0x141   : > { %v902_v34 = vadd.f32 %v887_v30, %v716_v48  ;;  %v2145_v36 = vpop.f32.mrb[45].mxu1  ;;  %v1001_v24 = vpop.f32.mrb[46].mxu0 }
 0x142   : > { %v890_v38 = vpop.f32.mrb[46].mxu1  ;;  %v1020_v39 = vadd.f32 %v1001_v24, %v901_v4  ;;  %v2164_v40 = vpop.f32.mrb[47].mxu0 }
 0x143   : > { %v903_v42 = vadd.f32 %v890_v38, %v717_v54  ;;  %v2146_v46 = vpop.f32.mrb[47].mxu1 }
 0x147   : > { %v1006_v5 = vpop.f32.mrb[48].mxu0 }
 0x148   : > { %v1021_v16 = vadd.f32 %v1006_v5, %v902_v34  ;;  %v1115_v47 = vpop.f32.mrb[48].mxu1  ;;  %v2167_v37 = vpop.f32.mrb[49].mxu0 }
 0x149   : > { %v1154_v49 = vadd.f32 %v1115_v47, %v1013_v33  ;;  %v2173_v50 = vpop.f32.mrb[49].mxu1  ;;  %v1009_v43 = vpop.f32.mrb[50].mxu0 }
 0x14a   : > { %v1022_v52 = vadd.f32 %v1009_v43, %v903_v42  ;;  %v1118_v53 = vpop.f32.mrb[50].mxu1  ;;  %v2168_v41 = vpop.f32.mrb[51].mxu0 }
 0x14b   : > { %v1155_v55 = vadd.f32 %v1118_v53, %v1014_v10  ;;  %v2174_v58 = vpop.f32.mrb[51].mxu1  ;;  %v1982_v53 = vld [vmem:[%s2793_s17] sm:$0xff]  }
 0x14c   : > { %v1689_v58 = vpop.permute.xlu0 %1688 }
 0x14f   : > { %v1310_v48 = vpop.f32.mrb[52].mxu0 }
 0x150   : > { %v1123_v59 = vpop.f32.mrb[52].mxu1  ;;  %v1349_v56 = vadd.f32 %v1310_v48, %v1154_v49  ;;  %v2195_v60 = vpop.f32.mrb[53].mxu0 }
 0x151   : > { %v1156_v63 = vadd.f32 %v1123_v59, %v1015_v35  ;;  %v2177_v0 = vpop.f32.mrb[53].mxu1  ;;  %v1313_v54 = vpop.f32.mrb[54].mxu0  ;;  %v1983_v60 = vunpack.c.l.bf16 %v1982_v53 }
 0x152   : > { %v1126_v2 = vpop.f32.mrb[54].mxu1  ;;  %v1350_v8 = vadd.f32 %v1313_v54, %v1155_v55  ;;  %v2196_v1 = vpop.f32.mrb[55].mxu0  ;;  %v2799_v55 = vld [vmem:[%s2853_s2] ss:$0 sm:$0xff] }
 0x153   : > { %v1157_v9 = vadd.f32 %v1126_v2, %v1016_v61  ;;  %v2178_v12 = vpop.f32.mrb[55].mxu1 }
 0x154   : > { %v1984_v12 = vunpack.c.h.bf16 %v1982_v53 }
 0x157   : > { %v1318_v33 = vpop.f32.mrb[56].mxu0 }
 0x158   : > { %v1131_v13 = vpop.f32.mrb[56].mxu1  ;;  %v1351_v15 = vadd.f32 %v1318_v33, %v1156_v63  ;;  %v2199_v3 = vpop.f32.mrb[57].mxu0 }
 0x159   : > { %v1158_v11 = vadd.f32 %v1131_v13, %v1017_v17  ;;  %v2181_v44 = vpop.f32.mrb[57].mxu1  ;;  %v1321_v10 = vpop.f32.mrb[58].mxu0 }
 0x15a   : > { %v1134_v45 = vpop.f32.mrb[58].mxu1  ;;  %v1352_v21 = vadd.f32 %v1321_v10, %v1157_v9  ;;  %v2200_v14 = vpop.f32.mrb[59].mxu0  ;;  %v2001_v44 = vld [vmem:[%s2793_s17 + $0x8] sm:$0xff]  }
 0x15b   : > { %v1159_v22 = vadd.f32 %v1134_v45, %v1018_v6  ;;  %v2182_v51 = vpop.f32.mrb[59].mxu1  ;;  %v1699_v45 = vpop.permute.xlu1 %1698 }
 0x15f   : > { %v1326_v35 = vpop.f32.mrb[60].mxu0 }
 0x160   : > { %v1139_v62 = vpop.f32.mrb[60].mxu1  ;;  %v2775_v25 = vadd.f32 %v1326_v35, %v1158_v11  ;;  %v2203_v18 = vpop.f32.mrb[61].mxu0 }
 0x161   : > { %v1160_v26 = vadd.f32 %v1139_v62, %v1019_v31  ;;  %v2185_v61 = vpop.f32.mrb[61].mxu1  ;;  %v1329_v7 = vpop.f32.mrb[62].mxu0 }
 0x162   : > { %v1142_v20 = vpop.f32.mrb[62].mxu1  ;;  %v2777_v28 = vadd.f32 %v1329_v7, %v1159_v22  ;;  %v2204_v17 = vpop.f32.mrb[63].mxu0 }
 0x163   : > { %v1161_v23 = vadd.f32 %v1142_v20, %v1020_v39  ;;  %v2186_v29 = vpop.f32.mrb[63].mxu1  ;;  %v1988_v17 = vunpack.c.h.bf16 %v2001_v44 }
 0x167   : > { %v1334_v57 = vpop.f32.mrb[64].mxu0 }
 0x168   : > { %v1147_v4 = vpop.f32.mrb[64].mxu1  ;;  %v2779_v19 = vadd.f32 %v1334_v57, %v1160_v26  ;;  %v2207_v6 = vpop.f32.mrb[65].mxu0  ;;  %v1987_v26 = vunpack.c.l.bf16 %v2001_v44 }
 0x169   : > { %v1162_v27 = vadd.f32 %v1147_v4, %v1021_v16  ;;  %v2189_v30 = vpop.f32.mrb[65].mxu1  ;;  %v1337_v32 = vpop.f32.mrb[66].mxu0 }
 0x16a   : > { %v1150_v34 = vpop.f32.mrb[66].mxu1  ;;  %v2781_v31 = vadd.f32 %v1337_v32, %v1161_v23  ;;  %v2208_v36 = vpop.f32.mrb[67].mxu0 }
 0x16b   : > { %v1163_v24 = vadd.f32 %v1150_v34, %v1022_v52  ;;  %v2190_v38 = vpop.f32.mrb[67].mxu1 }
 0x16f   : > { %v1342_v40 = vpop.f32.mrb[68].mxu0 }
 0x170   : > { %v2784_v42 = vadd.f32 %v1342_v40, %v1162_v27  ;;  %v1429_v39 = vpop.f32.mrb[68].mxu1  ;;  %v2211_v46 = vpop.f32.mrb[69].mxu0 }
 0x171   : > { %v1468_v5 = vadd.f32 %v1429_v39, %v1349_v56  ;;  %v2217_v47 = vpop.f32.mrb[69].mxu1  ;;  %v1345_v37 = vpop.f32.mrb[70].mxu0 }
 0x172   : > { %v2786_v49 = vadd.f32 %v1345_v37, %v1163_v24  ;;  %v1432_v16 = vpop.f32.mrb[70].mxu1  ;;  %v2212_v50 = vpop.f32.mrb[71].mxu0  ;;  %v2002_v24 = vld [vmem:[%s2793_s17 + $0x10] sm:$0xff]  }
 0x173   : > { %v1469_v43 = vadd.f32 %v1432_v16, %v1350_v8  ;;  %v2218_v52 = vpop.f32.mrb[71].mxu1  ;;  %v1704_v39 = vpop.permute.xlu1 %1703  ;;  %v1991_v50 = vunpack.c.l.bf16 %v2002_v24 }
 0x177   : > { %v1570_v41 = vpop.f32.mrb[72].mxu0 }
 0x178   : > { %v1437_v48 = vpop.f32.mrb[72].mxu1  ;;  %v1609_v59 = vadd.f32 %v1570_v41, %v1468_v5  ;;  %v2239_v56 = vpop.f32.mrb[73].mxu0  ;;  %v1992_v41 = vunpack.c.h.bf16 %v2002_v24 }
 0x179   : > { %v1470_v63 = vadd.f32 %v1437_v48, %v1351_v15  ;;  %v2221_v0 = vpop.f32.mrb[73].mxu1  ;;  %v1573_v54 = vpop.f32.mrb[74].mxu0 }
 0x17a   : > { %v1626_v2 = vadd.f32 %v2799_v55, %v1609_v59  ;;  %v1440_v8 = vpop.f32.mrb[74].mxu1  ;;  %v1610_v1 = vadd.f32 %v1573_v54, %v1469_v43  ;;  %v2240_v9 = vpop.f32.mrb[75].mxu0 }
 0x17b   : > { %v1471_v33 = vadd.f32 %v1440_v8, %v1352_v21  ;;  %v2222_v13 = vpop.f32.mrb[75].mxu1  ;;  %v1694_v15 = vpop.permute.xlu0 %1693 }
 0x17c   : > { %v1627_v3 = vadd.f32 %v2799_v55, %v1610_v1  ;;  %v1656_v11 = vadd.f32 %v1983_v60, %v1626_v2  ;;  %v2003_v1 = vld [vmem:[%s2793_s17 + $0x18] sm:$0xff]   ;;  %v1714_v9 = vpop.permute.xlu1 %1713 }
 0x17e   : > { %v1666_v10 = vmax.f32 %v1656_v11, 0.0  ;;  %v1657_v14 = vadd.f32 %v1984_v12, %v1627_v3 }
 0x17f   : > { %v1578_v22 = vpop.f32.mrb[76].mxu0  ;;  %v1709_v13 = vpop.permute.xlu0 %1708 }
 0x180   : > { %v1736_v51 = vmul.f32 %v1689_v58, %v1666_v10  ;;  %v1445_v35 = vpop.f32.mrb[76].mxu1  ;;  %v1611_v62 = vadd.f32 %v1578_v22, %v1470_v63  ;;  %v2243_v18 = vpop.f32.mrb[77].mxu0  ;;  %v1667_v61 = vmax.f32 %v1657_v14, 0.0 }
 0x181   : > { %v1472_v21 = vadd.f32 %v1445_v35, %v2775_v25  ;;  %v2225_v7 = vpop.f32.mrb[77].mxu1  ;;  %v1581_v20 = vpop.f32.mrb[78].mxu0  ;;  %v1996_v35 = vunpack.c.h.bf16 %v2003_v1 }
 0x182   : > { %v1971_v23 = vpack.c.bf16 %v1736_v51, %v1736_v51  ;;  %v1628_v29 = vadd.f32 %v2799_v55, %v1611_v62  ;;  %v1737_v57 = vmul.f32 %v1694_v15, %v1667_v61  ;;  %v1448_v4 = vpop.f32.mrb[78].mxu1  ;;  %v1612_v6 = vadd.f32 %v1581_v20, %v1471_v33  ;;  %v2244_v27 = vpop.f32.mrb[79].mxu0 }
 0x183   : > { %v1473_v30 = vadd.f32 %v1448_v4, %v2777_v28  ;;  %v2226_v32 = vpop.f32.mrb[79].mxu1  ;;  %v1719_v27 = vpop.permute.xlu0 %1718 }
 0x184   : > { %1787 = vst.msk [vmem:[%s2809_s24] sm:$0xf] %vm1786_vm9, %v1971_v23  ;;  %v1658_v34 = vadd.f32 %v1987_v26, %v1628_v29  ;;  %v1972_v36 = vpack.c.bf16 %v1737_v57, %v1737_v57  ;;  %v1629_v25 = vadd.f32 %v2799_v55, %v1612_v6  ;;  %v2004_v57 = vld [vmem:[%s2793_s17 + $0x20] sm:$0xff]   ;;  %v1724_v24 = vpop.permute.xlu1 %1723 }
 0x186   : > { %v1668_v38 = vmax.f32 %v1658_v34, 0.0  ;;  %1788 = vst.msk [vmem:[%s2809_s24 + $0x4] sm:$0xf] %vm1786_vm9, %v1972_v36  ;;  %v1659_v40 = vadd.f32 %v1988_v17, %v1629_v25 }
 0x187   : > { %v1586_v46 = vpop.f32.mrb[80].mxu0 }
 0x188   : > { %v1738_v5 = vmul.f32 %v1699_v45, %v1668_v38  ;;  %v1669_v47 = vmax.f32 %v1659_v40, 0.0  ;;  %v1453_v37 = vpop.f32.mrb[80].mxu1  ;;  %v1613_v16 = vadd.f32 %v1586_v46, %v1472_v21  ;;  %v2247_v28 = vpop.f32.mrb[81].mxu0  ;;  %v1995_v45 = vunpack.c.l.bf16 %v2003_v1 }
 0x189   : > { %v1474_v43 = vadd.f32 %v1453_v37, %v2779_v19  ;;  %v2229_v52 = vpop.f32.mrb[81].mxu1  ;;  %v1589_v53 = vpop.f32.mrb[82].mxu0  ;;  %v2000_v40 = vunpack.c.h.bf16 %v2004_v57 }
 0x18a   : > { %v1973_v58 = vpack.c.bf16 %v1738_v5, %v1738_v5  ;;  %v1739_v48 = vmul.f32 %v1704_v39, %v1669_v47  ;;  %v1630_v59 = vadd.f32 %v2799_v55, %v1613_v16  ;;  %v1456_v56 = vpop.f32.mrb[82].mxu1  ;;  %v1614_v60 = vadd.f32 %v1589_v53, %v1473_v30  ;;  %v2248_v63 = vpop.f32.mrb[83].mxu0 }
 0x18b   : > { %v1475_v0 = vadd.f32 %v1456_v56, %v2781_v31  ;;  %v2230_v54 = vpop.f32.mrb[83].mxu1  ;;  %v1729_v53 = vpop.permute.xlu0 %1728 }
 0x18c   : > { %1789 = vst.msk [vmem:[%s2809_s24 + $0x8] sm:$0xf] %vm1786_vm9, %v1973_v58  ;;  %v1974_v2 = vpack.c.bf16 %v1739_v48, %v1739_v48  ;;  %v1660_v8 = vadd.f32 %v1991_v50, %v1630_v59  ;;  %v1631_v19 = vadd.f32 %v2799_v55, %v1614_v60  ;;  %v1734_v48 = vpop.permute.xlu1 %1733 }
 0x18e   : > { %1790 = vst.msk [vmem:[%s2809_s24 + $0xc] sm:$0xf] %vm1786_vm9, %v1974_v2  ;;  %v1670_v12 = vmax.f32 %v1660_v8, 0.0  ;;  %v1661_v33 = vadd.f32 %v1992_v41, %v1631_v19 }
 0x18f   : > { %v1594_v3 = vpop.f32.mrb[84].mxu0 }
 0x190   : > { %v1740_v11 = vmul.f32 %v1709_v13, %v1670_v12  ;;  %v1671_v44 = vmax.f32 %v1661_v33, 0.0  ;;  %v1461_v10 = vpop.f32.mrb[84].mxu1  ;;  %v1615_v31 = vadd.f32 %v1594_v3, %v1474_v43  ;;  %v2251_v14 = vpop.f32.mrb[85].mxu0 }
 0x191   : > { %v1476_v22 = vadd.f32 %v1461_v10, %v2784_v42  ;;  %v2233_v15 = vpop.f32.mrb[85].mxu1  ;;  %v1597_v51 = vpop.f32.mrb[86].mxu0 }
 0x192   : > { %v1975_v62 = vpack.c.bf16 %v1740_v11, %v1740_v11  ;;  %v1741_v18 = vmul.f32 %v1714_v9, %v1671_v44  ;;  %v1632_v26 = vadd.f32 %v2799_v55, %v1615_v31  ;;  %v1464_v61 = vpop.f32.mrb[86].mxu1  ;;  %v1616_v21 = vadd.f32 %v1597_v51, %v1475_v0  ;;  %v2252_v7 = vpop.f32.mrb[87].mxu0 }
 0x193   : > { %v1477_v20 = vadd.f32 %v1464_v61, %v2786_v49  ;;  %v2234_v17 = vpop.f32.mrb[87].mxu1  ;;  %v1999_v49 = vunpack.c.l.bf16 %v2004_v57 }
 0x194   : > { %1791 = vst.msk [vmem:[%s2809_s24 + $0x10] sm:$0xf] %vm1786_vm9, %v1975_v62  ;;  %v1976_v23 = vpack.c.bf16 %v1741_v18, %v1741_v18  ;;  %v1662_v29 = vadd.f32 %v1995_v45, %v1632_v26  ;;  %v1633_v42 = vadd.f32 %v2799_v55, %v1616_v21 }
 0x196   : > { %1792 = vst.msk [vmem:[%s2809_s24 + $0x14] sm:$0xf] %vm1786_vm9, %v1976_v23  ;;  %v1672_v4 = vmax.f32 %v1662_v29, 0.0  ;;  %v1663_v6 = vadd.f32 %v1996_v35, %v1633_v42 }
 0x197   : > { %v1602_v30 = vpop.f32.mrb[88].mxu0 }
 0x198   : > { %v1742_v32 = vmul.f32 %v1719_v27, %v1672_v4  ;;  %v1673_v34 = vmax.f32 %v1663_v6, 0.0  ;;  %v1617_v36 = vadd.f32 %v1602_v30, %v1476_v22  ;;  %v2255_v25 = vpop.f32.mrb[89].mxu0 }
 0x199   : > { %v1605_v38 = vpop.f32.mrb[90].mxu0 }
 0x19a   : > { %v1977_v39 = vpack.c.bf16 %v1742_v32, %v1742_v32  ;;  %v1743_v46 = vmul.f32 %v1724_v24, %v1673_v34  ;;  %v1634_v5 = vadd.f32 %v2799_v55, %v1617_v36  ;;  %v1618_v47 = vadd.f32 %v1605_v38, %v1477_v20  ;;  %v2256_v37 = vpop.f32.mrb[91].mxu0 }
 0x19c   : > { %1793 = vst.msk [vmem:[%s2809_s24 + $0x18] sm:$0xf] %vm1786_vm9, %v1977_v39  ;;  %v1978_v16 = vpack.c.bf16 %v1743_v46, %v1743_v46  ;;  %v1664_v28 = vadd.f32 %v1999_v49, %v1634_v5  ;;  %v1635_v50 = vadd.f32 %v2799_v55, %v1618_v47 }
 0x19e   : > { %1794 = vst.msk [vmem:[%s2809_s24 + $0x1c] sm:$0xf] %vm1786_vm9, %v1978_v16  ;;  %v1674_v43 = vmax.f32 %v1664_v28, 0.0  ;;  %v1665_v52 = vadd.f32 %v2000_v40, %v1635_v50 }
 0x1a0   : > { %v1744_v41 = vmul.f32 %v1729_v53, %v1674_v43  ;;  %v1675_v58 = vmax.f32 %v1665_v52, 0.0 }
 0x1a2   : > { %v1979_v59 = vpack.c.bf16 %v1744_v41, %v1744_v41  ;;  %v1745_v56 = vmul.f32 %v1734_v48, %v1675_v58 }
 0x1a4   : > { %1795 = vst.msk [vmem:[%s2809_s24 + $0x20] sm:$0xf] %vm1786_vm9, %v1979_v59  ;;  %v1980_v60 = vpack.c.bf16 %v1745_v56, %v1745_v56 }
 0x1a6   : > { %1796 = vst.msk [vmem:[%s2809_s24 + $0x24] sm:$0xf] %vm1786_vm9, %v1980_v60 }
 0x1a7 PF: > { %s15_s18 = sadd.s32 1, %s2313_s18  }
 0x1a8   : > { %p12_p4 = scmp.ge.s32.totalorder %s15_s18, 4  }
 0x1aa   :  { %14 = sbr.rel (!%p12_p4) target bundleno = 1 (0x1), region = 81 }

// kernel: forward.22
= control target key start
LH: loop header
LB: loop body
LE: loop exit
PB: predicated region body
PF: predicated region fallthrough
CT: control target
= control target key end

     0   :  { %vm72_vm0 = vcmask 588800   ;;  %vm79_vm1 = vcmask 1043456   ;;  %vm152_vm2 = vcmask 125952   ;;  %s264_s1 = inlined_call_operand.vmem [shape: bf16[72,16], index: 1, kind: input, shape index: {}]   ;;  %s265_s0 = inlined_call_operand.vmem [shape: bf16[32,72], index: 0, kind: input, shape index: {}]   ;;  %s266_s2 = inlined_call_operand.vmem [shape: f32[1,16], index: 2, kind: input, shape index: {}]   ;;  %s267_s3 = inlined_call_operand.vmem [shape: bf16[32,16], index: 3, kind: output, shape index: {}]  }
   0x1   :  { %v201_v0 = vld [vmem:[%s264_s1] sm:$0xff]   ;;  %v202_v1 = vld [vmem:[%s264_s1 + $0x8] sm:$0xff]   ;;  %v203_v2 = vld [vmem:[%s264_s1 + $0x10] sm:$0xff]  }
   0x2   :  { %186 = vmatprep.subr.bf16.mxu0 %v201_v0  ;;  %v206_v3 = vld [vmem:[%s265_s0] sm:$0xff]   ;;  %v204_v4 = vld [vmem:[%s264_s1 + $0x18] sm:$0xff]   ;;  %v207_v7 = vld [vmem:[%s265_s0 + $0x8] sm:$0xff]  }
   0x3   :  { %187 = vmatpush3.bf16.msra.mxu0 %v201_v0  ;;  %196 = vmatprep.mubr.msk.bf16.mxu0 %vm72_vm0, %v206_v3  ;;  %v205_v5 = vld [vmem:[%s264_s1 + $0x20] ss:$0 sps:$4 sm:$0xff]  }
   0x4   :  { %188 = vmatprep.subr.bf16.mxu0 %v202_v1  ;;  %v81_v6 = vsel %vm79_vm1, %v205_v5, 0  ;;  %v161_v8 = vld [vmem:[%s266_s2] ss:$0 sm:$0xff] }
   0x7   :  { %189 = vmatpush3.bf16.msra.mxu0 %v202_v1 }
   0x8   :  { %190 = vmatprep.subr.bf16.mxu0 %v203_v2 }
   0xb   :  { %191 = vmatpush3.bf16.msra.mxu0 %v203_v2 }
   0xc   :  { %192 = vmatprep.subr.bf16.mxu0 %v204_v4 }
   0xf   :  { %193 = vmatpush3.bf16.msra.mxu0 %v204_v4 }
  0x10   :  { %200 = vmatprep.subr.msk.bf16.mxu0 %vm79_vm1, %v205_v5 }
  0x13   :  { %195 = vmatpush3.bf16.msra.mxu0 %v81_v6 }
  0x16   :  { %197 = vmatmul.mubr.msk.bf16.vlgmr.msra.gmra.mrb[0].mxu0 %vm72_vm0, %v207_v7 }
  0xe9   :  { %v198_v9 = vpop.f32.mrb[0].mxu0 }
  0xea   :  { %v126_v10 = vadd.f32 %v198_v9, %v161_v8  ;;  %v117_v11 = vpop.f32.mrb[1].mxu0 }
  0xeb   :  { %v118_v12 = vadd.f32 %v161_v8, %v117_v11  ;;  %v199_v13 = vpop.f32.mrb[2].mxu0 }
  0xec   :  { %v134_v14 = vmax.f32 %v126_v10, 0.0  ;;  %v129_v15 = vadd.f32 %v199_v13, %v161_v8  ;;  %v120_v16 = vpop.f32.mrb[3].mxu0 }
  0xed   :  { %v132_v17 = vmax.f32 %v118_v12, 0.0  ;;  %v121_v18 = vadd.f32 %v161_v8, %v120_v16 }
  0xee   :  { %v177_v19 = vpack.c.bf16 %v134_v14, %v134_v14  ;;  %v135_v20 = vmax.f32 %v129_v15, 0.0 }
  0xef   :  { %v175_v21 = vpack.c.bf16 %v132_v17, %v132_v17  ;;  %v133_v22 = vmax.f32 %v121_v18, 0.0 }
  0xf0   :  { %155 = vst.msk [vmem:[%s267_s3 + $0x8] sm:$0xf] %vm152_vm2, %v177_v19  ;;  %v178_v23 = vpack.c.bf16 %v135_v20, %v135_v20 }
  0xf1   :  { %153 = vst.msk [vmem:[%s267_s3] sm:$0xf] %vm152_vm2, %v175_v21  ;;  %v176_v24 = vpack.c.bf16 %v133_v22, %v133_v22 }
  0xf2   :  { %156 = vst.msk [vmem:[%s267_s3 + $0xc] sm:$0xf] %vm152_vm2, %v178_v23 }
  0xf3   :  { %154 = vst.msk [vmem:[%s267_s3 + $0x4] sm:$0xf] %vm152_vm2, %v176_v24 }

// kernel: forward.25
= control target key start
LH: loop header
LB: loop body
LE: loop exit
PB: predicated region body
PF: predicated region fallthrough
CT: control target
= control target key end

     0   :  { %s1375_s18 = smov 0   ;;  %s1509_s0 = inlined_call_operand.vmem [shape: bf16[2,52,16], index: 0, kind: input, shape index: {}]   ;;  %s1510_s1 = inlined_call_operand.vmem [shape: bf16[9,16,16], index: 1, kind: input, shape index: {}]   ;;  %s1511_s2 = inlined_call_operand.vmem [shape: f32[1,16], index: 2, kind: input, shape index: {}]   ;;  %s1512_s3 = inlined_call_operand.vmem [shape: f32[24,1], index: 3, kind: input, shape index: {}]   ;;  %s1513_s4 = inlined_call_operand.vmem [shape: bf16[2,24,16], index: 4, kind: input, shape index: {}]   ;;  %s1514_s5 = inlined_call_operand.vmem [shape: bf16[2,24,16], index: 5, kind: output, shape index: {}]  }
   0x1 LB: > { %s1141_s19 = sadd.s32 4294967295, %s1342_s18   ;;  %p1145_p0 = scmp.ge.s32.totalorder %s1342_s18, 1  ;;  %s1342_s18 = sphi %s1375_s18, %s15_s18  }
   0x2   : > { %p197_p1 = scmp.lt.s32.totalorder %s1342_s18, 3 }
   0x4   : > { %p198_p2 = pnand %p1145_p0, %p197_p1 }
   0x5   : > { %v1313_v0 = vld [vmem:[%s1510_s1 + $0x8] sm:$0xff] (!%p198_p2)   ;;  %p230_p3 = scmp.lt.s32.totalorder (!%p198_p2), %s1141_s19, 1  ;;  %v1318_v1 = vld [vmem:[%s1510_s1 + $0x10] sm:$0xff] (!%p198_p2)   ;;  %v1319_v2 = vld [vmem:[%s1510_s1] sm:$0xff] (!%p198_p2)   ;;  %vm269_vm0 = vcmask (!%p198_p2), 130048   ;;  %vm601_vm3 = vcmask (!%p198_p2), 1044480  }
   0x6   : > { %201 = sbr.rel (%p198_p2) target bundleno = 283 (0x11b), region = 40  ;;  %1246 = vmatprep.subr.bf16.mxu0 (!%p198_p2), %v1313_v0  ;;  %1252 = vmatprep.subr.bf16.mxu1 (!%p198_p2), %v1319_v2  ;;  %v1398_v3 = vld [vmem:[%s1510_s1 + $0x18] sm:$0xff] (!%p198_p2)   ;;  %vm328_vm1 = vsmask.f32 (!%p198_p2), 4352  ;;  %vm423_vm2 = vsmask.f32 (!%p198_p2), 7424 }
   0x7   : > { %1247 = vmatpush3.bf16.msra.mxu0 (!%p198_p2), %v1313_v0  ;;  %1253 = vmatpush3.bf16.msra.mxu1 (!%p198_p2), %v1319_v2  ;;  %v1412_v7 = vld [vmem:[%s1510_s1 + $0x20] sm:$0xff] (!%p198_p2)   ;;  %vm513_vm4 = vsmask.f32 (!%p198_p2), 5376  ;;  %v1433_v46 = vld [vmem:[%s1510_s1 + $0x28] sm:$0xff] (!%p198_p2)   ;;  %v1328_v62 = vld [vmem:[%s1510_s1 + $0x30] sm:$0xff] (!%p198_p2)   ;;  %vm860_vm6 = vcmask (!%p198_p2), 1045504  }
   0x8   : > { %1258 = vmatprep.subr.bf16.mxu0 (!%p198_p2), %v1318_v1  ;;  %1264 = vmatprep.subr.bf16.mxu1 (!%p198_p2), %v1398_v3  ;;  %vm772_vm5 = vsmask.f32 (!%p198_p2), 6400  ;;  %vm1070_vm7 = vcmask (!%p198_p2), 125952  }
   0xd   : > { %s1516_s19 = smov (!%p230_p3, %s1141_s19), 1 }
   0xe   : > { %s1300_s26 = smul.u32 28, %s1516_s19 }
   0xf   : > { %s1301_s25 = smul.u32 12, %s1516_s19 }
  0x10   : > { %s1403_s6 = scalar_lea.vmem %s1509_s0, %s1300_s26 }
  0x11   : > { %v246_v4 = vld [vmem:[%s1403_s6] sm:$0x8]  ;;  %v247_v5 = vld [vmem:[%s1403_s6 + $0x4] sm:$0xf]  ;;  %v248_v6 = vld [vmem:[%s1403_s6 + $0x8] sm:$0xf]  ;;  %s239_s28 = scalar_lea.vmem %s1513_s4, %s1301_s25  ;;  %s244_s8 = scalar_lea.vmem %s1514_s5, %s1301_s25 }
  0x12   : > { %v249_v8 = vld [vmem:[%s1403_s6 + $0xc] sm:$0xf]  ;;  %v1151_v9 = vcombine.low %v247_v5, %v248_v6  ;;  %v1156_v10 = vcombine.low %v246_v4, %v247_v5  ;;  %v406_v11 = vld [vmem:[%s1403_s6 + $0x4] sm:$0xf]  ;;  %v407_v12 = vld [vmem:[%s1403_s6 + $0x8] sm:$0xf] }
  0x13   : > { %v1152_v13 = vcombine.low %v249_v8, %v249_v8  ;;  %v1157_v14 = vcombine.low %v248_v6, %v249_v8  ;;  %v408_v15 = vld [vmem:[%s1403_s6 + $0xc] sm:$0xf]  ;;  %v409_v16 = vld [vmem:[%s1403_s6 + $0x10] sm:$0x1]  ;;  %v1163_v17 = vcombine.low %v406_v11, %v407_v12  ;;  %v502_v18 = vld [vmem:[%s1403_s6 + $0x4] sm:$0xc] }
  0x14   : > { %1248 = vmatprep.mubr.msk.bf16.mxu0 %vm269_vm0, %v1151_v9  ;;  %v330_v19 = vshrl.u32 %v1156_v10, 16  ;;  %v333_v20 = vshll.u32 %v1156_v10, 16  ;;  %v1164_v21 = vcombine.low %v408_v15, %v409_v16  ;;  %v503_v22 = vld [vmem:[%s1403_s6 + $0x10] sm:$0x7]  ;;  %v1170_v23 = vcombine.low %v502_v18, %v407_v12  ;;  %v594_v28 = vld [vmem:[%s1403_s6 + $0x4] sm:$0x8] }
  0x15   : > { %v338_v24 = vshrl.u32 %v1157_v14, 16  ;;  %v341_v25 = vshll.u32 %v1157_v14, 16  ;;  %1249 = vmatmul.mubr.msk.bf16.vlgmr.msra.gmra.mrb[0].mxu0 %vm269_vm0, %v1152_v13  ;;  %v425_v26 = vshrl.u32 %v1163_v17, 16  ;;  %v427_v27 = vshll.u32 %v1163_v17, 16  ;;  %v668_v37 = vld [vmem:[%s1403_s6 + $0x10] sm:$0xf] }
  0x16   : > { %v332_v29 = vrot.slane %v330_v19, 3  ;;  %v335_v30 = vrot.slane %v333_v20, 4  ;;  %1259 = vmatpush3.bf16.msra.mxu0 %v1318_v1  ;;  %v432_v31 = vshll.u32 %v1164_v21, 16  ;;  %v436_v32 = vshrl.u32 %v1164_v21, 16  ;;  %v755_v47 = vld [vmem:[%s1403_s6 + $0x8] sm:$0xe] }
  0x17   : > { %v340_v33 = vrot.slane %v338_v24, 3  ;;  %v343_v34 = vrot.slane %v341_v25, 4  ;;  %v429_v35 = vrot.slane %v427_v27, 1  ;;  %1270 = vmatprep.subr.bf16.mxu0 %v1412_v7  ;;  %v1425_v36 = vcombine.low %v408_v15, %v503_v22  ;;  %v756_v52 = vld [vmem:[%s1403_s6 + $0xc] sm:$0xf]  ;;  %v1330_v24 = vld [vmem:[%s1510_s1 + $0x38] sm:$0xff]  }
  0x18   : > { %v336_v38 = vor.u32 %v335_v30, %v332_v29  ;;  %v434_v39 = vrot.slane %v432_v31, 1  ;;  %v515_v40 = vshrl.u32 %v1170_v23, 16  ;;  %v518_v41 = vshll.u32 %v1170_v23, 16  ;;  %v757_v53 = vld [vmem:[%s1403_s6 + $0x10] sm:$0xf]  ;;  %v1333_v29 = vld [vmem:[%s1510_s1 + $0x40] sm:$0xff]  }
  0x19   : > { %v344_v42 = vor.u32 %v343_v34, %v340_v33  ;;  %v430_v43 = vor.u32 %v429_v35, %v425_v26  ;;  %v523_v44 = vshrl.u32 %v1425_v36, 16  ;;  %v526_v45 = vshll.u32 %v1425_v36, 16  ;;  %v758_v58 = vld [vmem:[%s1403_s6 + $0x14] sm:$0x3]  ;;  %v853_v10 = vld [vmem:[%s1403_s6 + $0x8] sm:$0xc] }
  0x1a   : > { %v438_v48 = vor.u32 %v436_v32, %v434_v39  ;;  %v517_v49 = vrot.slane %v515_v40, 2  ;;  %v520_v50 = vrot.slane %v518_v41, 3  ;;  %v1177_v51 = vcombine.low %v594_v28, %v407_v12  ;;  %v927_v20 = vld [vmem:[%s1403_s6 + $0x14] sm:$0x7] }
  0x1b   : > { %v345_v54 = vsel %vm328_vm1, %v336_v38, %v344_v42  ;;  %v435_v55 = vsel %vm423_vm2, %v430_v43, %v434_v39  ;;  %v525_v56 = vrot.slane %v523_v44, 2  ;;  %v528_v57 = vrot.slane %v526_v45, 3  ;;  %v1036_v39 = vld [vmem:[%s1512_s3] sm:$0xff]  ;;  %v1038_v40 = vld [vmem:[%s1512_s3 + $0x10] sm:$0xff] }
  0x1c   : > { %1254 = vmatprep.mubr.msk.bf16.mxu1 %vm269_vm0, %v345_v54  ;;  %1260 = vmatprep.mubr.msk.bf16.mxu0 %vm269_vm0, %v435_v55  ;;  %v521_v59 = vor.u32 %v520_v50, %v517_v49  ;;  %v602_v60 = vrot.slane %v1177_v51, 3  ;;  %v603_v61 = vrot.slane %v1425_v36, 3  ;;  %v1183_v63 = vcombine.low %v408_v15, %v668_v37  ;;  %v1037_v50 = vld [vmem:[%s1512_s3 + $0x8] sm:$0xff] }
  0x1d   : > { %1255 = vmatmul.mubr.msk.bf16.vlgmr.msra.gmra.mrb[0].mxu1 %vm269_vm0, %v344_v42  ;;  %1261 = vmatmul.mubr.msk.bf16.vlgmr.msra.gmra.mrb[4].mxu0 %vm269_vm0, %v438_v48  ;;  %v529_v0 = vor.u32 %v528_v57, %v525_v56  ;;  %v676_v1 = vshrl.u32 %v1177_v51, 16  ;;  %v679_v2 = vshll.u32 %v1177_v51, 16  ;;  %v1189_v4 = vcombine.low %v755_v47, %v756_v52 }
  0x1e   : > { %1265 = vmatpush3.bf16.msra.mxu1 %v1398_v3  ;;  %1271 = vmatpush3.bf16.msra.mxu0 %v1412_v7  ;;  %v604_v5 = vsel %vm601_vm3, %v602_v60, %v603_v61  ;;  %v684_v6 = vshrl.u32 %v1183_v63, 16  ;;  %v687_v8 = vshll.u32 %v1183_v63, 16  ;;  %v1452_v9 = vcombine.low %v757_v53, %v758_v58 }
  0x1f   : > { %v530_v11 = vsel %vm513_vm4, %v521_v59, %v529_v0  ;;  %1276 = vmatprep.subr.bf16.mxu1 %v1433_v46  ;;  %1272 = vmatprep.mubr.msk.bf16.mxu0 %vm269_vm0, %v604_v5  ;;  %v678_v12 = vrot.slane %v676_v1, 3  ;;  %v681_v13 = vrot.slane %v679_v2, 4  ;;  %v774_v14 = vshrl.u32 %v1189_v4, 16 }
  0x20   : > { %1266 = vmatprep.mubr.msk.bf16.mxu1 %vm269_vm0, %v530_v11  ;;  %1282 = vmatprep.subr.bf16.mxu0 %v1328_v62  ;;  %v686_v3 = vrot.slane %v684_v6, 3  ;;  %v689_v7 = vrot.slane %v687_v8, 4  ;;  %v777_v15 = vshll.u32 %v1189_v4, 16  ;;  %v782_v17 = vshrl.u32 %v1452_v9, 16 }
  0x21   : > { %v682_v16 = vor.u32 %v681_v13, %v678_v12  ;;  %v785_v18 = vshll.u32 %v1452_v9, 16  ;;  %v1196_v19 = vcombine.low %v853_v10, %v756_v52  ;;  %v776_v22 = vrot.slane %v774_v14, 1 }
  0x22   : > { %v690_v21 = vor.u32 %v689_v7, %v686_v3  ;;  %v779_v23 = vrot.slane %v777_v15, 2  ;;  %v784_v25 = vrot.slane %v782_v17, 1  ;;  %v1202_v30 = vcombine.low %v757_v53, %v927_v20 }
  0x23   : > { %v787_v26 = vrot.slane %v785_v18, 2  ;;  %v935_v31 = vshrl.u32 %v1196_v19, 16  ;;  %v938_v33 = vshll.u32 %v1196_v19, 16  ;;  %v861_v41 = vrot.slane %v1196_v19, 2 }
  0x24   : > { %v691_v27 = vsel %vm328_vm1, %v682_v16, %v690_v21  ;;  %v780_v28 = vor.u32 %v779_v23, %v776_v22  ;;  %v943_v35 = vshrl.u32 %v1202_v30, 16  ;;  %v946_v36 = vshll.u32 %v1202_v30, 16 }
  0x25   : > { %1267 = vmatmul.mubr.msk.bf16.vlgmr.msra.gmra.mrb[4].mxu1 %vm269_vm0, %v529_v0  ;;  %1273 = vmatmul.mubr.msk.bf16.vlgmr.msra.gmra.mrb[8].mxu0 %vm269_vm0, %v603_v61  ;;  %v788_v32 = vor.u32 %v787_v26, %v784_v25  ;;  %v937_v34 = vrot.slane %v935_v31, 2  ;;  %v940_v38 = vrot.slane %v938_v33, 3  ;;  %v862_v42 = vrot.slane %v1452_v9, 2 }
  0x26   : > { %1277 = vmatpush3.bf16.msra.mxu1 %v1433_v46  ;;  %1283 = vmatpush3.bf16.msra.mxu0 %v1328_v62  ;;  %v945_v43 = vrot.slane %v943_v35, 2  ;;  %v948_v44 = vrot.slane %v946_v36, 3  ;;  %v1344_v46 = vmov 0   ;;  %v1026_v35 = vld [vmem:[%s239_s28 + $0x8] sm:$0xf] }
  0x27   : > { %1278 = vmatprep.mubr.msk.bf16.mxu1 %vm269_vm0, %v691_v27  ;;  %1288 = vmatprep.subr.bf16.mxu1 %v1330_v24  ;;  %v789_v37 = vsel %vm772_vm5, %v780_v28, %v788_v32  ;;  %v941_v45 = vor.u32 %v940_v38, %v937_v34  ;;  %v863_v48 = vsel %vm860_vm6, %v861_v41, %v862_v42  ;;  %v1206_v41 = vld [vmem:[%s1511_s2] ss:$0 sm:$0xff] }
  0x28   : > { %1284 = vmatprep.mubr.msk.bf16.mxu0 %vm269_vm0, %v789_v37  ;;  %1294 = vmatprep.subr.bf16.mxu0 %v1333_v29  ;;  %v949_v47 = vor.u32 %v948_v44, %v945_v43 }
  0x29   : > { %1311 = vset.pattern.permute.xlu0 %v1344_v46  ;;  %1312 = vset.pattern.permute.xlu1 %v1344_v46 }
  0x2a   : > { %1041 = vperm.xlu0 %1311, %v1036_v39   ;;  %1051 = vperm.xlu1 %1312, %v1038_v40   ;;  %v950_v49 = vsel %vm513_vm4, %v941_v45, %v949_v47  ;;  %v1216_v39 = vld [vmem:[%s239_s28] sm:$0xff]  }
  0x2d   : > { %1279 = vmatmul.mubr.msk.bf16.vlgmr.msra.gmra.mrb[8].mxu1 %vm269_vm0, %v690_v21  ;;  %1285 = vmatmul.mubr.msk.bf16.vlgmr.msra.gmra.mrb[12].mxu0 %vm269_vm0, %v788_v32 }
  0x2e   : > { %1289 = vmatpush3.bf16.msra.mxu1 %v1330_v24  ;;  %1295 = vmatpush3.bf16.msra.mxu0 %v1333_v29 }
  0x2f   : > { %1290 = vmatprep.mubr.msk.bf16.mxu1 %vm269_vm0, %v863_v48  ;;  %1296 = vmatprep.mubr.msk.bf16.mxu0 %vm269_vm0, %v950_v49 }
  0x30   : > { %1046 = vperm.xlu0 %1311, %v1037_v50   ;;  %v1217_v50 = vunpack.c.l.bf16 %v1216_v39 }
  0x35   : > { %1291 = vmatmul.mubr.msk.bf16.vlgmr.msra.gmra.mrb[12].mxu1 %vm269_vm0, %v862_v42  ;;  %1297 = vmatmul.mubr.msk.bf16.vlgmr.msra.gmra.mrb[16].mxu0 %vm269_vm0, %v949_v47  ;;  %v1029_v47 = vunpack.c.l.bf16 %v1026_v35 }
  0xe8   : > { %v1250_v51 = vpop.f32.mrb[0].mxu0 }
  0xe9   : > { %v310_v52 = vpop.f32.mrb[1].mxu0 }
  0xea   : > { %v1251_v53 = vpop.f32.mrb[2].mxu0 }
  0xeb   : > { %v313_v54 = vpop.f32.mrb[3].mxu0 }
  0xf0   : > { %v1256_v55 = vpop.f32.mrb[0].mxu1  ;;  %v1262_v56 = vpop.f32.mrb[4].mxu0 }
  0xf1   : > { %v401_v57 = vadd.f32 %v1256_v55, %v1250_v51  ;;  %v392_v58 = vpop.f32.mrb[1].mxu1  ;;  %v485_v59 = vpop.f32.mrb[5].mxu0 }
  0xf2   : > { %v393_v60 = vadd.f32 %v392_v58, %v310_v52  ;;  %v1257_v61 = vpop.f32.mrb[2].mxu1  ;;  %v1263_v62 = vpop.f32.mrb[6].mxu0 }
  0xf3   : > { %v501_v63 = vadd.f32 %v1262_v56, %v401_v57  ;;  %v395_v0 = vpop.f32.mrb[3].mxu1  ;;  %v488_v1 = vpop.f32.mrb[7].mxu0 }
  0xf4   : > { %v499_v2 = vadd.f32 %v485_v59, %v393_v60  ;;  %v396_v4 = vadd.f32 %v395_v0, %v313_v54  ;;  %v1218_v54 = vunpack.c.h.bf16 %v1216_v39  ;;  %v1042_v55 = vpop.permute.xlu0 %1041  ;;  %v1052_v59 = vpop.permute.xlu1 %1051 }
  0xf6   : > { %v500_v5 = vadd.f32 %v488_v1, %v396_v4 }
  0xf8   : > { %v1268_v6 = vpop.f32.mrb[4].mxu1  ;;  %v1274_v8 = vpop.f32.mrb[8].mxu0 }
  0xf9   : > { %v593_v9 = vadd.f32 %v1268_v6, %v501_v63  ;;  %v577_v10 = vpop.f32.mrb[5].mxu1  ;;  %v651_v11 = vpop.f32.mrb[9].mxu0 }
  0xfa   : > { %v591_v12 = vadd.f32 %v577_v10, %v499_v2  ;;  %v1269_v13 = vpop.f32.mrb[6].mxu1  ;;  %v1275_v3 = vpop.f32.mrb[10].mxu0 }
  0xfb   : > { %v667_v7 = vadd.f32 %v1274_v8, %v593_v9  ;;  %v580_v14 = vpop.f32.mrb[7].mxu1  ;;  %v654_v15 = vpop.f32.mrb[11].mxu0 }
  0xfc   : > { %v665_v16 = vadd.f32 %v651_v11, %v591_v12  ;;  %v592_v17 = vadd.f32 %v580_v14, %v500_v5  ;;  %v1047_v2 = vpop.permute.xlu0 %1046 }
  0xfe   : > { %v666_v18 = vadd.f32 %v654_v15, %v592_v17 }
 0x100   : > { %v1280_v19 = vpop.f32.mrb[8].mxu1  ;;  %v1286_v20 = vpop.f32.mrb[12].mxu0 }
 0x101   : > { %v754_v21 = vadd.f32 %v1280_v19, %v667_v7  ;;  %v738_v22 = vpop.f32.mrb[9].mxu1  ;;  %v836_v23 = vpop.f32.mrb[13].mxu0 }
 0x102   : > { %v752_v24 = vadd.f32 %v738_v22, %v665_v16  ;;  %v1281_v25 = vpop.f32.mrb[10].mxu1  ;;  %v1287_v26 = vpop.f32.mrb[14].mxu0 }
 0x103   : > { %v852_v27 = vadd.f32 %v1286_v20, %v754_v21  ;;  %v741_v28 = vpop.f32.mrb[11].mxu1  ;;  %v839_v29 = vpop.f32.mrb[15].mxu0 }
 0x104   : > { %v850_v30 = vadd.f32 %v836_v23, %v752_v24  ;;  %v753_v31 = vadd.f32 %v741_v28, %v666_v18 }
 0x106   : > { %v851_v32 = vadd.f32 %v839_v29, %v753_v31 }
 0x108   : > { %v1292_v33 = vpop.f32.mrb[12].mxu1  ;;  %v1298_v34 = vpop.f32.mrb[16].mxu0 }
 0x109   : > { %v926_v36 = vadd.f32 %v1292_v33, %v852_v27  ;;  %v910_v37 = vpop.f32.mrb[13].mxu1  ;;  %v997_v38 = vpop.f32.mrb[17].mxu0 }
 0x10a   : > { %v924_v40 = vadd.f32 %v910_v37, %v850_v30  ;;  %v1293_v42 = vpop.f32.mrb[14].mxu1  ;;  %v1299_v43 = vpop.f32.mrb[18].mxu0 }
 0x10b   : > { %v1013_v44 = vadd.f32 %v1298_v34, %v926_v36  ;;  %v913_v45 = vpop.f32.mrb[15].mxu1  ;;  %v1000_v46 = vpop.f32.mrb[19].mxu0 }
 0x10c   : > { %v1011_v48 = vadd.f32 %v997_v38, %v924_v40  ;;  %v925_v49 = vadd.f32 %v913_v45, %v851_v32 }
 0x10d   : > { %v1023_v51 = vadd.f32 %v1206_v41, %v1013_v44 }
 0x10e   : > { %v1021_v52 = vadd.f32 %v1206_v41, %v1011_v48  ;;  %v1012_v53 = vadd.f32 %v1000_v46, %v925_v49 }
 0x10f   : > { %v1032_v56 = vadd.f32 %v1029_v47, %v1023_v51 }
 0x110   : > { %v1022_v57 = vadd.f32 %v1206_v41, %v1012_v53  ;;  %v1030_v58 = vadd.f32 %v1217_v50, %v1021_v52 }
 0x111   : > { %v1035_v60 = vmax.f32 %v1032_v56, 0.0 }
 0x112   : > { %v1033_v61 = vmax.f32 %v1030_v58, 0.0  ;;  %v1031_v62 = vadd.f32 %v1218_v54, %v1022_v57 }
 0x113   : > { %v1056_v63 = vmul.f32 %v1052_v59, %v1035_v60 }
 0x114   : > { %v1054_v0 = vmul.f32 %v1042_v55, %v1033_v61  ;;  %v1034_v1 = vmax.f32 %v1031_v62, 0.0 }
 0x115   : > { %v1214_v4 = vpack.c.bf16 %v1056_v63, %v1056_v63 }
 0x116   : > { %v1212_v5 = vpack.c.bf16 %v1054_v0, %v1054_v0  ;;  %v1055_v6 = vmul.f32 %v1047_v2, %v1034_v1 }
 0x117   : > { %1073 = vst.msk [vmem:[%s244_s8 + $0x8] sm:$0xf] %vm1070_vm7, %v1214_v4 }
 0x118   : > { %1071 = vst.msk [vmem:[%s244_s8] sm:$0xf] %vm1070_vm7, %v1212_v5  ;;  %v1213_v8 = vpack.c.bf16 %v1055_v6, %v1055_v6 }
 0x11a   : > { %1072 = vst.msk [vmem:[%s244_s8 + $0x4] sm:$0xf] %vm1070_vm7, %v1213_v8 }
 0x11b PF: > { %s15_s18 = sadd.s32 1, %s1342_s18  }
 0x11c   : > { %p12_p4 = scmp.ge.s32.totalorder %s15_s18, 4  }
 0x11e   :  { %14 = sbr.rel (!%p12_p4) target bundleno = 1 (0x1), region = 81 }

// kernel: forward.24
= control target key start
LH: loop header
LB: loop body
LE: loop exit
PB: predicated region body
PF: predicated region fallthrough
CT: control target
= control target key end

     0   :  { %s1297_s15 = smov 0   ;;  %s1424_s0 = inlined_call_operand.vmem [shape: bf16[2,52,16], index: 0, kind: input, shape index: {}]   ;;  %s1425_s1 = inlined_call_operand.vmem [shape: bf16[9,16,16], index: 1, kind: input, shape index: {}]   ;;  %s1426_s2 = inlined_call_operand.vmem [shape: f32[1,16], index: 2, kind: input, shape index: {}]   ;;  %s1427_s3 = inlined_call_operand.vmem [shape: f32[24,1], index: 3, kind: input, shape index: {}]   ;;  %s1428_s4 = inlined_call_operand.vmem [shape: bf16[2,24,16], index: 4, kind: output, shape index: {}]  }
   0x1 LB: > { %s1073_s16 = sadd.s32 4294967295, %s1269_s15   ;;  %p1077_p0 = scmp.ge.s32.totalorder %s1269_s15, 1  ;;  %s1269_s15 = sphi %s1297_s15, %s14_s15  }
   0x2   : > { %p162_p1 = scmp.lt.s32.totalorder %s1269_s15, 3 }
   0x4   : > { %p163_p2 = pnand %p1077_p0, %p162_p1 }
   0x5   : > { %v1240_v0 = vld [vmem:[%s1425_s1 + $0x8] sm:$0xff] (!%p163_p2)   ;;  %p188_p3 = scmp.lt.s32.totalorder (!%p163_p2), %s1073_s16, 1  ;;  %v1245_v1 = vld [vmem:[%s1425_s1 + $0x10] sm:$0xff] (!%p163_p2)   ;;  %v1246_v2 = vld [vmem:[%s1425_s1] sm:$0xff] (!%p163_p2)   ;;  %vm222_vm0 = vcmask (!%p163_p2), 130048   ;;  %vm554_vm3 = vcmask (!%p163_p2), 1044480  }
   0x6   : > { %166 = sbr.rel (%p163_p2) target bundleno = 281 (0x119), region = 36  ;;  %1173 = vmatprep.subr.bf16.mxu0 (!%p163_p2), %v1240_v0  ;;  %1179 = vmatprep.subr.bf16.mxu1 (!%p163_p2), %v1246_v2  ;;  %v1320_v3 = vld [vmem:[%s1425_s1 + $0x18] sm:$0xff] (!%p163_p2)   ;;  %vm281_vm1 = vsmask.f32 (!%p163_p2), 4352  ;;  %vm376_vm2 = vsmask.f32 (!%p163_p2), 7424 }
   0x7   : > { %1174 = vmatpush3.bf16.msra.mxu0 (!%p163_p2), %v1240_v0  ;;  %1180 = vmatpush3.bf16.msra.mxu1 (!%p163_p2), %v1246_v2  ;;  %v1334_v7 = vld [vmem:[%s1425_s1 + $0x20] sm:$0xff] (!%p163_p2)   ;;  %vm466_vm4 = vsmask.f32 (!%p163_p2), 5376  ;;  %v1355_v46 = vld [vmem:[%s1425_s1 + $0x28] sm:$0xff] (!%p163_p2)   ;;  %v1255_v62 = vld [vmem:[%s1425_s1 + $0x30] sm:$0xff] (!%p163_p2)   ;;  %vm813_vm6 = vcmask (!%p163_p2), 1045504  }
   0x8   : > { %1185 = vmatprep.subr.bf16.mxu0 (!%p163_p2), %v1245_v1  ;;  %1191 = vmatprep.subr.bf16.mxu1 (!%p163_p2), %v1320_v3  ;;  %vm725_vm5 = vsmask.f32 (!%p163_p2), 6400  ;;  %vm1014_vm7 = vcmask (!%p163_p2), 125952  }
   0xd   : > { %s1430_s16 = smov (!%p188_p3, %s1073_s16), 1 }
   0xe   : > { %s1227_s23 = smul.u32 28, %s1430_s16 }
  0x10   : > { %s1325_s28 = scalar_lea.vmem %s1424_s0, %s1227_s23  ;;  %s1228_s23 = smul.u32 12, %s1430_s16 }
  0x11   : > { %v199_v4 = vld [vmem:[%s1325_s28] sm:$0x8]  ;;  %v200_v5 = vld [vmem:[%s1325_s28 + $0x4] sm:$0xf]  ;;  %v201_v6 = vld [vmem:[%s1325_s28 + $0x8] sm:$0xf] }
  0x12   : > { %v202_v8 = vld [vmem:[%s1325_s28 + $0xc] sm:$0xf]  ;;  %v1082_v9 = vcombine.low %v200_v5, %v201_v6  ;;  %v1087_v10 = vcombine.low %v199_v4, %v200_v5  ;;  %v359_v11 = vld [vmem:[%s1325_s28 + $0x4] sm:$0xf]  ;;  %v360_v12 = vld [vmem:[%s1325_s28 + $0x8] sm:$0xf]  ;;  %s197_s26 = scalar_lea.vmem %s1428_s4, %s1228_s23 }
  0x13   : > { %v1083_v13 = vcombine.low %v202_v8, %v202_v8  ;;  %v1088_v14 = vcombine.low %v201_v6, %v202_v8  ;;  %v361_v15 = vld [vmem:[%s1325_s28 + $0xc] sm:$0xf]  ;;  %v362_v16 = vld [vmem:[%s1325_s28 + $0x10] sm:$0x1]  ;;  %v1094_v17 = vcombine.low %v359_v11, %v360_v12  ;;  %v455_v18 = vld [vmem:[%s1325_s28 + $0x4] sm:$0xc] }
  0x14   : > { %1175 = vmatprep.mubr.msk.bf16.mxu0 %vm222_vm0, %v1082_v9  ;;  %v283_v19 = vshrl.u32 %v1087_v10, 16  ;;  %v286_v20 = vshll.u32 %v1087_v10, 16  ;;  %v1095_v21 = vcombine.low %v361_v15, %v362_v16  ;;  %v456_v22 = vld [vmem:[%s1325_s28 + $0x10] sm:$0x7]  ;;  %v1101_v23 = vcombine.low %v455_v18, %v360_v12  ;;  %v547_v28 = vld [vmem:[%s1325_s28 + $0x4] sm:$0x8] }
  0x15   : > { %v291_v24 = vshrl.u32 %v1088_v14, 16  ;;  %v294_v25 = vshll.u32 %v1088_v14, 16  ;;  %1176 = vmatmul.mubr.msk.bf16.vlgmr.msra.gmra.mrb[0].mxu0 %vm222_vm0, %v1083_v13  ;;  %v378_v26 = vshrl.u32 %v1094_v17, 16  ;;  %v380_v27 = vshll.u32 %v1094_v17, 16  ;;  %v621_v37 = vld [vmem:[%s1325_s28 + $0x10] sm:$0xf] }
  0x16   : > { %v285_v29 = vrot.slane %v283_v19, 3  ;;  %v288_v30 = vrot.slane %v286_v20, 4  ;;  %1186 = vmatpush3.bf16.msra.mxu0 %v1245_v1  ;;  %v385_v31 = vshll.u32 %v1095_v21, 16  ;;  %v389_v32 = vshrl.u32 %v1095_v21, 16  ;;  %v708_v47 = vld [vmem:[%s1325_s28 + $0x8] sm:$0xe] }
  0x17   : > { %v293_v33 = vrot.slane %v291_v24, 3  ;;  %v296_v34 = vrot.slane %v294_v25, 4  ;;  %v382_v35 = vrot.slane %v380_v27, 1  ;;  %1197 = vmatprep.subr.bf16.mxu0 %v1334_v7  ;;  %v1347_v36 = vcombine.low %v361_v15, %v456_v22  ;;  %v709_v52 = vld [vmem:[%s1325_s28 + $0xc] sm:$0xf]  ;;  %v1257_v24 = vld [vmem:[%s1425_s1 + $0x38] sm:$0xff]  }
  0x18   : > { %v289_v38 = vor.u32 %v288_v30, %v285_v29  ;;  %v387_v39 = vrot.slane %v385_v31, 1  ;;  %v468_v40 = vshrl.u32 %v1101_v23, 16  ;;  %v471_v41 = vshll.u32 %v1101_v23, 16  ;;  %v710_v53 = vld [vmem:[%s1325_s28 + $0x10] sm:$0xf]  ;;  %v1260_v29 = vld [vmem:[%s1425_s1 + $0x40] sm:$0xff]  }
  0x19   : > { %v297_v42 = vor.u32 %v296_v34, %v293_v33  ;;  %v383_v43 = vor.u32 %v382_v35, %v378_v26  ;;  %v476_v44 = vshrl.u32 %v1347_v36, 16  ;;  %v479_v45 = vshll.u32 %v1347_v36, 16  ;;  %v711_v58 = vld [vmem:[%s1325_s28 + $0x14] sm:$0x3]  ;;  %v806_v10 = vld [vmem:[%s1325_s28 + $0x8] sm:$0xc] }
  0x1a   : > { %v391_v48 = vor.u32 %v389_v32, %v387_v39  ;;  %v470_v49 = vrot.slane %v468_v40, 2  ;;  %v473_v50 = vrot.slane %v471_v41, 3  ;;  %v1108_v51 = vcombine.low %v547_v28, %v360_v12  ;;  %v880_v20 = vld [vmem:[%s1325_s28 + $0x14] sm:$0x7] }
  0x1b   : > { %v298_v54 = vsel %vm281_vm1, %v289_v38, %v297_v42  ;;  %v388_v55 = vsel %vm376_vm2, %v383_v43, %v387_v39  ;;  %v478_v56 = vrot.slane %v476_v44, 2  ;;  %v481_v57 = vrot.slane %v479_v45, 3  ;;  %v980_v39 = vld [vmem:[%s1427_s3] sm:$0xff]  ;;  %v982_v40 = vld [vmem:[%s1427_s3 + $0x10] sm:$0xff] }
  0x1c   : > { %1181 = vmatprep.mubr.msk.bf16.mxu1 %vm222_vm0, %v298_v54  ;;  %1187 = vmatprep.mubr.msk.bf16.mxu0 %vm222_vm0, %v388_v55  ;;  %v474_v59 = vor.u32 %v473_v50, %v470_v49  ;;  %v555_v60 = vrot.slane %v1108_v51, 3  ;;  %v556_v61 = vrot.slane %v1347_v36, 3  ;;  %v1114_v63 = vcombine.low %v361_v15, %v621_v37  ;;  %v981_v50 = vld [vmem:[%s1427_s3 + $0x8] sm:$0xff] }
  0x1d   : > { %1182 = vmatmul.mubr.msk.bf16.vlgmr.msra.gmra.mrb[0].mxu1 %vm222_vm0, %v297_v42  ;;  %1188 = vmatmul.mubr.msk.bf16.vlgmr.msra.gmra.mrb[4].mxu0 %vm222_vm0, %v391_v48  ;;  %v482_v0 = vor.u32 %v481_v57, %v478_v56  ;;  %v629_v1 = vshrl.u32 %v1108_v51, 16  ;;  %v632_v2 = vshll.u32 %v1108_v51, 16  ;;  %v1120_v4 = vcombine.low %v708_v47, %v709_v52 }
  0x1e   : > { %1192 = vmatpush3.bf16.msra.mxu1 %v1320_v3  ;;  %1198 = vmatpush3.bf16.msra.mxu0 %v1334_v7  ;;  %v557_v5 = vsel %vm554_vm3, %v555_v60, %v556_v61  ;;  %v637_v6 = vshrl.u32 %v1114_v63, 16  ;;  %v640_v8 = vshll.u32 %v1114_v63, 16  ;;  %v1374_v9 = vcombine.low %v710_v53, %v711_v58 }
  0x1f   : > { %v483_v11 = vsel %vm466_vm4, %v474_v59, %v482_v0  ;;  %1203 = vmatprep.subr.bf16.mxu1 %v1355_v46  ;;  %1199 = vmatprep.mubr.msk.bf16.mxu0 %vm222_vm0, %v557_v5  ;;  %v631_v12 = vrot.slane %v629_v1, 3  ;;  %v634_v13 = vrot.slane %v632_v2, 4  ;;  %v727_v14 = vshrl.u32 %v1120_v4, 16 }
  0x20   : > { %1193 = vmatprep.mubr.msk.bf16.mxu1 %vm222_vm0, %v483_v11  ;;  %1209 = vmatprep.subr.bf16.mxu0 %v1255_v62  ;;  %v639_v3 = vrot.slane %v637_v6, 3  ;;  %v642_v7 = vrot.slane %v640_v8, 4  ;;  %v730_v15 = vshll.u32 %v1120_v4, 16  ;;  %v735_v17 = vshrl.u32 %v1374_v9, 16 }
  0x21   : > { %v635_v16 = vor.u32 %v634_v13, %v631_v12  ;;  %v738_v18 = vshll.u32 %v1374_v9, 16  ;;  %v1127_v19 = vcombine.low %v806_v10, %v709_v52  ;;  %v729_v22 = vrot.slane %v727_v14, 1 }
  0x22   : > { %v643_v21 = vor.u32 %v642_v7, %v639_v3  ;;  %v732_v23 = vrot.slane %v730_v15, 2  ;;  %v737_v25 = vrot.slane %v735_v17, 1  ;;  %v1133_v30 = vcombine.low %v710_v53, %v880_v20 }
  0x23   : > { %v740_v26 = vrot.slane %v738_v18, 2  ;;  %v888_v31 = vshrl.u32 %v1127_v19, 16  ;;  %v891_v33 = vshll.u32 %v1127_v19, 16  ;;  %v814_v41 = vrot.slane %v1127_v19, 2 }
  0x24   : > { %v644_v27 = vsel %vm281_vm1, %v635_v16, %v643_v21  ;;  %v733_v28 = vor.u32 %v732_v23, %v729_v22  ;;  %v896_v35 = vshrl.u32 %v1133_v30, 16  ;;  %v899_v36 = vshll.u32 %v1133_v30, 16 }
  0x25   : > { %1194 = vmatmul.mubr.msk.bf16.vlgmr.msra.gmra.mrb[4].mxu1 %vm222_vm0, %v482_v0  ;;  %1200 = vmatmul.mubr.msk.bf16.vlgmr.msra.gmra.mrb[8].mxu0 %vm222_vm0, %v556_v61  ;;  %v741_v32 = vor.u32 %v740_v26, %v737_v25  ;;  %v890_v34 = vrot.slane %v888_v31, 2  ;;  %v893_v38 = vrot.slane %v891_v33, 3  ;;  %v815_v42 = vrot.slane %v1374_v9, 2 }
  0x26   : > { %1204 = vmatpush3.bf16.msra.mxu1 %v1355_v46  ;;  %1210 = vmatpush3.bf16.msra.mxu0 %v1255_v62  ;;  %v898_v43 = vrot.slane %v896_v35, 2  ;;  %v901_v44 = vrot.slane %v899_v36, 3  ;;  %v1271_v46 = vmov 0  }
  0x27   : > { %1205 = vmatprep.mubr.msk.bf16.mxu1 %vm222_vm0, %v644_v27  ;;  %1215 = vmatprep.subr.bf16.mxu1 %v1257_v24  ;;  %v742_v37 = vsel %vm725_vm5, %v733_v28, %v741_v32  ;;  %v894_v45 = vor.u32 %v893_v38, %v890_v34  ;;  %v816_v48 = vsel %vm813_vm6, %v814_v41, %v815_v42 }
  0x28   : > { %1211 = vmatprep.mubr.msk.bf16.mxu0 %vm222_vm0, %v742_v37  ;;  %1221 = vmatprep.subr.bf16.mxu0 %v1260_v29  ;;  %v902_v47 = vor.u32 %v901_v44, %v898_v43 }
  0x29   : > { %1238 = vset.pattern.permute.xlu0 %v1271_v46  ;;  %1239 = vset.pattern.permute.xlu1 %v1271_v46 }
  0x2a   : > { %985 = vperm.xlu0 %1238, %v980_v39   ;;  %995 = vperm.xlu1 %1239, %v982_v40   ;;  %v903_v49 = vsel %vm466_vm4, %v894_v45, %v902_v47  ;;  %v1137_v39 = vld [vmem:[%s1426_s2] ss:$0 sm:$0xff] }
  0x2d   : > { %1206 = vmatmul.mubr.msk.bf16.vlgmr.msra.gmra.mrb[8].mxu1 %vm222_vm0, %v643_v21  ;;  %1212 = vmatmul.mubr.msk.bf16.vlgmr.msra.gmra.mrb[12].mxu0 %vm222_vm0, %v741_v32 }
  0x2e   : > { %1216 = vmatpush3.bf16.msra.mxu1 %v1257_v24  ;;  %1222 = vmatpush3.bf16.msra.mxu0 %v1260_v29 }
  0x2f   : > { %1217 = vmatprep.mubr.msk.bf16.mxu1 %vm222_vm0, %v816_v48  ;;  %1223 = vmatprep.mubr.msk.bf16.mxu0 %vm222_vm0, %v903_v49 }
  0x30   : > { %990 = vperm.xlu0 %1238, %v981_v50  }
  0x35   : > { %1218 = vmatmul.mubr.msk.bf16.vlgmr.msra.gmra.mrb[12].mxu1 %vm222_vm0, %v815_v42  ;;  %1224 = vmatmul.mubr.msk.bf16.vlgmr.msra.gmra.mrb[16].mxu0 %vm222_vm0, %v902_v47 }
  0xa9   : > { %v986_v48 = vpop.permute.xlu0 %985 }
  0xe8   : > { %v1177_v51 = vpop.f32.mrb[0].mxu0 }
  0xe9   : > { %v263_v52 = vpop.f32.mrb[1].mxu0 }
  0xea   : > { %v1178_v53 = vpop.f32.mrb[2].mxu0 }
  0xeb   : > { %v266_v54 = vpop.f32.mrb[3].mxu0 }
  0xf0   : > { %v1183_v55 = vpop.f32.mrb[0].mxu1  ;;  %v1189_v56 = vpop.f32.mrb[4].mxu0 }
  0xf1   : > { %v354_v57 = vadd.f32 %v1183_v55, %v1177_v51  ;;  %v345_v58 = vpop.f32.mrb[1].mxu1  ;;  %v438_v59 = vpop.f32.mrb[5].mxu0 }
  0xf2   : > { %v346_v60 = vadd.f32 %v345_v58, %v263_v52  ;;  %v1184_v61 = vpop.f32.mrb[2].mxu1  ;;  %v1190_v62 = vpop.f32.mrb[6].mxu0 }
  0xf3   : > { %v454_v63 = vadd.f32 %v1189_v56, %v354_v57  ;;  %v348_v0 = vpop.f32.mrb[3].mxu1  ;;  %v441_v1 = vpop.f32.mrb[7].mxu0 }
  0xf4   : > { %v452_v2 = vadd.f32 %v438_v59, %v346_v60  ;;  %v349_v4 = vadd.f32 %v348_v0, %v266_v54  ;;  %v996_v51 = vpop.permute.xlu1 %995  ;;  %v991_v58 = vpop.permute.xlu0 %990 }
  0xf6   : > { %v453_v5 = vadd.f32 %v441_v1, %v349_v4 }
  0xf8   : > { %v1195_v6 = vpop.f32.mrb[4].mxu1  ;;  %v1201_v8 = vpop.f32.mrb[8].mxu0 }
  0xf9   : > { %v546_v9 = vadd.f32 %v1195_v6, %v454_v63  ;;  %v530_v10 = vpop.f32.mrb[5].mxu1  ;;  %v604_v11 = vpop.f32.mrb[9].mxu0 }
  0xfa   : > { %v544_v12 = vadd.f32 %v530_v10, %v452_v2  ;;  %v1196_v13 = vpop.f32.mrb[6].mxu1  ;;  %v1202_v3 = vpop.f32.mrb[10].mxu0 }
  0xfb   : > { %v620_v7 = vadd.f32 %v1201_v8, %v546_v9  ;;  %v533_v14 = vpop.f32.mrb[7].mxu1  ;;  %v607_v15 = vpop.f32.mrb[11].mxu0 }
  0xfc   : > { %v618_v16 = vadd.f32 %v604_v11, %v544_v12  ;;  %v545_v17 = vadd.f32 %v533_v14, %v453_v5 }
  0xfe   : > { %v619_v18 = vadd.f32 %v607_v15, %v545_v17 }
 0x100   : > { %v1207_v19 = vpop.f32.mrb[8].mxu1  ;;  %v1213_v20 = vpop.f32.mrb[12].mxu0 }
 0x101   : > { %v707_v21 = vadd.f32 %v1207_v19, %v620_v7  ;;  %v691_v22 = vpop.f32.mrb[9].mxu1  ;;  %v789_v23 = vpop.f32.mrb[13].mxu0 }
 0x102   : > { %v705_v24 = vadd.f32 %v691_v22, %v618_v16  ;;  %v1208_v25 = vpop.f32.mrb[10].mxu1  ;;  %v1214_v26 = vpop.f32.mrb[14].mxu0 }
 0x103   : > { %v805_v27 = vadd.f32 %v1213_v20, %v707_v21  ;;  %v694_v28 = vpop.f32.mrb[11].mxu1  ;;  %v792_v29 = vpop.f32.mrb[15].mxu0 }
 0x104   : > { %v803_v30 = vadd.f32 %v789_v23, %v705_v24  ;;  %v706_v31 = vadd.f32 %v694_v28, %v619_v18 }
 0x106   : > { %v804_v32 = vadd.f32 %v792_v29, %v706_v31 }
 0x108   : > { %v1219_v33 = vpop.f32.mrb[12].mxu1  ;;  %v1225_v34 = vpop.f32.mrb[16].mxu0 }
 0x109   : > { %v879_v35 = vadd.f32 %v1219_v33, %v805_v27  ;;  %v863_v36 = vpop.f32.mrb[13].mxu1  ;;  %v950_v37 = vpop.f32.mrb[17].mxu0 }
 0x10a   : > { %v877_v38 = vadd.f32 %v863_v36, %v803_v30  ;;  %v1220_v40 = vpop.f32.mrb[14].mxu1  ;;  %v1226_v41 = vpop.f32.mrb[18].mxu0 }
 0x10b   : > { %v966_v42 = vadd.f32 %v1225_v34, %v879_v35  ;;  %v866_v43 = vpop.f32.mrb[15].mxu1  ;;  %v953_v44 = vpop.f32.mrb[19].mxu0 }
 0x10c   : > { %v964_v45 = vadd.f32 %v950_v37, %v877_v38  ;;  %v878_v46 = vadd.f32 %v866_v43, %v804_v32 }
 0x10d   : > { %v976_v47 = vadd.f32 %v1137_v39, %v966_v42 }
 0x10e   : > { %v974_v49 = vadd.f32 %v1137_v39, %v964_v45  ;;  %v965_v50 = vadd.f32 %v953_v44, %v878_v46 }
 0x10f   : > { %v979_v52 = vmax.f32 %v976_v47, 0.0 }
 0x110   : > { %v977_v53 = vmax.f32 %v974_v49, 0.0  ;;  %v975_v54 = vadd.f32 %v1137_v39, %v965_v50 }
 0x111   : > { %v1000_v55 = vmul.f32 %v996_v51, %v979_v52 }
 0x112   : > { %v998_v56 = vmul.f32 %v986_v48, %v977_v53  ;;  %v978_v57 = vmax.f32 %v975_v54, 0.0 }
 0x113   : > { %v1145_v59 = vpack.c.bf16 %v1000_v55, %v1000_v55 }
 0x114   : > { %v1143_v60 = vpack.c.bf16 %v998_v56, %v998_v56  ;;  %v999_v61 = vmul.f32 %v991_v58, %v978_v57 }
 0x115   : > { %1017 = vst.msk [vmem:[%s197_s26 + $0x8] sm:$0xf] %vm1014_vm7, %v1145_v59 }
 0x116   : > { %1015 = vst.msk [vmem:[%s197_s26] sm:$0xf] %vm1014_vm7, %v1143_v60  ;;  %v1144_v62 = vpack.c.bf16 %v999_v61, %v999_v61 }
 0x118   : > { %1016 = vst.msk [vmem:[%s197_s26 + $0x4] sm:$0xf] %vm1014_vm7, %v1144_v62 }
 0x119 PF: > { %s14_s15 = sadd.s32 1, %s1269_s15  }
 0x11a   : > { %p11_p4 = scmp.ge.s32.totalorder %s14_s15, 4  }
 0x11c   :  { %13 = sbr.rel (!%p11_p4) target bundleno = 1 (0x1), region = 74 }

// kernel: forward.23
= control target key start
LH: loop header
LB: loop body
LE: loop exit
PB: predicated region body
PF: predicated region fallthrough
CT: control target
= control target key end

     0   :  { %s1484_s21 = smov 0   ;;  %s1624_s0 = inlined_call_operand.vmem [shape: bf16[2,52,16], index: 0, kind: input, shape index: {}]   ;;  %s1625_s1 = inlined_call_operand.vmem [shape: bf16[9,16,16], index: 1, kind: input, shape index: {}]   ;;  %s1626_s2 = inlined_call_operand.vmem [shape: f32[1,16], index: 2, kind: input, shape index: {}]   ;;  %s1627_s3 = inlined_call_operand.vmem [shape: f32[24,1], index: 3, kind: input, shape index: {}]   ;;  %s1628_s4 = inlined_call_operand.vmem [shape: bf16[2,24,8], index: 4, kind: input, shape index: {}]   ;;  %s1629_s5 = inlined_call_operand.vmem [shape: bf16[8,16], index: 5, kind: input, shape index: {}]   ;;  %s1630_s6 = inlined_call_operand.vmem [shape: bf16[2,24,16], index: 6, kind: output, shape index: {}]  }
   0x1 LB: > { %s1233_s22 = sadd.s32 4294967295, %s1446_s21   ;;  %p1237_p0 = scmp.ge.s32.totalorder %s1446_s21, 1  ;;  %s1446_s21 = sphi %s1484_s21, %s16_s21  }
   0x2   : > { %p222_p1 = scmp.lt.s32.totalorder %s1446_s21, 3 }
   0x4   : > { %p223_p2 = pnand %p1237_p0, %p222_p1 }
   0x5   : > { %v1415_v0 = vld [vmem:[%s1625_s1 + $0x8] sm:$0xff] (!%p223_p2)   ;;  %p257_p3 = scmp.lt.s32.totalorder (!%p223_p2), %s1233_s22, 1  ;;  %v1420_v1 = vld [vmem:[%s1625_s1] sm:$0xff] (!%p223_p2)   ;;  %v1421_v2 = vld [vmem:[%s1625_s1 + $0x10] sm:$0xff] (!%p223_p2)   ;;  %vm296_vm0 = vcmask (!%p223_p2), 130048   ;;  %vm628_vm3 = vcmask (!%p223_p2), 1044480  }
   0x6   : > { %226 = sbr.rel (%p223_p2) target bundleno = 287 (0x11f), region = 44  ;;  %1341 = vmatprep.subr.bf16.mxu0 (!%p223_p2), %v1415_v0  ;;  %1347 = vmatprep.subr.bf16.mxu1 (!%p223_p2), %v1420_v1  ;;  %v1507_v3 = vld [vmem:[%s1625_s1 + $0x18] sm:$0xff] (!%p223_p2)   ;;  %vm355_vm1 = vsmask.f32 (!%p223_p2), 4352  ;;  %vm450_vm2 = vsmask.f32 (!%p223_p2), 7424 }
   0x7   : > { %1342 = vmatpush3.bf16.msra.mxu0 (!%p223_p2), %v1415_v0  ;;  %1348 = vmatpush3.bf16.msra.mxu1 (!%p223_p2), %v1420_v1  ;;  %v1521_v7 = vld [vmem:[%s1625_s1 + $0x20] sm:$0xff] (!%p223_p2)   ;;  %vm540_vm4 = vsmask.f32 (!%p223_p2), 5376  ;;  %v1542_v46 = vld [vmem:[%s1625_s1 + $0x28] sm:$0xff] (!%p223_p2)   ;;  %v1430_v62 = vld [vmem:[%s1625_s1 + $0x30] sm:$0xff] (!%p223_p2)   ;;  %vm887_vm6 = vcmask (!%p223_p2), 1045504  }
   0x8   : > { %1353 = vmatprep.subr.bf16.mxu0 (!%p223_p2), %v1421_v2  ;;  %1359 = vmatprep.subr.bf16.mxu1 (!%p223_p2), %v1507_v3  ;;  %vm799_vm5 = vsmask.f32 (!%p223_p2), 6400  ;;  %vm1060_vm7 = vcmask (!%p223_p2), 1043456   ;;  %vm1053_vm8 = vcmask (!%p223_p2), 64512   ;;  %vm1162_vm9 = vcmask (!%p223_p2), 125952  }
   0xd   : > { %s1632_s22 = smov (!%p257_p3, %s1233_s22), 1 }
   0xe   : > { %s1402_s29 = smul.u32 28, %s1632_s22 }
   0xf   : > { %s1403_s17 = smul.u32 12, %s1632_s22 }
  0x10   : > { %s1512_s10 = scalar_lea.vmem %s1624_s0, %s1402_s29 }
  0x11   : > { %v273_v4 = vld [vmem:[%s1512_s10] sm:$0x8]  ;;  %v274_v5 = vld [vmem:[%s1512_s10 + $0x4] sm:$0xf]  ;;  %v275_v6 = vld [vmem:[%s1512_s10 + $0x8] sm:$0xf]  ;;  %s1575_s20 = scalar_lea.vmem %s1628_s4, %s1403_s17  ;;  %s271_s15 = scalar_lea.vmem %s1630_s6, %s1403_s17 }
  0x12   : > { %v276_v8 = vld [vmem:[%s1512_s10 + $0xc] sm:$0xf]  ;;  %v1243_v9 = vcombine.low %v274_v5, %v275_v6  ;;  %v1248_v10 = vcombine.low %v273_v4, %v274_v5  ;;  %v433_v11 = vld [vmem:[%s1512_s10 + $0x4] sm:$0xf]  ;;  %v434_v12 = vld [vmem:[%s1512_s10 + $0x8] sm:$0xf] }
  0x13   : > { %v1244_v13 = vcombine.low %v276_v8, %v276_v8  ;;  %v1249_v14 = vcombine.low %v275_v6, %v276_v8  ;;  %v435_v15 = vld [vmem:[%s1512_s10 + $0xc] sm:$0xf]  ;;  %v436_v16 = vld [vmem:[%s1512_s10 + $0x10] sm:$0x1]  ;;  %v1255_v17 = vcombine.low %v433_v11, %v434_v12  ;;  %v529_v18 = vld [vmem:[%s1512_s10 + $0x4] sm:$0xc] }
  0x14   : > { %1343 = vmatprep.mubr.msk.bf16.mxu0 %vm296_vm0, %v1243_v9  ;;  %v357_v19 = vshrl.u32 %v1248_v10, 16  ;;  %v360_v20 = vshll.u32 %v1248_v10, 16  ;;  %v1256_v21 = vcombine.low %v435_v15, %v436_v16  ;;  %v530_v22 = vld [vmem:[%s1512_s10 + $0x10] sm:$0x7]  ;;  %v1262_v23 = vcombine.low %v529_v18, %v434_v12  ;;  %v621_v28 = vld [vmem:[%s1512_s10 + $0x4] sm:$0x8] }
  0x15   : > { %v365_v24 = vshrl.u32 %v1249_v14, 16  ;;  %v368_v25 = vshll.u32 %v1249_v14, 16  ;;  %1344 = vmatmul.mubr.msk.bf16.vlgmr.msra.gmra.mrb[0].mxu0 %vm296_vm0, %v1244_v13  ;;  %v452_v26 = vshrl.u32 %v1255_v17, 16  ;;  %v454_v27 = vshll.u32 %v1255_v17, 16  ;;  %v695_v37 = vld [vmem:[%s1512_s10 + $0x10] sm:$0xf] }
  0x16   : > { %v359_v29 = vrot.slane %v357_v19, 3  ;;  %v362_v30 = vrot.slane %v360_v20, 4  ;;  %1354 = vmatpush3.bf16.msra.mxu0 %v1421_v2  ;;  %v459_v31 = vshll.u32 %v1256_v21, 16  ;;  %v463_v32 = vshrl.u32 %v1256_v21, 16  ;;  %v782_v47 = vld [vmem:[%s1512_s10 + $0x8] sm:$0xe] }
  0x17   : > { %v367_v33 = vrot.slane %v365_v24, 3  ;;  %v370_v34 = vrot.slane %v368_v25, 4  ;;  %v456_v35 = vrot.slane %v454_v27, 1  ;;  %1365 = vmatprep.subr.bf16.mxu0 %v1521_v7  ;;  %v1534_v36 = vcombine.low %v435_v15, %v530_v22  ;;  %v783_v52 = vld [vmem:[%s1512_s10 + $0xc] sm:$0xf]  ;;  %v1432_v24 = vld [vmem:[%s1625_s1 + $0x38] sm:$0xff]  }
  0x18   : > { %v363_v38 = vor.u32 %v362_v30, %v359_v29  ;;  %v461_v39 = vrot.slane %v459_v31, 1  ;;  %v542_v40 = vshrl.u32 %v1262_v23, 16  ;;  %v545_v41 = vshll.u32 %v1262_v23, 16  ;;  %v784_v53 = vld [vmem:[%s1512_s10 + $0x10] sm:$0xf]  ;;  %v1435_v29 = vld [vmem:[%s1625_s1 + $0x40] sm:$0xff]  }
  0x19   : > { %v371_v42 = vor.u32 %v370_v34, %v367_v33  ;;  %v457_v43 = vor.u32 %v456_v35, %v452_v26  ;;  %v550_v44 = vshrl.u32 %v1534_v36, 16  ;;  %v553_v45 = vshll.u32 %v1534_v36, 16  ;;  %v785_v58 = vld [vmem:[%s1512_s10 + $0x14] sm:$0x3]  ;;  %v880_v10 = vld [vmem:[%s1512_s10 + $0x8] sm:$0xc] }
  0x1a   : > { %v465_v48 = vor.u32 %v463_v32, %v461_v39  ;;  %v544_v49 = vrot.slane %v542_v40, 2  ;;  %v547_v50 = vrot.slane %v545_v41, 3  ;;  %v1269_v51 = vcombine.low %v621_v28, %v434_v12  ;;  %v954_v16 = vld [vmem:[%s1512_s10 + $0x14] sm:$0x7] }
  0x1b   : > { %v372_v54 = vsel %vm355_vm1, %v363_v38, %v371_v42  ;;  %v462_v55 = vsel %vm450_vm2, %v457_v43, %v461_v39  ;;  %v552_v56 = vrot.slane %v550_v44, 2  ;;  %v555_v57 = vrot.slane %v553_v45, 3  ;;  %v1128_v39 = vld [vmem:[%s1627_s3] sm:$0xff]  ;;  %v1130_v40 = vld [vmem:[%s1627_s3 + $0x10] sm:$0xff] }
  0x1c   : > { %1349 = vmatprep.mubr.msk.bf16.mxu1 %vm296_vm0, %v372_v54  ;;  %1355 = vmatprep.mubr.msk.bf16.mxu0 %vm296_vm0, %v462_v55  ;;  %v548_v59 = vor.u32 %v547_v50, %v544_v49  ;;  %v629_v60 = vrot.slane %v1269_v51, 3  ;;  %v630_v61 = vrot.slane %v1534_v36, 3  ;;  %v1275_v63 = vcombine.low %v435_v15, %v695_v37  ;;  %v1044_v49 = vld [vmem:[%s1629_s5] sm:$0xf]  ;;  %v1439_v54 = vld [vmem:[%s1575_s20 + $0x8] ss:$0 sps:$4 sm:$0xff]  }
  0x1d   : > { %1350 = vmatmul.mubr.msk.bf16.vlgmr.msra.gmra.mrb[0].mxu1 %vm296_vm0, %v371_v42  ;;  %1356 = vmatmul.mubr.msk.bf16.vlgmr.msra.gmra.mrb[4].mxu0 %vm296_vm0, %v465_v48  ;;  %v556_v0 = vor.u32 %v555_v57, %v552_v56  ;;  %v703_v1 = vshrl.u32 %v1269_v51, 16  ;;  %v706_v2 = vshll.u32 %v1269_v51, 16  ;;  %v1281_v4 = vcombine.low %v782_v47, %v783_v52  ;;  %v1129_v51 = vld [vmem:[%s1627_s3 + $0x8] sm:$0xff] }
  0x1e   : > { %1360 = vmatpush3.bf16.msra.mxu1 %v1507_v3  ;;  %1366 = vmatpush3.bf16.msra.mxu0 %v1521_v7  ;;  %v631_v5 = vsel %vm628_vm3, %v629_v60, %v630_v61  ;;  %v711_v6 = vshrl.u32 %v1275_v63, 16  ;;  %v714_v8 = vshll.u32 %v1275_v63, 16  ;;  %v1561_v9 = vcombine.low %v784_v53, %v785_v58 }
  0x1f   : > { %v557_v11 = vsel %vm540_vm4, %v548_v59, %v556_v0  ;;  %1371 = vmatprep.subr.bf16.mxu1 %v1542_v46  ;;  %1367 = vmatprep.mubr.msk.bf16.mxu0 %vm296_vm0, %v631_v5  ;;  %v705_v12 = vrot.slane %v703_v1, 3  ;;  %v708_v3 = vrot.slane %v706_v2, 4  ;;  %v801_v14 = vshrl.u32 %v1281_v4, 16 }
  0x20   : > { %1361 = vmatprep.mubr.msk.bf16.mxu1 %vm296_vm0, %v557_v11  ;;  %1377 = vmatprep.subr.bf16.mxu0 %v1430_v62  ;;  %v713_v7 = vrot.slane %v711_v6, 3  ;;  %v716_v13 = vrot.slane %v714_v8, 4  ;;  %v804_v15 = vshll.u32 %v1281_v4, 16  ;;  %v809_v18 = vshrl.u32 %v1561_v9, 16 }
  0x21   : > { %v709_v17 = vor.u32 %v708_v3, %v705_v12  ;;  %v812_v19 = vshll.u32 %v1561_v9, 16  ;;  %v1288_v20 = vcombine.low %v880_v10, %v783_v52  ;;  %v803_v22 = vrot.slane %v801_v14, 1  ;;  %v1438_v52 = vld [vmem:[%s1575_s20] sm:$0xff]  }
  0x22   : > { %v717_v21 = vor.u32 %v716_v13, %v713_v7  ;;  %v806_v23 = vrot.slane %v804_v15, 2  ;;  %v811_v25 = vrot.slane %v809_v18, 1  ;;  %v1294_v30 = vcombine.low %v784_v53, %v954_v16 }
  0x23   : > { %v814_v26 = vrot.slane %v812_v19, 2  ;;  %v962_v32 = vshrl.u32 %v1288_v20, 16  ;;  %v965_v33 = vshll.u32 %v1288_v20, 16  ;;  %v888_v37 = vrot.slane %v1288_v20, 2 }
  0x24   : > { %v718_v27 = vsel %vm355_vm1, %v709_v17, %v717_v21  ;;  %v807_v28 = vor.u32 %v806_v23, %v803_v22  ;;  %v970_v34 = vshrl.u32 %v1294_v30, 16  ;;  %v973_v35 = vshll.u32 %v1294_v30, 16 }
  0x25   : > { %1362 = vmatmul.mubr.msk.bf16.vlgmr.msra.gmra.mrb[4].mxu1 %vm296_vm0, %v556_v0  ;;  %1368 = vmatmul.mubr.msk.bf16.vlgmr.msra.gmra.mrb[8].mxu0 %vm296_vm0, %v630_v61  ;;  %v815_v31 = vor.u32 %v814_v26, %v811_v25  ;;  %v964_v38 = vrot.slane %v962_v32, 2  ;;  %v889_v41 = vrot.slane %v1561_v9, 2  ;;  %v967_v42 = vrot.slane %v965_v33, 3 }
  0x26   : > { %1372 = vmatpush3.bf16.msra.mxu1 %v1542_v46  ;;  %1378 = vmatpush3.bf16.msra.mxu0 %v1430_v62  ;;  %v972_v43 = vrot.slane %v970_v34, 2  ;;  %v975_v44 = vrot.slane %v973_v35, 3  ;;  %v1448_v45 = vmov 0   ;;  %v1062_v53 = vsel %vm1060_vm7, %v1044_v49, 0 }
  0x27   : > { %1373 = vmatprep.mubr.msk.bf16.mxu1 %vm296_vm0, %v718_v27  ;;  %1383 = vmatprep.subr.bf16.mxu1 %v1432_v24  ;;  %v816_v36 = vsel %vm799_vm5, %v807_v28, %v815_v31  ;;  %v968_v46 = vor.u32 %v967_v42, %v964_v38  ;;  %v890_v48 = vsel %vm887_vm6, %v888_v37, %v889_v41 }
  0x28   : > { %1379 = vmatprep.mubr.msk.bf16.mxu0 %vm296_vm0, %v816_v36  ;;  %1389 = vmatprep.subr.bf16.mxu0 %v1435_v29  ;;  %v976_v47 = vor.u32 %v975_v44, %v972_v43 }
  0x29   : > { %1413 = vset.pattern.permute.xlu0 %v1448_v45  ;;  %1414 = vset.pattern.permute.xlu1 %v1448_v45 }
  0x2a   : > { %1133 = vperm.xlu0 %1413, %v1128_v39   ;;  %1143 = vperm.xlu1 %1414, %v1130_v40   ;;  %v977_v50 = vsel %vm540_vm4, %v968_v46, %v976_v47 }
  0x2d   : > { %1374 = vmatmul.mubr.msk.bf16.vlgmr.msra.gmra.mrb[8].mxu1 %vm296_vm0, %v717_v21  ;;  %1380 = vmatmul.mubr.msk.bf16.vlgmr.msra.gmra.mrb[12].mxu0 %vm296_vm0, %v815_v31 }
  0x2e   : > { %1384 = vmatpush3.bf16.msra.mxu1 %v1432_v24  ;;  %1390 = vmatpush3.bf16.msra.mxu0 %v1435_v29 }
  0x2f   : > { %1385 = vmatprep.mubr.msk.bf16.mxu1 %vm296_vm0, %v890_v48  ;;  %1401 = vmatprep.subr.msk.bf16.mxu1 %vm1060_vm7, %v1044_v49 }
  0x30   : > { %1391 = vmatprep.mubr.msk.bf16.mxu0 %vm296_vm0, %v977_v50  ;;  %1138 = vperm.xlu0 %1413, %v1129_v51  }
  0x35   : > { %1386 = vmatmul.mubr.msk.bf16.vlgmr.msra.gmra.mrb[12].mxu1 %vm296_vm0, %v889_v41  ;;  %1392 = vmatmul.mubr.msk.bf16.vlgmr.msra.gmra.mrb[16].mxu0 %vm296_vm0, %v976_v47 }
  0x36   : > { %1396 = vmatpush3.bf16.msra.mxu1 %v1062_v53  ;;  %1397 = vmatprep.mubr.msk.bf16.mxu1 %vm1053_vm8, %v1438_v52  ;;  %v1302_v52 = vld [vmem:[%s1626_s2] ss:$0 sm:$0xff] }
  0x3d   : > { %1398 = vmatmul.mubr.msk.bf16.vlgmr.msra.gmra.mrb[16].mxu1 %vm1053_vm8, %v1439_v54 }
  0xe8   : > { %v1345_v55 = vpop.f32.mrb[0].mxu0 }
  0xe9   : > { %v337_v56 = vpop.f32.mrb[1].mxu0 }
  0xea   : > { %v1346_v57 = vpop.f32.mrb[2].mxu0 }
  0xeb   : > { %v340_v58 = vpop.f32.mrb[3].mxu0 }
  0xf0   : > { %v1351_v59 = vpop.f32.mrb[0].mxu1  ;;  %v1357_v60 = vpop.f32.mrb[4].mxu0 }
  0xf1   : > { %v428_v61 = vadd.f32 %v1351_v59, %v1345_v55  ;;  %v419_v62 = vpop.f32.mrb[1].mxu1  ;;  %v512_v63 = vpop.f32.mrb[5].mxu0 }
  0xf2   : > { %v420_v0 = vadd.f32 %v419_v62, %v337_v56  ;;  %v1352_v1 = vpop.f32.mrb[2].mxu1  ;;  %v1358_v2 = vpop.f32.mrb[6].mxu0 }
  0xf3   : > { %v528_v4 = vadd.f32 %v1357_v60, %v428_v61  ;;  %v422_v5 = vpop.f32.mrb[3].mxu1  ;;  %v515_v6 = vpop.f32.mrb[7].mxu0 }
  0xf4   : > { %v423_v8 = vadd.f32 %v422_v5, %v340_v58  ;;  %v526_v9 = vadd.f32 %v512_v63, %v420_v0  ;;  %v1134_v58 = vpop.permute.xlu0 %1133  ;;  %v1144_v62 = vpop.permute.xlu1 %1143 }
  0xf6   : > { %v527_v10 = vadd.f32 %v515_v6, %v423_v8 }
  0xf8   : > { %v1363_v11 = vpop.f32.mrb[4].mxu1  ;;  %v1369_v12 = vpop.f32.mrb[8].mxu0 }
  0xf9   : > { %v620_v3 = vadd.f32 %v1363_v11, %v528_v4  ;;  %v604_v7 = vpop.f32.mrb[5].mxu1  ;;  %v678_v13 = vpop.f32.mrb[9].mxu0 }
  0xfa   : > { %v618_v14 = vadd.f32 %v604_v7, %v526_v9  ;;  %v1364_v15 = vpop.f32.mrb[6].mxu1  ;;  %v1370_v16 = vpop.f32.mrb[10].mxu0 }
  0xfb   : > { %v694_v17 = vadd.f32 %v1369_v12, %v620_v3  ;;  %v607_v18 = vpop.f32.mrb[7].mxu1  ;;  %v681_v19 = vpop.f32.mrb[11].mxu0 }
  0xfc   : > { %v619_v20 = vadd.f32 %v607_v18, %v527_v10  ;;  %v692_v21 = vadd.f32 %v678_v13, %v618_v14  ;;  %v1139_v6 = vpop.permute.xlu0 %1138 }
  0xfe   : > { %v693_v22 = vadd.f32 %v681_v19, %v619_v20 }
 0x100   : > { %v1375_v23 = vpop.f32.mrb[8].mxu1  ;;  %v1381_v24 = vpop.f32.mrb[12].mxu0 }
 0x101   : > { %v781_v25 = vadd.f32 %v1375_v23, %v694_v17  ;;  %v765_v26 = vpop.f32.mrb[9].mxu1  ;;  %v863_v27 = vpop.f32.mrb[13].mxu0 }
 0x102   : > { %v779_v28 = vadd.f32 %v765_v26, %v692_v21  ;;  %v1376_v29 = vpop.f32.mrb[10].mxu1  ;;  %v1382_v30 = vpop.f32.mrb[14].mxu0 }
 0x103   : > { %v879_v31 = vadd.f32 %v1381_v24, %v781_v25  ;;  %v768_v32 = vpop.f32.mrb[11].mxu1  ;;  %v866_v33 = vpop.f32.mrb[15].mxu0 }
 0x104   : > { %v780_v34 = vadd.f32 %v768_v32, %v693_v22  ;;  %v877_v35 = vadd.f32 %v863_v27, %v779_v28 }
 0x106   : > { %v878_v36 = vadd.f32 %v866_v33, %v780_v34 }
 0x108   : > { %v1387_v37 = vpop.f32.mrb[12].mxu1  ;;  %v1393_v38 = vpop.f32.mrb[16].mxu0 }
 0x109   : > { %v953_v39 = vadd.f32 %v1387_v37, %v879_v31  ;;  %v937_v40 = vpop.f32.mrb[13].mxu1  ;;  %v1024_v41 = vpop.f32.mrb[17].mxu0 }
 0x10a   : > { %v951_v42 = vadd.f32 %v937_v40, %v877_v35  ;;  %v1388_v43 = vpop.f32.mrb[14].mxu1  ;;  %v1394_v44 = vpop.f32.mrb[18].mxu0 }
 0x10b   : > { %v1040_v45 = vadd.f32 %v1393_v38, %v953_v39  ;;  %v940_v46 = vpop.f32.mrb[15].mxu1  ;;  %v1027_v47 = vpop.f32.mrb[19].mxu0 }
 0x10c   : > { %v952_v48 = vadd.f32 %v940_v46, %v878_v36  ;;  %v1038_v49 = vadd.f32 %v1024_v41, %v951_v42 }
 0x10e   : > { %v1039_v50 = vadd.f32 %v1027_v47, %v952_v48 }
 0x110   : > { %v1399_v51 = vpop.f32.mrb[16].mxu1 }
 0x111   : > { %v1114_v53 = vadd.f32 %v1399_v51, %v1040_v45  ;;  %v1098_v54 = vpop.f32.mrb[17].mxu1 }
 0x112   : > { %v1112_v55 = vadd.f32 %v1098_v54, %v1038_v49  ;;  %v1400_v56 = vpop.f32.mrb[18].mxu1 }
 0x113   : > { %v1124_v57 = vadd.f32 %v1302_v52, %v1114_v53  ;;  %v1101_v59 = vpop.f32.mrb[19].mxu1 }
 0x114   : > { %v1122_v60 = vadd.f32 %v1302_v52, %v1112_v55  ;;  %v1113_v61 = vadd.f32 %v1101_v59, %v1039_v50 }
 0x115   : > { %v1127_v63 = vmax.f32 %v1124_v57, 0.0 }
 0x116   : > { %v1125_v0 = vmax.f32 %v1122_v60, 0.0  ;;  %v1123_v1 = vadd.f32 %v1302_v52, %v1113_v61 }
 0x117   : > { %v1148_v2 = vmul.f32 %v1144_v62, %v1127_v63 }
 0x118   : > { %v1146_v4 = vmul.f32 %v1134_v58, %v1125_v0  ;;  %v1126_v5 = vmax.f32 %v1123_v1, 0.0 }
 0x119   : > { %v1310_v8 = vpack.c.bf16 %v1148_v2, %v1148_v2 }
 0x11a   : > { %v1308_v9 = vpack.c.bf16 %v1146_v4, %v1146_v4  ;;  %v1147_v10 = vmul.f32 %v1139_v6, %v1126_v5 }
 0x11b   : > { %1165 = vst.msk [vmem:[%s271_s15 + $0x8] sm:$0xf] %vm1162_vm9, %v1310_v8 }
 0x11c   : > { %v1309_v11 = vpack.c.bf16 %v1147_v10, %v1147_v10  ;;  %1163 = vst.msk [vmem:[%s271_s15] sm:$0xf] %vm1162_vm9, %v1308_v9 }
 0x11e   : > { %1164 = vst.msk [vmem:[%s271_s15 + $0x4] sm:$0xf] %vm1162_vm9, %v1309_v11 }
 0x11f PF: > { %s16_s21 = sadd.s32 1, %s1446_s21  }
 0x120   : > { %p13_p4 = scmp.ge.s32.totalorder %s16_s21, 4  }
 0x122   :  { %15 = sbr.rel (!%p13_p4) target bundleno = 1 (0x1), region = 85 }

// kernel: forward.26
= control target key start
LH: loop header
LB: loop body
LE: loop exit
PB: predicated region body
PF: predicated region fallthrough
CT: control target
= control target key end

     0   :  { %v178_v0 = vmov 0   ;;  %vm101_vm0 = vcmask 130048   ;;  %vm147_vm1 = vcmask 257024   ;;  %s235_s1 = inlined_call_operand.vmem [shape: bf16[144,32], index: 1, kind: input, shape index: {}]   ;;  %s236_s0 = inlined_call_operand.vmem [shape: bf16[8,144], index: 0, kind: input, shape index: {}]   ;;  %s237_s2 = inlined_call_operand.vmem [shape: f32[1,32], index: 2, kind: input, shape index: {}]   ;;  %s238_s3 = inlined_call_operand.vmem [shape: bf16[8,32], index: 3, kind: output, shape index: {}]  }
   0x1   :  { %105 = vmatprep.subr.bf16.mxu0 %v178_v0  ;;  %v167_v1 = vld [vmem:[%s235_s1] sm:$0xff]   ;;  %v168_v2 = vld [vmem:[%s235_s1 + $0x8] sm:$0xff]   ;;  %v169_v3 = vld [vmem:[%s235_s1 + $0x10] sm:$0xff]  }
   0x2   :  { %106 = vmatpush1.bf16.msra.mxu0 %v167_v1  ;;  %v15_v4 = vld [vmem:[%s236_s0] sm:$0xff]  ;;  %v170_v5 = vld [vmem:[%s235_s1 + $0x18] sm:$0xff]   ;;  %v172_v8 = vld [vmem:[%s235_s1 + $0x28] sm:$0xff]  }
   0x3   :  { %107 = vmatprep.subr.bf16.mxu0 %v178_v0  ;;  %v155_v6 = vcombine.high %v15_v4, %v15_v4  ;;  %v171_v7 = vld [vmem:[%s235_s1 + $0x20] sm:$0xff]   ;;  %v173_v9 = vld [vmem:[%s235_s1 + $0x30] sm:$0xff]   ;;  %v174_v10 = vld [vmem:[%s235_s1 + $0x38] sm:$0xff]   ;;  %v154_v12 = vcombine.low %v15_v4, %v15_v4 }
   0x4   :  { %v175_v11 = vld [vmem:[%s235_s1 + $0x40] sm:$0xff]  }
   0x5   :  { %165 = vmatprep.mubr.msk.bf16.mxu0 %vm101_vm0, %v155_v6  ;;  %v153_v13 = vld [vmem:[%s237_s2] ss:$0 sm:$0xff] }
   0x6   :  { %108 = vmatpush1.bf16.msra.mxu0 %v168_v2 }
   0x7   :  { %109 = vmatprep.subr.bf16.mxu0 %v178_v0 }
   0xa   :  { %110 = vmatpush1.bf16.msra.mxu0 %v169_v3 }
   0xb   :  { %111 = vmatprep.subr.bf16.mxu0 %v178_v0 }
   0xe   :  { %112 = vmatpush1.bf16.msra.mxu0 %v170_v5 }
   0xf   :  { %113 = vmatprep.subr.bf16.mxu0 %v178_v0 }
  0x12   :  { %114 = vmatpush1.bf16.msra.mxu0 %v171_v7 }
  0x13   :  { %115 = vmatprep.subr.bf16.mxu0 %v178_v0 }
  0x16   :  { %116 = vmatpush1.bf16.msra.mxu0 %v172_v8 }
  0x17   :  { %117 = vmatprep.subr.bf16.mxu0 %v178_v0 }
  0x1a   :  { %118 = vmatpush1.bf16.msra.mxu0 %v173_v9 }
  0x1b   :  { %119 = vmatprep.subr.bf16.mxu0 %v178_v0 }
  0x1e   :  { %120 = vmatpush1.bf16.msra.mxu0 %v174_v10 }
  0x1f   :  { %121 = vmatprep.subr.bf16.mxu0 %v178_v0 }
  0x22   :  { %122 = vmatpush1.bf16.msra.mxu0 %v175_v11 }
  0x25   :  { %138 = vmatmul.mubr.bf16.vlgmr.msra.gmra.mrb[0].mxu0 %v154_v12 }
  0xf8   :  { %v139_v14 = vpop.f32.mrb[0].mxu0 }
  0xf9   :  { %v140_v15 = vadd.f32 %v153_v13, %v139_v14  ;;  %v141_v16 = vpop.f32.mrb[1].mxu0 }
  0xfa   :  { %v142_v17 = vpop.f32.mrb[2].mxu0 }
  0xfb   :  { %v145_v18 = vmax.f32 %v140_v15, 0.0  ;;  %v143_v19 = vpop.f32.mrb[3].mxu0 }
  0xfd   :  { %v146_v20 = vpack.c.bf16 %v145_v18, %v145_v18 }
  0xff   :  { %148 = vst.msk [vmem:[%s238_s3] sm:$0xf] %vm147_vm1, %v146_v20 }

// kernel: forward.28
= control target key start
LH: loop header
LB: loop body
LE: loop exit
PB: predicated region body
PF: predicated region fallthrough
CT: control target
= control target key end

     0   :  { %s1156_s15 = smov 0   ;;  %s1294_s0 = inlined_call_operand.vmem [shape: bf16[2,32,32], index: 0, kind: input, shape index: {}]   ;;  %s1295_s1 = inlined_call_operand.vmem [shape: bf16[9,32,32], index: 1, kind: input, shape index: {}]   ;;  %s1296_s2 = inlined_call_operand.vmem [shape: f32[1,32], index: 2, kind: input, shape index: {}]   ;;  %s1297_s3 = inlined_call_operand.vmem [shape: f32[8,1], index: 3, kind: input, shape index: {}]   ;;  %s1298_s4 = inlined_call_operand.vmem [shape: bf16[2,8,32], index: 4, kind: output, shape index: {}]  }
   0x1 LB: > { %s906_s16 = sadd.s32 4294967295, %s1126_s15   ;;  %p910_p0 = scmp.ge.s32.totalorder %s1126_s15, 1  ;;  %s1126_s15 = sphi %s1156_s15, %s14_s15  }
   0x2   : > { %p162_p1 = scmp.lt.s32.totalorder %s1126_s15, 3 }
   0x4   : > { %p163_p2 = pnand %p910_p0, %p162_p1 }
   0x5   : > { %v1095_v0 = vld [vmem:[%s1295_s1 + $0x10] sm:$0xff] (!%p163_p2)   ;;  %v1128_v1 = vmov (!%p163_p2), 0.0   ;;  %v1096_v2 = vld [vmem:[%s1295_s1 + $0x18] sm:$0xff] (!%p163_p2)   ;;  %v1097_v3 = vld [vmem:[%s1295_s1] sm:$0xff] (!%p163_p2)   ;;  %vm1129_vm0 = vmmov (!%p163_p2), 0   ;;  %p187_p3 = scmp.lt.s32.totalorder (!%p163_p2), %s906_s16, 1 }
   0x6   : > { %166 = sbr.rel (%p163_p2) target bundleno = 274 (0x112), region = 36  ;;  %1011 = vmatprep.subr.bf16.mxu0 (!%p163_p2), %v1128_v1  ;;  %1019 = vmatprep.subr.bf16.mxu1 (!%p163_p2), %v1128_v1  ;;  %v1100_v4 = vld [vmem:[%s1295_s1 + $0x8] sm:$0xff] (!%p163_p2)   ;;  %vm220_vm1 = vcmask (!%p163_p2), 261120   ;;  %v1099_v5 = vld [vmem:[%s1295_s1 + $0x20] sm:$0xff] (!%p163_p2)   ;;  %v1130_v6 = vmov (!%p163_p2), 0   ;;  %v1102_v18 = vld [vmem:[%s1295_s1 + $0x30] sm:$0xff] (!%p163_p2)  }
   0x7   : > { %1012 = vmatpush3.bf16.msra.mxu0 (!%p163_p2), %v1095_v0  ;;  %1015 = vmatprep.mubr.msk.bf16.mxu0 (!%p163_p2), %vm1129_vm0, %v1128_v1  ;;  %v1101_v11 = vld [vmem:[%s1295_s1 + $0x28] sm:$0xff] (!%p163_p2)   ;;  %v1104_v23 = vld [vmem:[%s1295_s1 + $0x40] sm:$0xff] (!%p163_p2)   ;;  %v1105_v30 = vld [vmem:[%s1295_s1 + $0x38] sm:$0xff] (!%p163_p2)   ;;  %vm851_vm2 = vcmask (!%p163_p2), 257024  }
   0x8   : > { %1013 = vmatprep.subr.bf16.mxu0 (!%p163_p2), %v1128_v1  ;;  %1023 = vmatprep.mubr.msk.bf16.mxu1 (!%p163_p2), %vm1129_vm0, %v1128_v1  ;;  %v1107_v35 = vld [vmem:[%s1295_s1 + $0x48] sm:$0xff] (!%p163_p2)   ;;  %v1108_v37 = vld [vmem:[%s1295_s1 + $0x50] sm:$0xff] (!%p163_p2)   ;;  %v1111_v44 = vld [vmem:[%s1295_s1 + $0x60] sm:$0xff] (!%p163_p2)  }
   0x9   : > { %1020 = vmatpush3.bf16.msra.mxu1 (!%p163_p2), %v1097_v3  ;;  %1094 = vset.pattern.permute.xlu0 (!%p163_p2), %v1130_v6  ;;  %v843_v47 = vld [vmem:[%s1297_s3] sm:$0xff] (!%p163_p2)  ;;  %v1112_v53 = vld [vmem:[%s1295_s1 + $0x58] sm:$0xff] (!%p163_p2)   ;;  %v1113_v54 = vld [vmem:[%s1295_s1 + $0x68] sm:$0xff] (!%p163_p2)  }
   0xa   : > { %1021 = vmatprep.subr.bf16.mxu1 (!%p163_p2), %v1128_v1  ;;  %846 = vperm.xlu0 (!%p163_p2), %1094, %v843_v47   ;;  %v1114_v58 = vld [vmem:[%s1295_s1 + $0x70] sm:$0xff] (!%p163_p2)   ;;  %v1116_v59 = vld [vmem:[%s1295_s1 + $0x80] sm:$0xff] (!%p163_p2)   ;;  %v1117_v62 = vld [vmem:[%s1295_s1 + $0x78] sm:$0xff] (!%p163_p2)  }
   0xb   : > { %1014 = vmatpush3.bf16.msra.mxu0 (!%p163_p2), %v1096_v2  ;;  %v1118_v63 = vld [vmem:[%s1295_s1 + $0x88] sm:$0xff] (!%p163_p2)  }
   0xc   : > { %1027 = vmatprep.subr.bf16.mxu0 (!%p163_p2), %v1128_v1 }
   0xd   : > { %s1300_s16 = smov (!%p187_p3, %s906_s16), 1  ;;  %1022 = vmatpush3.bf16.msra.mxu1 %v1100_v4 }
   0xe   : > { %s983_s25 = sshll.u32 %s1300_s16, 4  ;;  %1035 = vmatprep.subr.bf16.mxu1 %v1128_v1  ;;  %s913_s11 = sshll.u32 %s1300_s16, 2 }
   0xf   : > { %s1193_s30 = scalar_lea.vmem %s1294_s0, %s983_s25  ;;  %s195_s14 = scalar_lea.vmem %s1298_s4, %s913_s11 }
  0x10   : > { %v197_v7 = vld [vmem:[%s1193_s30] sm:$0x8]  ;;  %v198_v8 = vld [vmem:[%s1193_s30 + $0x4] sm:$0xf]  ;;  %v408_v17 = vld [vmem:[%s1193_s30 + $0x8] sm:$0x3] }
  0x11   : > { %1016 = vmatmul.mubr.msk.bf16.vlgmr.msra.gmra.mrb[0].mxu0 %vm220_vm1, %v198_v8  ;;  %v921_v9 = vcombine.low %v197_v7, %v198_v8  ;;  %v1103_v10 = vld [vmem:[%s1193_s30 + $0x4] sm:$0x1f]  }
  0x12   : > { %1028 = vmatpush3.bf16.msra.mxu0 %v1099_v5  ;;  %1031 = vmatprep.mubr.msk.bf16.mxu0 %vm1129_vm0, %v1128_v1  ;;  %v407_v12 = vld [vmem:[%s1193_s30 + $0x4] sm:$0xe]  ;;  %v345_v15 = vshrl.u32 %v1103_v10, 16  ;;  %v347_v16 = vshll.u32 %v1103_v10, 16  ;;  %v549_v29 = vld [vmem:[%s1193_s30 + $0x8] sm:$0x7] }
  0x13   : > { %v270_v13 = vshrl.u32 %v921_v9, 16  ;;  %v273_v14 = vshll.u32 %v921_v9, 16  ;;  %1029 = vmatprep.subr.bf16.mxu0 %v1128_v1  ;;  %v937_v19 = vcombine.low %v407_v12, %v408_v17  ;;  %v483_v26 = vld [vmem:[%s1193_s30 + $0x4] sm:$0xc]  ;;  %v623_v39 = vld [vmem:[%s1193_s30 + $0x8] sm:$0xf] }
  0x14   : > { %v349_v22 = vrot.slane %v347_v16, 1  ;;  %v945_v31 = vcombine.low %v483_v26, %v408_v17  ;;  %v953_v34 = vcombine.low %v483_v26, %v549_v29  ;;  %v622_v36 = vld [vmem:[%s1193_s30 + $0x4] sm:$0x8]  ;;  %v1119_v52 = vld [vmem:[%s1193_s30 + $0x8] sm:$0x1f]  }
  0x15   : > { %v272_v20 = vrot.slane %v270_v13, 3  ;;  %v275_v21 = vrot.slane %v273_v14, 4  ;;  %v420_v24 = vshrl.u32 %v937_v19, 16  ;;  %v423_v25 = vshll.u32 %v937_v19, 16 }
  0x16   : > { %1030 = vmatpush3.bf16.msra.mxu0 %v1101_v11  ;;  %v350_v28 = vor.u32 %v349_v22, %v345_v15  ;;  %v492_v38 = vrot.slane %v945_v31, 2  ;;  %v559_v41 = vshrl.u32 %v953_v34, 16  ;;  %v562_v42 = vshll.u32 %v953_v34, 16 }
  0x17   : > { %v276_v27 = vor.u32 %v275_v21, %v272_v20  ;;  %1043 = vmatprep.subr.bf16.mxu0 %v1128_v1  ;;  %v422_v32 = vrot.slane %v420_v24, 1  ;;  %v425_v33 = vrot.slane %v423_v25, 2  ;;  %v961_v43 = vcombine.low %v622_v36, %v623_v39 }
  0x18   : > { %v561_v48 = vrot.slane %v559_v41, 2  ;;  %v564_v49 = vrot.slane %v562_v42, 3  ;;  %v774_v57 = vshll.u32 %v1119_v52, 16  ;;  %v772_v60 = vshrl.u32 %v1119_v52, 16  ;;  %v980_v41 = vld [vmem:[%s1296_s2] ss:$0 sm:$0xff] }
  0x19   : > { %1024 = vmatmul.mubr.msk.bf16.vlgmr.msra.gmra.mrb[0].mxu1 %vm220_vm1, %v276_v27  ;;  %1032 = vmatmul.mubr.msk.bf16.vlgmr.msra.gmra.mrb[4].mxu0 %vm220_vm1, %v350_v28  ;;  %v426_v40 = vor.u32 %v425_v33, %v422_v32  ;;  %v635_v45 = vshrl.u32 %v961_v43, 16  ;;  %v638_v46 = vshll.u32 %v961_v43, 16 }
  0x1a   : > { %1036 = vmatpush3.bf16.msra.mxu1 %v1102_v18  ;;  %1044 = vmatpush3.bf16.msra.mxu0 %v1104_v23  ;;  %v565_v55 = vor.u32 %v564_v49, %v561_v48  ;;  %v776_v61 = vrot.slane %v774_v57, 1 }
  0x1b   : > { %1037 = vmatprep.subr.bf16.mxu1 %v1128_v1  ;;  %1039 = vmatprep.mubr.msk.bf16.mxu1 %vm1129_vm0, %v1128_v1  ;;  %v637_v50 = vrot.slane %v635_v45, 3  ;;  %v640_v51 = vrot.slane %v638_v46, 4 }
  0x1c   : > { %1045 = vmatprep.subr.bf16.mxu0 %v1128_v1  ;;  %1047 = vmatprep.mubr.msk.bf16.mxu0 %vm1129_vm0, %v1128_v1  ;;  %v777_v0 = vor.u32 %v776_v61, %v772_v60 }
  0x1d   : > { %v641_v56 = vor.u32 %v640_v51, %v637_v50 }
  0x1e   : > { %1038 = vmatpush3.bf16.msra.mxu1 %v1105_v30  ;;  %1046 = vmatpush3.bf16.msra.mxu0 %v1107_v35 }
  0x1f   : > { %1051 = vmatprep.subr.bf16.mxu1 %v1128_v1  ;;  %1059 = vmatprep.subr.bf16.mxu0 %v1128_v1 }
  0x21   : > { %1040 = vmatmul.mubr.msk.bf16.vlgmr.msra.gmra.mrb[4].mxu1 %vm220_vm1, %v426_v40  ;;  %1048 = vmatmul.mubr.msk.bf16.vlgmr.msra.gmra.mrb[8].mxu0 %vm220_vm1, %v492_v38 }
  0x22   : > { %1052 = vmatpush3.bf16.msra.mxu1 %v1108_v37  ;;  %1060 = vmatpush3.bf16.msra.mxu0 %v1111_v44 }
  0x23   : > { %1053 = vmatprep.subr.bf16.mxu1 %v1128_v1  ;;  %1055 = vmatprep.mubr.msk.bf16.mxu1 %vm1129_vm0, %v1128_v1 }
  0x24   : > { %1061 = vmatprep.subr.bf16.mxu0 %v1128_v1  ;;  %1063 = vmatprep.mubr.msk.bf16.mxu0 %vm1129_vm0, %v1128_v1 }
  0x26   : > { %1054 = vmatpush3.bf16.msra.mxu1 %v1112_v53  ;;  %1062 = vmatpush3.bf16.msra.mxu0 %v1113_v54 }
  0x27   : > { %1067 = vmatprep.subr.bf16.mxu1 %v1128_v1  ;;  %1075 = vmatprep.subr.bf16.mxu0 %v1128_v1 }
  0x29   : > { %1056 = vmatmul.mubr.msk.bf16.vlgmr.msra.gmra.mrb[8].mxu1 %vm220_vm1, %v565_v55  ;;  %1064 = vmatmul.mubr.msk.bf16.vlgmr.msra.gmra.mrb[12].mxu0 %vm220_vm1, %v641_v56 }
  0x2a   : > { %1068 = vmatpush3.bf16.msra.mxu1 %v1114_v58  ;;  %1076 = vmatpush3.bf16.msra.mxu0 %v1116_v59 }
  0x2b   : > { %1069 = vmatprep.subr.bf16.mxu1 %v1128_v1  ;;  %1071 = vmatprep.mubr.msk.bf16.mxu1 %vm1129_vm0, %v1128_v1 }
  0x2c   : > { %1077 = vmatprep.subr.bf16.mxu0 %v1128_v1  ;;  %1079 = vmatprep.mubr.msk.bf16.mxu0 %vm1129_vm0, %v1128_v1 }
  0x2e   : > { %1070 = vmatpush3.bf16.msra.mxu1 %v1117_v62  ;;  %1078 = vmatpush3.bf16.msra.mxu0 %v1118_v63 }
  0x31   : > { %1072 = vmatmul.mubr.msk.bf16.vlgmr.msra.gmra.mrb[12].mxu1 %vm220_vm1, %v623_v39  ;;  %1080 = vmatmul.mubr.msk.bf16.vlgmr.msra.gmra.mrb[16].mxu0 %vm220_vm1, %v777_v0 }
  0x89   : > { %v847_v47 = vpop.permute.xlu0 %846 }
  0xe4   : > { %v258_v2 = vpop.f32.mrb[0].mxu0 }
  0xe5   : > { %v1017_v3 = vpop.f32.mrb[1].mxu0 }
  0xe6   : > { %v261_v4 = vpop.f32.mrb[2].mxu0 }
  0xe7   : > { %v1018_v5 = vpop.f32.mrb[3].mxu0 }
  0xec   : > { %v326_v6 = vpop.f32.mrb[0].mxu1  ;;  %v400_v7 = vpop.f32.mrb[4].mxu0 }
  0xed   : > { %v327_v8 = vadd.f32 %v326_v6, %v258_v2  ;;  %v1025_v9 = vpop.f32.mrb[1].mxu1  ;;  %v1033_v10 = vpop.f32.mrb[5].mxu0 }
  0xee   : > { %v329_v11 = vpop.f32.mrb[2].mxu1  ;;  %v403_v12 = vpop.f32.mrb[6].mxu0 }
  0xef   : > { %v1026_v13 = vpop.f32.mrb[3].mxu1  ;;  %v406_v1 = vadd.f32 %v400_v7, %v327_v8  ;;  %v1034_v14 = vpop.f32.mrb[7].mxu0 }
  0xf4   : > { %v476_v15 = vpop.f32.mrb[4].mxu1  ;;  %v542_v16 = vpop.f32.mrb[8].mxu0 }
  0xf5   : > { %v482_v17 = vadd.f32 %v476_v15, %v406_v1  ;;  %v1041_v18 = vpop.f32.mrb[5].mxu1  ;;  %v1049_v19 = vpop.f32.mrb[9].mxu0 }
  0xf6   : > { %v479_v20 = vpop.f32.mrb[6].mxu1  ;;  %v545_v21 = vpop.f32.mrb[10].mxu0 }
  0xf7   : > { %v1042_v22 = vpop.f32.mrb[7].mxu1  ;;  %v548_v23 = vadd.f32 %v542_v16, %v482_v17  ;;  %v1050_v24 = vpop.f32.mrb[11].mxu0 }
  0xfc   : > { %v615_v25 = vpop.f32.mrb[8].mxu1  ;;  %v691_v26 = vpop.f32.mrb[12].mxu0 }
  0xfd   : > { %v621_v27 = vadd.f32 %v615_v25, %v548_v23  ;;  %v1057_v28 = vpop.f32.mrb[9].mxu1  ;;  %v1065_v29 = vpop.f32.mrb[13].mxu0 }
  0xfe   : > { %v618_v30 = vpop.f32.mrb[10].mxu1  ;;  %v694_v31 = vpop.f32.mrb[14].mxu0 }
  0xff   : > { %v1058_v32 = vpop.f32.mrb[11].mxu1  ;;  %v697_v33 = vadd.f32 %v691_v26, %v621_v27  ;;  %v1066_v34 = vpop.f32.mrb[15].mxu0 }
 0x104   : > { %v752_v35 = vpop.f32.mrb[12].mxu1  ;;  %v827_v36 = vpop.f32.mrb[16].mxu0 }
 0x105   : > { %v758_v37 = vadd.f32 %v752_v35, %v697_v33  ;;  %v1073_v38 = vpop.f32.mrb[13].mxu1  ;;  %v1081_v39 = vpop.f32.mrb[17].mxu0 }
 0x106   : > { %v755_v40 = vpop.f32.mrb[14].mxu1  ;;  %v830_v42 = vpop.f32.mrb[18].mxu0 }
 0x107   : > { %v1074_v43 = vpop.f32.mrb[15].mxu1  ;;  %v833_v44 = vadd.f32 %v827_v36, %v758_v37  ;;  %v1082_v45 = vpop.f32.mrb[19].mxu0 }
 0x109   : > { %v841_v46 = vadd.f32 %v980_v41, %v833_v44 }
 0x10b   : > { %v842_v48 = vmax.f32 %v841_v46, 0.0 }
 0x10d   : > { %v849_v49 = vmul.f32 %v847_v47, %v842_v48 }
 0x10f   : > { %v850_v50 = vpack.c.bf16 %v849_v49, %v849_v49 }
 0x111   : > { %852 = vst.msk [vmem:[%s195_s14] sm:$0xf] %vm851_vm2, %v850_v50 }
 0x112 PF: > { %s14_s15 = sadd.s32 1, %s1126_s15  }
 0x113   : > { %p11_p4 = scmp.ge.s32.totalorder %s14_s15, 4  }
 0x115   :  { %13 = sbr.rel (!%p11_p4) target bundleno = 1 (0x1), region = 74 }

// kernel: forward.27
= control target key start
LH: loop header
LB: loop body
LE: loop exit
PB: predicated region body
PF: predicated region fallthrough
CT: control target
= control target key end

     0   :  { %s1315_s21 = smov 0   ;;  %s1466_s0 = inlined_call_operand.vmem [shape: bf16[2,32,32], index: 0, kind: input, shape index: {}]   ;;  %s1467_s1 = inlined_call_operand.vmem [shape: bf16[9,32,32], index: 1, kind: input, shape index: {}]   ;;  %s1468_s2 = inlined_call_operand.vmem [shape: f32[1,32], index: 2, kind: input, shape index: {}]   ;;  %s1469_s3 = inlined_call_operand.vmem [shape: f32[8,1], index: 3, kind: input, shape index: {}]   ;;  %s1470_s4 = inlined_call_operand.vmem [shape: bf16[2,8,16], index: 4, kind: input, shape index: {}]   ;;  %s1471_s5 = inlined_call_operand.vmem [shape: bf16[16,32], index: 5, kind: input, shape index: {}]   ;;  %s1472_s6 = inlined_call_operand.vmem [shape: bf16[2,8,32], index: 6, kind: output, shape index: {}]  }
   0x1 LB: > { %s1043_s22 = sadd.s32 4294967295, %s1275_s21   ;;  %p1047_p0 = scmp.ge.s32.totalorder %s1275_s21, 1  ;;  %s1275_s21 = sphi %s1315_s21, %s16_s21  }
   0x2   : > { %p221_p1 = scmp.lt.s32.totalorder %s1275_s21, 3 }
   0x4   : > { %p222_p2 = pnand %p1047_p0, %p221_p1 }
   0x5   : > { %v1243_v0 = vld [vmem:[%s1467_s1 + $0x10] sm:$0xff] (!%p222_p2)   ;;  %v1277_v1 = vmov (!%p222_p2), 0.0   ;;  %v1244_v2 = vld [vmem:[%s1467_s1 + $0x18] sm:$0xff] (!%p222_p2)   ;;  %v1245_v3 = vld [vmem:[%s1467_s1] sm:$0xff] (!%p222_p2)   ;;  %vm1278_vm0 = vmmov (!%p222_p2), 0   ;;  %p254_p3 = scmp.lt.s32.totalorder (!%p222_p2), %s1043_s22, 1 }
   0x6   : > { %225 = sbr.rel (%p222_p2) target bundleno = 280 (0x118), region = 44  ;;  %1153 = vmatprep.subr.bf16.mxu0 (!%p222_p2), %v1277_v1  ;;  %1161 = vmatprep.subr.bf16.mxu1 (!%p222_p2), %v1277_v1  ;;  %v1247_v4 = vld [vmem:[%s1467_s1 + $0x8] sm:$0xff] (!%p222_p2)   ;;  %vm291_vm1 = vcmask (!%p222_p2), 261120   ;;  %v1248_v5 = vld [vmem:[%s1467_s1 + $0x20] sm:$0xff] (!%p222_p2)   ;;  %v1279_v17 = vmov (!%p222_p2), 0   ;;  %v1250_v18 = vld [vmem:[%s1467_s1 + $0x30] sm:$0xff] (!%p222_p2)  }
   0x7   : > { %1154 = vmatpush3.bf16.msra.mxu0 (!%p222_p2), %v1243_v0  ;;  %1157 = vmatprep.mubr.msk.bf16.mxu0 (!%p222_p2), %vm1278_vm0, %v1277_v1  ;;  %v1249_v10 = vld [vmem:[%s1467_s1 + $0x28] sm:$0xff] (!%p222_p2)   ;;  %v1253_v23 = vld [vmem:[%s1467_s1 + $0x40] sm:$0xff] (!%p222_p2)   ;;  %v1252_v30 = vld [vmem:[%s1467_s1 + $0x38] sm:$0xff] (!%p222_p2)   ;;  %vm914_vm2 = vcmask (!%p222_p2), 130048   ;;  %vm976_vm3 = vcmask (!%p222_p2), 257024  }
   0x8   : > { %1155 = vmatprep.subr.bf16.mxu0 (!%p222_p2), %v1277_v1  ;;  %1165 = vmatprep.mubr.msk.bf16.mxu1 (!%p222_p2), %vm1278_vm0, %v1277_v1  ;;  %v1255_v35 = vld [vmem:[%s1467_s1 + $0x48] sm:$0xff] (!%p222_p2)   ;;  %v1256_v41 = vld [vmem:[%s1467_s1 + $0x50] sm:$0xff] (!%p222_p2)   ;;  %v1260_v44 = vld [vmem:[%s1467_s1 + $0x60] sm:$0xff] (!%p222_p2)  }
   0x9   : > { %1162 = vmatpush3.bf16.msra.mxu1 (!%p222_p2), %v1245_v3  ;;  %1242 = vset.pattern.permute.xlu0 (!%p222_p2), %v1279_v17  ;;  %v1259_v52 = vld [vmem:[%s1467_s1 + $0x58] sm:$0xff] (!%p222_p2)   ;;  %v1261_v53 = vld [vmem:[%s1467_s1 + $0x68] sm:$0xff] (!%p222_p2)   ;;  %v968_v54 = vld [vmem:[%s1469_s3] sm:$0xff] (!%p222_p2) }
   0xa   : > { %1163 = vmatprep.subr.bf16.mxu1 (!%p222_p2), %v1277_v1  ;;  %971 = vperm.xlu0 (!%p222_p2), %1242, %v968_v54   ;;  %v1262_v58 = vld [vmem:[%s1467_s1 + $0x70] sm:$0xff] (!%p222_p2)   ;;  %v1265_v59 = vld [vmem:[%s1467_s1 + $0x80] sm:$0xff] (!%p222_p2)   ;;  %v1264_v62 = vld [vmem:[%s1467_s1 + $0x78] sm:$0xff] (!%p222_p2)  }
   0xb   : > { %1156 = vmatpush3.bf16.msra.mxu0 (!%p222_p2), %v1244_v2  ;;  %v1266_v63 = vld [vmem:[%s1467_s1 + $0x88] sm:$0xff] (!%p222_p2)   ;;  %v1267_v2 = vld [vmem:[%s1471_s5] sm:$0xff] (!%p222_p2)  }
   0xc   : > { %1169 = vmatprep.subr.bf16.mxu0 (!%p222_p2), %v1277_v1 }
   0xd   : > { %s1474_s22 = smov (!%p254_p3, %s1043_s22), 1  ;;  %1164 = vmatpush3.bf16.msra.mxu1 %v1247_v4 }
   0xe   : > { %s1123_s7 = sshll.u32 %s1474_s22, 4  ;;  %1177 = vmatprep.subr.bf16.mxu1 %v1277_v1  ;;  %s1050_s23 = sshll.u32 %s1474_s22, 2 }
   0xf   : > { %s1352_s12 = scalar_lea.vmem %s1466_s0, %s1123_s7  ;;  %s262_s26 = scalar_lea.vmem %s1470_s4, %s1050_s23 }
  0x10   : > { %v268_v6 = vld [vmem:[%s1352_s12] sm:$0x8]  ;;  %v269_v7 = vld [vmem:[%s1352_s12 + $0x4] sm:$0xf]  ;;  %v479_v16 = vld [vmem:[%s1352_s12 + $0x8] sm:$0x3]  ;;  %s266_s7 = scalar_lea.vmem %s1472_s6, %s1050_s23 }
  0x11   : > { %1158 = vmatmul.mubr.msk.bf16.vlgmr.msra.gmra.mrb[0].mxu0 %vm291_vm1, %v269_v7  ;;  %v1059_v8 = vcombine.low %v268_v6, %v269_v7  ;;  %v1251_v9 = vld [vmem:[%s1352_s12 + $0x4] sm:$0x1f]   ;;  %v905_v3 = vld [vmem:[%s262_s26] sm:$0xf] }
  0x12   : > { %1170 = vmatpush3.bf16.msra.mxu0 %v1248_v5  ;;  %1173 = vmatprep.mubr.msk.bf16.mxu0 %vm1278_vm0, %v1277_v1  ;;  %v478_v11 = vld [vmem:[%s1352_s12 + $0x4] sm:$0xe]  ;;  %v416_v14 = vshrl.u32 %v1251_v9, 16  ;;  %v418_v15 = vshll.u32 %v1251_v9, 16  ;;  %v620_v29 = vld [vmem:[%s1352_s12 + $0x8] sm:$0x7] }
  0x13   : > { %v341_v12 = vshrl.u32 %v1059_v8, 16  ;;  %v344_v13 = vshll.u32 %v1059_v8, 16  ;;  %1171 = vmatprep.subr.bf16.mxu0 %v1277_v1  ;;  %v1075_v19 = vcombine.low %v478_v11, %v479_v16  ;;  %v554_v26 = vld [vmem:[%s1352_s12 + $0x4] sm:$0xc]  ;;  %v694_v39 = vld [vmem:[%s1352_s12 + $0x8] sm:$0xf] }
  0x14   : > { %v420_v22 = vrot.slane %v418_v15, 1  ;;  %v1091_v31 = vcombine.low %v554_v26, %v620_v29  ;;  %v1083_v34 = vcombine.low %v554_v26, %v479_v16  ;;  %v693_v38 = vld [vmem:[%s1352_s12 + $0x4] sm:$0x8]  ;;  %v1268_v51 = vld [vmem:[%s1352_s12 + $0x8] sm:$0x1f]  }
  0x15   : > { %v343_v20 = vrot.slane %v341_v12, 3  ;;  %v346_v21 = vrot.slane %v344_v13, 4  ;;  %v491_v24 = vshrl.u32 %v1075_v19, 16  ;;  %v494_v25 = vshll.u32 %v1075_v19, 16 }
  0x16   : > { %1172 = vmatpush3.bf16.msra.mxu0 %v1249_v10  ;;  %v421_v28 = vor.u32 %v420_v22, %v416_v14  ;;  %v630_v36 = vshrl.u32 %v1091_v31, 16  ;;  %v633_v37 = vshll.u32 %v1091_v31, 16  ;;  %v563_v42 = vrot.slane %v1083_v34, 2 }
  0x17   : > { %v347_v27 = vor.u32 %v346_v21, %v343_v20  ;;  %1185 = vmatprep.subr.bf16.mxu0 %v1277_v1  ;;  %v493_v32 = vrot.slane %v491_v24, 1  ;;  %v496_v33 = vrot.slane %v494_v25, 2  ;;  %v1099_v43 = vcombine.low %v693_v38, %v694_v39 }
  0x18   : > { %v632_v45 = vrot.slane %v630_v36, 2  ;;  %v635_v46 = vrot.slane %v633_v37, 3  ;;  %v845_v57 = vshll.u32 %v1268_v51, 16  ;;  %v843_v60 = vshrl.u32 %v1268_v51, 16 }
  0x19   : > { %1166 = vmatmul.mubr.msk.bf16.vlgmr.msra.gmra.mrb[0].mxu1 %vm291_vm1, %v347_v27  ;;  %1174 = vmatmul.mubr.msk.bf16.vlgmr.msra.gmra.mrb[4].mxu0 %vm291_vm1, %v421_v28  ;;  %v497_v40 = vor.u32 %v496_v33, %v493_v32  ;;  %v706_v47 = vshrl.u32 %v1099_v43, 16  ;;  %v709_v48 = vshll.u32 %v1099_v43, 16 }
  0x1a   : > { %1178 = vmatpush3.bf16.msra.mxu1 %v1250_v18  ;;  %1186 = vmatpush3.bf16.msra.mxu0 %v1253_v23  ;;  %v636_v55 = vor.u32 %v635_v46, %v632_v45  ;;  %v847_v61 = vrot.slane %v845_v57, 1 }
  0x1b   : > { %1179 = vmatprep.subr.bf16.mxu1 %v1277_v1  ;;  %1181 = vmatprep.mubr.msk.bf16.mxu1 %vm1278_vm0, %v1277_v1  ;;  %v708_v49 = vrot.slane %v706_v47, 3  ;;  %v711_v50 = vrot.slane %v709_v48, 4  ;;  %v1120_v48 = vld [vmem:[%s1468_s2] ss:$0 sm:$0xff] }
  0x1c   : > { %1187 = vmatprep.subr.bf16.mxu0 %v1277_v1  ;;  %1189 = vmatprep.mubr.msk.bf16.mxu0 %vm1278_vm0, %v1277_v1  ;;  %v848_v0 = vor.u32 %v847_v61, %v843_v60 }
  0x1d   : > { %v712_v56 = vor.u32 %v711_v50, %v708_v49 }
  0x1e   : > { %1180 = vmatpush3.bf16.msra.mxu1 %v1252_v30  ;;  %1188 = vmatpush3.bf16.msra.mxu0 %v1255_v35 }
  0x1f   : > { %1193 = vmatprep.subr.bf16.mxu1 %v1277_v1  ;;  %1201 = vmatprep.subr.bf16.mxu0 %v1277_v1 }
  0x21   : > { %1182 = vmatmul.mubr.msk.bf16.vlgmr.msra.gmra.mrb[4].mxu1 %vm291_vm1, %v497_v40  ;;  %1190 = vmatmul.mubr.msk.bf16.vlgmr.msra.gmra.mrb[8].mxu0 %vm291_vm1, %v563_v42 }
  0x22   : > { %1194 = vmatpush3.bf16.msra.mxu1 %v1256_v41  ;;  %1202 = vmatpush3.bf16.msra.mxu0 %v1260_v44 }
  0x23   : > { %1195 = vmatprep.subr.bf16.mxu1 %v1277_v1  ;;  %1197 = vmatprep.mubr.msk.bf16.mxu1 %vm1278_vm0, %v1277_v1 }
  0x24   : > { %1203 = vmatprep.subr.bf16.mxu0 %v1277_v1  ;;  %1205 = vmatprep.mubr.msk.bf16.mxu0 %vm1278_vm0, %v1277_v1 }
  0x26   : > { %1196 = vmatpush3.bf16.msra.mxu1 %v1259_v52  ;;  %1204 = vmatpush3.bf16.msra.mxu0 %v1261_v53 }
  0x27   : > { %1209 = vmatprep.subr.bf16.mxu1 %v1277_v1  ;;  %1217 = vmatprep.subr.bf16.mxu0 %v1277_v1 }
  0x29   : > { %1198 = vmatmul.mubr.msk.bf16.vlgmr.msra.gmra.mrb[8].mxu1 %vm291_vm1, %v636_v55  ;;  %1206 = vmatmul.mubr.msk.bf16.vlgmr.msra.gmra.mrb[12].mxu0 %vm291_vm1, %v712_v56 }
  0x2a   : > { %1210 = vmatpush3.bf16.msra.mxu1 %v1262_v58  ;;  %1218 = vmatpush3.bf16.msra.mxu0 %v1265_v59 }
  0x2b   : > { %1211 = vmatprep.subr.bf16.mxu1 %v1277_v1  ;;  %1213 = vmatprep.mubr.msk.bf16.mxu1 %vm1278_vm0, %v1277_v1 }
  0x2c   : > { %1219 = vmatprep.subr.bf16.mxu0 %v1277_v1  ;;  %1221 = vmatprep.mubr.msk.bf16.mxu0 %vm1278_vm0, %v1277_v1 }
  0x2e   : > { %1212 = vmatpush3.bf16.msra.mxu1 %v1264_v62  ;;  %1220 = vmatpush3.bf16.msra.mxu0 %v1266_v63 }
  0x2f   : > { %1225 = vmatprep.subr.bf16.mxu1 %v1277_v1 }
  0x31   : > { %1214 = vmatmul.mubr.msk.bf16.vlgmr.msra.gmra.mrb[12].mxu1 %vm291_vm1, %v694_v39  ;;  %1222 = vmatmul.mubr.msk.bf16.vlgmr.msra.gmra.mrb[16].mxu0 %vm291_vm1, %v848_v0 }
  0x32   : > { %1226 = vmatpush3.bf16.msra.mxu1 %v1267_v2  ;;  %1227 = vmatprep.mubr.msk.bf16.mxu1 %vm1278_vm0, %v1277_v1 }
  0x39   : > { %1228 = vmatmul.mubr.msk.bf16.vlgmr.msra.gmra.mrb[16].mxu1 %vm914_vm2, %v905_v3 }
  0x89   : > { %v972_v54 = vpop.permute.xlu0 %971 }
  0xe4   : > { %v329_v4 = vpop.f32.mrb[0].mxu0 }
  0xe5   : > { %v1159_v5 = vpop.f32.mrb[1].mxu0 }
  0xe6   : > { %v332_v6 = vpop.f32.mrb[2].mxu0 }
  0xe7   : > { %v1160_v7 = vpop.f32.mrb[3].mxu0 }
  0xec   : > { %v397_v8 = vpop.f32.mrb[0].mxu1  ;;  %v471_v9 = vpop.f32.mrb[4].mxu0 }
  0xed   : > { %v398_v10 = vadd.f32 %v397_v8, %v329_v4  ;;  %v1167_v11 = vpop.f32.mrb[1].mxu1  ;;  %v1175_v12 = vpop.f32.mrb[5].mxu0 }
  0xee   : > { %v400_v13 = vpop.f32.mrb[2].mxu1  ;;  %v474_v14 = vpop.f32.mrb[6].mxu0 }
  0xef   : > { %v1168_v1 = vpop.f32.mrb[3].mxu1  ;;  %v477_v15 = vadd.f32 %v471_v9, %v398_v10  ;;  %v1176_v16 = vpop.f32.mrb[7].mxu0 }
  0xf4   : > { %v547_v17 = vpop.f32.mrb[4].mxu1  ;;  %v613_v18 = vpop.f32.mrb[8].mxu0 }
  0xf5   : > { %v553_v19 = vadd.f32 %v547_v17, %v477_v15  ;;  %v1183_v20 = vpop.f32.mrb[5].mxu1  ;;  %v1191_v21 = vpop.f32.mrb[9].mxu0 }
  0xf6   : > { %v550_v22 = vpop.f32.mrb[6].mxu1  ;;  %v616_v23 = vpop.f32.mrb[10].mxu0 }
  0xf7   : > { %v1184_v24 = vpop.f32.mrb[7].mxu1  ;;  %v619_v25 = vadd.f32 %v613_v18, %v553_v19  ;;  %v1192_v26 = vpop.f32.mrb[11].mxu0 }
  0xfc   : > { %v686_v27 = vpop.f32.mrb[8].mxu1  ;;  %v762_v28 = vpop.f32.mrb[12].mxu0 }
  0xfd   : > { %v692_v29 = vadd.f32 %v686_v27, %v619_v25  ;;  %v1199_v30 = vpop.f32.mrb[9].mxu1  ;;  %v1207_v31 = vpop.f32.mrb[13].mxu0 }
  0xfe   : > { %v689_v32 = vpop.f32.mrb[10].mxu1  ;;  %v765_v33 = vpop.f32.mrb[14].mxu0 }
  0xff   : > { %v1200_v34 = vpop.f32.mrb[11].mxu1  ;;  %v768_v35 = vadd.f32 %v762_v28, %v692_v29  ;;  %v1208_v36 = vpop.f32.mrb[15].mxu0 }
 0x104   : > { %v823_v37 = vpop.f32.mrb[12].mxu1  ;;  %v898_v38 = vpop.f32.mrb[16].mxu0 }
 0x105   : > { %v829_v39 = vadd.f32 %v823_v37, %v768_v35  ;;  %v1215_v40 = vpop.f32.mrb[13].mxu1  ;;  %v1223_v41 = vpop.f32.mrb[17].mxu0 }
 0x106   : > { %v826_v42 = vpop.f32.mrb[14].mxu1  ;;  %v901_v43 = vpop.f32.mrb[18].mxu0 }
 0x107   : > { %v1216_v44 = vpop.f32.mrb[15].mxu1  ;;  %v904_v45 = vadd.f32 %v898_v38, %v829_v39  ;;  %v1224_v46 = vpop.f32.mrb[19].mxu0 }
 0x10c   : > { %v952_v47 = vpop.f32.mrb[16].mxu1 }
 0x10d   : > { %v958_v49 = vadd.f32 %v952_v47, %v904_v45  ;;  %v1229_v50 = vpop.f32.mrb[17].mxu1 }
 0x10e   : > { %v955_v51 = vpop.f32.mrb[18].mxu1 }
 0x10f   : > { %v966_v52 = vadd.f32 %v1120_v48, %v958_v49  ;;  %v1230_v53 = vpop.f32.mrb[19].mxu1 }
 0x111   : > { %v967_v55 = vmax.f32 %v966_v52, 0.0 }
 0x113   : > { %v974_v56 = vmul.f32 %v972_v54, %v967_v55 }
 0x115   : > { %v975_v57 = vpack.c.bf16 %v974_v56, %v974_v56 }
 0x117   : > { %977 = vst.msk [vmem:[%s266_s7] sm:$0xf] %vm976_vm3, %v975_v57 }
 0x118 PF: > { %s16_s21 = sadd.s32 1, %s1275_s21  }
 0x119   : > { %p13_p4 = scmp.ge.s32.totalorder %s16_s21, 4  }
 0x11b   :  { %15 = sbr.rel (!%p13_p4) target bundleno = 1 (0x1), region = 85 }

// kernel: forward.29
= control target key start
LH: loop header
LB: loop body
LE: loop exit
PB: predicated region body
PF: predicated region fallthrough
CT: control target
= control target key end

     0   :  { %s1221_s18 = smov 0   ;;  %s1362_s0 = inlined_call_operand.vmem [shape: bf16[2,32,32], index: 0, kind: input, shape index: {}]   ;;  %s1363_s1 = inlined_call_operand.vmem [shape: bf16[9,32,32], index: 1, kind: input, shape index: {}]   ;;  %s1364_s2 = inlined_call_operand.vmem [shape: f32[1,32], index: 2, kind: input, shape index: {}]   ;;  %s1365_s3 = inlined_call_operand.vmem [shape: f32[8,1], index: 3, kind: input, shape index: {}]   ;;  %s1366_s4 = inlined_call_operand.vmem [shape: bf16[2,8,32], index: 4, kind: input, shape index: {}]   ;;  %s1367_s5 = inlined_call_operand.vmem [shape: bf16[2,8,32], index: 5, kind: output, shape index: {}]  }
   0x1 LB: > { %s965_s19 = sadd.s32 4294967295, %s1186_s18   ;;  %p969_p0 = scmp.ge.s32.totalorder %s1186_s18, 1  ;;  %s1186_s18 = sphi %s1221_s18, %s15_s18  }
   0x2   : > { %p196_p1 = scmp.lt.s32.totalorder %s1186_s18, 3 }
   0x4   : > { %p197_p2 = pnand %p969_p0, %p196_p1 }
   0x5   : > { %v1155_v0 = vld [vmem:[%s1363_s1 + $0x10] sm:$0xff] (!%p197_p2)   ;;  %v1188_v1 = vmov (!%p197_p2), 0.0   ;;  %v1156_v2 = vld [vmem:[%s1363_s1 + $0x18] sm:$0xff] (!%p197_p2)   ;;  %v1157_v3 = vld [vmem:[%s1363_s1] sm:$0xff] (!%p197_p2)   ;;  %vm1189_vm0 = vmmov (!%p197_p2), 0   ;;  %p227_p3 = scmp.lt.s32.totalorder (!%p197_p2), %s965_s19, 1 }
   0x6   : > { %200 = sbr.rel (%p197_p2) target bundleno = 276 (0x114), region = 40  ;;  %1071 = vmatprep.subr.bf16.mxu0 (!%p197_p2), %v1188_v1  ;;  %1079 = vmatprep.subr.bf16.mxu1 (!%p197_p2), %v1188_v1  ;;  %v1160_v4 = vld [vmem:[%s1363_s1 + $0x8] sm:$0xff] (!%p197_p2)   ;;  %vm264_vm1 = vcmask (!%p197_p2), 261120   ;;  %v1159_v5 = vld [vmem:[%s1363_s1 + $0x20] sm:$0xff] (!%p197_p2)   ;;  %v1190_v6 = vmov (!%p197_p2), 0   ;;  %v1162_v18 = vld [vmem:[%s1363_s1 + $0x30] sm:$0xff] (!%p197_p2)  }
   0x7   : > { %1072 = vmatpush3.bf16.msra.mxu0 (!%p197_p2), %v1155_v0  ;;  %1075 = vmatprep.mubr.msk.bf16.mxu0 (!%p197_p2), %vm1189_vm0, %v1188_v1  ;;  %v1161_v11 = vld [vmem:[%s1363_s1 + $0x28] sm:$0xff] (!%p197_p2)   ;;  %v1164_v23 = vld [vmem:[%s1363_s1 + $0x40] sm:$0xff] (!%p197_p2)   ;;  %v1165_v30 = vld [vmem:[%s1363_s1 + $0x38] sm:$0xff] (!%p197_p2)   ;;  %vm898_vm2 = vcmask (!%p197_p2), 257024  }
   0x8   : > { %1073 = vmatprep.subr.bf16.mxu0 (!%p197_p2), %v1188_v1  ;;  %1083 = vmatprep.mubr.msk.bf16.mxu1 (!%p197_p2), %vm1189_vm0, %v1188_v1  ;;  %v1167_v35 = vld [vmem:[%s1363_s1 + $0x48] sm:$0xff] (!%p197_p2)   ;;  %v1168_v37 = vld [vmem:[%s1363_s1 + $0x50] sm:$0xff] (!%p197_p2)   ;;  %v1171_v44 = vld [vmem:[%s1363_s1 + $0x60] sm:$0xff] (!%p197_p2)  }
   0x9   : > { %1080 = vmatpush3.bf16.msra.mxu1 (!%p197_p2), %v1157_v3  ;;  %1154 = vset.pattern.permute.xlu0 (!%p197_p2), %v1190_v6  ;;  %v890_v47 = vld [vmem:[%s1365_s3] sm:$0xff] (!%p197_p2)  ;;  %v1172_v53 = vld [vmem:[%s1363_s1 + $0x58] sm:$0xff] (!%p197_p2)   ;;  %v1173_v54 = vld [vmem:[%s1363_s1 + $0x68] sm:$0xff] (!%p197_p2)  }
   0xa   : > { %1081 = vmatprep.subr.bf16.mxu1 (!%p197_p2), %v1188_v1  ;;  %893 = vperm.xlu0 (!%p197_p2), %1154, %v890_v47   ;;  %v1174_v58 = vld [vmem:[%s1363_s1 + $0x70] sm:$0xff] (!%p197_p2)   ;;  %v1176_v59 = vld [vmem:[%s1363_s1 + $0x80] sm:$0xff] (!%p197_p2)   ;;  %v1177_v62 = vld [vmem:[%s1363_s1 + $0x78] sm:$0xff] (!%p197_p2)  }
   0xb   : > { %1074 = vmatpush3.bf16.msra.mxu0 (!%p197_p2), %v1156_v2  ;;  %v1178_v63 = vld [vmem:[%s1363_s1 + $0x88] sm:$0xff] (!%p197_p2)  }
   0xc   : > { %1087 = vmatprep.subr.bf16.mxu0 (!%p197_p2), %v1188_v1 }
   0xd   : > { %s1369_s19 = smov (!%p227_p3, %s965_s19), 1  ;;  %1082 = vmatpush3.bf16.msra.mxu1 %v1160_v4 }
   0xe   : > { %s1043_s28 = sshll.u32 %s1369_s19, 4  ;;  %1095 = vmatprep.subr.bf16.mxu1 %v1188_v1  ;;  %s972_s14 = sshll.u32 %s1369_s19, 2 }
   0xf   : > { %s1258_s8 = scalar_lea.vmem %s1362_s0, %s1043_s28  ;;  %s235_s17 = scalar_lea.vmem %s1366_s4, %s972_s14 }
  0x10   : > { %v241_v7 = vld [vmem:[%s1258_s8] sm:$0x8]  ;;  %v242_v8 = vld [vmem:[%s1258_s8 + $0x4] sm:$0xf]  ;;  %v452_v17 = vld [vmem:[%s1258_s8 + $0x8] sm:$0x3]  ;;  %s239_s23 = scalar_lea.vmem %s1367_s5, %s972_s14 }
  0x11   : > { %1076 = vmatmul.mubr.msk.bf16.vlgmr.msra.gmra.mrb[0].mxu0 %vm264_vm1, %v242_v8  ;;  %v981_v9 = vcombine.low %v241_v7, %v242_v8  ;;  %v1163_v10 = vld [vmem:[%s1258_s8 + $0x4] sm:$0x1f]  }
  0x12   : > { %1088 = vmatpush3.bf16.msra.mxu0 %v1159_v5  ;;  %1091 = vmatprep.mubr.msk.bf16.mxu0 %vm1189_vm0, %v1188_v1  ;;  %v451_v12 = vld [vmem:[%s1258_s8 + $0x4] sm:$0xe]  ;;  %v389_v15 = vshrl.u32 %v1163_v10, 16  ;;  %v391_v16 = vshll.u32 %v1163_v10, 16  ;;  %v593_v29 = vld [vmem:[%s1258_s8 + $0x8] sm:$0x7] }
  0x13   : > { %v314_v13 = vshrl.u32 %v981_v9, 16  ;;  %v317_v14 = vshll.u32 %v981_v9, 16  ;;  %1089 = vmatprep.subr.bf16.mxu0 %v1188_v1  ;;  %v997_v19 = vcombine.low %v451_v12, %v452_v17  ;;  %v527_v26 = vld [vmem:[%s1258_s8 + $0x4] sm:$0xc]  ;;  %v667_v39 = vld [vmem:[%s1258_s8 + $0x8] sm:$0xf] }
  0x14   : > { %v393_v22 = vrot.slane %v391_v16, 1  ;;  %v1005_v31 = vcombine.low %v527_v26, %v452_v17  ;;  %v1013_v34 = vcombine.low %v527_v26, %v593_v29  ;;  %v666_v36 = vld [vmem:[%s1258_s8 + $0x4] sm:$0x8]  ;;  %v1179_v52 = vld [vmem:[%s1258_s8 + $0x8] sm:$0x1f]  }
  0x15   : > { %v316_v20 = vrot.slane %v314_v13, 3  ;;  %v319_v21 = vrot.slane %v317_v14, 4  ;;  %v464_v24 = vshrl.u32 %v997_v19, 16  ;;  %v467_v25 = vshll.u32 %v997_v19, 16 }
  0x16   : > { %1090 = vmatpush3.bf16.msra.mxu0 %v1161_v11  ;;  %v394_v28 = vor.u32 %v393_v22, %v389_v15  ;;  %v536_v38 = vrot.slane %v1005_v31, 2  ;;  %v603_v41 = vshrl.u32 %v1013_v34, 16  ;;  %v606_v42 = vshll.u32 %v1013_v34, 16 }
  0x17   : > { %v320_v27 = vor.u32 %v319_v21, %v316_v20  ;;  %1103 = vmatprep.subr.bf16.mxu0 %v1188_v1  ;;  %v466_v32 = vrot.slane %v464_v24, 1  ;;  %v469_v33 = vrot.slane %v467_v25, 2  ;;  %v1021_v43 = vcombine.low %v666_v36, %v667_v39 }
  0x18   : > { %v605_v48 = vrot.slane %v603_v41, 2  ;;  %v608_v49 = vrot.slane %v606_v42, 3  ;;  %v818_v57 = vshll.u32 %v1179_v52, 16  ;;  %v816_v60 = vshrl.u32 %v1179_v52, 16  ;;  %v1040_v42 = vld [vmem:[%s1364_s2] ss:$0 sm:$0xff] }
  0x19   : > { %1084 = vmatmul.mubr.msk.bf16.vlgmr.msra.gmra.mrb[0].mxu1 %vm264_vm1, %v320_v27  ;;  %1092 = vmatmul.mubr.msk.bf16.vlgmr.msra.gmra.mrb[4].mxu0 %vm264_vm1, %v394_v28  ;;  %v470_v40 = vor.u32 %v469_v33, %v466_v32  ;;  %v679_v45 = vshrl.u32 %v1021_v43, 16  ;;  %v682_v46 = vshll.u32 %v1021_v43, 16 }
  0x1a   : > { %1096 = vmatpush3.bf16.msra.mxu1 %v1162_v18  ;;  %1104 = vmatpush3.bf16.msra.mxu0 %v1164_v23  ;;  %v609_v55 = vor.u32 %v608_v49, %v605_v48  ;;  %v820_v61 = vrot.slane %v818_v57, 1 }
  0x1b   : > { %1097 = vmatprep.subr.bf16.mxu1 %v1188_v1  ;;  %1099 = vmatprep.mubr.msk.bf16.mxu1 %vm1189_vm0, %v1188_v1  ;;  %v681_v50 = vrot.slane %v679_v45, 3  ;;  %v684_v51 = vrot.slane %v682_v46, 4 }
  0x1c   : > { %1105 = vmatprep.subr.bf16.mxu0 %v1188_v1  ;;  %1107 = vmatprep.mubr.msk.bf16.mxu0 %vm1189_vm0, %v1188_v1  ;;  %v821_v0 = vor.u32 %v820_v61, %v816_v60 }
  0x1d   : > { %v685_v56 = vor.u32 %v684_v51, %v681_v50 }
  0x1e   : > { %1098 = vmatpush3.bf16.msra.mxu1 %v1165_v30  ;;  %1106 = vmatpush3.bf16.msra.mxu0 %v1167_v35 }
  0x1f   : > { %1111 = vmatprep.subr.bf16.mxu1 %v1188_v1  ;;  %1119 = vmatprep.subr.bf16.mxu0 %v1188_v1 }
  0x21   : > { %1100 = vmatmul.mubr.msk.bf16.vlgmr.msra.gmra.mrb[4].mxu1 %vm264_vm1, %v470_v40  ;;  %1108 = vmatmul.mubr.msk.bf16.vlgmr.msra.gmra.mrb[8].mxu0 %vm264_vm1, %v536_v38 }
  0x22   : > { %1112 = vmatpush3.bf16.msra.mxu1 %v1168_v37  ;;  %1120 = vmatpush3.bf16.msra.mxu0 %v1171_v44  ;;  %v886_v37 = vld [vmem:[%s235_s17] sm:$0xf] }
  0x23   : > { %1113 = vmatprep.subr.bf16.mxu1 %v1188_v1  ;;  %1115 = vmatprep.mubr.msk.bf16.mxu1 %vm1189_vm0, %v1188_v1  ;;  %v887_v47 = vunpack.c.l.bf16 %v886_v37 }
  0x24   : > { %1121 = vmatprep.subr.bf16.mxu0 %v1188_v1  ;;  %1123 = vmatprep.mubr.msk.bf16.mxu0 %vm1189_vm0, %v1188_v1 }
  0x26   : > { %1114 = vmatpush3.bf16.msra.mxu1 %v1172_v53  ;;  %1122 = vmatpush3.bf16.msra.mxu0 %v1173_v54 }
  0x27   : > { %1127 = vmatprep.subr.bf16.mxu1 %v1188_v1  ;;  %1135 = vmatprep.subr.bf16.mxu0 %v1188_v1 }
  0x29   : > { %1116 = vmatmul.mubr.msk.bf16.vlgmr.msra.gmra.mrb[8].mxu1 %vm264_vm1, %v609_v55  ;;  %1124 = vmatmul.mubr.msk.bf16.vlgmr.msra.gmra.mrb[12].mxu0 %vm264_vm1, %v685_v56 }
  0x2a   : > { %1128 = vmatpush3.bf16.msra.mxu1 %v1174_v58  ;;  %1136 = vmatpush3.bf16.msra.mxu0 %v1176_v59 }
  0x2b   : > { %1129 = vmatprep.subr.bf16.mxu1 %v1188_v1  ;;  %1131 = vmatprep.mubr.msk.bf16.mxu1 %vm1189_vm0, %v1188_v1 }
  0x2c   : > { %1137 = vmatprep.subr.bf16.mxu0 %v1188_v1  ;;  %1139 = vmatprep.mubr.msk.bf16.mxu0 %vm1189_vm0, %v1188_v1 }
  0x2e   : > { %1130 = vmatpush3.bf16.msra.mxu1 %v1177_v62  ;;  %1138 = vmatpush3.bf16.msra.mxu0 %v1178_v63 }
  0x31   : > { %1132 = vmatmul.mubr.msk.bf16.vlgmr.msra.gmra.mrb[12].mxu1 %vm264_vm1, %v667_v39  ;;  %1140 = vmatmul.mubr.msk.bf16.vlgmr.msra.gmra.mrb[16].mxu0 %vm264_vm1, %v821_v0 }
  0x89   : > { %v894_v50 = vpop.permute.xlu0 %893 }
  0xe4   : > { %v302_v2 = vpop.f32.mrb[0].mxu0 }
  0xe5   : > { %v1077_v3 = vpop.f32.mrb[1].mxu0 }
  0xe6   : > { %v305_v4 = vpop.f32.mrb[2].mxu0 }
  0xe7   : > { %v1078_v5 = vpop.f32.mrb[3].mxu0 }
  0xec   : > { %v370_v6 = vpop.f32.mrb[0].mxu1  ;;  %v444_v7 = vpop.f32.mrb[4].mxu0 }
  0xed   : > { %v371_v8 = vadd.f32 %v370_v6, %v302_v2  ;;  %v1085_v9 = vpop.f32.mrb[1].mxu1  ;;  %v1093_v10 = vpop.f32.mrb[5].mxu0 }
  0xee   : > { %v373_v11 = vpop.f32.mrb[2].mxu1  ;;  %v447_v12 = vpop.f32.mrb[6].mxu0 }
  0xef   : > { %v1086_v13 = vpop.f32.mrb[3].mxu1  ;;  %v450_v1 = vadd.f32 %v444_v7, %v371_v8  ;;  %v1094_v14 = vpop.f32.mrb[7].mxu0 }
  0xf4   : > { %v520_v15 = vpop.f32.mrb[4].mxu1  ;;  %v586_v16 = vpop.f32.mrb[8].mxu0 }
  0xf5   : > { %v526_v17 = vadd.f32 %v520_v15, %v450_v1  ;;  %v1101_v18 = vpop.f32.mrb[5].mxu1  ;;  %v1109_v19 = vpop.f32.mrb[9].mxu0 }
  0xf6   : > { %v523_v20 = vpop.f32.mrb[6].mxu1  ;;  %v589_v21 = vpop.f32.mrb[10].mxu0 }
  0xf7   : > { %v1102_v22 = vpop.f32.mrb[7].mxu1  ;;  %v592_v23 = vadd.f32 %v586_v16, %v526_v17  ;;  %v1110_v24 = vpop.f32.mrb[11].mxu0 }
  0xfc   : > { %v659_v25 = vpop.f32.mrb[8].mxu1  ;;  %v735_v26 = vpop.f32.mrb[12].mxu0 }
  0xfd   : > { %v665_v27 = vadd.f32 %v659_v25, %v592_v23  ;;  %v1117_v28 = vpop.f32.mrb[9].mxu1  ;;  %v1125_v29 = vpop.f32.mrb[13].mxu0 }
  0xfe   : > { %v662_v30 = vpop.f32.mrb[10].mxu1  ;;  %v738_v31 = vpop.f32.mrb[14].mxu0 }
  0xff   : > { %v1118_v32 = vpop.f32.mrb[11].mxu1  ;;  %v741_v33 = vadd.f32 %v735_v26, %v665_v27  ;;  %v1126_v34 = vpop.f32.mrb[15].mxu0 }
 0x104   : > { %v796_v35 = vpop.f32.mrb[12].mxu1  ;;  %v871_v36 = vpop.f32.mrb[16].mxu0 }
 0x105   : > { %v802_v38 = vadd.f32 %v796_v35, %v741_v33  ;;  %v1133_v39 = vpop.f32.mrb[13].mxu1  ;;  %v1141_v40 = vpop.f32.mrb[17].mxu0 }
 0x106   : > { %v799_v41 = vpop.f32.mrb[14].mxu1  ;;  %v874_v43 = vpop.f32.mrb[18].mxu0 }
 0x107   : > { %v1134_v44 = vpop.f32.mrb[15].mxu1  ;;  %v877_v45 = vadd.f32 %v871_v36, %v802_v38  ;;  %v1142_v46 = vpop.f32.mrb[19].mxu0 }
 0x109   : > { %v885_v48 = vadd.f32 %v1040_v42, %v877_v45 }
 0x10b   : > { %v888_v49 = vadd.f32 %v887_v47, %v885_v48 }
 0x10d   : > { %v889_v51 = vmax.f32 %v888_v49, 0.0 }
 0x10f   : > { %v896_v52 = vmul.f32 %v894_v50, %v889_v51 }
 0x111   : > { %v897_v53 = vpack.c.bf16 %v896_v52, %v896_v52 }
 0x113   : > { %899 = vst.msk [vmem:[%s239_s23] sm:$0xf] %vm898_vm2, %v897_v53 }
 0x114 PF: > { %s15_s18 = sadd.s32 1, %s1186_s18  }
 0x115   : > { %p12_p4 = scmp.ge.s32.totalorder %s15_s18, 4  }
 0x117   :  { %14 = sbr.rel (!%p12_p4) target bundleno = 1 (0x1), region = 81 }

// kernel: forward.30
= control target key start
LH: loop header
LB: loop body
LE: loop exit
PB: predicated region body
PF: predicated region fallthrough
CT: control target
= control target key end

     0   :  { %v360_v1 = vmov 0.0   ;;  %vm361_vm0 = vmmov 0   ;;  %v362_v6 = vmov 1966171168   ;;  %v71_v8 = vlaneseq  ;;  %s446_s1 = inlined_call_operand.vmem [shape: bf16[288,64], index: 1, kind: input, shape index: {}]   ;;  %s447_s0 = inlined_call_operand.vmem [shape: bf16[2,288], index: 0, kind: input, shape index: {}]   ;;  %s448_s2 = inlined_call_operand.vmem [shape: f32[1,64], index: 2, kind: input, shape index: {}]   ;;  %s449_s3 = inlined_call_operand.vmem [shape: bf16[2,64], index: 3, kind: output, shape index: {}]  }
   0x1   :  { %v342_v0 = vld [vmem:[%s446_s1 + $0x40] sm:$0xff]   ;;  %331 = vmatprep.subr.bf16.mxu1 %v360_v1  ;;  %335 = vmatprep.mubr.msk.bf16.mxu1 %vm361_vm0, %v360_v1  ;;  %v344_v3 = vld [vmem:[%s446_s1 + $0x48] sm:$0xff]   ;;  %v346_v5 = vld [vmem:[%s446_s1 + $0x50] sm:$0xff]   ;;  %v69_v7 = vunpack.c.l.s4 %v362_v6  ;;  %vm193_vm1 = vcmask 261120   ;;  %vm279_vm2 = vcmask 516096  }
   0x2   :  { %v343_v2 = vld [vmem:[%s446_s1] sm:$0xff]   ;;  %306 = vmatprep.subr.bf16.mxu0 %v342_v0  ;;  %v345_v4 = vld [vmem:[%s446_s1 + $0x8] sm:$0xff]   ;;  %v347_v9 = vld [vmem:[%s446_s1 + $0x10] sm:$0xff]   ;;  %v72_v12 = vshrl.u32 %v71_v8, 7 }
   0x3   :  { %307 = vmatpush3.bf16.msra.mxu0 %v343_v2  ;;  %v348_v10 = vld [vmem:[%s446_s1 + $0x58] sm:$0xff]   ;;  %v70_v11 = vunpack.c.0.s8 %v69_v7  ;;  %v350_v14 = vld [vmem:[%s446_s1 + $0x60] sm:$0xff]   ;;  %v352_v18 = vld [vmem:[%s446_s1 + $0x68] sm:$0xff]  }
   0x4   :  { %308 = vmatprep.subr.bf16.mxu0 %v344_v3  ;;  %v349_v13 = vld [vmem:[%s446_s1 + $0x18] sm:$0xff]   ;;  %v356_v15 = vld [vmem:[%s446_s1 + $0x80] sm:$0xff]   ;;  %v359_v21 = vld [vmem:[%s446_s1 + $0x88] sm:$0xff]  }
   0x5   :  { %v73_v16 = vsub.s32 %v70_v11, %v72_v12  ;;  %v351_v17 = vld [vmem:[%s446_s1 + $0x20] sm:$0xff]   ;;  %332 = vmatpush3.bf16.msra.mxu1 %v356_v15  ;;  %v353_v23 = vld [vmem:[%s446_s1 + $0x28] sm:$0xff]   ;;  %v354_v24 = vld [vmem:[%s446_s1 + $0x70] sm:$0xff]  }
   0x6   :  { %333 = vmatprep.subr.bf16.mxu1 %v360_v1  ;;  %v286_v19 = vld.sshfl [vmem:[%s447_s0] sm:$0x13 pattern:$0x75316420]  ;;  %v355_v27 = vld [vmem:[%s446_s1 + $0x30] sm:$0xff]   ;;  %v357_v28 = vld [vmem:[%s446_s1 + $0x78] sm:$0xff]  }
   0x7   :  { %309 = vmatpush3.bf16.msra.mxu0 %v345_v4  ;;  %v67_v20 = vcombine.high %v286_v19, %v286_v19  ;;  %v74_v22 = vrot.slane %v286_v19, %v73_v16  ;;  %v358_v29 = vld [vmem:[%s446_s1 + $0x38] sm:$0xff]   ;;  %v285_v36 = vld [vmem:[%s448_s2] ss:$0 sm:$0xff] }
   0x8   :  { %310 = vmatprep.subr.bf16.mxu0 %v346_v5 }
   0x9   :  { %v81_v25 = vrot.slane %v67_v20, %v73_v16  ;;  %334 = vmatpush3.bf16.msra.mxu1 %v359_v21  ;;  %v82_v26 = vcombine.high %v74_v22, %v74_v22 }
   0xb   :  { %311 = vmatpush3.bf16.msra.mxu0 %v347_v9  ;;  %229 = vmatprep.mubr.bf16.mxu0 %v81_v25 }
   0xc   :  { %312 = vmatprep.subr.bf16.mxu0 %v348_v10  ;;  %336 = vmatmul.mubr.msk.bf16.vlgmr.msra.gmra.mrb[0].mxu1 %vm193_vm1, %v82_v26 }
   0xf   :  { %313 = vmatpush3.bf16.msra.mxu0 %v349_v13 }
  0x10   :  { %314 = vmatprep.subr.bf16.mxu0 %v350_v14 }
  0x13   :  { %315 = vmatpush3.bf16.msra.mxu0 %v351_v17 }
  0x14   :  { %316 = vmatprep.subr.bf16.mxu0 %v352_v18 }
  0x17   :  { %317 = vmatpush3.bf16.msra.mxu0 %v353_v23 }
  0x18   :  { %318 = vmatprep.subr.bf16.mxu0 %v354_v24 }
  0x1b   :  { %319 = vmatpush3.bf16.msra.mxu0 %v355_v27 }
  0x1c   :  { %320 = vmatprep.subr.bf16.mxu0 %v357_v28 }
  0x1f   :  { %321 = vmatpush3.bf16.msra.mxu0 %v358_v29 }
  0x22   :  { %230 = vmatmul.mubr.bf16.vlgmr.msra.gmra.mrb[0].mxu0 %v74_v22 }
  0xdf   :  { %v271_v30 = vpop.f32.mrb[0].mxu1 }
  0xe0   :  { %v337_v31 = vpop.f32.mrb[1].mxu1 }
  0xe1   :  { %v274_v32 = vpop.f32.mrb[2].mxu1 }
  0xe2   :  { %v338_v33 = vpop.f32.mrb[3].mxu1 }
  0xf5   :  { %v322_v34 = vpop.f32.mrb[0].mxu0 }
  0xf6   :  { %v323_v35 = vpop.f32.mrb[1].mxu0 }
  0xf7   :  { %v324_v37 = vadd.f32 %v323_v35, %v322_v34  ;;  %v325_v38 = vpop.f32.mrb[2].mxu0 }
  0xf8   :  { %v326_v39 = vpop.f32.mrb[3].mxu0 }
  0xf9   :  { %v232_v40 = vadd.f32 %v324_v37, %v285_v36 }
  0xfb   :  { %v272_v41 = vadd.f32 %v271_v30, %v232_v40 }
  0xfd   :  { %v277_v42 = vmax.f32 %v272_v41, 0.0 }
  0xff   :  { %v278_v43 = vpack.c.bf16 %v277_v42, %v277_v42 }
 0x101   :  { %280 = vst.msk [vmem:[%s449_s3] sm:$0x1] %vm279_vm2, %v278_v43 }

// kernel: forward.32
= control target key start
LH: loop header
LB: loop body
LE: loop exit
PB: predicated region body
PF: predicated region fallthrough
CT: control target
= control target key end

     0   :  { %s1400_s15 = smov 0   ;;  %s1605_s0 = inlined_call_operand.vmem [shape: bf16[2,25,64], index: 0, kind: input, shape index: {}]   ;;  %s1606_s1 = inlined_call_operand.vmem [shape: bf16[9,64,64], index: 1, kind: input, shape index: {}]   ;;  %s1607_s2 = inlined_call_operand.vmem [shape: f32[1,64], index: 2, kind: input, shape index: {}]   ;;  %s1608_s3 = inlined_call_operand.vmem [shape: f32[3,1], index: 3, kind: input, shape index: {}]   ;;  %s1609_s4 = inlined_call_operand.vmem [shape: bf16[2,3,64], index: 4, kind: output, shape index: {}]  }
   0x1 LB: > { %s1032_s16 = sadd.s32 4294967295, %s1370_s15   ;;  %p1036_p0 = scmp.ge.s32.totalorder %s1370_s15, 1  ;;  %s1370_s15 = sphi %s1400_s15, %s14_s15  }
   0x2   : > { %p162_p1 = scmp.lt.s32.totalorder %s1370_s15, 3 }
   0x4   : > { %p163_p2 = pnand %p1036_p0, %p162_p1 }
   0x5   : > { %v1323_v0 = vld [vmem:[%s1606_s1 + $0x20] sm:$0xff] (!%p163_p2)   ;;  %v1372_v1 = vmov (!%p163_p2), 0.0   ;;  %v1325_v3 = vld [vmem:[%s1606_s1 + $0x28] sm:$0xff] (!%p163_p2)   ;;  %vm1373_vm0 = vmmov (!%p163_p2), 0   ;;  %p187_p3 = scmp.lt.s32.totalorder (!%p163_p2), %s1032_s16, 1  ;;  %v1327_v5 = vld [vmem:[%s1606_s1 + $0x30] sm:$0xff] (!%p163_p2)  }
   0x6   : > { %166 = sbr.rel (%p163_p2) target bundleno = 310 (0x136), region = 36  ;;  %1203 = vmatprep.subr.bf16.mxu0 (!%p163_p2), %v1372_v1  ;;  %1215 = vmatprep.subr.bf16.mxu1 (!%p163_p2), %v1372_v1  ;;  %v1324_v2 = vld [vmem:[%s1606_s1] sm:$0xff] (!%p163_p2)   ;;  %v1326_v4 = vld [vmem:[%s1606_s1 + $0x8] sm:$0xff] (!%p163_p2)   ;;  %v1374_v6 = vmov (!%p163_p2), 0   ;;  %v1328_v7 = vld [vmem:[%s1606_s1 + $0x10] sm:$0xff] (!%p163_p2)   ;;  %vm241_vm1 = vcmask (!%p163_p2), 523264  }
   0x7   : > { %1204 = vmatpush3.bf16.msra.mxu0 (!%p163_p2), %v1323_v0  ;;  %1211 = vmatprep.mubr.msk.bf16.mxu0 (!%p163_p2), %vm1373_vm0, %v1372_v1  ;;  %v1329_v9 = vld [vmem:[%s1606_s1 + $0x38] sm:$0xff] (!%p163_p2)   ;;  %v1333_v16 = vld [vmem:[%s1606_s1 + $0x40] sm:$0xff] (!%p163_p2)   ;;  %v1335_v20 = vld [vmem:[%s1606_s1 + $0x48] sm:$0xff] (!%p163_p2)   ;;  %vm973_vm2 = vcmask (!%p163_p2), 517120   ;;  %vm974_vm3 = vsmask.f32 (!%p163_p2), 1280 }
   0x8   : > { %1216 = vmatpush3.bf16.msra.mxu1 (!%p163_p2), %v1324_v2  ;;  %1205 = vmatprep.subr.bf16.mxu0 (!%p163_p2), %v1372_v1  ;;  %v1330_v10 = vld [vmem:[%s1606_s1 + $0x18] sm:$0xff] (!%p163_p2)   ;;  %v1334_v18 = vld [vmem:[%s1606_s1 + $0x60] sm:$0xff] (!%p163_p2)   ;;  %v1336_v21 = vld [vmem:[%s1606_s1 + $0x68] sm:$0xff] (!%p163_p2)  }
   0x9   : > { %1217 = vmatprep.subr.bf16.mxu1 (!%p163_p2), %v1372_v1  ;;  %1223 = vmatprep.mubr.msk.bf16.mxu1 (!%p163_p2), %vm1373_vm0, %v1372_v1  ;;  %v1337_v23 = vld [vmem:[%s1606_s1 + $0x50] sm:$0xff] (!%p163_p2)   ;;  %v1339_v28 = vld [vmem:[%s1606_s1 + $0x58] sm:$0xff] (!%p163_p2)   ;;  %v1341_v31 = vld [vmem:[%s1606_s1 + $0x80] sm:$0xff] (!%p163_p2)  }
   0xa   : > { %1322 = vset.pattern.permute.xlu0 (!%p163_p2), %v1374_v6  ;;  %v1338_v24 = vld [vmem:[%s1606_s1 + $0x70] sm:$0xff] (!%p163_p2)   ;;  %v1340_v29 = vld [vmem:[%s1606_s1 + $0x78] sm:$0xff] (!%p163_p2)   ;;  %v1343_v33 = vld [vmem:[%s1606_s1 + $0xa0] sm:$0xff] (!%p163_p2)  }
   0xb   : > { %1206 = vmatpush3.bf16.msra.mxu0 (!%p163_p2), %v1325_v3  ;;  %v1344_v34 = vld [vmem:[%s1606_s1 + $0x88] sm:$0xff] (!%p163_p2)   ;;  %v1346_v38 = vld [vmem:[%s1606_s1 + $0x90] sm:$0xff] (!%p163_p2)   ;;  %v965_v40 = vld [vmem:[%s1608_s3] sm:$0x7] (!%p163_p2) }
   0xc   : > { %1218 = vmatpush3.bf16.msra.mxu1 (!%p163_p2), %v1326_v4  ;;  %1207 = vmatprep.subr.bf16.mxu0 (!%p163_p2), %v1372_v1  ;;  %v1345_v35 = vld [vmem:[%s1606_s1 + $0xa8] sm:$0xff] (!%p163_p2)   ;;  %v1347_v39 = vld [vmem:[%s1606_s1 + $0xb0] sm:$0xff] (!%p163_p2)   ;;  %v1348_v43 = vld [vmem:[%s1606_s1 + $0x98] sm:$0xff] (!%p163_p2)  }
   0xd   : > { %s1611_s16 = smov (!%p187_p3, %s1032_s16), 1  ;;  %1219 = vmatprep.subr.bf16.mxu1 %v1372_v1  ;;  %968 = vperm.xlu0 %1322, %v965_v40   ;;  %v1349_v45 = vld [vmem:[%s1606_s1 + $0xb8] sm:$0xff]   ;;  %v1350_v47 = vld [vmem:[%s1606_s1 + $0xc0] sm:$0xff]   ;;  %v1353_v50 = vld [vmem:[%s1606_s1 + $0xc8] sm:$0xff]  }
   0xe   : > { %s1157_s27 = sshll.u32 %s1611_s16, 4  ;;  %v1352_v49 = vld [vmem:[%s1606_s1 + $0xe0] sm:$0xff]   ;;  %v1354_v51 = vld [vmem:[%s1606_s1 + $0xe8] sm:$0xff]   ;;  %v1355_v54 = vld [vmem:[%s1606_s1 + $0xd0] sm:$0xff]   ;;  %s1039_s26 = sshll.u32 %s1611_s16, 1 }
   0xf   : > { %s1441_s6 = scalar_lea.vmem %s1605_s0, %s1157_s27  ;;  %1208 = vmatpush3.bf16.msra.mxu0 %v1327_v5  ;;  %v1356_v55 = vld [vmem:[%s1606_s1 + $0xf0] sm:$0xff]   ;;  %v1357_v58 = vld [vmem:[%s1606_s1 + $0xd8] sm:$0xff]   ;;  %v1359_v62 = vld [vmem:[%s1606_s1 + $0x100] sm:$0xff]   ;;  %s195_s29 = scalar_lea.vmem %s1609_s4, %s1039_s26 }
  0x10   : > { %v1332_v8 = vld [vmem:[%s1441_s6] sm:$0x18]   ;;  %1220 = vmatpush3.bf16.msra.mxu1 %v1328_v7  ;;  %1209 = vmatprep.subr.bf16.mxu0 %v1372_v1  ;;  %v1360_v59 = vld [vmem:[%s1441_s6 + $0x4] sm:$0x18]   ;;  %v1358_v60 = vld [vmem:[%s1606_s1 + $0xf8] sm:$0xff]  }
  0x11   : > { %v291_v11 = vshrl.u32 %v1332_v8, 16  ;;  %v294_v12 = vshll.u32 %v1332_v8, 16  ;;  %1221 = vmatprep.subr.bf16.mxu1 %v1372_v1  ;;  %v207_v13 = vld [vmem:[%s1441_s6 + $0x4] sm:$0x3]  ;;  %v802_v63 = vrot.slane %v1360_v59, 3  ;;  %v1361_v0 = vld [vmem:[%s1606_s1 + $0x108] sm:$0xff]   ;;  %vm975_vm4 = vmand %vm973_vm2, %vm974_vm3 }
  0x12   : > { %v1067_v19 = vcombine.low %v207_v13, %v207_v13  ;;  %v1342_v25 = vld [vmem:[%s1441_s6 + $0x4] ss:$0 sps:$4 sm:$0x66]   ;;  %v881_v2 = vshrl.u32 %v1360_v59, 16  ;;  %v884_v3 = vshll.u32 %v1360_v59, 16  ;;  %v1362_v4 = vld [vmem:[%s1606_s1 + $0x110] sm:$0xff]  }
  0x13   : > { %v293_v14 = vrot.slane %v291_v11, 3  ;;  %v296_v15 = vrot.slane %v294_v12, 4  ;;  %1210 = vmatpush3.bf16.msra.mxu0 %v1329_v9  ;;  %v465_v32 = vrot.slane %v1342_v25, 1  ;;  %v544_v36 = vshrl.u32 %v1342_v25, 16  ;;  %v1363_v7 = vld [vmem:[%s1606_s1 + $0x118] sm:$0xff]  }
  0x14   : > { %1222 = vmatpush3.bf16.msra.mxu1 %v1330_v10  ;;  %1227 = vmatprep.subr.bf16.mxu0 %v1372_v1  ;;  %v380_v22 = vshll.u32 %v1067_v19, 16  ;;  %v378_v26 = vshrl.u32 %v1067_v19, 16  ;;  %v547_v37 = vshll.u32 %v1342_v25, 16  ;;  %v1351_v44 = vld [vmem:[%s1441_s6 + $0x4] ss:$0 sps:$4 sm:$0xcc]  }
  0x15   : > { %v297_v17 = vor.u32 %v296_v15, %v293_v14  ;;  %1239 = vmatprep.subr.bf16.mxu1 %v1372_v1  ;;  %v546_v41 = vrot.slane %v544_v36, 1  ;;  %v632_v48 = vrot.slane %v1351_v44, 2  ;;  %v711_v52 = vshrl.u32 %v1351_v44, 16 }
  0x16   : > { %1212 = vmatmul.mubr.msk.bf16.vlgmr.msra.gmra.mrb[0].mxu0 %vm241_vm1, %v207_v13  ;;  %v382_v27 = vrot.slane %v380_v22, 1  ;;  %v549_v42 = vrot.slane %v547_v37, 2  ;;  %v714_v53 = vshll.u32 %v1351_v44, 16  ;;  %v883_v5 = vrot.slane %v881_v2, 3 }
  0x17   : > { %1224 = vmatmul.mubr.msk.bf16.vlgmr.msra.gmra.mrb[0].mxu1 %vm241_vm1, %v297_v17  ;;  %1228 = vmatpush3.bf16.msra.mxu0 %v1333_v16  ;;  %v713_v56 = vrot.slane %v711_v52, 2  ;;  %v886_v6 = vrot.slane %v884_v3, 4 }
  0x18   : > { %1240 = vmatpush3.bf16.msra.mxu1 %v1334_v18  ;;  %1229 = vmatprep.subr.bf16.mxu0 %v1372_v1  ;;  %v383_v30 = vor.u32 %v382_v27, %v378_v26  ;;  %v550_v46 = vor.u32 %v549_v42, %v546_v41  ;;  %v716_v57 = vrot.slane %v714_v53, 3 }
  0x19   : > { %1241 = vmatprep.subr.bf16.mxu1 %v1372_v1  ;;  %1235 = vmatprep.mubr.msk.bf16.mxu0 %vm1373_vm0, %v1372_v1  ;;  %v887_v8 = vor.u32 %v886_v6, %v883_v5 }
  0x1a   : > { %1247 = vmatprep.mubr.msk.bf16.mxu1 %vm1373_vm0, %v1372_v1  ;;  %v717_v61 = vor.u32 %v716_v57, %v713_v56  ;;  %v976_v57 = vld [vmem:[%s195_s29] sm:$0x3] }
  0x1b   : > { %1230 = vmatpush3.bf16.msra.mxu0 %v1335_v20 }
  0x1c   : > { %1242 = vmatpush3.bf16.msra.mxu1 %v1336_v21  ;;  %1231 = vmatprep.subr.bf16.mxu0 %v1372_v1 }
  0x1d   : > { %1243 = vmatprep.subr.bf16.mxu1 %v1372_v1 }
  0x1f   : > { %1232 = vmatpush3.bf16.msra.mxu0 %v1337_v23 }
  0x20   : > { %1244 = vmatpush3.bf16.msra.mxu1 %v1338_v24  ;;  %1233 = vmatprep.subr.bf16.mxu0 %v1372_v1 }
  0x21   : > { %1245 = vmatprep.subr.bf16.mxu1 %v1372_v1 }
  0x23   : > { %1234 = vmatpush3.bf16.msra.mxu0 %v1339_v28 }
  0x24   : > { %1246 = vmatpush3.bf16.msra.mxu1 %v1340_v29  ;;  %1251 = vmatprep.subr.bf16.mxu0 %v1372_v1 }
  0x25   : > { %1263 = vmatprep.subr.bf16.mxu1 %v1372_v1 }
  0x26   : > { %1236 = vmatmul.mubr.msk.bf16.vlgmr.msra.gmra.mrb[4].mxu0 %vm241_vm1, %v383_v30 }
  0x27   : > { %1252 = vmatpush3.bf16.msra.mxu0 %v1341_v31  ;;  %1248 = vmatmul.mubr.msk.bf16.vlgmr.msra.gmra.mrb[4].mxu1 %vm241_vm1, %v465_v32 }
  0x28   : > { %1264 = vmatpush3.bf16.msra.mxu1 %v1343_v33  ;;  %1253 = vmatprep.subr.bf16.mxu0 %v1372_v1 }
  0x29   : > { %1265 = vmatprep.subr.bf16.mxu1 %v1372_v1  ;;  %1259 = vmatprep.mubr.msk.bf16.mxu0 %vm1373_vm0, %v1372_v1 }
  0x2a   : > { %1271 = vmatprep.mubr.msk.bf16.mxu1 %vm1373_vm0, %v1372_v1 }
  0x2b   : > { %1254 = vmatpush3.bf16.msra.mxu0 %v1344_v34 }
  0x2c   : > { %1266 = vmatpush3.bf16.msra.mxu1 %v1345_v35  ;;  %1255 = vmatprep.subr.bf16.mxu0 %v1372_v1 }
  0x2d   : > { %1267 = vmatprep.subr.bf16.mxu1 %v1372_v1 }
  0x2f   : > { %1256 = vmatpush3.bf16.msra.mxu0 %v1346_v38 }
  0x30   : > { %1268 = vmatpush3.bf16.msra.mxu1 %v1347_v39  ;;  %1257 = vmatprep.subr.bf16.mxu0 %v1372_v1 }
  0x31   : > { %1269 = vmatprep.subr.bf16.mxu1 %v1372_v1 }
  0x33   : > { %1258 = vmatpush3.bf16.msra.mxu0 %v1348_v43 }
  0x34   : > { %1270 = vmatpush3.bf16.msra.mxu1 %v1349_v45  ;;  %1275 = vmatprep.subr.bf16.mxu0 %v1372_v1 }
  0x35   : > { %1287 = vmatprep.subr.bf16.mxu1 %v1372_v1 }
  0x36   : > { %1260 = vmatmul.mubr.msk.bf16.vlgmr.msra.gmra.mrb[8].mxu0 %vm241_vm1, %v550_v46 }
  0x37   : > { %1276 = vmatpush3.bf16.msra.mxu0 %v1350_v47  ;;  %1272 = vmatmul.mubr.msk.bf16.vlgmr.msra.gmra.mrb[8].mxu1 %vm241_vm1, %v632_v48  ;;  %v1154_v48 = vld [vmem:[%s1607_s2] ss:$0 sm:$0xff] }
  0x38   : > { %1288 = vmatpush3.bf16.msra.mxu1 %v1352_v49  ;;  %1277 = vmatprep.subr.bf16.mxu0 %v1372_v1 }
  0x39   : > { %1289 = vmatprep.subr.bf16.mxu1 %v1372_v1  ;;  %1283 = vmatprep.mubr.msk.bf16.mxu0 %vm1373_vm0, %v1372_v1 }
  0x3a   : > { %1295 = vmatprep.mubr.msk.bf16.mxu1 %vm1373_vm0, %v1372_v1 }
  0x3b   : > { %1278 = vmatpush3.bf16.msra.mxu0 %v1353_v50 }
  0x3c   : > { %1290 = vmatpush3.bf16.msra.mxu1 %v1354_v51  ;;  %1279 = vmatprep.subr.bf16.mxu0 %v1372_v1 }
  0x3d   : > { %1291 = vmatprep.subr.bf16.mxu1 %v1372_v1 }
  0x3f   : > { %1280 = vmatpush3.bf16.msra.mxu0 %v1355_v54 }
  0x40   : > { %1292 = vmatpush3.bf16.msra.mxu1 %v1356_v55  ;;  %1281 = vmatprep.subr.bf16.mxu0 %v1372_v1 }
  0x41   : > { %1293 = vmatprep.subr.bf16.mxu1 %v1372_v1 }
  0x43   : > { %1282 = vmatpush3.bf16.msra.mxu0 %v1357_v58 }
  0x44   : > { %1294 = vmatpush3.bf16.msra.mxu1 %v1358_v60  ;;  %1299 = vmatprep.subr.bf16.mxu0 %v1372_v1 }
  0x46   : > { %1284 = vmatmul.mubr.msk.bf16.vlgmr.msra.gmra.mrb[12].mxu0 %vm241_vm1, %v717_v61 }
  0x47   : > { %1300 = vmatpush3.bf16.msra.mxu0 %v1359_v62  ;;  %1296 = vmatmul.mubr.msk.bf16.vlgmr.msra.gmra.mrb[12].mxu1 %vm241_vm1, %v802_v63 }
  0x48   : > { %1301 = vmatprep.subr.bf16.mxu0 %v1372_v1  ;;  %1307 = vmatprep.mubr.msk.bf16.mxu0 %vm1373_vm0, %v1372_v1 }
  0x4b   : > { %1302 = vmatpush3.bf16.msra.mxu0 %v1361_v0 }
  0x4c   : > { %1303 = vmatprep.subr.bf16.mxu0 %v1372_v1 }
  0x4f   : > { %1304 = vmatpush3.bf16.msra.mxu0 %v1362_v4 }
  0x50   : > { %1305 = vmatprep.subr.bf16.mxu0 %v1372_v1 }
  0x53   : > { %1306 = vmatpush3.bf16.msra.mxu0 %v1363_v7 }
  0x56   : > { %1308 = vmatmul.mubr.msk.bf16.vlgmr.msra.gmra.mrb[16].mxu0 %vm241_vm1, %v887_v8 }
  0x8c   : > { %v969_v54 = vpop.permute.xlu0 %968 }
  0xe9   : > { %v279_v9 = vpop.f32.mrb[0].mxu0 }
  0xea   : > { %v1213_v10 = vpop.f32.mrb[1].mxu0  ;;  %v359_v11 = vpop.f32.mrb[0].mxu1 }
  0xeb   : > { %v360_v12 = vadd.f32 %v359_v11, %v279_v9  ;;  %v282_v13 = vpop.f32.mrb[2].mxu0  ;;  %v1225_v14 = vpop.f32.mrb[1].mxu1 }
  0xec   : > { %v1214_v15 = vpop.f32.mrb[3].mxu0  ;;  %v362_v16 = vpop.f32.mrb[2].mxu1 }
  0xed   : > { %v1226_v17 = vpop.f32.mrb[3].mxu1 }
  0xf9   : > { %v445_v18 = vpop.f32.mrb[4].mxu0 }
  0xfa   : > { %v451_v19 = vadd.f32 %v445_v18, %v360_v12  ;;  %v1237_v20 = vpop.f32.mrb[5].mxu0  ;;  %v527_v21 = vpop.f32.mrb[4].mxu1 }
  0xfb   : > { %v448_v22 = vpop.f32.mrb[6].mxu0  ;;  %v1249_v23 = vpop.f32.mrb[5].mxu1 }
  0xfc   : > { %v533_v1 = vadd.f32 %v527_v21, %v451_v19  ;;  %v1238_v24 = vpop.f32.mrb[7].mxu0  ;;  %v530_v25 = vpop.f32.mrb[6].mxu1 }
  0xfd   : > { %v1250_v26 = vpop.f32.mrb[7].mxu1 }
 0x109   : > { %v612_v27 = vpop.f32.mrb[8].mxu0 }
 0x10a   : > { %v618_v28 = vadd.f32 %v612_v27, %v533_v1  ;;  %v1261_v29 = vpop.f32.mrb[9].mxu0  ;;  %v694_v30 = vpop.f32.mrb[8].mxu1 }
 0x10b   : > { %v615_v31 = vpop.f32.mrb[10].mxu0  ;;  %v1273_v32 = vpop.f32.mrb[9].mxu1 }
 0x10c   : > { %v700_v33 = vadd.f32 %v694_v30, %v618_v28  ;;  %v1262_v34 = vpop.f32.mrb[11].mxu0  ;;  %v697_v35 = vpop.f32.mrb[10].mxu1 }
 0x10d   : > { %v1274_v36 = vpop.f32.mrb[11].mxu1 }
 0x119   : > { %v779_v37 = vpop.f32.mrb[12].mxu0 }
 0x11a   : > { %v785_v38 = vadd.f32 %v779_v37, %v700_v33  ;;  %v1285_v39 = vpop.f32.mrb[13].mxu0  ;;  %v864_v40 = vpop.f32.mrb[12].mxu1 }
 0x11b   : > { %v782_v41 = vpop.f32.mrb[14].mxu0  ;;  %v1297_v42 = vpop.f32.mrb[13].mxu1 }
 0x11c   : > { %v870_v43 = vadd.f32 %v864_v40, %v785_v38  ;;  %v1286_v44 = vpop.f32.mrb[15].mxu0  ;;  %v867_v45 = vpop.f32.mrb[14].mxu1 }
 0x11d   : > { %v1298_v46 = vpop.f32.mrb[15].mxu1 }
 0x129   : > { %v949_v47 = vpop.f32.mrb[16].mxu0 }
 0x12a   : > { %v955_v49 = vadd.f32 %v949_v47, %v870_v43  ;;  %v1309_v50 = vpop.f32.mrb[17].mxu0 }
 0x12b   : > { %v952_v51 = vpop.f32.mrb[18].mxu0 }
 0x12c   : > { %v963_v52 = vadd.f32 %v1154_v48, %v955_v49  ;;  %v1310_v53 = vpop.f32.mrb[19].mxu0 }
 0x12e   : > { %v964_v55 = vmax.f32 %v963_v52, 0.0 }
 0x130   : > { %v971_v56 = vmul.f32 %v969_v54, %v964_v55 }
 0x132   : > { %v972_v58 = vpack.c.bf16 %v971_v56, %v971_v56 }
 0x134   : > { %v977_v59 = vsel %vm975_vm4, %v972_v58, %v976_v57 }
 0x135   : > { %978 = vst [vmem:[%s195_s29] sm:$0x3] %v977_v59 }
 0x136 PF: > { %s14_s15 = sadd.s32 1, %s1370_s15  }
 0x137   : > { %p11_p4 = scmp.ge.s32.totalorder %s14_s15, 4  }
 0x139   :  { %13 = sbr.rel (!%p11_p4) target bundleno = 1 (0x1), region = 74 }

// kernel: forward.31
= control target key start
LH: loop header
LB: loop body
LE: loop exit
PB: predicated region body
PF: predicated region fallthrough
CT: control target
= control target key end

     0   :  { %s1572_s21 = smov 0   ;;  %s1794_s0 = inlined_call_operand.vmem [shape: bf16[2,25,64], index: 0, kind: input, shape index: {}]   ;;  %s1795_s1 = inlined_call_operand.vmem [shape: bf16[9,64,64], index: 1, kind: input, shape index: {}]   ;;  %s1796_s2 = inlined_call_operand.vmem [shape: f32[1,64], index: 2, kind: input, shape index: {}]   ;;  %s1797_s3 = inlined_call_operand.vmem [shape: f32[3,1], index: 3, kind: input, shape index: {}]   ;;  %s1798_s4 = inlined_call_operand.vmem [shape: bf16[2,3,32], index: 4, kind: input, shape index: {}]   ;;  %s1799_s5 = inlined_call_operand.vmem [shape: bf16[32,64], index: 5, kind: input, shape index: {}]   ;;  %s1800_s6 = inlined_call_operand.vmem [shape: bf16[2,3,64], index: 6, kind: output, shape index: {}]  }
   0x1 LB: > { %s1177_s22 = sadd.s32 4294967295, %s1532_s21   ;;  %p1181_p0 = scmp.ge.s32.totalorder %s1532_s21, 1  ;;  %s1532_s21 = sphi %s1572_s21, %s16_s21  }
   0x2   : > { %p221_p1 = scmp.lt.s32.totalorder %s1532_s21, 3 }
   0x4   : > { %p222_p2 = pnand %p1181_p0, %p221_p1 }
   0x5   : > { %v1483_v0 = vld [vmem:[%s1795_s1 + $0x20] sm:$0xff] (!%p222_p2)   ;;  %v1534_v1 = vmov (!%p222_p2), 0.0   ;;  %v1485_v3 = vld [vmem:[%s1795_s1 + $0x28] sm:$0xff] (!%p222_p2)   ;;  %vm1535_vm0 = vmmov (!%p222_p2), 0   ;;  %p254_p3 = scmp.lt.s32.totalorder (!%p222_p2), %s1177_s22, 1  ;;  %v1487_v5 = vld [vmem:[%s1795_s1 + $0x30] sm:$0xff] (!%p222_p2)  }
   0x6   : > { %225 = sbr.rel (%p222_p2) target bundleno = 312 (0x138), region = 44  ;;  %1355 = vmatprep.subr.bf16.mxu0 (!%p222_p2), %v1534_v1  ;;  %1367 = vmatprep.subr.bf16.mxu1 (!%p222_p2), %v1534_v1  ;;  %v1484_v2 = vld [vmem:[%s1795_s1] sm:$0xff] (!%p222_p2)   ;;  %v1486_v4 = vld [vmem:[%s1795_s1 + $0x8] sm:$0xff] (!%p222_p2)   ;;  %v1488_v6 = vld [vmem:[%s1795_s1 + $0x10] sm:$0xff] (!%p222_p2)   ;;  %v1536_v12 = vmov (!%p222_p2), 0   ;;  %vm312_vm1 = vcmask (!%p222_p2), 523264  }
   0x7   : > { %1356 = vmatpush3.bf16.msra.mxu0 (!%p222_p2), %v1483_v0  ;;  %1363 = vmatprep.mubr.msk.bf16.mxu0 (!%p222_p2), %vm1535_vm0, %v1534_v1  ;;  %v1489_v8 = vld [vmem:[%s1795_s1 + $0x38] sm:$0xff] (!%p222_p2)   ;;  %v1493_v16 = vld [vmem:[%s1795_s1 + $0x40] sm:$0xff] (!%p222_p2)   ;;  %v1495_v20 = vld [vmem:[%s1795_s1 + $0x48] sm:$0xff] (!%p222_p2)   ;;  %vm1044_vm2 = vcmask (!%p222_p2), 261120   ;;  %vm1106_vm3 = vcmask (!%p222_p2), 517120  }
   0x8   : > { %1368 = vmatpush3.bf16.msra.mxu1 (!%p222_p2), %v1484_v2  ;;  %1357 = vmatprep.subr.bf16.mxu0 (!%p222_p2), %v1534_v1  ;;  %v1490_v9 = vld [vmem:[%s1795_s1 + $0x18] sm:$0xff] (!%p222_p2)   ;;  %v1494_v18 = vld [vmem:[%s1795_s1 + $0x60] sm:$0xff] (!%p222_p2)   ;;  %v1496_v21 = vld [vmem:[%s1795_s1 + $0x68] sm:$0xff] (!%p222_p2)   ;;  %vm1107_vm4 = vsmask.f32 (!%p222_p2), 1280 }
   0x9   : > { %1369 = vmatprep.subr.bf16.mxu1 (!%p222_p2), %v1534_v1  ;;  %1375 = vmatprep.mubr.msk.bf16.mxu1 (!%p222_p2), %vm1535_vm0, %v1534_v1  ;;  %v1497_v23 = vld [vmem:[%s1795_s1 + $0x50] sm:$0xff] (!%p222_p2)   ;;  %v1499_v28 = vld [vmem:[%s1795_s1 + $0x58] sm:$0xff] (!%p222_p2)   ;;  %v1501_v31 = vld [vmem:[%s1795_s1 + $0x80] sm:$0xff] (!%p222_p2)  }
   0xa   : > { %1482 = vset.pattern.permute.xlu0 (!%p222_p2), %v1536_v12  ;;  %v1498_v24 = vld [vmem:[%s1795_s1 + $0x70] sm:$0xff] (!%p222_p2)   ;;  %v1500_v29 = vld [vmem:[%s1795_s1 + $0x78] sm:$0xff] (!%p222_p2)   ;;  %v1503_v33 = vld [vmem:[%s1795_s1 + $0xa0] sm:$0xff] (!%p222_p2)  }
   0xb   : > { %1358 = vmatpush3.bf16.msra.mxu0 (!%p222_p2), %v1485_v3  ;;  %v1504_v34 = vld [vmem:[%s1795_s1 + $0x88] sm:$0xff] (!%p222_p2)   ;;  %v1506_v38 = vld [vmem:[%s1795_s1 + $0x90] sm:$0xff] (!%p222_p2)   ;;  %v1508_v42 = vld [vmem:[%s1795_s1 + $0x98] sm:$0xff] (!%p222_p2)  }
   0xc   : > { %1370 = vmatpush3.bf16.msra.mxu1 (!%p222_p2), %v1486_v4  ;;  %1359 = vmatprep.subr.bf16.mxu0 (!%p222_p2), %v1534_v1  ;;  %v1505_v35 = vld [vmem:[%s1795_s1 + $0xa8] sm:$0xff] (!%p222_p2)   ;;  %v1507_v39 = vld [vmem:[%s1795_s1 + $0xb0] sm:$0xff] (!%p222_p2)   ;;  %v1098_v44 = vld [vmem:[%s1797_s3] sm:$0x7] (!%p222_p2) }
   0xd   : > { %s1802_s22 = smov (!%p254_p3, %s1177_s22), 1  ;;  %1371 = vmatprep.subr.bf16.mxu1 %v1534_v1  ;;  %v1509_v45 = vld [vmem:[%s1795_s1 + $0xb8] sm:$0xff]   ;;  %1101 = vperm.xlu0 %1482, %v1098_v44   ;;  %v1510_v47 = vld [vmem:[%s1795_s1 + $0xc0] sm:$0xff]   ;;  %v1513_v50 = vld [vmem:[%s1795_s1 + $0xc8] sm:$0xff]  }
   0xe   : > { %s1306_s9 = sshll.u32 %s1802_s22, 4  ;;  %v1512_v49 = vld [vmem:[%s1795_s1 + $0xe0] sm:$0xff]   ;;  %v1514_v51 = vld [vmem:[%s1795_s1 + $0xe8] sm:$0xff]   ;;  %v1515_v54 = vld [vmem:[%s1795_s1 + $0xd0] sm:$0xff]   ;;  %s1184_s8 = sshll.u32 %s1802_s22, 1 }
   0xf   : > { %s1613_s14 = scalar_lea.vmem %s1794_s0, %s1306_s9  ;;  %1360 = vmatpush3.bf16.msra.mxu0 %v1487_v5  ;;  %v1516_v55 = vld [vmem:[%s1795_s1 + $0xf0] sm:$0xff]   ;;  %v1517_v58 = vld [vmem:[%s1795_s1 + $0xd8] sm:$0xff]   ;;  %v1519_v62 = vld [vmem:[%s1795_s1 + $0x100] sm:$0xff]   ;;  %s262_s16 = scalar_lea.vmem %s1798_s4, %s1184_s8 }
  0x10   : > { %v1492_v7 = vld [vmem:[%s1613_s14] sm:$0x18]   ;;  %1372 = vmatpush3.bf16.msra.mxu1 %v1488_v6  ;;  %1361 = vmatprep.subr.bf16.mxu0 %v1534_v1  ;;  %v1520_v59 = vld [vmem:[%s1613_s14 + $0x4] sm:$0x18]   ;;  %v1518_v60 = vld [vmem:[%s1795_s1 + $0xf8] sm:$0xff]   ;;  %s266_s27 = scalar_lea.vmem %s1800_s6, %s1184_s8 }
  0x11   : > { %v362_v10 = vshrl.u32 %v1492_v7, 16  ;;  %v365_v11 = vshll.u32 %v1492_v7, 16  ;;  %1373 = vmatprep.subr.bf16.mxu1 %v1534_v1  ;;  %v278_v13 = vld [vmem:[%s1613_s14 + $0x4] sm:$0x3]  ;;  %v873_v63 = vrot.slane %v1520_v59, 3  ;;  %v1521_v2 = vld [vmem:[%s1795_s1 + $0x108] sm:$0xff]   ;;  %vm1108_vm5 = vmand %vm1106_vm3, %vm1107_vm4 }
  0x12   : > { %v1213_v19 = vcombine.low %v278_v13, %v278_v13  ;;  %v1502_v25 = vld [vmem:[%s1613_s14 + $0x4] ss:$0 sps:$4 sm:$0x66]   ;;  %v1524_v3 = vld [vmem:[%s1799_s5 + $0x8] sm:$0xff]   ;;  %v952_v4 = vshrl.u32 %v1520_v59, 16  ;;  %v955_v5 = vshll.u32 %v1520_v59, 16 }
  0x13   : > { %v364_v14 = vrot.slane %v362_v10, 3  ;;  %v367_v15 = vrot.slane %v365_v11, 4  ;;  %1362 = vmatpush3.bf16.msra.mxu0 %v1489_v8  ;;  %v536_v32 = vrot.slane %v1502_v25, 1  ;;  %v615_v36 = vshrl.u32 %v1502_v25, 16  ;;  %v1522_v0 = vld [vmem:[%s1799_s5] sm:$0xff]   ;;  %v1523_v6 = vld [vmem:[%s1795_s1 + $0x110] sm:$0xff]  }
  0x14   : > { %1374 = vmatpush3.bf16.msra.mxu1 %v1490_v9  ;;  %1379 = vmatprep.subr.bf16.mxu0 %v1534_v1  ;;  %v451_v22 = vshll.u32 %v1213_v19, 16  ;;  %v449_v26 = vshrl.u32 %v1213_v19, 16  ;;  %v618_v37 = vshll.u32 %v1502_v25, 16  ;;  %v1511_v43 = vld [vmem:[%s1613_s14 + $0x4] ss:$0 sps:$4 sm:$0xcc]  }
  0x15   : > { %v368_v17 = vor.u32 %v367_v15, %v364_v14  ;;  %1391 = vmatprep.subr.bf16.mxu1 %v1534_v1  ;;  %v617_v40 = vrot.slane %v615_v36, 1  ;;  %v703_v48 = vrot.slane %v1511_v43, 2  ;;  %v782_v52 = vshrl.u32 %v1511_v43, 16  ;;  %v1027_v7 = vld [vmem:[%s262_s16] sm:$0x3]  ;;  %v1525_v10 = vld [vmem:[%s1795_s1 + $0x118] sm:$0xff]  }
  0x16   : > { %1364 = vmatmul.mubr.msk.bf16.vlgmr.msra.gmra.mrb[0].mxu0 %vm312_vm1, %v278_v13  ;;  %v453_v27 = vrot.slane %v451_v22, 1  ;;  %v620_v41 = vrot.slane %v618_v37, 2  ;;  %v785_v53 = vshll.u32 %v1511_v43, 16  ;;  %v954_v8 = vrot.slane %v952_v4, 3 }
  0x17   : > { %1376 = vmatmul.mubr.msk.bf16.vlgmr.msra.gmra.mrb[0].mxu1 %vm312_vm1, %v368_v17  ;;  %1380 = vmatpush3.bf16.msra.mxu0 %v1493_v16  ;;  %v784_v56 = vrot.slane %v782_v52, 2  ;;  %v957_v9 = vrot.slane %v955_v5, 4 }
  0x18   : > { %1392 = vmatpush3.bf16.msra.mxu1 %v1494_v18  ;;  %1381 = vmatprep.subr.bf16.mxu0 %v1534_v1  ;;  %v454_v30 = vor.u32 %v453_v27, %v449_v26  ;;  %v621_v46 = vor.u32 %v620_v41, %v617_v40  ;;  %v787_v57 = vrot.slane %v785_v53, 3 }
  0x19   : > { %1393 = vmatprep.subr.bf16.mxu1 %v1534_v1  ;;  %1387 = vmatprep.mubr.msk.bf16.mxu0 %vm1535_vm0, %v1534_v1  ;;  %v958_v11 = vor.u32 %v957_v9, %v954_v8 }
  0x1a   : > { %1399 = vmatprep.mubr.msk.bf16.mxu1 %vm1535_vm0, %v1534_v1  ;;  %v788_v61 = vor.u32 %v787_v57, %v784_v56 }
  0x1b   : > { %1382 = vmatpush3.bf16.msra.mxu0 %v1495_v20 }
  0x1c   : > { %1394 = vmatpush3.bf16.msra.mxu1 %v1496_v21  ;;  %1383 = vmatprep.subr.bf16.mxu0 %v1534_v1 }
  0x1d   : > { %1395 = vmatprep.subr.bf16.mxu1 %v1534_v1 }
  0x1f   : > { %1384 = vmatpush3.bf16.msra.mxu0 %v1497_v23 }
  0x20   : > { %1396 = vmatpush3.bf16.msra.mxu1 %v1498_v24  ;;  %1385 = vmatprep.subr.bf16.mxu0 %v1534_v1 }
  0x21   : > { %1397 = vmatprep.subr.bf16.mxu1 %v1534_v1 }
  0x23   : > { %1386 = vmatpush3.bf16.msra.mxu0 %v1499_v28 }
  0x24   : > { %1398 = vmatpush3.bf16.msra.mxu1 %v1500_v29  ;;  %1403 = vmatprep.subr.bf16.mxu0 %v1534_v1 }
  0x25   : > { %1415 = vmatprep.subr.bf16.mxu1 %v1534_v1 }
  0x26   : > { %1388 = vmatmul.mubr.msk.bf16.vlgmr.msra.gmra.mrb[4].mxu0 %vm312_vm1, %v454_v30 }
  0x27   : > { %1404 = vmatpush3.bf16.msra.mxu0 %v1501_v31  ;;  %1400 = vmatmul.mubr.msk.bf16.vlgmr.msra.gmra.mrb[4].mxu1 %vm312_vm1, %v536_v32 }
  0x28   : > { %1416 = vmatpush3.bf16.msra.mxu1 %v1503_v33  ;;  %1405 = vmatprep.subr.bf16.mxu0 %v1534_v1 }
  0x29   : > { %1417 = vmatprep.subr.bf16.mxu1 %v1534_v1  ;;  %1411 = vmatprep.mubr.msk.bf16.mxu0 %vm1535_vm0, %v1534_v1 }
  0x2a   : > { %1423 = vmatprep.mubr.msk.bf16.mxu1 %vm1535_vm0, %v1534_v1 }
  0x2b   : > { %1406 = vmatpush3.bf16.msra.mxu0 %v1504_v34 }
  0x2c   : > { %1418 = vmatpush3.bf16.msra.mxu1 %v1505_v35  ;;  %1407 = vmatprep.subr.bf16.mxu0 %v1534_v1 }
  0x2d   : > { %1419 = vmatprep.subr.bf16.mxu1 %v1534_v1 }
  0x2f   : > { %1408 = vmatpush3.bf16.msra.mxu0 %v1506_v38 }
  0x30   : > { %1420 = vmatpush3.bf16.msra.mxu1 %v1507_v39  ;;  %1409 = vmatprep.subr.bf16.mxu0 %v1534_v1 }
  0x31   : > { %1421 = vmatprep.subr.bf16.mxu1 %v1534_v1 }
  0x33   : > { %1410 = vmatpush3.bf16.msra.mxu0 %v1508_v42 }
  0x34   : > { %1422 = vmatpush3.bf16.msra.mxu1 %v1509_v45  ;;  %1427 = vmatprep.subr.bf16.mxu0 %v1534_v1 }
  0x35   : > { %1439 = vmatprep.subr.bf16.mxu1 %v1534_v1 }
  0x36   : > { %1412 = vmatmul.mubr.msk.bf16.vlgmr.msra.gmra.mrb[8].mxu0 %vm312_vm1, %v621_v46 }
  0x37   : > { %1428 = vmatpush3.bf16.msra.mxu0 %v1510_v47  ;;  %1424 = vmatmul.mubr.msk.bf16.vlgmr.msra.gmra.mrb[8].mxu1 %vm312_vm1, %v703_v48 }
  0x38   : > { %1440 = vmatpush3.bf16.msra.mxu1 %v1512_v49  ;;  %1429 = vmatprep.subr.bf16.mxu0 %v1534_v1 }
  0x39   : > { %1441 = vmatprep.subr.bf16.mxu1 %v1534_v1  ;;  %1435 = vmatprep.mubr.msk.bf16.mxu0 %vm1535_vm0, %v1534_v1 }
  0x3a   : > { %1447 = vmatprep.mubr.msk.bf16.mxu1 %vm1535_vm0, %v1534_v1 }
  0x3b   : > { %1430 = vmatpush3.bf16.msra.mxu0 %v1513_v50 }
  0x3c   : > { %1442 = vmatpush3.bf16.msra.mxu1 %v1514_v51  ;;  %1431 = vmatprep.subr.bf16.mxu0 %v1534_v1 }
  0x3d   : > { %1443 = vmatprep.subr.bf16.mxu1 %v1534_v1 }
  0x3f   : > { %1432 = vmatpush3.bf16.msra.mxu0 %v1515_v54 }
  0x40   : > { %1444 = vmatpush3.bf16.msra.mxu1 %v1516_v55  ;;  %1433 = vmatprep.subr.bf16.mxu0 %v1534_v1 }
  0x41   : > { %1445 = vmatprep.subr.bf16.mxu1 %v1534_v1 }
  0x43   : > { %1434 = vmatpush3.bf16.msra.mxu0 %v1517_v58  ;;  %v1303_v58 = vld [vmem:[%s1796_s2] ss:$0 sm:$0xff] }
  0x44   : > { %1446 = vmatpush3.bf16.msra.mxu1 %v1518_v60  ;;  %1451 = vmatprep.subr.bf16.mxu0 %v1534_v1 }
  0x45   : > { %1463 = vmatprep.subr.bf16.mxu1 %v1534_v1 }
  0x46   : > { %1436 = vmatmul.mubr.msk.bf16.vlgmr.msra.gmra.mrb[12].mxu0 %vm312_vm1, %v788_v61 }
  0x47   : > { %1452 = vmatpush3.bf16.msra.mxu0 %v1519_v62  ;;  %1448 = vmatmul.mubr.msk.bf16.vlgmr.msra.gmra.mrb[12].mxu1 %vm312_vm1, %v873_v63 }
  0x48   : > { %1453 = vmatprep.subr.bf16.mxu0 %v1534_v1  ;;  %1464 = vmatpush3.bf16.msra.mxu1 %v1522_v0 }
  0x49   : > { %1465 = vmatprep.subr.bf16.mxu1 %v1534_v1  ;;  %1467 = vmatprep.mubr.msk.bf16.mxu1 %vm1535_vm0, %v1534_v1 }
  0x4a   : > { %1459 = vmatprep.mubr.msk.bf16.mxu0 %vm1535_vm0, %v1534_v1 }
  0x4b   : > { %1454 = vmatpush3.bf16.msra.mxu0 %v1521_v2  ;;  %v1109_v2 = vld [vmem:[%s266_s27] sm:$0x3] }
  0x4c   : > { %1455 = vmatprep.subr.bf16.mxu0 %v1534_v1  ;;  %1466 = vmatpush3.bf16.msra.mxu1 %v1524_v3 }
  0x4f   : > { %1456 = vmatpush3.bf16.msra.mxu0 %v1523_v6  ;;  %1468 = vmatmul.mubr.msk.bf16.vlgmr.msra.gmra.mrb[16].mxu1 %vm1044_vm2, %v1027_v7 }
  0x50   : > { %1457 = vmatprep.subr.bf16.mxu0 %v1534_v1 }
  0x53   : > { %1458 = vmatpush3.bf16.msra.mxu0 %v1525_v10 }
  0x56   : > { %1460 = vmatmul.mubr.msk.bf16.vlgmr.msra.gmra.mrb[16].mxu0 %vm312_vm1, %v958_v11 }
  0x8c   : > { %v1102_v62 = vpop.permute.xlu0 %1101 }
  0xe9   : > { %v350_v12 = vpop.f32.mrb[0].mxu0 }
  0xea   : > { %v1365_v13 = vpop.f32.mrb[1].mxu0  ;;  %v430_v14 = vpop.f32.mrb[0].mxu1 }
  0xeb   : > { %v431_v15 = vadd.f32 %v430_v14, %v350_v12  ;;  %v353_v16 = vpop.f32.mrb[2].mxu0  ;;  %v1377_v17 = vpop.f32.mrb[1].mxu1 }
  0xec   : > { %v1366_v18 = vpop.f32.mrb[3].mxu0  ;;  %v433_v19 = vpop.f32.mrb[2].mxu1 }
  0xed   : > { %v1378_v20 = vpop.f32.mrb[3].mxu1 }
  0xf9   : > { %v516_v21 = vpop.f32.mrb[4].mxu0 }
  0xfa   : > { %v522_v22 = vadd.f32 %v516_v21, %v431_v15  ;;  %v1389_v23 = vpop.f32.mrb[5].mxu0  ;;  %v598_v24 = vpop.f32.mrb[4].mxu1 }
  0xfb   : > { %v519_v25 = vpop.f32.mrb[6].mxu0  ;;  %v1401_v26 = vpop.f32.mrb[5].mxu1 }
  0xfc   : > { %v604_v1 = vadd.f32 %v598_v24, %v522_v22  ;;  %v1390_v27 = vpop.f32.mrb[7].mxu0  ;;  %v601_v28 = vpop.f32.mrb[6].mxu1 }
  0xfd   : > { %v1402_v29 = vpop.f32.mrb[7].mxu1 }
 0x109   : > { %v683_v30 = vpop.f32.mrb[8].mxu0 }
 0x10a   : > { %v689_v31 = vadd.f32 %v683_v30, %v604_v1  ;;  %v1413_v32 = vpop.f32.mrb[9].mxu0  ;;  %v765_v33 = vpop.f32.mrb[8].mxu1 }
 0x10b   : > { %v686_v34 = vpop.f32.mrb[10].mxu0  ;;  %v1425_v35 = vpop.f32.mrb[9].mxu1 }
 0x10c   : > { %v771_v36 = vadd.f32 %v765_v33, %v689_v31  ;;  %v1414_v37 = vpop.f32.mrb[11].mxu0  ;;  %v768_v38 = vpop.f32.mrb[10].mxu1 }
 0x10d   : > { %v1426_v39 = vpop.f32.mrb[11].mxu1 }
 0x119   : > { %v850_v40 = vpop.f32.mrb[12].mxu0 }
 0x11a   : > { %v856_v41 = vadd.f32 %v850_v40, %v771_v36  ;;  %v1437_v42 = vpop.f32.mrb[13].mxu0  ;;  %v935_v43 = vpop.f32.mrb[12].mxu1 }
 0x11b   : > { %v853_v44 = vpop.f32.mrb[14].mxu0  ;;  %v1449_v45 = vpop.f32.mrb[13].mxu1 }
 0x11c   : > { %v941_v46 = vadd.f32 %v935_v43, %v856_v41  ;;  %v1438_v47 = vpop.f32.mrb[15].mxu0  ;;  %v938_v48 = vpop.f32.mrb[14].mxu1 }
 0x11d   : > { %v1450_v49 = vpop.f32.mrb[15].mxu1 }
 0x122   : > { %v1082_v50 = vpop.f32.mrb[16].mxu1 }
 0x123   : > { %v1469_v51 = vpop.f32.mrb[17].mxu1 }
 0x124   : > { %v1085_v52 = vpop.f32.mrb[18].mxu1 }
 0x125   : > { %v1470_v53 = vpop.f32.mrb[19].mxu1 }
 0x129   : > { %v1020_v54 = vpop.f32.mrb[16].mxu0 }
 0x12a   : > { %v1026_v55 = vadd.f32 %v1020_v54, %v941_v46  ;;  %v1461_v56 = vpop.f32.mrb[17].mxu0 }
 0x12b   : > { %v1023_v57 = vpop.f32.mrb[18].mxu0 }
 0x12c   : > { %v1088_v59 = vadd.f32 %v1082_v50, %v1026_v55  ;;  %v1462_v60 = vpop.f32.mrb[19].mxu0 }
 0x12e   : > { %v1096_v61 = vadd.f32 %v1303_v58, %v1088_v59 }
 0x130   : > { %v1097_v63 = vmax.f32 %v1096_v61, 0.0 }
 0x132   : > { %v1104_v0 = vmul.f32 %v1102_v62, %v1097_v63 }
 0x134   : > { %v1105_v3 = vpack.c.bf16 %v1104_v0, %v1104_v0 }
 0x136   : > { %v1110_v4 = vsel %vm1108_vm5, %v1105_v3, %v1109_v2 }
 0x137   : > { %1111 = vst [vmem:[%s266_s27] sm:$0x3] %v1110_v4 }
 0x138 PF: > { %s16_s21 = sadd.s32 1, %s1532_s21  }
 0x139   : > { %p13_p4 = scmp.ge.s32.totalorder %s16_s21, 4  }
 0x13b   :  { %15 = sbr.rel (!%p13_p4) target bundleno = 1 (0x1), region = 85 }

// kernel: forward.33
= control target key start
LH: loop header
LB: loop body
LE: loop exit
PB: predicated region body
PF: predicated region fallthrough
CT: control target
= control target key end

     0   :  { %s1465_s18 = smov 0   ;;  %s1673_s0 = inlined_call_operand.vmem [shape: bf16[2,25,64], index: 0, kind: input, shape index: {}]   ;;  %s1674_s1 = inlined_call_operand.vmem [shape: bf16[9,64,64], index: 1, kind: input, shape index: {}]   ;;  %s1675_s2 = inlined_call_operand.vmem [shape: f32[1,64], index: 2, kind: input, shape index: {}]   ;;  %s1676_s3 = inlined_call_operand.vmem [shape: f32[3,1], index: 3, kind: input, shape index: {}]   ;;  %s1677_s4 = inlined_call_operand.vmem [shape: bf16[2,3,64], index: 4, kind: input, shape index: {}]   ;;  %s1678_s5 = inlined_call_operand.vmem [shape: bf16[2,3,64], index: 5, kind: output, shape index: {}]  }
   0x1 LB: > { %s1091_s19 = sadd.s32 4294967295, %s1430_s18   ;;  %p1095_p0 = scmp.ge.s32.totalorder %s1430_s18, 1  ;;  %s1430_s18 = sphi %s1465_s18, %s15_s18  }
   0x2   : > { %p196_p1 = scmp.lt.s32.totalorder %s1430_s18, 3 }
   0x4   : > { %p197_p2 = pnand %p1095_p0, %p196_p1 }
   0x5   : > { %v1383_v0 = vld [vmem:[%s1674_s1 + $0x20] sm:$0xff] (!%p197_p2)   ;;  %v1432_v1 = vmov (!%p197_p2), 0.0   ;;  %v1385_v3 = vld [vmem:[%s1674_s1 + $0x28] sm:$0xff] (!%p197_p2)   ;;  %vm1433_vm0 = vmmov (!%p197_p2), 0   ;;  %p227_p3 = scmp.lt.s32.totalorder (!%p197_p2), %s1091_s19, 1  ;;  %v1387_v5 = vld [vmem:[%s1674_s1 + $0x30] sm:$0xff] (!%p197_p2)  }
   0x6   : > { %200 = sbr.rel (%p197_p2) target bundleno = 312 (0x138), region = 40  ;;  %1263 = vmatprep.subr.bf16.mxu0 (!%p197_p2), %v1432_v1  ;;  %1275 = vmatprep.subr.bf16.mxu1 (!%p197_p2), %v1432_v1  ;;  %v1384_v2 = vld [vmem:[%s1674_s1] sm:$0xff] (!%p197_p2)   ;;  %v1386_v4 = vld [vmem:[%s1674_s1 + $0x8] sm:$0xff] (!%p197_p2)   ;;  %v1434_v6 = vmov (!%p197_p2), 0   ;;  %v1388_v7 = vld [vmem:[%s1674_s1 + $0x10] sm:$0xff] (!%p197_p2)   ;;  %vm285_vm1 = vcmask (!%p197_p2), 523264  }
   0x7   : > { %1264 = vmatpush3.bf16.msra.mxu0 (!%p197_p2), %v1383_v0  ;;  %1271 = vmatprep.mubr.msk.bf16.mxu0 (!%p197_p2), %vm1433_vm0, %v1432_v1  ;;  %v1389_v9 = vld [vmem:[%s1674_s1 + $0x38] sm:$0xff] (!%p197_p2)   ;;  %v1393_v16 = vld [vmem:[%s1674_s1 + $0x40] sm:$0xff] (!%p197_p2)   ;;  %v1395_v20 = vld [vmem:[%s1674_s1 + $0x48] sm:$0xff] (!%p197_p2)   ;;  %vm1020_vm2 = vcmask (!%p197_p2), 517120   ;;  %vm1021_vm3 = vsmask.f32 (!%p197_p2), 1280 }
   0x8   : > { %1276 = vmatpush3.bf16.msra.mxu1 (!%p197_p2), %v1384_v2  ;;  %1265 = vmatprep.subr.bf16.mxu0 (!%p197_p2), %v1432_v1  ;;  %v1390_v10 = vld [vmem:[%s1674_s1 + $0x18] sm:$0xff] (!%p197_p2)   ;;  %v1394_v18 = vld [vmem:[%s1674_s1 + $0x60] sm:$0xff] (!%p197_p2)   ;;  %v1396_v21 = vld [vmem:[%s1674_s1 + $0x68] sm:$0xff] (!%p197_p2)  }
   0x9   : > { %1277 = vmatprep.subr.bf16.mxu1 (!%p197_p2), %v1432_v1  ;;  %1283 = vmatprep.mubr.msk.bf16.mxu1 (!%p197_p2), %vm1433_vm0, %v1432_v1  ;;  %v1397_v23 = vld [vmem:[%s1674_s1 + $0x50] sm:$0xff] (!%p197_p2)   ;;  %v1399_v28 = vld [vmem:[%s1674_s1 + $0x58] sm:$0xff] (!%p197_p2)   ;;  %v1401_v31 = vld [vmem:[%s1674_s1 + $0x80] sm:$0xff] (!%p197_p2)  }
   0xa   : > { %1382 = vset.pattern.permute.xlu0 (!%p197_p2), %v1434_v6  ;;  %v1398_v24 = vld [vmem:[%s1674_s1 + $0x70] sm:$0xff] (!%p197_p2)   ;;  %v1400_v29 = vld [vmem:[%s1674_s1 + $0x78] sm:$0xff] (!%p197_p2)   ;;  %v1403_v33 = vld [vmem:[%s1674_s1 + $0xa0] sm:$0xff] (!%p197_p2)  }
   0xb   : > { %1266 = vmatpush3.bf16.msra.mxu0 (!%p197_p2), %v1385_v3  ;;  %v1404_v34 = vld [vmem:[%s1674_s1 + $0x88] sm:$0xff] (!%p197_p2)   ;;  %v1406_v38 = vld [vmem:[%s1674_s1 + $0x90] sm:$0xff] (!%p197_p2)   ;;  %v1012_v40 = vld [vmem:[%s1676_s3] sm:$0x7] (!%p197_p2) }
   0xc   : > { %1278 = vmatpush3.bf16.msra.mxu1 (!%p197_p2), %v1386_v4  ;;  %1267 = vmatprep.subr.bf16.mxu0 (!%p197_p2), %v1432_v1  ;;  %v1405_v35 = vld [vmem:[%s1674_s1 + $0xa8] sm:$0xff] (!%p197_p2)   ;;  %v1407_v39 = vld [vmem:[%s1674_s1 + $0xb0] sm:$0xff] (!%p197_p2)   ;;  %v1408_v43 = vld [vmem:[%s1674_s1 + $0x98] sm:$0xff] (!%p197_p2)  }
   0xd   : > { %s1680_s19 = smov (!%p227_p3, %s1091_s19), 1  ;;  %1279 = vmatprep.subr.bf16.mxu1 %v1432_v1  ;;  %1015 = vperm.xlu0 %1382, %v1012_v40   ;;  %v1409_v45 = vld [vmem:[%s1674_s1 + $0xb8] sm:$0xff]   ;;  %v1410_v47 = vld [vmem:[%s1674_s1 + $0xc0] sm:$0xff]   ;;  %v1413_v50 = vld [vmem:[%s1674_s1 + $0xc8] sm:$0xff]  }
   0xe   : > { %s1217_s30 = sshll.u32 %s1680_s19, 4  ;;  %v1412_v49 = vld [vmem:[%s1674_s1 + $0xe0] sm:$0xff]   ;;  %v1414_v51 = vld [vmem:[%s1674_s1 + $0xe8] sm:$0xff]   ;;  %v1415_v54 = vld [vmem:[%s1674_s1 + $0xd0] sm:$0xff]  }
   0xf   : > { %s1506_s10 = scalar_lea.vmem %s1673_s0, %s1217_s30  ;;  %1268 = vmatpush3.bf16.msra.mxu0 %v1387_v5  ;;  %v1416_v55 = vld [vmem:[%s1674_s1 + $0xf0] sm:$0xff]   ;;  %v1417_v58 = vld [vmem:[%s1674_s1 + $0xd8] sm:$0xff]   ;;  %v1419_v62 = vld [vmem:[%s1674_s1 + $0x100] sm:$0xff]   ;;  %s1098_s30 = sshll.u32 %s1680_s19, 1 }
  0x10   : > { %v1392_v8 = vld [vmem:[%s1506_s10] sm:$0x18]   ;;  %1280 = vmatpush3.bf16.msra.mxu1 %v1388_v7  ;;  %1269 = vmatprep.subr.bf16.mxu0 %v1432_v1  ;;  %v1420_v59 = vld [vmem:[%s1506_s10 + $0x4] sm:$0x18]   ;;  %v1418_v60 = vld [vmem:[%s1674_s1 + $0xf8] sm:$0xff]   ;;  %s235_s8 = scalar_lea.vmem %s1677_s4, %s1098_s30  ;;  %s239_s13 = scalar_lea.vmem %s1678_s5, %s1098_s30 }
  0x11   : > { %v335_v11 = vshrl.u32 %v1392_v8, 16  ;;  %v338_v12 = vshll.u32 %v1392_v8, 16  ;;  %1281 = vmatprep.subr.bf16.mxu1 %v1432_v1  ;;  %v251_v13 = vld [vmem:[%s1506_s10 + $0x4] sm:$0x3]  ;;  %v846_v63 = vrot.slane %v1420_v59, 3  ;;  %v1421_v0 = vld [vmem:[%s1674_s1 + $0x108] sm:$0xff]   ;;  %vm1022_vm4 = vmand %vm1020_vm2, %vm1021_vm3 }
  0x12   : > { %v1127_v19 = vcombine.low %v251_v13, %v251_v13  ;;  %v1402_v25 = vld [vmem:[%s1506_s10 + $0x4] ss:$0 sps:$4 sm:$0x66]   ;;  %v925_v2 = vshrl.u32 %v1420_v59, 16  ;;  %v928_v3 = vshll.u32 %v1420_v59, 16  ;;  %v1422_v4 = vld [vmem:[%s1674_s1 + $0x110] sm:$0xff]  }
  0x13   : > { %v337_v14 = vrot.slane %v335_v11, 3  ;;  %v340_v15 = vrot.slane %v338_v12, 4  ;;  %1270 = vmatpush3.bf16.msra.mxu0 %v1389_v9  ;;  %v509_v32 = vrot.slane %v1402_v25, 1  ;;  %v588_v36 = vshrl.u32 %v1402_v25, 16  ;;  %v1423_v7 = vld [vmem:[%s1674_s1 + $0x118] sm:$0xff]  }
  0x14   : > { %1282 = vmatpush3.bf16.msra.mxu1 %v1390_v10  ;;  %1287 = vmatprep.subr.bf16.mxu0 %v1432_v1  ;;  %v424_v22 = vshll.u32 %v1127_v19, 16  ;;  %v422_v26 = vshrl.u32 %v1127_v19, 16  ;;  %v591_v37 = vshll.u32 %v1402_v25, 16  ;;  %v1411_v44 = vld [vmem:[%s1506_s10 + $0x4] ss:$0 sps:$4 sm:$0xcc]  }
  0x15   : > { %v341_v17 = vor.u32 %v340_v15, %v337_v14  ;;  %1299 = vmatprep.subr.bf16.mxu1 %v1432_v1  ;;  %v590_v41 = vrot.slane %v588_v36, 1  ;;  %v676_v48 = vrot.slane %v1411_v44, 2  ;;  %v755_v52 = vshrl.u32 %v1411_v44, 16 }
  0x16   : > { %1272 = vmatmul.mubr.msk.bf16.vlgmr.msra.gmra.mrb[0].mxu0 %vm285_vm1, %v251_v13  ;;  %v426_v27 = vrot.slane %v424_v22, 1  ;;  %v593_v42 = vrot.slane %v591_v37, 2  ;;  %v758_v53 = vshll.u32 %v1411_v44, 16  ;;  %v927_v5 = vrot.slane %v925_v2, 3 }
  0x17   : > { %1284 = vmatmul.mubr.msk.bf16.vlgmr.msra.gmra.mrb[0].mxu1 %vm285_vm1, %v341_v17  ;;  %1288 = vmatpush3.bf16.msra.mxu0 %v1393_v16  ;;  %v757_v56 = vrot.slane %v755_v52, 2  ;;  %v930_v6 = vrot.slane %v928_v3, 4 }
  0x18   : > { %1300 = vmatpush3.bf16.msra.mxu1 %v1394_v18  ;;  %1289 = vmatprep.subr.bf16.mxu0 %v1432_v1  ;;  %v427_v30 = vor.u32 %v426_v27, %v422_v26  ;;  %v594_v46 = vor.u32 %v593_v42, %v590_v41  ;;  %v760_v57 = vrot.slane %v758_v53, 3 }
  0x19   : > { %1301 = vmatprep.subr.bf16.mxu1 %v1432_v1  ;;  %1295 = vmatprep.mubr.msk.bf16.mxu0 %vm1433_vm0, %v1432_v1  ;;  %v931_v8 = vor.u32 %v930_v6, %v927_v5 }
  0x1a   : > { %1307 = vmatprep.mubr.msk.bf16.mxu1 %vm1433_vm0, %v1432_v1  ;;  %v761_v61 = vor.u32 %v760_v57, %v757_v56 }
  0x1b   : > { %1290 = vmatpush3.bf16.msra.mxu0 %v1395_v20 }
  0x1c   : > { %1302 = vmatpush3.bf16.msra.mxu1 %v1396_v21  ;;  %1291 = vmatprep.subr.bf16.mxu0 %v1432_v1 }
  0x1d   : > { %1303 = vmatprep.subr.bf16.mxu1 %v1432_v1 }
  0x1f   : > { %1292 = vmatpush3.bf16.msra.mxu0 %v1397_v23 }
  0x20   : > { %1304 = vmatpush3.bf16.msra.mxu1 %v1398_v24  ;;  %1293 = vmatprep.subr.bf16.mxu0 %v1432_v1 }
  0x21   : > { %1305 = vmatprep.subr.bf16.mxu1 %v1432_v1 }
  0x23   : > { %1294 = vmatpush3.bf16.msra.mxu0 %v1399_v28 }
  0x24   : > { %1306 = vmatpush3.bf16.msra.mxu1 %v1400_v29  ;;  %1311 = vmatprep.subr.bf16.mxu0 %v1432_v1 }
  0x25   : > { %1323 = vmatprep.subr.bf16.mxu1 %v1432_v1 }
  0x26   : > { %1296 = vmatmul.mubr.msk.bf16.vlgmr.msra.gmra.mrb[4].mxu0 %vm285_vm1, %v427_v30 }
  0x27   : > { %1312 = vmatpush3.bf16.msra.mxu0 %v1401_v31  ;;  %1308 = vmatmul.mubr.msk.bf16.vlgmr.msra.gmra.mrb[4].mxu1 %vm285_vm1, %v509_v32 }
  0x28   : > { %1324 = vmatpush3.bf16.msra.mxu1 %v1403_v33  ;;  %1313 = vmatprep.subr.bf16.mxu0 %v1432_v1 }
  0x29   : > { %1325 = vmatprep.subr.bf16.mxu1 %v1432_v1  ;;  %1319 = vmatprep.mubr.msk.bf16.mxu0 %vm1433_vm0, %v1432_v1 }
  0x2a   : > { %1331 = vmatprep.mubr.msk.bf16.mxu1 %vm1433_vm0, %v1432_v1 }
  0x2b   : > { %1314 = vmatpush3.bf16.msra.mxu0 %v1404_v34 }
  0x2c   : > { %1326 = vmatpush3.bf16.msra.mxu1 %v1405_v35  ;;  %1315 = vmatprep.subr.bf16.mxu0 %v1432_v1 }
  0x2d   : > { %1327 = vmatprep.subr.bf16.mxu1 %v1432_v1 }
  0x2f   : > { %1316 = vmatpush3.bf16.msra.mxu0 %v1406_v38 }
  0x30   : > { %1328 = vmatpush3.bf16.msra.mxu1 %v1407_v39  ;;  %1317 = vmatprep.subr.bf16.mxu0 %v1432_v1 }
  0x31   : > { %1329 = vmatprep.subr.bf16.mxu1 %v1432_v1 }
  0x33   : > { %1318 = vmatpush3.bf16.msra.mxu0 %v1408_v43 }
  0x34   : > { %1330 = vmatpush3.bf16.msra.mxu1 %v1409_v45  ;;  %1335 = vmatprep.subr.bf16.mxu0 %v1432_v1 }
  0x35   : > { %1347 = vmatprep.subr.bf16.mxu1 %v1432_v1 }
  0x36   : > { %1320 = vmatmul.mubr.msk.bf16.vlgmr.msra.gmra.mrb[8].mxu0 %vm285_vm1, %v594_v46 }
  0x37   : > { %1336 = vmatpush3.bf16.msra.mxu0 %v1410_v47  ;;  %1332 = vmatmul.mubr.msk.bf16.vlgmr.msra.gmra.mrb[8].mxu1 %vm285_vm1, %v676_v48  ;;  %v1008_v47 = vld [vmem:[%s235_s8] sm:$0x3] }
  0x38   : > { %1348 = vmatpush3.bf16.msra.mxu1 %v1412_v49  ;;  %1337 = vmatprep.subr.bf16.mxu0 %v1432_v1  ;;  %v1214_v49 = vld [vmem:[%s1675_s2] ss:$0 sm:$0xff]  ;;  %v1009_v52 = vunpack.c.l.bf16 %v1008_v47 }
  0x39   : > { %1349 = vmatprep.subr.bf16.mxu1 %v1432_v1  ;;  %1343 = vmatprep.mubr.msk.bf16.mxu0 %vm1433_vm0, %v1432_v1 }
  0x3a   : > { %1355 = vmatprep.mubr.msk.bf16.mxu1 %vm1433_vm0, %v1432_v1 }
  0x3b   : > { %1338 = vmatpush3.bf16.msra.mxu0 %v1413_v50 }
  0x3c   : > { %1350 = vmatpush3.bf16.msra.mxu1 %v1414_v51  ;;  %1339 = vmatprep.subr.bf16.mxu0 %v1432_v1 }
  0x3d   : > { %1351 = vmatprep.subr.bf16.mxu1 %v1432_v1 }
  0x3f   : > { %1340 = vmatpush3.bf16.msra.mxu0 %v1415_v54 }
  0x40   : > { %1352 = vmatpush3.bf16.msra.mxu1 %v1416_v55  ;;  %1341 = vmatprep.subr.bf16.mxu0 %v1432_v1 }
  0x41   : > { %1353 = vmatprep.subr.bf16.mxu1 %v1432_v1 }
  0x43   : > { %1342 = vmatpush3.bf16.msra.mxu0 %v1417_v58 }
  0x44   : > { %1354 = vmatpush3.bf16.msra.mxu1 %v1418_v60  ;;  %1359 = vmatprep.subr.bf16.mxu0 %v1432_v1  ;;  %v1023_v60 = vld [vmem:[%s239_s13] sm:$0x3] }
  0x46   : > { %1344 = vmatmul.mubr.msk.bf16.vlgmr.msra.gmra.mrb[12].mxu0 %vm285_vm1, %v761_v61 }
  0x47   : > { %1360 = vmatpush3.bf16.msra.mxu0 %v1419_v62  ;;  %1356 = vmatmul.mubr.msk.bf16.vlgmr.msra.gmra.mrb[12].mxu1 %vm285_vm1, %v846_v63 }
  0x48   : > { %1361 = vmatprep.subr.bf16.mxu0 %v1432_v1  ;;  %1367 = vmatprep.mubr.msk.bf16.mxu0 %vm1433_vm0, %v1432_v1 }
  0x4b   : > { %1362 = vmatpush3.bf16.msra.mxu0 %v1421_v0 }
  0x4c   : > { %1363 = vmatprep.subr.bf16.mxu0 %v1432_v1 }
  0x4f   : > { %1364 = vmatpush3.bf16.msra.mxu0 %v1422_v4 }
  0x50   : > { %1365 = vmatprep.subr.bf16.mxu0 %v1432_v1 }
  0x53   : > { %1366 = vmatpush3.bf16.msra.mxu0 %v1423_v7 }
  0x56   : > { %1368 = vmatmul.mubr.msk.bf16.vlgmr.msra.gmra.mrb[16].mxu0 %vm285_vm1, %v931_v8 }
  0x8c   : > { %v1016_v57 = vpop.permute.xlu0 %1015 }
  0xe9   : > { %v323_v9 = vpop.f32.mrb[0].mxu0 }
  0xea   : > { %v1273_v10 = vpop.f32.mrb[1].mxu0  ;;  %v403_v11 = vpop.f32.mrb[0].mxu1 }
  0xeb   : > { %v404_v12 = vadd.f32 %v403_v11, %v323_v9  ;;  %v326_v13 = vpop.f32.mrb[2].mxu0  ;;  %v1285_v14 = vpop.f32.mrb[1].mxu1 }
  0xec   : > { %v1274_v15 = vpop.f32.mrb[3].mxu0  ;;  %v406_v16 = vpop.f32.mrb[2].mxu1 }
  0xed   : > { %v1286_v17 = vpop.f32.mrb[3].mxu1 }
  0xf9   : > { %v489_v18 = vpop.f32.mrb[4].mxu0 }
  0xfa   : > { %v495_v19 = vadd.f32 %v489_v18, %v404_v12  ;;  %v1297_v20 = vpop.f32.mrb[5].mxu0  ;;  %v571_v21 = vpop.f32.mrb[4].mxu1 }
  0xfb   : > { %v492_v22 = vpop.f32.mrb[6].mxu0  ;;  %v1309_v23 = vpop.f32.mrb[5].mxu1 }
  0xfc   : > { %v577_v1 = vadd.f32 %v571_v21, %v495_v19  ;;  %v1298_v24 = vpop.f32.mrb[7].mxu0  ;;  %v574_v25 = vpop.f32.mrb[6].mxu1 }
  0xfd   : > { %v1310_v26 = vpop.f32.mrb[7].mxu1 }
 0x109   : > { %v656_v27 = vpop.f32.mrb[8].mxu0 }
 0x10a   : > { %v662_v28 = vadd.f32 %v656_v27, %v577_v1  ;;  %v1321_v29 = vpop.f32.mrb[9].mxu0  ;;  %v738_v30 = vpop.f32.mrb[8].mxu1 }
 0x10b   : > { %v659_v31 = vpop.f32.mrb[10].mxu0  ;;  %v1333_v32 = vpop.f32.mrb[9].mxu1 }
 0x10c   : > { %v744_v33 = vadd.f32 %v738_v30, %v662_v28  ;;  %v1322_v34 = vpop.f32.mrb[11].mxu0  ;;  %v741_v35 = vpop.f32.mrb[10].mxu1 }
 0x10d   : > { %v1334_v36 = vpop.f32.mrb[11].mxu1 }
 0x119   : > { %v823_v37 = vpop.f32.mrb[12].mxu0 }
 0x11a   : > { %v829_v38 = vadd.f32 %v823_v37, %v744_v33  ;;  %v1345_v39 = vpop.f32.mrb[13].mxu0  ;;  %v908_v40 = vpop.f32.mrb[12].mxu1 }
 0x11b   : > { %v826_v41 = vpop.f32.mrb[14].mxu0  ;;  %v1357_v42 = vpop.f32.mrb[13].mxu1 }
 0x11c   : > { %v914_v43 = vadd.f32 %v908_v40, %v829_v38  ;;  %v1346_v44 = vpop.f32.mrb[15].mxu0  ;;  %v911_v45 = vpop.f32.mrb[14].mxu1 }
 0x11d   : > { %v1358_v46 = vpop.f32.mrb[15].mxu1 }
 0x129   : > { %v993_v48 = vpop.f32.mrb[16].mxu0 }
 0x12a   : > { %v999_v50 = vadd.f32 %v993_v48, %v914_v43  ;;  %v1369_v51 = vpop.f32.mrb[17].mxu0 }
 0x12b   : > { %v996_v53 = vpop.f32.mrb[18].mxu0 }
 0x12c   : > { %v1007_v54 = vadd.f32 %v1214_v49, %v999_v50  ;;  %v1370_v55 = vpop.f32.mrb[19].mxu0 }
 0x12e   : > { %v1010_v56 = vadd.f32 %v1009_v52, %v1007_v54 }
 0x130   : > { %v1011_v58 = vmax.f32 %v1010_v56, 0.0 }
 0x132   : > { %v1018_v59 = vmul.f32 %v1016_v57, %v1011_v58 }
 0x134   : > { %v1019_v61 = vpack.c.bf16 %v1018_v59, %v1018_v59 }
 0x136   : > { %v1024_v62 = vsel %vm1022_vm4, %v1019_v61, %v1023_v60 }
 0x137   : > { %1025 = vst [vmem:[%s239_s13] sm:$0x3] %v1024_v62 }
 0x138 PF: > { %s15_s18 = sadd.s32 1, %s1430_s18  }
 0x139   : > { %p12_p4 = scmp.ge.s32.totalorder %s15_s18, 4  }
 0x13b   :  { %14 = sbr.rel (!%p12_p4) target bundleno = 1 (0x1), region = 81 }

</bundles_post_ra>
